<compile_context>
chip_gen: v6e
topology: v6e:2x2x1
jax: 0.10.0
libtpu: 0.0.40
codegen_flags: <defaults>
</compile_context>

<pallas_src>
import functools
import math

import jax
import jax.numpy as jnp
import numpy as np
from jax.experimental import pallas as pl
from jax.experimental.pallas import tpu as pltpu


# ----------------------------------------------------------------------------
# Kernel: grid = (batch, query_tile); K^T and V@W3 cached in VMEM scratch
# across the (innermost, "arbitrary") query-tile axis.
# ----------------------------------------------------------------------------
def _self_attention_kernel(
    x_ref,        # (1, L, D)   bf16  full sequence (resident across q tiles)
    bias_ref,     # (1, 1, L)   f32   additive key-mask bias (0 keep / -1e9 mask)
    wq_ref,       # (D, D)      bf16  composed query weight (1/sqrt(d_k) folded in)
    bq_ref,       # (1, D)      f32   (scaled)
    wk_ref,       # (D, D)      bf16  composed key weight
    bk_ref,       # (1, D)      f32
    wv_ref,       # (D, D)      bf16  composed value weight
    bv_ref,       # (1, D)      f32
    w3h_ref,      # (H, d_k, D) bf16  output weight split by input head
    b3_ref,       # (1, D)      f32
    o_ref,        # (1, TQ, D)  f32
    kT_scratch,   # (D, L)      bf16  K^T, persists across q tiles
    vw3_scratch,  # (H, L, D)   bf16  per-head V_h @ W3_h, persists across q tiles
    *,
    num_heads: int,
    tq: int,
):
    H = num_heads
    L = x_ref.shape[1]
    D = x_ref.shape[2]
    d_k = D // H
    qi = pl.program_id(1)

    # ---- Once per batch element: build K^T and fused V@W3 caches. ----
    @pl.when(qi == 0)
    def _():
        x = x_ref[0]                                                # (L, D) bf16
        k = jnp.dot(x, wk_ref[...],
                    preferred_element_type=jnp.float32) + bk_ref[...]   # (L, D) f32
        v = (jnp.dot(x, wv_ref[...],
                     preferred_element_type=jnp.float32)
             + bv_ref[...]).astype(jnp.bfloat16)                        # (L, D) bf16
        # Single dense f32 transpose -> lane-dense (D, L) K cache (no padding).
        kT_scratch[...] = jnp.transpose(k, (1, 0)).astype(jnp.bfloat16)
        # Fuse value projection with the output linear, per head.
        for h in range(H):
            lo, hi = h * d_k, (h + 1) * d_k
            vw3_scratch[h] = jnp.dot(
                v[:, lo:hi], w3h_ref[h],
                preferred_element_type=jnp.float32).astype(jnp.bfloat16)

    # ---- Query projection for this tile (dense, full-width matmul). ----
    q_start = pl.multiple_of(qi * tq, tq)
    xq = x_ref[0, pl.ds(q_start, tq), :]                            # (TQ, D) bf16
    q = (jnp.dot(xq, wq_ref[...],
                 preferred_element_type=jnp.float32)
         + bq_ref[...]).astype(jnp.bfloat16)   # scale already folded into wq/bq
    bias = bias_ref[0]                                              # (1, L) f32

    # ---- Per-head scores -> softmax (normalize after PV) -> accumulate. ----
    acc = None
    for h in range(H):
        lo, hi = h * d_k, (h + 1) * d_k
        s = jnp.dot(q[:, lo:hi], kT_scratch[lo:hi, :],
                    preferred_element_type=jnp.float32)             # (TQ, L)
        s = s + bias
        s = s - jnp.max(s, axis=-1, keepdims=True)   # keep BEFORE exp (mask equiv.)
        p = jnp.exp(s)
        inv = pl.reciprocal(jnp.sum(p, axis=-1, keepdims=True),
                            approx=True)                            # (TQ, 1)
        term = jnp.dot(p.astype(jnp.bfloat16), vw3_scratch[h],
                       preferred_element_type=jnp.float32) * inv    # (TQ, D)
        acc = term if acc is None else acc + term

    o_ref[0] = (acc + b3_ref[...]).astype(o_ref.dtype)


# ----------------------------------------------------------------------------
# Wrapper
# ----------------------------------------------------------------------------
def self_attention(queries, mask, params, *, d_model=128, num_heads=8):
    """queries: (B, d_model, L) NCL like the PyTorch module; mask: (B, L) or None.
    Returns (B, L, d_model) float32."""
    B, D, L = queries.shape
    assert D == d_model and D % num_heads == 0
    H = num_heads
    d_k = D // H

    # Layout + dtype glue (one cheap pass in plain JAX): NCL -> NLC, bf16.
    x = jnp.transpose(queries, (0, 2, 1)).astype(jnp.bfloat16)          # (B, L, D)

    # Additive key-axis mask bias: 0 keep / -1e9 masked, shape (B, 1, L).
    if mask is None:
        bias = jnp.zeros((B, 1, L), jnp.float32)
    else:
        bias = jnp.where(mask.reshape(B, 1, L) == 0,
                         -1000000000.0, 0.0).astype(jnp.float32)

    # One-time weight composition in f32 (no-bias 1x1 convs make this exact),
    # then bf16 for the MXU.  1/sqrt(d_k) folded into the query weight/bias.
    f32 = jnp.float32
    scale = 1.0 / math.sqrt(d_k)
    w_mem = params["w_mem_t"].astype(f32)                               # (D, 2D)
    wq = ((params["w_qc_t"].astype(f32) @ params["w0_t"].astype(f32))
          * scale).astype(jnp.bfloat16)
    bq = (params["b0"].astype(f32) * scale).reshape(1, D)
    wk = (w_mem[:, :D] @ params["w1_t"].astype(f32)).astype(jnp.bfloat16)
    bk = params["b1"].astype(f32).reshape(1, D)
    wv = (w_mem[:, D:] @ params["w2_t"].astype(f32)).astype(jnp.bfloat16)
    bv = params["b2"].astype(f32).reshape(1, D)
    w3h = params["w3_t"].astype(f32).reshape(H, d_k, D).astype(jnp.bfloat16)
    b3 = params["b3"].astype(f32).reshape(1, D)

    # Query-tile size (bounds per-step live (TQ, L) scores).
    tq = 128 if L % 128 == 0 else L
    nq = L // tq

    kernel = functools.partial(_self_attention_kernel, num_heads=H, tq=tq)

    def _full(a):
        zeros = (0,) * a.ndim
        return pl.BlockSpec(a.shape, lambda b, q: zeros)

    # Advisory cost estimate (post weight-composition).
    flops = int(B * (8 * L * D * D + 2 * (1 + H) * L * L * D))
    transcendentals = int(B * H * L * L)
    bytes_accessed = int(B * L * D * (2 + 4) + B * L * 4
                         + 2 * (3 * D * D + H * d_k * D) + 4 * 4 * D)

    # Explicit VMEM budget (headroom over a rough footprint estimate).
    est_vmem = (4 * L * D * 2                     # resident x block (+ buffer)
                + 4 * tq * D * 4                  # output blocks
                + 2 * (3 * D * D * 2 + H * d_k * D * 2 + 4 * D * 4)   # weights
                + D * max(L, 128) * 2             # K^T scratch
                + H * L * D * 2                   # V@W3 scratch
                + 4 * tq * max(L, 128) * 4)       # live scores / spills
    vmem_limit = int(min(48 * 1024 * 1024, max(16 * 1024 * 1024, 2 * est_vmem)))

    return pl.pallas_call(
        kernel,
        out_shape=jax.ShapeDtypeStruct((B, L, D), jnp.float32),
        grid_spec=pltpu.PrefetchScalarGridSpec(
            num_scalar_prefetch=0,
            grid=(B, nq),
            in_specs=[
                pl.BlockSpec((1, L, D), lambda b, q: (b, 0, 0)),   # x full seq
                pl.BlockSpec((1, 1, L), lambda b, q: (b, 0, 0)),   # mask bias
                _full(wq), _full(bq),
                _full(wk), _full(bk),
                _full(wv), _full(bv),
                _full(w3h), _full(b3),
            ],
            out_specs=pl.BlockSpec((1, tq, D), lambda b, q: (b, q, 0)),
            scratch_shapes=[
                pltpu.VMEM((D, L), jnp.bfloat16),       # K^T cache (dense)
                pltpu.VMEM((H, L, D), jnp.bfloat16),    # fused V@W3 cache
            ],
        ),
        compiler_params=pltpu.CompilerParams(
            dimension_semantics=("parallel", "arbitrary"),
            vmem_limit_bytes=vmem_limit),
        cost_estimate=pl.CostEstimate(
            flops=flops, transcendentals=transcendentals,
            bytes_accessed=bytes_accessed),
    )(x, bias, wq, bq, wk, bk, wv, bv, w3h, b3)


# ----------------------------------------------------------------------------
# Pure-JAX reference (mirrors the PyTorch forward, full f32) for sanity check.
# ----------------------------------------------------------------------------
def self_attention_ref(queries, mask, params, *, d_model=128, num_heads=8):
    x = jnp.transpose(queries, (0, 2, 1)).astype(jnp.float32)           # (B, L, D)
    B, L, D = x.shape
    d_k = d_model // num_heads

    mem = x @ params["w_mem_t"]                                          # (B, L, 2D)
    qc = x @ params["w_qc_t"]                                            # (B, L, D)
    kc, vc = mem[..., :d_model], mem[..., d_model:]

    q = qc @ params["w0_t"] + params["b0"]
    k = kc @ params["w1_t"] + params["b1"]
    v = vc @ params["w2_t"] + params["b2"]

    def split_heads(t):
        return t.reshape(B, L, num_heads, d_k).transpose(0, 2, 1, 3)

    qh, kh, vh = split_heads(q), split_heads(k), split_heads(v)
    s = jnp.einsum("bhqd,bhkd->bhqk", qh, kh) / math.sqrt(d_k)
    if mask is not None:
        s = jnp.where(mask[:, None, None, :] == 0, -1000000000.0, s)
    p = jax.nn.softmax(s, axis=-1)
    o = jnp.einsum("bhqk,bhkd->bhqd", p, vh)
    o = o.transpose(0, 2, 1, 3).reshape(B, L, d_model)
    return o @ params["w3_t"] + params["b3"]


# ----------------------------------------------------------------------------
# Deterministic parameter construction (synthetic init, matching shapes).
# ----------------------------------------------------------------------------
def make_params(key, d_model=128):
    ks = jax.random.split(key, 10)
    scale = 0.05

    def mat(k, shape):
        return jax.random.normal(k, shape, jnp.float32) * scale

    return {
        # Conv1d weights are (out, in, 1) in torch; stored pre-transposed (in, out).
        "w_mem_t": mat(ks[0], (d_model, 2 * d_model)),
        "w_qc_t": mat(ks[1], (d_model, d_model)),
        "w0_t": mat(ks[2], (d_model, d_model)),
        "b0": mat(ks[3], (1, d_model)),
        "w1_t": mat(ks[4], (d_model, d_model)),
        "b1": mat(ks[5], (1, d_model)),
        "w2_t": mat(ks[6], (d_model, d_model)),
        "b2": mat(ks[7], (1, d_model)),
        "w3_t": mat(ks[8], (d_model, d_model)),
        "b3": mat(ks[9], (1, d_model)),
    }


if __name__ == "__main__":
    D_MODEL, NUM_HEADS = 128, 8
    B, L = 2, 256          # L = 2 query tiles of 128: exercises the K/V caching

    key = jax.random.PRNGKey(0)
    k_x, k_p = jax.random.split(key)

    # queries in PyTorch NCL layout: (B, d_model, L)
    queries = jax.random.normal(k_x, (B, D_MODEL, L), jnp.float32)
    # padding mask (B, L): second sequence has 64 padded positions
    valid = L - 64
    mask = jnp.stack([
        jnp.ones((L,), jnp.float32),
        jnp.concatenate([jnp.ones((valid,), jnp.float32),
                         jnp.zeros((L - valid,), jnp.float32)]),
    ], axis=0)

    params = make_params(k_p, D_MODEL)

    out = self_attention(queries, mask, params,
                         d_model=D_MODEL, num_heads=NUM_HEADS)
    out = jax.block_until_ready(out)

    ref = self_attention_ref(queries, mask, params,
                             d_model=D_MODEL, num_heads=NUM_HEADS)
    np.testing.assert_allclose(np.asarray(out), np.asarray(ref),
                               rtol=5e-2, atol=5e-2)

    print("KERNEL_OK")
</pallas_src>

<mosaic_0001>
module attributes {stable_mosaic.version = 11 : i64} {
  func.func @_self_attention_kernel(%arg0: i32, %arg1: i32, %arg2: memref<1x256x128xbf16, #tpu.memory_space<vmem>>, %arg3: memref<1x1x256xf32, #tpu.memory_space<vmem>>, %arg4: memref<128x128xbf16, #tpu.memory_space<vmem>>, %arg5: memref<1x128xf32, #tpu.memory_space<vmem>>, %arg6: memref<128x128xbf16, #tpu.memory_space<vmem>>, %arg7: memref<1x128xf32, #tpu.memory_space<vmem>>, %arg8: memref<128x128xbf16, #tpu.memory_space<vmem>>, %arg9: memref<1x128xf32, #tpu.memory_space<vmem>>, %arg10: memref<8x16x128xbf16, #tpu.memory_space<vmem>>, %arg11: memref<1x128xf32, #tpu.memory_space<vmem>>, %arg12: memref<1x128x128xf32, #tpu.memory_space<vmem>>, %arg13: memref<128x256xbf16, #tpu.memory_space<vmem>>, %arg14: memref<8x256x128xbf16, #tpu.memory_space<vmem>>) attributes {dimension_semantics = [#tpu.dimension_semantics<parallel>, #tpu.dimension_semantics<arbitrary>], iteration_bounds = array<i64: 2, 2>, scalar_prefetch = 0 : i64, scratch_operands = 2 : i64, tpu.core_type = #tpu.core_type<tc>, window_params = [{transform_indices = @transform_0, window_bounds = array<i64: 1, 256, 128>}, {transform_indices = @transform_1, window_bounds = array<i64: 1, 1, 256>}, {pipeline_mode = #tpu.pipeline_mode<synchronous>, transform_indices = @transform_2, window_bounds = array<i64: 128, 128>}, {pipeline_mode = #tpu.pipeline_mode<synchronous>, transform_indices = @transform_3, window_bounds = array<i64: 1, 128>}, {pipeline_mode = #tpu.pipeline_mode<synchronous>, transform_indices = @transform_4, window_bounds = array<i64: 128, 128>}, {pipeline_mode = #tpu.pipeline_mode<synchronous>, transform_indices = @transform_5, window_bounds = array<i64: 1, 128>}, {pipeline_mode = #tpu.pipeline_mode<synchronous>, transform_indices = @transform_6, window_bounds = array<i64: 128, 128>}, {pipeline_mode = #tpu.pipeline_mode<synchronous>, transform_indices = @transform_7, window_bounds = array<i64: 1, 128>}, {pipeline_mode = #tpu.pipeline_mode<synchronous>, transform_indices = @transform_8, window_bounds = array<i64: 8, 16, 128>}, {pipeline_mode = #tpu.pipeline_mode<synchronous>, transform_indices = @transform_9, window_bounds = array<i64: 1, 128>}, {transform_indices = @transform_10, window_bounds = array<i64: 1, 128, 128>}]} {
    %c0_i32 = arith.constant 0 : i32
    %0 = arith.cmpi eq, %arg1, %c0_i32 : i32
    %1 = arith.extui %0 : i1 to i32
    %c0_i32_0 = arith.constant 0 : i32
    %2 = arith.cmpi ne, %1, %c0_i32_0 : i32
    scf.if %2 {
      %c0_72 = arith.constant 0 : index
      %c0_73 = arith.constant 0 : index
      %c0_74 = arith.constant 0 : index
      %181 = vector.load %arg2[%c0_72, %c0_73, %c0_74] : memref<1x256x128xbf16, #tpu.memory_space<vmem>>, vector<1x256x128xbf16>
      %182 = vector.shape_cast %181 : vector<1x256x128xbf16> to vector<256x128xbf16>
      %c0_75 = arith.constant 0 : index
      %c0_76 = arith.constant 0 : index
      %183 = vector.load %arg6[%c0_75, %c0_76] : memref<128x128xbf16, #tpu.memory_space<vmem>>, vector<128x128xbf16>
      %cst_77 = arith.constant dense<0.000000e+00> : vector<256x128xf32>
      %184 = tpu.matmul %182, %183, %cst_77 {dimension_numbers = #tpu.dot_dimension_numbers<[1], [0], [0], [1], [0, 0, 1, 1], [], []>} : vector<256x128xbf16>, vector<128x128xbf16>, vector<256x128xf32> -> vector<256x128xf32>
      %c0_78 = arith.constant 0 : index
      %c0_79 = arith.constant 0 : index
      %185 = vector.load %arg7[%c0_78, %c0_79] : memref<1x128xf32, #tpu.memory_space<vmem>>, vector<1x128xf32>
      %186 = vector.broadcast %185 : vector<1x128xf32> to vector<256x128xf32>
      %187 = arith.addf %184, %186 : vector<256x128xf32>
      %c0_80 = arith.constant 0 : index
      %c0_81 = arith.constant 0 : index
      %188 = vector.load %arg8[%c0_80, %c0_81] : memref<128x128xbf16, #tpu.memory_space<vmem>>, vector<128x128xbf16>
      %cst_82 = arith.constant dense<0.000000e+00> : vector<256x128xf32>
      %189 = tpu.matmul %182, %188, %cst_82 {dimension_numbers = #tpu.dot_dimension_numbers<[1], [0], [0], [1], [0, 0, 1, 1], [], []>} : vector<256x128xbf16>, vector<128x128xbf16>, vector<256x128xf32> -> vector<256x128xf32>
      %c0_83 = arith.constant 0 : index
      %c0_84 = arith.constant 0 : index
      %190 = vector.load %arg9[%c0_83, %c0_84] : memref<1x128xf32, #tpu.memory_space<vmem>>, vector<1x128xf32>
      %191 = vector.broadcast %190 : vector<1x128xf32> to vector<256x128xf32>
      %192 = arith.addf %189, %191 : vector<256x128xf32>
      %193 = arith.truncf %192 : vector<256x128xf32> to vector<256x128xbf16>
      %194 = tpu.transpose %187, [1, 0] : vector<256x128xf32> -> vector<128x256xf32>
      %195 = arith.truncf %194 : vector<128x256xf32> to vector<128x256xbf16>
      %c0_85 = arith.constant 0 : index
      %c0_86 = arith.constant 0 : index
      %196 = vector.load %arg13[%c0_85, %c0_86] : memref<128x256xbf16, #tpu.memory_space<vmem>>, vector<128x256xbf16>
      tpu.vector_store %arg13[%c0_85, %c0_86], %195 {strides = array<i32>} : memref<128x256xbf16, #tpu.memory_space<vmem>>, vector<128x256xbf16>,
      %197 = vector.extract_strided_slice %193 {offsets = [0, 0], sizes = [256, 16], strides = [1, 1]} : vector<256x128xbf16> to vector<256x16xbf16>
      %c0_87 = arith.constant 0 : index
      %c0_88 = arith.constant 0 : index
      %c0_89 = arith.constant 0 : index
      %198 = vector.load %arg10[%c0_87, %c0_88, %c0_89] : memref<8x16x128xbf16, #tpu.memory_space<vmem>>, vector<1x16x128xbf16>
      %199 = vector.shape_cast %198 : vector<1x16x128xbf16> to vector<16x128xbf16>
      %cst_90 = arith.constant dense<0.000000e+00> : vector<256x128xf32>
      %200 = tpu.matmul %197, %199, %cst_90 {dimension_numbers = #tpu.dot_dimension_numbers<[1], [0], [0], [1], [0, 0, 1, 1], [], []>} : vector<256x16xbf16>, vector<16x128xbf16>, vector<256x128xf32> -> vector<256x128xf32>
      %201 = arith.truncf %200 : vector<256x128xf32> to vector<256x128xbf16>
      %c0_91 = arith.constant 0 : index
      %c0_92 = arith.constant 0 : index
      %c0_93 = arith.constant 0 : index
      %202 = vector.load %arg14[%c0_91, %c0_92, %c0_93] : memref<8x256x128xbf16, #tpu.memory_space<vmem>>, vector<1x256x128xbf16>
      %203 = vector.shape_cast %202 : vector<1x256x128xbf16> to vector<256x128xbf16>
      %204 = vector.shape_cast %201 : vector<256x128xbf16> to vector<1x256x128xbf16>
      tpu.vector_store %arg14[%c0_91, %c0_92, %c0_93], %204 {strides = array<i32>} : memref<8x256x128xbf16, #tpu.memory_space<vmem>>, vector<1x256x128xbf16>,
      %205 = vector.extract_strided_slice %193 {offsets = [0, 16], sizes = [256, 16], strides = [1, 1]} : vector<256x128xbf16> to vector<256x16xbf16>
      %c1_94 = arith.constant 1 : index
      %c0_95 = arith.constant 0 : index
      %c0_96 = arith.constant 0 : index
      %206 = vector.load %arg10[%c1_94, %c0_95, %c0_96] : memref<8x16x128xbf16, #tpu.memory_space<vmem>>, vector<1x16x128xbf16>
      %207 = vector.shape_cast %206 : vector<1x16x128xbf16> to vector<16x128xbf16>
      %cst_97 = arith.constant dense<0.000000e+00> : vector<256x128xf32>
      %208 = tpu.matmul %205, %207, %cst_97 {dimension_numbers = #tpu.dot_dimension_numbers<[1], [0], [0], [1], [0, 0, 1, 1], [], []>} : vector<256x16xbf16>, vector<16x128xbf16>, vector<256x128xf32> -> vector<256x128xf32>
      %209 = arith.truncf %208 : vector<256x128xf32> to vector<256x128xbf16>
      %c1_98 = arith.constant 1 : index
      %c0_99 = arith.constant 0 : index
      %c0_100 = arith.constant 0 : index
      %210 = vector.load %arg14[%c1_98, %c0_99, %c0_100] : memref<8x256x128xbf16, #tpu.memory_space<vmem>>, vector<1x256x128xbf16>
      %211 = vector.shape_cast %210 : vector<1x256x128xbf16> to vector<256x128xbf16>
      %212 = vector.shape_cast %209 : vector<256x128xbf16> to vector<1x256x128xbf16>
      tpu.vector_store %arg14[%c1_98, %c0_99, %c0_100], %212 {strides = array<i32>} : memref<8x256x128xbf16, #tpu.memory_space<vmem>>, vector<1x256x128xbf16>,
      %213 = vector.extract_strided_slice %193 {offsets = [0, 32], sizes = [256, 16], strides = [1, 1]} : vector<256x128xbf16> to vector<256x16xbf16>
      %c2_101 = arith.constant 2 : index
      %c0_102 = arith.constant 0 : index
      %c0_103 = arith.constant 0 : index
      %214 = vector.load %arg10[%c2_101, %c0_102, %c0_103] : memref<8x16x128xbf16, #tpu.memory_space<vmem>>, vector<1x16x128xbf16>
      %215 = vector.shape_cast %214 : vector<1x16x128xbf16> to vector<16x128xbf16>
      %cst_104 = arith.constant dense<0.000000e+00> : vector<256x128xf32>
      %216 = tpu.matmul %213, %215, %cst_104 {dimension_numbers = #tpu.dot_dimension_numbers<[1], [0], [0], [1], [0, 0, 1, 1], [], []>} : vector<256x16xbf16>, vector<16x128xbf16>, vector<256x128xf32> -> vector<256x128xf32>
      %217 = arith.truncf %216 : vector<256x128xf32> to vector<256x128xbf16>
      %c2_105 = arith.constant 2 : index
      %c0_106 = arith.constant 0 : index
      %c0_107 = arith.constant 0 : index
      %218 = vector.load %arg14[%c2_105, %c0_106, %c0_107] : memref<8x256x128xbf16, #tpu.memory_space<vmem>>, vector<1x256x128xbf16>
      %219 = vector.shape_cast %218 : vector<1x256x128xbf16> to vector<256x128xbf16>
      %220 = vector.shape_cast %217 : vector<256x128xbf16> to vector<1x256x128xbf16>
      tpu.vector_store %arg14[%c2_105, %c0_106, %c0_107], %220 {strides = array<i32>} : memref<8x256x128xbf16, #tpu.memory_space<vmem>>, vector<1x256x128xbf16>,
      %221 = vector.extract_strided_slice %193 {offsets = [0, 48], sizes = [256, 16], strides = [1, 1]} : vector<256x128xbf16> to vector<256x16xbf16>
      %c3_108 = arith.constant 3 : index
      %c0_109 = arith.constant 0 : index
      %c0_110 = arith.constant 0 : index
      %222 = vector.load %arg10[%c3_108, %c0_109, %c0_110] : memref<8x16x128xbf16, #tpu.memory_space<vmem>>, vector<1x16x128xbf16>
      %223 = vector.shape_cast %222 : vector<1x16x128xbf16> to vector<16x128xbf16>
      %cst_111 = arith.constant dense<0.000000e+00> : vector<256x128xf32>
      %224 = tpu.matmul %221, %223, %cst_111 {dimension_numbers = #tpu.dot_dimension_numbers<[1], [0], [0], [1], [0, 0, 1, 1], [], []>} : vector<256x16xbf16>, vector<16x128xbf16>, vector<256x128xf32> -> vector<256x128xf32>
      %225 = arith.truncf %224 : vector<256x128xf32> to vector<256x128xbf16>
      %c3_112 = arith.constant 3 : index
      %c0_113 = arith.constant 0 : index
      %c0_114 = arith.constant 0 : index
      %226 = vector.load %arg14[%c3_112, %c0_113, %c0_114] : memref<8x256x128xbf16, #tpu.memory_space<vmem>>, vector<1x256x128xbf16>
      %227 = vector.shape_cast %226 : vector<1x256x128xbf16> to vector<256x128xbf16>
      %228 = vector.shape_cast %225 : vector<256x128xbf16> to vector<1x256x128xbf16>
      tpu.vector_store %arg14[%c3_112, %c0_113, %c0_114], %228 {strides = array<i32>} : memref<8x256x128xbf16, #tpu.memory_space<vmem>>, vector<1x256x128xbf16>,
      %229 = vector.extract_strided_slice %193 {offsets = [0, 64], sizes = [256, 16], strides = [1, 1]} : vector<256x128xbf16> to vector<256x16xbf16>
      %c4_115 = arith.constant 4 : index
      %c0_116 = arith.constant 0 : index
      %c0_117 = arith.constant 0 : index
      %230 = vector.load %arg10[%c4_115, %c0_116, %c0_117] : memref<8x16x128xbf16, #tpu.memory_space<vmem>>, vector<1x16x128xbf16>
      %231 = vector.shape_cast %230 : vector<1x16x128xbf16> to vector<16x128xbf16>
      %cst_118 = arith.constant dense<0.000000e+00> : vector<256x128xf32>
      %232 = tpu.matmul %229, %231, %cst_118 {dimension_numbers = #tpu.dot_dimension_numbers<[1], [0], [0], [1], [0, 0, 1, 1], [], []>} : vector<256x16xbf16>, vector<16x128xbf16>, vector<256x128xf32> -> vector<256x128xf32>
      %233 = arith.truncf %232 : vector<256x128xf32> to vector<256x128xbf16>
      %c4_119 = arith.constant 4 : index
      %c0_120 = arith.constant 0 : index
      %c0_121 = arith.constant 0 : index
      %234 = vector.load %arg14[%c4_119, %c0_120, %c0_121] : memref<8x256x128xbf16, #tpu.memory_space<vmem>>, vector<1x256x128xbf16>
      %235 = vector.shape_cast %234 : vector<1x256x128xbf16> to vector<256x128xbf16>
      %236 = vector.shape_cast %233 : vector<256x128xbf16> to vector<1x256x128xbf16>
      tpu.vector_store %arg14[%c4_119, %c0_120, %c0_121], %236 {strides = array<i32>} : memref<8x256x128xbf16, #tpu.memory_space<vmem>>, vector<1x256x128xbf16>,
      %237 = vector.extract_strided_slice %193 {offsets = [0, 80], sizes = [256, 16], strides = [1, 1]} : vector<256x128xbf16> to vector<256x16xbf16>
      %c5_122 = arith.constant 5 : index
      %c0_123 = arith.constant 0 : index
      %c0_124 = arith.constant 0 : index
      %238 = vector.load %arg10[%c5_122, %c0_123, %c0_124] : memref<8x16x128xbf16, #tpu.memory_space<vmem>>, vector<1x16x128xbf16>
      %239 = vector.shape_cast %238 : vector<1x16x128xbf16> to vector<16x128xbf16>
      %cst_125 = arith.constant dense<0.000000e+00> : vector<256x128xf32>
      %240 = tpu.matmul %237, %239, %cst_125 {dimension_numbers = #tpu.dot_dimension_numbers<[1], [0], [0], [1], [0, 0, 1, 1], [], []>} : vector<256x16xbf16>, vector<16x128xbf16>, vector<256x128xf32> -> vector<256x128xf32>
      %241 = arith.truncf %240 : vector<256x128xf32> to vector<256x128xbf16>
      %c5_126 = arith.constant 5 : index
      %c0_127 = arith.constant 0 : index
      %c0_128 = arith.constant 0 : index
      %242 = vector.load %arg14[%c5_126, %c0_127, %c0_128] : memref<8x256x128xbf16, #tpu.memory_space<vmem>>, vector<1x256x128xbf16>
      %243 = vector.shape_cast %242 : vector<1x256x128xbf16> to vector<256x128xbf16>
      %244 = vector.shape_cast %241 : vector<256x128xbf16> to vector<1x256x128xbf16>
      tpu.vector_store %arg14[%c5_126, %c0_127, %c0_128], %244 {strides = array<i32>} : memref<8x256x128xbf16, #tpu.memory_space<vmem>>, vector<1x256x128xbf16>,
      %245 = vector.extract_strided_slice %193 {offsets = [0, 96], sizes = [256, 16], strides = [1, 1]} : vector<256x128xbf16> to vector<256x16xbf16>
      %c6_129 = arith.constant 6 : index
      %c0_130 = arith.constant 0 : index
      %c0_131 = arith.constant 0 : index
      %246 = vector.load %arg10[%c6_129, %c0_130, %c0_131] : memref<8x16x128xbf16, #tpu.memory_space<vmem>>, vector<1x16x128xbf16>
      %247 = vector.shape_cast %246 : vector<1x16x128xbf16> to vector<16x128xbf16>
      %cst_132 = arith.constant dense<0.000000e+00> : vector<256x128xf32>
      %248 = tpu.matmul %245, %247, %cst_132 {dimension_numbers = #tpu.dot_dimension_numbers<[1], [0], [0], [1], [0, 0, 1, 1], [], []>} : vector<256x16xbf16>, vector<16x128xbf16>, vector<256x128xf32> -> vector<256x128xf32>
      %249 = arith.truncf %248 : vector<256x128xf32> to vector<256x128xbf16>
      %c6_133 = arith.constant 6 : index
      %c0_134 = arith.constant 0 : index
      %c0_135 = arith.constant 0 : index
      %250 = vector.load %arg14[%c6_133, %c0_134, %c0_135] : memref<8x256x128xbf16, #tpu.memory_space<vmem>>, vector<1x256x128xbf16>
      %251 = vector.shape_cast %250 : vector<1x256x128xbf16> to vector<256x128xbf16>
      %252 = vector.shape_cast %249 : vector<256x128xbf16> to vector<1x256x128xbf16>
      tpu.vector_store %arg14[%c6_133, %c0_134, %c0_135], %252 {strides = array<i32>} : memref<8x256x128xbf16, #tpu.memory_space<vmem>>, vector<1x256x128xbf16>,
      %253 = vector.extract_strided_slice %193 {offsets = [0, 112], sizes = [256, 16], strides = [1, 1]} : vector<256x128xbf16> to vector<256x16xbf16>
      %c7_136 = arith.constant 7 : index
      %c0_137 = arith.constant 0 : index
      %c0_138 = arith.constant 0 : index
      %254 = vector.load %arg10[%c7_136, %c0_137, %c0_138] : memref<8x16x128xbf16, #tpu.memory_space<vmem>>, vector<1x16x128xbf16>
      %255 = vector.shape_cast %254 : vector<1x16x128xbf16> to vector<16x128xbf16>
      %cst_139 = arith.constant dense<0.000000e+00> : vector<256x128xf32>
      %256 = tpu.matmul %253, %255, %cst_139 {dimension_numbers = #tpu.dot_dimension_numbers<[1], [0], [0], [1], [0, 0, 1, 1], [], []>} : vector<256x16xbf16>, vector<16x128xbf16>, vector<256x128xf32> -> vector<256x128xf32>
      %257 = arith.truncf %256 : vector<256x128xf32> to vector<256x128xbf16>
      %c7_140 = arith.constant 7 : index
      %c0_141 = arith.constant 0 : index
      %c0_142 = arith.constant 0 : index
      %258 = vector.load %arg14[%c7_140, %c0_141, %c0_142] : memref<8x256x128xbf16, #tpu.memory_space<vmem>>, vector<1x256x128xbf16>
      %259 = vector.shape_cast %258 : vector<1x256x128xbf16> to vector<256x128xbf16>
      %260 = vector.shape_cast %257 : vector<256x128xbf16> to vector<1x256x128xbf16>
      tpu.vector_store %arg14[%c7_140, %c0_141, %c0_142], %260 {strides = array<i32>} : memref<8x256x128xbf16, #tpu.memory_space<vmem>>, vector<1x256x128xbf16>,
    } else {
    }
    %c128_i32 = arith.constant 128 : i32
    %3 = arith.muli %arg1, %c128_i32 : i32
    %4 = tpu.assume_multiple %3, 128 : i32
    %c0 = arith.constant 0 : index
    %5 = arith.index_cast %4 : i32 to index
    %c0_1 = arith.constant 0 : index
    %6 = vector.load %arg2[%c0, %5, %c0_1] : memref<1x256x128xbf16, #tpu.memory_space<vmem>>, vector<1x128x128xbf16>
    %7 = vector.shape_cast %6 : vector<1x128x128xbf16> to vector<128x128xbf16>
    %c0_2 = arith.constant 0 : index
    %c0_3 = arith.constant 0 : index
    %8 = vector.load %arg4[%c0_2, %c0_3] : memref<128x128xbf16, #tpu.memory_space<vmem>>, vector<128x128xbf16>
    %cst = arith.constant dense<0.000000e+00> : vector<128x128xf32>
    %9 = tpu.matmul %7, %8, %cst {dimension_numbers = #tpu.dot_dimension_numbers<[1], [0], [0], [1], [0, 0, 1, 1], [], []>} : vector<128x128xbf16>, vector<128x128xbf16>, vector<128x128xf32> -> vector<128x128xf32>
    %c0_4 = arith.constant 0 : index
    %c0_5 = arith.constant 0 : index
    %10 = vector.load %arg5[%c0_4, %c0_5] : memref<1x128xf32, #tpu.memory_space<vmem>>, vector<1x128xf32>
    %11 = vector.broadcast %10 : vector<1x128xf32> to vector<128x128xf32>
    %12 = arith.addf %9, %11 : vector<128x128xf32>
    %13 = arith.truncf %12 : vector<128x128xf32> to vector<128x128xbf16>
    %c0_6 = arith.constant 0 : index
    %c0_7 = arith.constant 0 : index
    %c0_8 = arith.constant 0 : index
    %14 = vector.load %arg3[%c0_6, %c0_7, %c0_8] : memref<1x1x256xf32, #tpu.memory_space<vmem>>, vector<1x1x256xf32>
    %15 = vector.shape_cast %14 : vector<1x1x256xf32> to vector<1x256xf32>
    %16 = vector.extract_strided_slice %13 {offsets = [0, 0], sizes = [128, 16], strides = [1, 1]} : vector<128x128xbf16> to vector<128x16xbf16>
    %c0_9 = arith.constant 0 : index
    %c0_10 = arith.constant 0 : index
    %17 = vector.load %arg13[%c0_9, %c0_10] : memref<128x256xbf16, #tpu.memory_space<vmem>>, vector<16x256xbf16>
    %cst_11 = arith.constant dense<0.000000e+00> : vector<128x256xf32>
    %18 = tpu.matmul %16, %17, %cst_11 {dimension_numbers = #tpu.dot_dimension_numbers<[1], [0], [0], [1], [0, 0, 1, 1], [], []>} : vector<128x16xbf16>, vector<16x256xbf16>, vector<128x256xf32> -> vector<128x256xf32>
    %19 = vector.broadcast %15 : vector<1x256xf32> to vector<128x256xf32>
    %20 = arith.addf %18, %19 : vector<128x256xf32>
    %cst_12 = arith.constant dense<0xFF800000> : vector<128xf32>
    %21 = vector.multi_reduction <maximumf>, %20, %cst_12 [1] : vector<128x256xf32> to vector<128xf32>
    %22 = vector.shape_cast %21 : vector<128xf32> to vector<128x1xf32>
    %23 = vector.broadcast %22 : vector<128x1xf32> to vector<128x256xf32>
    %24 = arith.subf %20, %23 : vector<128x256xf32>
    %25 = math.exp %24 : vector<128x256xf32>
    %cst_13 = arith.constant dense<0.000000e+00> : vector<128xf32>
    %26 = vector.multi_reduction <add>, %25, %cst_13 [1] : vector<128x256xf32> to vector<128xf32>
    %27 = vector.shape_cast %26 : vector<128xf32> to vector<128x1xf32>
    %28 = tpu.reciprocal %27 {approx = true} : vector<128x1xf32> -> vector<128x1xf32>
    %29 = arith.truncf %25 : vector<128x256xf32> to vector<128x256xbf16>
    %c0_14 = arith.constant 0 : index
    %c0_15 = arith.constant 0 : index
    %c0_16 = arith.constant 0 : index
    %30 = vector.load %arg14[%c0_14, %c0_15, %c0_16] : memref<8x256x128xbf16, #tpu.memory_space<vmem>>, vector<1x256x128xbf16>
    %31 = vector.shape_cast %30 : vector<1x256x128xbf16> to vector<256x128xbf16>
    %cst_17 = arith.constant dense<0.000000e+00> : vector<128x128xf32>
    %32 = tpu.matmul %29, %31, %cst_17 {dimension_numbers = #tpu.dot_dimension_numbers<[1], [0], [0], [1], [0, 0, 1, 1], [], []>} : vector<128x256xbf16>, vector<256x128xbf16>, vector<128x128xf32> -> vector<128x128xf32>
    %33 = vector.broadcast %28 : vector<128x1xf32> to vector<128x128xf32>
    %34 = arith.mulf %32, %33 : vector<128x128xf32>
    %35 = vector.extract_strided_slice %13 {offsets = [0, 16], sizes = [128, 16], strides = [1, 1]} : vector<128x128xbf16> to vector<128x16xbf16>
    %c16 = arith.constant 16 : index
    %c0_18 = arith.constant 0 : index
    %36 = vector.load %arg13[%c16, %c0_18] : memref<128x256xbf16, #tpu.memory_space<vmem>>, vector<16x256xbf16>
    %cst_19 = arith.constant dense<0.000000e+00> : vector<128x256xf32>
    %37 = tpu.matmul %35, %36, %cst_19 {dimension_numbers = #tpu.dot_dimension_numbers<[1], [0], [0], [1], [0, 0, 1, 1], [], []>} : vector<128x16xbf16>, vector<16x256xbf16>, vector<128x256xf32> -> vector<128x256xf32>
    %38 = vector.broadcast %15 : vector<1x256xf32> to vector<128x256xf32>
    %39 = arith.addf %37, %38 : vector<128x256xf32>
    %cst_20 = arith.constant dense<0xFF800000> : vector<128xf32>
    %40 = vector.multi_reduction <maximumf>, %39, %cst_20 [1] : vector<128x256xf32> to vector<128xf32>
    %41 = vector.shape_cast %40 : vector<128xf32> to vector<128x1xf32>
    %42 = vector.broadcast %41 : vector<128x1xf32> to vector<128x256xf32>
    %43 = arith.subf %39, %42 : vector<128x256xf32>
    %44 = math.exp %43 : vector<128x256xf32>
    %cst_21 = arith.constant dense<0.000000e+00> : vector<128xf32>
    %45 = vector.multi_reduction <add>, %44, %cst_21 [1] : vector<128x256xf32> to vector<128xf32>
    %46 = vector.shape_cast %45 : vector<128xf32> to vector<128x1xf32>
    %47 = tpu.reciprocal %46 {approx = true} : vector<128x1xf32> -> vector<128x1xf32>
    %48 = arith.truncf %44 : vector<128x256xf32> to vector<128x256xbf16>
    %c1 = arith.constant 1 : index
    %c0_22 = arith.constant 0 : index
    %c0_23 = arith.constant 0 : index
    %49 = vector.load %arg14[%c1, %c0_22, %c0_23] : memref<8x256x128xbf16, #tpu.memory_space<vmem>>, vector<1x256x128xbf16>
    %50 = vector.shape_cast %49 : vector<1x256x128xbf16> to vector<256x128xbf16>
    %cst_24 = arith.constant dense<0.000000e+00> : vector<128x128xf32>
    %51 = tpu.matmul %48, %50, %cst_24 {dimension_numbers = #tpu.dot_dimension_numbers<[1], [0], [0], [1], [0, 0, 1, 1], [], []>} : vector<128x256xbf16>, vector<256x128xbf16>, vector<128x128xf32> -> vector<128x128xf32>
    %52 = vector.broadcast %47 : vector<128x1xf32> to vector<128x128xf32>
    %53 = arith.mulf %51, %52 : vector<128x128xf32>
    %54 = arith.addf %34, %53 : vector<128x128xf32>
    %55 = vector.extract_strided_slice %13 {offsets = [0, 32], sizes = [128, 16], strides = [1, 1]} : vector<128x128xbf16> to vector<128x16xbf16>
    %c32 = arith.constant 32 : index
    %c0_25 = arith.constant 0 : index
    %56 = vector.load %arg13[%c32, %c0_25] : memref<128x256xbf16, #tpu.memory_space<vmem>>, vector<16x256xbf16>
    %cst_26 = arith.constant dense<0.000000e+00> : vector<128x256xf32>
    %57 = tpu.matmul %55, %56, %cst_26 {dimension_numbers = #tpu.dot_dimension_numbers<[1], [0], [0], [1], [0, 0, 1, 1], [], []>} : vector<128x16xbf16>, vector<16x256xbf16>, vector<128x256xf32> -> vector<128x256xf32>
    %58 = vector.broadcast %15 : vector<1x256xf32> to vector<128x256xf32>
    %59 = arith.addf %57, %58 : vector<128x256xf32>
    %cst_27 = arith.constant dense<0xFF800000> : vector<128xf32>
    %60 = vector.multi_reduction <maximumf>, %59, %cst_27 [1] : vector<128x256xf32> to vector<128xf32>
    %61 = vector.shape_cast %60 : vector<128xf32> to vector<128x1xf32>
    %62 = vector.broadcast %61 : vector<128x1xf32> to vector<128x256xf32>
    %63 = arith.subf %59, %62 : vector<128x256xf32>
    %64 = math.exp %63 : vector<128x256xf32>
    %cst_28 = arith.constant dense<0.000000e+00> : vector<128xf32>
    %65 = vector.multi_reduction <add>, %64, %cst_28 [1] : vector<128x256xf32> to vector<128xf32>
    %66 = vector.shape_cast %65 : vector<128xf32> to vector<128x1xf32>
    %67 = tpu.reciprocal %66 {approx = true} : vector<128x1xf32> -> vector<128x1xf32>
    %68 = arith.truncf %64 : vector<128x256xf32> to vector<128x256xbf16>
    %c2 = arith.constant 2 : index
    %c0_29 = arith.constant 0 : index
    %c0_30 = arith.constant 0 : index
    %69 = vector.load %arg14[%c2, %c0_29, %c0_30] : memref<8x256x128xbf16, #tpu.memory_space<vmem>>, vector<1x256x128xbf16>
    %70 = vector.shape_cast %69 : vector<1x256x128xbf16> to vector<256x128xbf16>
    %cst_31 = arith.constant dense<0.000000e+00> : vector<128x128xf32>
    %71 = tpu.matmul %68, %70, %cst_31 {dimension_numbers = #tpu.dot_dimension_numbers<[1], [0], [0], [1], [0, 0, 1, 1], [], []>} : vector<128x256xbf16>, vector<256x128xbf16>, vector<128x128xf32> -> vector<128x128xf32>
    %72 = vector.broadcast %67 : vector<128x1xf32> to vector<128x128xf32>
    %73 = arith.mulf %71, %72 : vector<128x128xf32>
    %74 = arith.addf %54, %73 : vector<128x128xf32>
    %75 = vector.extract_strided_slice %13 {offsets = [0, 48], sizes = [128, 16], strides = [1, 1]} : vector<128x128xbf16> to vector<128x16xbf16>
    %c48 = arith.constant 48 : index
    %c0_32 = arith.constant 0 : index
    %76 = vector.load %arg13[%c48, %c0_32] : memref<128x256xbf16, #tpu.memory_space<vmem>>, vector<16x256xbf16>
    %cst_33 = arith.constant dense<0.000000e+00> : vector<128x256xf32>
    %77 = tpu.matmul %75, %76, %cst_33 {dimension_numbers = #tpu.dot_dimension_numbers<[1], [0], [0], [1], [0, 0, 1, 1], [], []>} : vector<128x16xbf16>, vector<16x256xbf16>, vector<128x256xf32> -> vector<128x256xf32>
    %78 = vector.broadcast %15 : vector<1x256xf32> to vector<128x256xf32>
    %79 = arith.addf %77, %78 : vector<128x256xf32>
    %cst_34 = arith.constant dense<0xFF800000> : vector<128xf32>
    %80 = vector.multi_reduction <maximumf>, %79, %cst_34 [1] : vector<128x256xf32> to vector<128xf32>
    %81 = vector.shape_cast %80 : vector<128xf32> to vector<128x1xf32>
    %82 = vector.broadcast %81 : vector<128x1xf32> to vector<128x256xf32>
    %83 = arith.subf %79, %82 : vector<128x256xf32>
    %84 = math.exp %83 : vector<128x256xf32>
    %cst_35 = arith.constant dense<0.000000e+00> : vector<128xf32>
    %85 = vector.multi_reduction <add>, %84, %cst_35 [1] : vector<128x256xf32> to vector<128xf32>
    %86 = vector.shape_cast %85 : vector<128xf32> to vector<128x1xf32>
    %87 = tpu.reciprocal %86 {approx = true} : vector<128x1xf32> -> vector<128x1xf32>
    %88 = arith.truncf %84 : vector<128x256xf32> to vector<128x256xbf16>
    %c3 = arith.constant 3 : index
    %c0_36 = arith.constant 0 : index
    %c0_37 = arith.constant 0 : index
    %89 = vector.load %arg14[%c3, %c0_36, %c0_37] : memref<8x256x128xbf16, #tpu.memory_space<vmem>>, vector<1x256x128xbf16>
    %90 = vector.shape_cast %89 : vector<1x256x128xbf16> to vector<256x128xbf16>
    %cst_38 = arith.constant dense<0.000000e+00> : vector<128x128xf32>
    %91 = tpu.matmul %88, %90, %cst_38 {dimension_numbers = #tpu.dot_dimension_numbers<[1], [0], [0], [1], [0, 0, 1, 1], [], []>} : vector<128x256xbf16>, vector<256x128xbf16>, vector<128x128xf32> -> vector<128x128xf32>
    %92 = vector.broadcast %87 : vector<128x1xf32> to vector<128x128xf32>
    %93 = arith.mulf %91, %92 : vector<128x128xf32>
    %94 = arith.addf %74, %93 : vector<128x128xf32>
    %95 = vector.extract_strided_slice %13 {offsets = [0, 64], sizes = [128, 16], strides = [1, 1]} : vector<128x128xbf16> to vector<128x16xbf16>
    %c64 = arith.constant 64 : index
    %c0_39 = arith.constant 0 : index
    %96 = vector.load %arg13[%c64, %c0_39] : memref<128x256xbf16, #tpu.memory_space<vmem>>, vector<16x256xbf16>
    %cst_40 = arith.constant dense<0.000000e+00> : vector<128x256xf32>
    %97 = tpu.matmul %95, %96, %cst_40 {dimension_numbers = #tpu.dot_dimension_numbers<[1], [0], [0], [1], [0, 0, 1, 1], [], []>} : vector<128x16xbf16>, vector<16x256xbf16>, vector<128x256xf32> -> vector<128x256xf32>
    %98 = vector.broadcast %15 : vector<1x256xf32> to vector<128x256xf32>
    %99 = arith.addf %97, %98 : vector<128x256xf32>
    %cst_41 = arith.constant dense<0xFF800000> : vector<128xf32>
    %100 = vector.multi_reduction <maximumf>, %99, %cst_41 [1] : vector<128x256xf32> to vector<128xf32>
    %101 = vector.shape_cast %100 : vector<128xf32> to vector<128x1xf32>
    %102 = vector.broadcast %101 : vector<128x1xf32> to vector<128x256xf32>
    %103 = arith.subf %99, %102 : vector<128x256xf32>
    %104 = math.exp %103 : vector<128x256xf32>
    %cst_42 = arith.constant dense<0.000000e+00> : vector<128xf32>
    %105 = vector.multi_reduction <add>, %104, %cst_42 [1] : vector<128x256xf32> to vector<128xf32>
    %106 = vector.shape_cast %105 : vector<128xf32> to vector<128x1xf32>
    %107 = tpu.reciprocal %106 {approx = true} : vector<128x1xf32> -> vector<128x1xf32>
    %108 = arith.truncf %104 : vector<128x256xf32> to vector<128x256xbf16>
    %c4 = arith.constant 4 : index
    %c0_43 = arith.constant 0 : index
    %c0_44 = arith.constant 0 : index
    %109 = vector.load %arg14[%c4, %c0_43, %c0_44] : memref<8x256x128xbf16, #tpu.memory_space<vmem>>, vector<1x256x128xbf16>
    %110 = vector.shape_cast %109 : vector<1x256x128xbf16> to vector<256x128xbf16>
    %cst_45 = arith.constant dense<0.000000e+00> : vector<128x128xf32>
    %111 = tpu.matmul %108, %110, %cst_45 {dimension_numbers = #tpu.dot_dimension_numbers<[1], [0], [0], [1], [0, 0, 1, 1], [], []>} : vector<128x256xbf16>, vector<256x128xbf16>, vector<128x128xf32> -> vector<128x128xf32>
    %112 = vector.broadcast %107 : vector<128x1xf32> to vector<128x128xf32>
    %113 = arith.mulf %111, %112 : vector<128x128xf32>
    %114 = arith.addf %94, %113 : vector<128x128xf32>
    %115 = vector.extract_strided_slice %13 {offsets = [0, 80], sizes = [128, 16], strides = [1, 1]} : vector<128x128xbf16> to vector<128x16xbf16>
    %c80 = arith.constant 80 : index
    %c0_46 = arith.constant 0 : index
    %116 = vector.load %arg13[%c80, %c0_46] : memref<128x256xbf16, #tpu.memory_space<vmem>>, vector<16x256xbf16>
    %cst_47 = arith.constant dense<0.000000e+00> : vector<128x256xf32>
    %117 = tpu.matmul %115, %116, %cst_47 {dimension_numbers = #tpu.dot_dimension_numbers<[1], [0], [0], [1], [0, 0, 1, 1], [], []>} : vector<128x16xbf16>, vector<16x256xbf16>, vector<128x256xf32> -> vector<128x256xf32>
    %118 = vector.broadcast %15 : vector<1x256xf32> to vector<128x256xf32>
    %119 = arith.addf %117, %118 : vector<128x256xf32>
    %cst_48 = arith.constant dense<0xFF800000> : vector<128xf32>
    %120 = vector.multi_reduction <maximumf>, %119, %cst_48 [1] : vector<128x256xf32> to vector<128xf32>
    %121 = vector.shape_cast %120 : vector<128xf32> to vector<128x1xf32>
    %122 = vector.broadcast %121 : vector<128x1xf32> to vector<128x256xf32>
    %123 = arith.subf %119, %122 : vector<128x256xf32>
    %124 = math.exp %123 : vector<128x256xf32>
    %cst_49 = arith.constant dense<0.000000e+00> : vector<128xf32>
    %125 = vector.multi_reduction <add>, %124, %cst_49 [1] : vector<128x256xf32> to vector<128xf32>
    %126 = vector.shape_cast %125 : vector<128xf32> to vector<128x1xf32>
    %127 = tpu.reciprocal %126 {approx = true} : vector<128x1xf32> -> vector<128x1xf32>
    %128 = arith.truncf %124 : vector<128x256xf32> to vector<128x256xbf16>
    %c5 = arith.constant 5 : index
    %c0_50 = arith.constant 0 : index
    %c0_51 = arith.constant 0 : index
    %129 = vector.load %arg14[%c5, %c0_50, %c0_51] : memref<8x256x128xbf16, #tpu.memory_space<vmem>>, vector<1x256x128xbf16>
    %130 = vector.shape_cast %129 : vector<1x256x128xbf16> to vector<256x128xbf16>
    %cst_52 = arith.constant dense<0.000000e+00> : vector<128x128xf32>
    %131 = tpu.matmul %128, %130, %cst_52 {dimension_numbers = #tpu.dot_dimension_numbers<[1], [0], [0], [1], [0, 0, 1, 1], [], []>} : vector<128x256xbf16>, vector<256x128xbf16>, vector<128x128xf32> -> vector<128x128xf32>
    %132 = vector.broadcast %127 : vector<128x1xf32> to vector<128x128xf32>
    %133 = arith.mulf %131, %132 : vector<128x128xf32>
    %134 = arith.addf %114, %133 : vector<128x128xf32>
    %135 = vector.extract_strided_slice %13 {offsets = [0, 96], sizes = [128, 16], strides = [1, 1]} : vector<128x128xbf16> to vector<128x16xbf16>
    %c96 = arith.constant 96 : index
    %c0_53 = arith.constant 0 : index
    %136 = vector.load %arg13[%c96, %c0_53] : memref<128x256xbf16, #tpu.memory_space<vmem>>, vector<16x256xbf16>
    %cst_54 = arith.constant dense<0.000000e+00> : vector<128x256xf32>
    %137 = tpu.matmul %135, %136, %cst_54 {dimension_numbers = #tpu.dot_dimension_numbers<[1], [0], [0], [1], [0, 0, 1, 1], [], []>} : vector<128x16xbf16>, vector<16x256xbf16>, vector<128x256xf32> -> vector<128x256xf32>
    %138 = vector.broadcast %15 : vector<1x256xf32> to vector<128x256xf32>
    %139 = arith.addf %137, %138 : vector<128x256xf32>
    %cst_55 = arith.constant dense<0xFF800000> : vector<128xf32>
    %140 = vector.multi_reduction <maximumf>, %139, %cst_55 [1] : vector<128x256xf32> to vector<128xf32>
    %141 = vector.shape_cast %140 : vector<128xf32> to vector<128x1xf32>
    %142 = vector.broadcast %141 : vector<128x1xf32> to vector<128x256xf32>
    %143 = arith.subf %139, %142 : vector<128x256xf32>
    %144 = math.exp %143 : vector<128x256xf32>
    %cst_56 = arith.constant dense<0.000000e+00> : vector<128xf32>
    %145 = vector.multi_reduction <add>, %144, %cst_56 [1] : vector<128x256xf32> to vector<128xf32>
    %146 = vector.shape_cast %145 : vector<128xf32> to vector<128x1xf32>
    %147 = tpu.reciprocal %146 {approx = true} : vector<128x1xf32> -> vector<128x1xf32>
    %148 = arith.truncf %144 : vector<128x256xf32> to vector<128x256xbf16>
    %c6 = arith.constant 6 : index
    %c0_57 = arith.constant 0 : index
    %c0_58 = arith.constant 0 : index
    %149 = vector.load %arg14[%c6, %c0_57, %c0_58] : memref<8x256x128xbf16, #tpu.memory_space<vmem>>, vector<1x256x128xbf16>
    %150 = vector.shape_cast %149 : vector<1x256x128xbf16> to vector<256x128xbf16>
    %cst_59 = arith.constant dense<0.000000e+00> : vector<128x128xf32>
    %151 = tpu.matmul %148, %150, %cst_59 {dimension_numbers = #tpu.dot_dimension_numbers<[1], [0], [0], [1], [0, 0, 1, 1], [], []>} : vector<128x256xbf16>, vector<256x128xbf16>, vector<128x128xf32> -> vector<128x128xf32>
    %152 = vector.broadcast %147 : vector<128x1xf32> to vector<128x128xf32>
    %153 = arith.mulf %151, %152 : vector<128x128xf32>
    %154 = arith.addf %134, %153 : vector<128x128xf32>
    %155 = vector.extract_strided_slice %13 {offsets = [0, 112], sizes = [128, 16], strides = [1, 1]} : vector<128x128xbf16> to vector<128x16xbf16>
    %c112 = arith.constant 112 : index
    %c0_60 = arith.constant 0 : index
    %156 = vector.load %arg13[%c112, %c0_60] : memref<128x256xbf16, #tpu.memory_space<vmem>>, vector<16x256xbf16>
    %cst_61 = arith.constant dense<0.000000e+00> : vector<128x256xf32>
    %157 = tpu.matmul %155, %156, %cst_61 {dimension_numbers = #tpu.dot_dimension_numbers<[1], [0], [0], [1], [0, 0, 1, 1], [], []>} : vector<128x16xbf16>, vector<16x256xbf16>, vector<128x256xf32> -> vector<128x256xf32>
    %158 = vector.broadcast %15 : vector<1x256xf32> to vector<128x256xf32>
    %159 = arith.addf %157, %158 : vector<128x256xf32>
    %cst_62 = arith.constant dense<0xFF800000> : vector<128xf32>
    %160 = vector.multi_reduction <maximumf>, %159, %cst_62 [1] : vector<128x256xf32> to vector<128xf32>
    %161 = vector.shape_cast %160 : vector<128xf32> to vector<128x1xf32>
    %162 = vector.broadcast %161 : vector<128x1xf32> to vector<128x256xf32>
    %163 = arith.subf %159, %162 : vector<128x256xf32>
    %164 = math.exp %163 : vector<128x256xf32>
    %cst_63 = arith.constant dense<0.000000e+00> : vector<128xf32>
    %165 = vector.multi_reduction <add>, %164, %cst_63 [1] : vector<128x256xf32> to vector<128xf32>
    %166 = vector.shape_cast %165 : vector<128xf32> to vector<128x1xf32>
    %167 = tpu.reciprocal %166 {approx = true} : vector<128x1xf32> -> vector<128x1xf32>
    %168 = arith.truncf %164 : vector<128x256xf32> to vector<128x256xbf16>
    %c7 = arith.constant 7 : index
    %c0_64 = arith.constant 0 : index
    %c0_65 = arith.constant 0 : index
    %169 = vector.load %arg14[%c7, %c0_64, %c0_65] : memref<8x256x128xbf16, #tpu.memory_space<vmem>>, vector<1x256x128xbf16>
    %170 = vector.shape_cast %169 : vector<1x256x128xbf16> to vector<256x128xbf16>
    %cst_66 = arith.constant dense<0.000000e+00> : vector<128x128xf32>
    %171 = tpu.matmul %168, %170, %cst_66 {dimension_numbers = #tpu.dot_dimension_numbers<[1], [0], [0], [1], [0, 0, 1, 1], [], []>} : vector<128x256xbf16>, vector<256x128xbf16>, vector<128x128xf32> -> vector<128x128xf32>
    %172 = vector.broadcast %167 : vector<128x1xf32> to vector<128x128xf32>
    %173 = arith.mulf %171, %172 : vector<128x128xf32>
    %174 = arith.addf %154, %173 : vector<128x128xf32>
    %c0_67 = arith.constant 0 : index
    %c0_68 = arith.constant 0 : index
    %175 = vector.load %arg11[%c0_67, %c0_68] : memref<1x128xf32, #tpu.memory_space<vmem>>, vector<1x128xf32>
    %176 = vector.broadcast %175 : vector<1x128xf32> to vector<128x128xf32>
    %177 = arith.addf %174, %176 : vector<128x128xf32>
    %c0_69 = arith.constant 0 : index
    %c0_70 = arith.constant 0 : index
    %c0_71 = arith.constant 0 : index
    %178 = vector.load %arg12[%c0_69, %c0_70, %c0_71] : memref<1x128x128xf32, #tpu.memory_space<vmem>>, vector<1x128x128xf32>
    %179 = vector.shape_cast %178 : vector<1x128x128xf32> to vector<128x128xf32>
    %180 = vector.shape_cast %177 : vector<128x128xf32> to vector<1x128x128xf32>
    tpu.vector_store %arg12[%c0_69, %c0_70, %c0_71], %180 {strides = array<i32>} : memref<1x128x128xf32, #tpu.memory_space<vmem>>, vector<1x128x128xf32>,
    return
  }
  func.func @transform_0(%arg0: i32, %arg1: i32) -> (i32, i32, i32) {
    %c0_i32 = arith.constant 0 : i32
    %c0_i32_0 = arith.constant 0 : i32
    %c0_i32_1 = arith.constant 0 : i32
    return %arg0, %c0_i32, %c0_i32_0 : i32, i32, i32
  }
  func.func @transform_1(%arg0: i32, %arg1: i32) -> (i32, i32, i32) {
    %c0_i32 = arith.constant 0 : i32
    %c0_i32_0 = arith.constant 0 : i32
    %c0_i32_1 = arith.constant 0 : i32
    return %arg0, %c0_i32, %c0_i32_0 : i32, i32, i32
  }
  func.func @transform_2(%arg0: i32, %arg1: i32) -> (i32, i32) {
    %c0_i32 = arith.constant 0 : i32
    %c0_i32_0 = arith.constant 0 : i32
    %c0_i32_1 = arith.constant 0 : i32
    return %c0_i32, %c0_i32_0 : i32, i32
  }
  func.func @transform_3(%arg0: i32, %arg1: i32) -> (i32, i32) {
    %c0_i32 = arith.constant 0 : i32
    %c0_i32_0 = arith.constant 0 : i32
    %c0_i32_1 = arith.constant 0 : i32
    return %c0_i32, %c0_i32_0 : i32, i32
  }
  func.func @transform_4(%arg0: i32, %arg1: i32) -> (i32, i32) {
    %c0_i32 = arith.constant 0 : i32
    %c0_i32_0 = arith.constant 0 : i32
    %c0_i32_1 = arith.constant 0 : i32
    return %c0_i32, %c0_i32_0 : i32, i32
  }
  func.func @transform_5(%arg0: i32, %arg1: i32) -> (i32, i32) {
    %c0_i32 = arith.constant 0 : i32
    %c0_i32_0 = arith.constant 0 : i32
    %c0_i32_1 = arith.constant 0 : i32
    return %c0_i32, %c0_i32_0 : i32, i32
  }
  func.func @transform_6(%arg0: i32, %arg1: i32) -> (i32, i32) {
    %c0_i32 = arith.constant 0 : i32
    %c0_i32_0 = arith.constant 0 : i32
    %c0_i32_1 = arith.constant 0 : i32
    return %c0_i32, %c0_i32_0 : i32, i32
  }
  func.func @transform_7(%arg0: i32, %arg1: i32) -> (i32, i32) {
    %c0_i32 = arith.constant 0 : i32
    %c0_i32_0 = arith.constant 0 : i32
    %c0_i32_1 = arith.constant 0 : i32
    return %c0_i32, %c0_i32_0 : i32, i32
  }
  func.func @transform_8(%arg0: i32, %arg1: i32) -> (i32, i32, i32) {
    %c0_i32 = arith.constant 0 : i32
    %c0_i32_0 = arith.constant 0 : i32
    %c0_i32_1 = arith.constant 0 : i32
    %c0_i32_2 = arith.constant 0 : i32
    return %c0_i32, %c0_i32_0, %c0_i32_1 : i32, i32, i32
  }
  func.func @transform_9(%arg0: i32, %arg1: i32) -> (i32, i32) {
    %c0_i32 = arith.constant 0 : i32
    %c0_i32_0 = arith.constant 0 : i32
    %c0_i32_1 = arith.constant 0 : i32
    return %c0_i32, %c0_i32_0 : i32, i32
  }
  func.func @transform_10(%arg0: i32, %arg1: i32) -> (i32, i32, i32) {
    %c0_i32 = arith.constant 0 : i32
    %c0_i32_0 = arith.constant 0 : i32
    return %arg0, %arg1, %c0_i32 : i32, i32, i32
  }
}

</mosaic_0001>

<bundles_post_ra>
// kernel: tpu_custom_call.1
= control target key start
LH: loop header
LB: loop body
LE: loop exit
PB: predicated region body
PF: predicated region fallthrough
CT: control target
= control target key end

     0   :  { %s19412_s0 = inlined_call_operand.hbm [shape: bf16[2,256,128], index: 0, kind: input, shape index: {}]   ;;  %s19413_s1 = inlined_call_operand.hbm [shape: f32[2,1,256], index: 1, kind: input, shape index: {}]   ;;  %s19414_s2 = inlined_call_operand.hbm [shape: bf16[128,128], index: 2, kind: input, shape index: {}]   ;;  %s19415_s3 = inlined_call_operand.vmem [shape: f32[1,128], index: 3, kind: input, shape index: {}]   ;;  %s19416_s4 = inlined_call_operand.hbm [shape: bf16[128,128], index: 4, kind: input, shape index: {}]   ;;  %s19417_s5 = inlined_call_operand.vmem [shape: f32[1,128], index: 5, kind: input, shape index: {}]   ;;  %s19418_s6 = inlined_call_operand.hbm [shape: bf16[128,128], index: 6, kind: input, shape index: {}]   ;;  %s19419_s7 = inlined_call_operand.vmem [shape: f32[1,128], index: 7, kind: input, shape index: {}]   ;;  %s19420_s8 = inlined_call_operand.hbm [shape: bf16[8,16,128], index: 8, kind: input, shape index: {}]   ;;  %s19421_s9 = inlined_call_operand.vmem [shape: f32[1,128], index: 9, kind: input, shape index: {}]   ;;  %s19422_s10 = inlined_call_operand.hbm [shape: f32[2,256,128], index: 10, kind: output, shape index: {}]  }
   0x1   :  { %19584 = sst [smem:[#allocation200_spill]] %s19412_s0 }
   0x2   :  { %19585 = sst [smem:[#allocation201_spill]] %s19414_s2 }
   0x3   :  { %19586 = sst [smem:[#allocation202_spill]] %s19415_s3 }
   0x4   :  { %19587 = sst [smem:[#allocation203_spill]] %s19416_s4 }
   0x5   :  { %19588 = sst [smem:[#allocation204_spill]] %s19417_s5 }
   0x6   :  { %19589 = sst [smem:[#allocation205_spill]] %s19418_s6 }
   0x7   :  { %19590 = sst [smem:[#allocation206_spill]] %s19420_s8 }
   0x8   :  { %19591 = sst [smem:[#allocation207_spill]] %s19421_s9 }
   0x9   :  { %19592 = sst [smem:[#allocation208_spill]] %s19422_s10 }
   0xa   :  { %15 = vsyncpa [#allocation5], 0 }
   0xb   :  { %17 = vsyncpa [#allocation5 + $0x1], 0 }
   0xc   :  { %18 = vsyncpa [#allocation8], 0 }
   0xd   :  { %20 = vsyncpa [#allocation8 + $0x1], 0 }
   0xe   :  { %21 = vsyncpa [#allocation11], 0 }
   0xf   :  { %22 = vsyncpa [#allocation14], 0 }
  0x10   :  { %23 = vsyncpa [#allocation6], 0 }
  0x11   :  { %25 = vsyncpa [#allocation6 + $0x1], 0  ;;  %s14649_s13 = smov 0   ;;  %s14651_s14 = smov 0  }
  0x12   :  { %s14653_s15 = smov 0   ;;  %s14655_s16 = smov 0  }
  0x13   :  { %s14657_s17 = smov 0   ;;  %s14659_s18 = smov 0  }
  0x14   :  { %s14661_s19 = smov 0   ;;  %s14663_s20 = smov 0  }
  0x15   :  { %s14665_s21 = smov 0   ;;  %s14667_s22 = smov 0  }
  0x16   :  { %s14669_s23 = smov 0  }
  0x17 LB: > { %19593 = sst [smem:[#allocation22_spill]] %s14526_s13  ;;  %s14703_s24 = sadd.s32 4294967295, %s14566_s23   ;;  %s14566_s23 = sphi %s14669_s23, %s31_s23   ;;  %s14562_s22 = sphi %s14667_s22, %s20362_s22   ;;  %s14558_s21 = sphi %s14665_s21, %s20353_s21   ;;  %s14554_s20 = sphi %s14663_s20, %s20361_s20   ;;  %s14550_s19 = sphi %s14661_s19, %s20360_s19   ;;  %s14546_s18 = sphi %s14659_s18, %s20351_s18   ;;  %s14542_s17 = sphi %s14657_s17, %s20359_s17   ;;  %s14538_s16 = sphi %s14655_s16, %s20358_s16   ;;  %s14534_s15 = sphi %s14653_s15, %s20357_s15   ;;  %s14530_s14 = sphi %s14651_s14, %s20356_s14   ;;  %s14526_s13 = sphi %s14649_s13, %s20355_s13  }
  0x18   : > { %19594 = sst [smem:[#allocation23_spill]] %s14546_s18  ;;  %s10164_s25 = sadd.s32 4294967294, %s14566_s23  }
  0x19   : > { %19595 = sst [smem:[#allocation24_spill]] %s14554_s20  ;;  %p63_p0 = scmp.ne.s32.totalorder %s14542_s17, %s14538_s16 }
  0x1a   : > { %19596 = sst [smem:[#allocation25_spill]] %s14558_s21  ;;  %p19428_p1 = scmp.eq.s32.totalorder %s14703_s24, 0 }
  0x1b   : > { %p282_p2 = scmp.ne.s32.totalorder %s14534_s15, %s14530_s14  ;;  %p283_p4 = scmp.eq.s32.totalorder %s14703_s24, 3 }
  0x1c   : > { %p14713_p3 = por %p19428_p1, %p63_p0  ;;  %p288_p5 = scmp.ne.s32.totalorder %s14530_s14, %s14526_s13 }
  0x1d   : > { %p289_p6 = scmp.eq.s32.totalorder %s10164_s25, 3  ;;  %p14720_p7 = por %p283_p4, %p282_p2 }
  0x1e   : > { %p10165_p8 = scmp.ge.s32.totalorder %s14566_s23, 1  ;;  %p296_p10 = scmp.lt.s32.totalorder %s14566_s23, 5 }
  0x1f   : > { %s19598_s28 = scalar_select %p14720_p7, 1, 0 }
  0x20   : > { %p14725_p9 = por %p289_p6, %p288_p5  ;;  %p14730_p11 = pnand %p10165_p8, %p296_p10 }
  0x21   : > { %19599 = sst [smem:[#allocation26_spill]] %s19598_s28  ;;  %s14568_s11 = smov [#allocation9]  }
  0x22   : > { %s19600_s29 = scalar_select %p14725_p9, 1, 0 }
  0x23   : > { %s308_s12 = sshll.u32 %s14568_s11, 4  ;;  %p13046_p12 = pneg %p14730_p11  ;;  %s309_s12 = int_to_ptr.vmem [resolvable:$true] %s308_s12 }
  0x24   : > { %19601 = sst [smem:[#allocation27_spill]] %s19600_s29  ;;  %s14569_s25 = smov [#allocation10]  }
  0x25   : > { %p14738_p13 = pnand %p13046_p12, %p19428_p1  ;;  %s324_s26 = sshll.u32 %s14569_s25, 4  ;;  %s325_s26 = int_to_ptr.vmem [resolvable:$true] %s324_s26 }
  0x26   : > { %s14570_s29 = smov [#allocation12]   ;;  %s14281_s10 = scalar_lea.vmem %s309_s12, 1024 }
  0x27   : > { %s340_s13 = sshll.u32 %s14570_s29, 4  ;;  %p14272_p0 = pneg %p14738_p13  ;;  %s341_s13 = int_to_ptr.vmem [resolvable:$true] %s340_s13 }
  0x28   : > { %p14282_p2 = scmp.ne.s32.totalorder %s309_s12, %s14281_s10  ;;  %p14289_p6 = scmp.lt.s32.totalorder %s309_s12, %s309_s12 }
  0x29   : > { %p14290_p8 = scmp.lt.s32.totalorder %s14281_s10, %s14281_s10 }
  0x2a   : > { %p14284_p4 = pnand %p14282_p2, %p14272_p0 }
  0x2b   : > { %p14291_p10 = por %p14290_p8, %p14289_p6 }
  0x2c   : > { %p14285_p5 = pneg %p14284_p4 }
  0x2e   : > { %p14292_p12 = pnand %p14291_p10, %p14285_p5 }
  0x30   : > { %14295 = shalt.err (!%p14292_p12)
}
  0x31   : > { %s19429_s11 = smov 64   ;;  %s19430_s25 = smov 4  }
  0x32   : > { %s19604_s2 = sld [smem:[#allocation201_spill]]  ;;  %s14307_s20 = scalar_lea.vmem %s325_s26, 1024 }
  0x33   : > { %p14308_p2 = scmp.ne.s32.totalorder %s325_s26, %s14307_s20  ;;  %p14315_p5 = scmp.lt.s32.totalorder %s325_s26, %s325_s26 }
  0x34   : > { %p14316_p8 = scmp.lt.s32.totalorder %s14307_s20, %s14307_s20 }
  0x35   : > { %p14310_p4 = pnand %p14308_p2, %p14272_p0 }
  0x36   : > { %p14317_p10 = por %p14316_p8, %p14315_p5 }
  0x37   : > { %p14311_p6 = pneg %p14310_p4 }
  0x38   : > { %13049 = dma.hbm_to_vmem [thread:$0]  (!%p14738_p13), %s19604_s2, 1024, %s309_s12, [#allocation8], %s19429_s11, %s19429_s11, %s19430_s25  }
  0x39   : > { %p14318_p12 = pnand %p14317_p10, %p14311_p6 }
  0x3b   : > { %14321 = shalt.err (!%p14318_p12)
}
  0x3c   : > { %s19605_s4 = sld [smem:[#allocation203_spill]]  ;;  %s14333_s28 = scalar_lea.vmem %s341_s13, 1024 }
  0x3d   : > { %p14334_p1 = scmp.ne.s32.totalorder %s341_s13, %s14333_s28  ;;  %p14341_p5 = scmp.lt.s32.totalorder %s341_s13, %s341_s13 }
  0x3e   : > { %p14342_p6 = scmp.lt.s32.totalorder %s14333_s28, %s14333_s28 }
  0x3f   : > { %p14336_p2 = pnand %p14334_p1, %p14272_p0 }
  0x40   : > { %p14343_p8 = por %p14342_p6, %p14341_p5 }
  0x41   : > { %p14337_p4 = pneg %p14336_p2 }
  0x42   : > { %13052 = dma.hbm_to_vmem [thread:$0]  (!%p14738_p13), %s19605_s4, 1024, %s325_s26, [#allocation11], %s19429_s11, %s19429_s11, %s19430_s25  }
  0x43   : > { %p14344_p10 = pnand %p14343_p8, %p14337_p4 }
  0x45   : > { %14347 = shalt.err (!%p14344_p10)
}
  0x46   : > { %s19606_s6 = sld [smem:[#allocation205_spill]]  ;;  %s14573_s26 = smov [#allocation13]  }
  0x47   : > { %s356_s12 = sshll.u32 %s14573_s26, 4  ;;  %s357_s12 = int_to_ptr.vmem [resolvable:$true] %s356_s12 }
  0x48   : > { %s14359_s29 = scalar_lea.vmem %s357_s12, 1024  ;;  %p14367_p4 = scmp.lt.s32.totalorder %s357_s12, %s357_s12 }
  0x49   : > { %p14360_p1 = scmp.ne.s32.totalorder %s357_s12, %s14359_s29  ;;  %p14368_p5 = scmp.lt.s32.totalorder %s14359_s29, %s14359_s29 }
  0x4b   : > { %p14362_p12 = pnand %p14360_p1, %p14272_p0  ;;  %p14369_p6 = por %p14368_p5, %p14367_p4 }
  0x4c   : > { %13055 = dma.hbm_to_vmem [thread:$0]  (!%p14738_p13), %s19606_s6, 1024, %s341_s13, [#allocation11], %s19429_s11, %s19429_s11, %s19430_s25  }
  0x4d   : > { %p14363_p2 = pneg %p14362_p12 }
  0x4f   : > { %p14370_p8 = pnand %p14369_p6, %p14363_p2 }
  0x51   : > { %14373 = shalt.err (!%p14370_p8)
}
  0x52   : > { %s19607_s8 = sld [smem:[#allocation206_spill]]  ;;  %s40_s28 = sadd.s32 1, %s14558_s21 }
  0x53   : > { %s43_s16 = sadd.s32 1, %s14562_s22  ;;  %p41_p0 = scmp.ge.s32.totalorder %s40_s28, 2 }
  0x54   : > { %s50_s9 = sadd.s32 1, %s14546_s18  ;;  %p57_p10 = scmp.ne.s32.totalorder %s14546_s18, %s14542_s17 }
  0x55   : > { %p58_p1 = scmp.eq.s32.totalorder %s14566_s23, 0  ;;  %s20364_s28 = smov (%p41_p0, %s40_s28), 0 }
  0x56   : > { %19608 = sst [smem:[#allocation28_spill]] %s20364_s28  ;;  %s20366_s16 = smov (!%p41_p0, %s43_s16), %s14562_s22 }
  0x57   : > { %p14797_p12 = por %p58_p1, %p57_p10  ;;  %s268_s26 = ssub.s32 %s14558_s21, %s20364_s28 }
  0x58   : > { %13058 = dma.hbm_to_vmem [thread:$0]  (!%p14738_p13), %s19607_s8, 1024, %s357_s12, [#allocation14], %s19429_s11, %s19429_s11, %s19430_s25  }
  0x59   : > { %p45_p13 = scmp.ge.s32.totalorder %s20366_s16, 2  ;;  %p13074_p2 = scmp.lt.s32.totalorder %s14566_s23, 4 }
  0x5a   : > { %s14805_s12 = sand.u32 1, %s14546_s18   ;;  %s10862_s29 = sshll.u32 %s14562_s22, 11 }
  0x5b   : > { %s20368_s16 = smov (%p45_p13, %s20366_s16), 0  ;;  %s10171_s13 = sshll.u32 %s14805_s12, 7 }
  0x5c   : > { %19610 = sst [smem:[#allocation29_spill]] %s20368_s16  ;;  %s47_s10 = ssub.s32 %s14562_s22, %s20368_s16 }
  0x5d   : > { %p48_p4 = scmp.eq.s32.totalorder %s47_s10, 0  ;;  %s269_s11 = sor.u32 %s268_s26, %s47_s10 }
  0x5e   : > { %p270_p5 = scmp.eq.s32.totalorder %s269_s11, 0  ;;  %s19611_s0 = sld [smem:[#allocation200_spill]] }
  0x5f   : > { %s14817_s6 = scalar_select %p48_p4, %s14546_s18, %s50_s9  }
  0x60   : > { %s19613_s8 = sadd.s32 1, %s14534_s15  ;;  %s377_s21 = scalar_lea.vmem [#allocation4], %s10171_s13 }
  0x61   : > { %19612 = sst [smem:[#allocation30_spill]] %s14817_s6  ;;  %s384_s3 = sshll.u32 %s377_s21, 4  ;;  %s385_s3 = int_to_ptr.vmem [resolvable:$true] %s384_s3 }
  0x62   : > { %s14822_s28 = scalar_select %p270_p5, %s14534_s15, %s19613_s8  }
  0x63   : > { %p14828_p6 = pnand %p13074_p2, %p14797_p12  ;;  %s394_s11 = sand.u32 1, %s14566_s23  }
  0x64   : > { %s383_s4 = scalar_lea.hbm %s19611_s0, %s10862_s29  ;;  %s374_s26 = scalar_lea.sflag [#allocation5], %s14805_s12 }
  0x65   : > { %p14376_p8 = pneg %p14828_p6  ;;  %s14387_s2 = scalar_lea.vmem %s385_s3, 2048 }
  0x66   : > { %p14388_p0 = scmp.ne.s32.totalorder %s385_s3, %s14387_s2  ;;  %s14574_s8 = smov [#allocation4]  }
  0x67   : > { %s14392_s21 = sshll.u32 %s14574_s8, 4  ;;  %s14393_s21 = int_to_ptr.vmem [resolvable:$false] %s14392_s21 }
  0x68   : > { %p14390_p10 = pnand %p14388_p0, %p14376_p8  ;;  %s14394_s25 = scalar_lea.vmem %s14393_s21, 4096 }
  0x69   : > { %p14395_p12 = scmp.lt.s32.totalorder %s385_s3, %s14393_s21  ;;  %p14396_p13 = scmp.lt.s32.totalorder %s14394_s25, %s14387_s2 }
  0x6a   : > { %p14391_p1 = pneg %p14390_p10 }
  0x6b   : > { %p14397_p2 = por %p14396_p13, %p14395_p12 }
  0x6d   : > { %p14398_p4 = pnand %p14397_p2, %p14391_p1 }
  0x6f   : > { %14401 = shalt.err (!%p14398_p4)
}
  0x70   : > { %s19615_s9 = smov 4   ;;  %s19616_s20 = smov 64  }
  0x71   : > { %13062 = dma.hbm_to_vmem [thread:$0]  (!%p14828_p6), %s383_s4, 2048, %s385_s3, %s374_s26, %s19616_s20, %s19616_s20, %s19615_s9  }
  0x72   : > { %s10174_s29 = sshll.u32 %s14805_s12, 1  ;;  %s10863_s13 = sshll.u32 %s14562_s22, 5 }
  0x73   : > { %s404_s0 = scalar_lea.hbm %s19413_s1, %s10863_s13  ;;  %s398_s21 = scalar_lea.vmem [#allocation7], %s10174_s29 }
  0x74   : > { %s406_s2 = sshll.u32 %s398_s21, 4  ;;  %s395_s25 = scalar_lea.sflag [#allocation8], %s394_s11  ;;  %s407_s2 = int_to_ptr.vmem [resolvable:$true] %s406_s2 }
  0x75   : > { %s14415_s16 = scalar_lea.vmem %s407_s2, 32  ;;  %s14575_s6 = smov [#allocation7]  }
  0x76   : > { %p14416_p5 = scmp.ne.s32.totalorder %s407_s2, %s14415_s16  ;;  %s14420_s18 = sshll.u32 %s14575_s6, 4  ;;  %s14421_s18 = int_to_ptr.vmem [resolvable:$false] %s14420_s18 }
  0x77   : > { %s14422_s3 = scalar_lea.vmem %s14421_s18, 64  ;;  %p14423_p1 = scmp.lt.s32.totalorder %s407_s2, %s14421_s18 }
  0x78   : > { %p14418_p0 = pnand %p14416_p5, %p14376_p8  ;;  %p14424_p12 = scmp.lt.s32.totalorder %s14422_s3, %s14415_s16 }
  0x7a   : > { %p14419_p10 = pneg %p14418_p0  ;;  %p14425_p13 = por %p14424_p12, %p14423_p1 }
  0x7c   : > { %p14426_p2 = pnand %p14425_p13, %p14419_p10 }
  0x7e   : > { %14429 = shalt.err (!%p14426_p2)
}
  0x7f   : > { %13065 = dma.hbm_to_vmem [thread:$0]  (!%p14828_p6), %s404_s0, 32, %s407_s2, %s395_s25  }
  0x80   : > { %415 = sbr.rel (%p14730_p11) target bundleno = 2738 (0xab2), region = 60 }
  0x85   : > { %s417_s4 = sand.u32 1, %s14542_s17  }
  0x86   : > { %s10178_s12 = sshll.u32 %s417_s4, 7  ;;  %s418_s11 = scalar_lea.sflag [#allocation5], %s417_s4 }
  0x87   : > { %s14857_s26 = scalar_lea.vmem [#allocation4], %s10178_s12 }
  0x88   : > { %14501 = dma.done.wait (%p14713_p3), %s418_s11, 2048  }
  0x89   : > { %14503 = vsyncadd (%p14713_p3), %s418_s11, 4294965248  ;;  %s426_s6 = sand.u32 1, %s14703_s24   ;;  %s10179_s5 = sshll.u32 %s417_s4, 1 }
  0x8a   : > { %s427_s0 = scalar_lea.sflag [#allocation8], %s426_s6  ;;  %s14864_s18 = scalar_lea.vmem [#allocation7], %s10179_s5 }
  0x8b   : > { %14505 = dma.done.wait (%p14713_p3), %s427_s0, 32  }
  0x8c   : > { %14507 = vsyncadd (%p14713_p3), %s427_s0, 4294967264  ;;  %p19617_p11 = scmp.eq.s32.totalorder %s14703_s24, 0 }
  0x8e   : > { %14509 = dma.done.wait (%p19617_p11), [#allocation8], 1024   ;;  %p19618_p6 = pmov %p19617_p11 }
  0x90   : > { %14511 = vsyncadd (%p19618_p6), [#allocation8], 4294966272  ;;  %p19619_p8 = pmov %p19618_p6 }
  0x91   : > { %p19620_p4 = pmov %p19618_p6 }
  0x92   : > { %14513 = dma.done.wait (%p19619_p8), [#allocation11], 2048  }
  0x93   : > { %14515 = vsyncadd (%p19620_p4), [#allocation11], 4294965248  ;;  %p19621_p5 = pmov %p19620_p4 }
  0x94   : > { %p19622_p0 = pmov %p19620_p4 }
  0x95   : > { %14517 = dma.done.wait (%p19621_p5), [#allocation14], 1024  }
  0x96   : > { %14519 = vsyncadd (%p19622_p0), [#allocation14], 4294966272  ;;  %s485_s27 = sand.u32 1, %s14530_s14   ;;  %p10185_p3 = scmp.ne.s32.totalorder %s14550_s19, 0 }
  0x97   : > { %s10184_s30 = sshll.u32 %s485_s27, 7  ;;  %s14576_s20 = smov (!%p10185_p3), 112  }
  0x98   : > { %s14885_s16 = scalar_lea.vmem [#allocation15], %s10184_s30  ;;  %493 = sbr.rel (%p10185_p3) target bundleno = 962 (0x3c2), region = 88 }
  0x99   : > { %s19623_s10 = sld [smem:[#allocation204_spill]] (!%p10185_p3)  ;;  %s14577_s8 = smov (!%p10185_p3), 80  }
  0x9a   : > { %s14578_s21 = smov (!%p10185_p3), 96   ;;  %s14579_s2 = smov (!%p10185_p3), 48  }
  0x9b   : > { %s14580_s25 = smov (!%p10185_p3), 64   ;;  %s14581_s3 = smov (!%p10185_p3), 16  }
  0x9c   : > { %s14582_s4 = smov (!%p10185_p3), 32  }
  0x9d   : > { %v13303_v0 = vld [vmem:[#allocation12 + $0x38] sm:$0xff]   ;;  %v13304_v1 = vld [vmem:[#allocation12 + $0x30] sm:$0xff]   ;;  %v13305_v2 = vld [vmem:[#allocation12 + $0x28] sm:$0xff]   ;;  %vm1286_vm0 = vcmask 130048  }
  0x9e   : > { %12656 = vmatprep.subr.bf16.mxu1 %v13303_v0  ;;  %v13306_v3 = vld [vmem:[#allocation12 + $0x20] sm:$0xff]   ;;  %v13307_v5 = vld [vmem:[#allocation12 + $0x18] sm:$0xff]   ;;  %v13308_v6 = vld [vmem:[#allocation12 + $0x10] sm:$0xff]  }
  0x9f   : > { %12657 = vmatpush3.bf16.msra.mxu1 %v13303_v0  ;;  %v13311_v4 = vld [vmem:[%s14857_s26] sm:$0xff]   ;;  %v13309_v7 = vld [vmem:[#allocation12 + $0x8] sm:$0xff]   ;;  %v13328_v10 = vld [vmem:[#allocation10 + $0x30] sm:$0xff]  }
  0xa0   : > { %12658 = vmatprep.subr.bf16.mxu1 %v13304_v1  ;;  %12672 = vmatprep.mubr.bf16.mxu1 %v13311_v4  ;;  %v13310_v8 = vld [vmem:[#allocation12] sm:$0xff]   ;;  %v13327_v9 = vld [vmem:[#allocation10 + $0x38] sm:$0xff]   ;;  %v13329_v11 = vld [vmem:[#allocation10 + $0x28] sm:$0xff]  }
  0xa1   : > { %12624 = vmatprep.mubr.bf16.mxu0 %v13311_v4  ;;  %12608 = vmatprep.subr.bf16.mxu0 %v13327_v9  ;;  %v13312_v12 = vld [vmem:[%s14857_s26 + $0x8] sm:$0xff]   ;;  %v13313_v13 = vld [vmem:[%s14857_s26 + $0x10] sm:$0xff]   ;;  %v13331_v15 = vld [vmem:[#allocation10 + $0x18] sm:$0xff]  }
  0xa2   : > { %12609 = vmatpush3.bf16.msra.mxu0 %v13327_v9  ;;  %v13330_v14 = vld [vmem:[#allocation10 + $0x20] sm:$0xff]   ;;  %v13314_v16 = vld [vmem:[%s14857_s26 + $0x18] sm:$0xff]   ;;  %v13333_v19 = vld [vmem:[#allocation10 + $0x8] sm:$0xff]  }
  0xa3   : > { %12659 = vmatpush3.bf16.msra.mxu1 %v13304_v1  ;;  %12610 = vmatprep.subr.bf16.mxu0 %v13328_v10  ;;  %v13315_v17 = vld [vmem:[%s14857_s26 + $0x20] sm:$0xff]   ;;  %v13332_v18 = vld [vmem:[#allocation10 + $0x10] sm:$0xff]   ;;  %v13316_v20 = vld [vmem:[%s14857_s26 + $0x28] sm:$0xff]  }
  0xa4   : > { %12660 = vmatprep.subr.bf16.mxu1 %v13305_v2  ;;  %v13317_v21 = vld [vmem:[%s14857_s26 + $0x30] sm:$0xff]   ;;  %v13334_v22 = vld [vmem:[#allocation10] sm:$0xff]   ;;  %v13318_v23 = vld [vmem:[%s14857_s26 + $0x38] sm:$0xff]  }
  0xa5   : > { %v13319_v24 = vld [vmem:[%s14857_s26 + $0x40] sm:$0xff]   ;;  %v13320_v25 = vld [vmem:[%s14857_s26 + $0x48] sm:$0xff]   ;;  %v13321_v26 = vld [vmem:[%s14857_s26 + $0x50] sm:$0xff]  }
  0xa6   : > { %12611 = vmatpush3.bf16.msra.mxu0 %v13328_v10  ;;  %v13322_v27 = vld [vmem:[%s14857_s26 + $0x58] sm:$0xff]   ;;  %v13323_v28 = vld [vmem:[%s14857_s26 + $0x60] sm:$0xff]   ;;  %v13324_v29 = vld [vmem:[%s14857_s26 + $0x68] sm:$0xff]  }
  0xa7   : > { %12661 = vmatpush3.bf16.msra.mxu1 %v13305_v2  ;;  %12612 = vmatprep.subr.bf16.mxu0 %v13329_v11  ;;  %v13325_v30 = vld [vmem:[%s14857_s26 + $0x70] sm:$0xff]   ;;  %v13326_v31 = vld [vmem:[%s14857_s26 + $0x78] sm:$0xff]   ;;  %v13335_v32 = vld [vmem:[#allocation13] sm:$0xff]  }
  0xa8   : > { %12662 = vmatprep.subr.bf16.mxu1 %v13306_v3  ;;  %v13336_v33 = vld [vmem:[#allocation13 + $0x8] sm:$0xff]   ;;  %v14904_v34 = vld [vmem:[#allocation13 + $0x18] sm:$0xff]   ;;  %v13338_v36 = vld [vmem:[#allocation13 + $0x10] sm:$0xff]  }
  0xa9   : > { %v14910_v39 = vld [vmem:[%s19419_s7] ss:$0 sm:$0xff] }
  0xaa   : > { %12613 = vmatpush3.bf16.msra.mxu0 %v13329_v11 }
  0xab   : > { %12663 = vmatpush3.bf16.msra.mxu1 %v13306_v3  ;;  %12614 = vmatprep.subr.bf16.mxu0 %v13330_v14 }
  0xac   : > { %12664 = vmatprep.subr.bf16.mxu1 %v13307_v5 }
  0xae   : > { %12615 = vmatpush3.bf16.msra.mxu0 %v13330_v14 }
  0xaf   : > { %12665 = vmatpush3.bf16.msra.mxu1 %v13307_v5  ;;  %12616 = vmatprep.subr.bf16.mxu0 %v13331_v15 }
  0xb0   : > { %12666 = vmatprep.subr.bf16.mxu1 %v13308_v6 }
  0xb2   : > { %12617 = vmatpush3.bf16.msra.mxu0 %v13331_v15 }
  0xb3   : > { %12667 = vmatpush3.bf16.msra.mxu1 %v13308_v6  ;;  %12618 = vmatprep.subr.bf16.mxu0 %v13332_v18 }
  0xb4   : > { %12668 = vmatprep.subr.bf16.mxu1 %v13309_v7 }
  0xb6   : > { %12619 = vmatpush3.bf16.msra.mxu0 %v13332_v18 }
  0xb7   : > { %12669 = vmatpush3.bf16.msra.mxu1 %v13309_v7  ;;  %12620 = vmatprep.subr.bf16.mxu0 %v13333_v19 }
  0xb8   : > { %12670 = vmatprep.subr.bf16.mxu1 %v13310_v8 }
  0xba   : > { %12621 = vmatpush3.bf16.msra.mxu0 %v13333_v19 }
  0xbb   : > { %12671 = vmatpush3.bf16.msra.mxu1 %v13310_v8  ;;  %12622 = vmatprep.subr.bf16.mxu0 %v13334_v22 }
  0xbc   : > { %12738 = vmatprep.subr.bf16.mxu1 %v13336_v33 }
  0xbe   : > { %12673 = vmatmul.mubr.bf16.vlgmr.msra.gmra.mxu1 %v13312_v12  ;;  %12623 = vmatpush3.bf16.msra.mxu0 %v13334_v22 }
  0xbf   : > { %12676 = vmatprep.mubr.bf16.mxu1 %v13313_v13  ;;  %12704 = vmatprep.subr.bf16.mxu0 %v13335_v32 }
  0xc0   : > { %12739 = vmatpush3.bf16.msra.mxu1 %v13336_v33 }
  0xc1   : > { %12625 = vmatmul.mubr.bf16.vlgmr.msra.gmra.mxu0 %v13312_v12  ;;  %12806 = vmatprep.subr.bf16.mxu1 %v14904_v34 }
  0xc2   : > { %12628 = vmatprep.mubr.bf16.mxu0 %v13313_v13  ;;  %12705 = vmatpush3.bf16.msra.mxu0 %v13335_v32 }
  0xc3   : > { %12772 = vmatprep.subr.bf16.mxu0 %v13338_v36 }
  0xc6   : > { %12677 = vmatmul.mubr.bf16.gmra.mxu1 %v13314_v16 }
  0xc7   : > { %12680 = vmatprep.mubr.bf16.mxu1 %v13315_v17 }
  0xc9   : > { %12629 = vmatmul.mubr.bf16.gmra.mxu0 %v13314_v16 }
  0xca   : > { %12632 = vmatprep.mubr.bf16.mxu0 %v13315_v17 }
  0xce   : > { %12681 = vmatmul.mubr.bf16.gmra.mxu1 %v13316_v20 }
  0xcf   : > { %12684 = vmatprep.mubr.bf16.mxu1 %v13317_v21 }
  0xd1   : > { %12633 = vmatmul.mubr.bf16.gmra.mxu0 %v13316_v20 }
  0xd2   : > { %12636 = vmatprep.mubr.bf16.mxu0 %v13317_v21 }
  0xd6   : > { %12685 = vmatmul.mubr.bf16.gmra.mxu1 %v13318_v23 }
  0xd7   : > { %12688 = vmatprep.mubr.bf16.mxu1 %v13319_v24 }
  0xd9   : > { %12637 = vmatmul.mubr.bf16.gmra.mxu0 %v13318_v23 }
  0xda   : > { %12640 = vmatprep.mubr.bf16.mxu0 %v13319_v24 }
  0xde   : > { %12689 = vmatmul.mubr.bf16.gmra.mxu1 %v13320_v25 }
  0xdf   : > { %12692 = vmatprep.mubr.bf16.mxu1 %v13321_v26 }
  0xe1   : > { %12641 = vmatmul.mubr.bf16.gmra.mxu0 %v13320_v25 }
  0xe2   : > { %12644 = vmatprep.mubr.bf16.mxu0 %v13321_v26 }
  0xe6   : > { %12693 = vmatmul.mubr.bf16.gmra.mxu1 %v13322_v27 }
  0xe7   : > { %12696 = vmatprep.mubr.bf16.mxu1 %v13323_v28 }
  0xe9   : > { %12645 = vmatmul.mubr.bf16.gmra.mxu0 %v13322_v27 }
  0xea   : > { %12648 = vmatprep.mubr.bf16.mxu0 %v13323_v28 }
  0xee   : > { %12697 = vmatmul.mubr.bf16.gmra.mxu1 %v13324_v29 }
  0xef   : > { %12700 = vmatprep.mubr.bf16.mxu1 %v13325_v30 }
  0xf1   : > { %12649 = vmatmul.mubr.bf16.gmra.mxu0 %v13324_v29 }
  0xf2   : > { %12652 = vmatprep.mubr.bf16.mxu0 %v13325_v30 }
  0xf6   : > { %12701 = vmatmul.mubr.bf16.gmra.mxu1 %v13326_v31 }
  0xf9   : > { %12653 = vmatmul.mubr.bf16.gmra.mxu0 %v13326_v31 }
 0x17e   : > { %v12674_v35 = vpop.f32.mrf.mxu1 }
 0x17f   : > { %v968_v44 = vadd.f32 %v12674_v35, %v14910_v39 }
 0x180   : > { %v959_v37 = vpop.f32.mrf.mxu1 }
 0x181   : > { %v960_v42 = vadd.f32 %v14910_v39, %v959_v37  ;;  %v14948_v2 = vpop.f32.mrf.mxu0 }
 0x182   : > { %v12675_v38 = vpop.f32.mrf.mxu1 }
 0x183   : > { %v971_v40 = vadd.f32 %v12675_v38, %v14910_v39  ;;  %v14954_v6 = vpop.f32.mrf.mxu0 }
 0x184   : > { %v962_v41 = vpop.f32.mrf.mxu1 }
 0x185   : > { %v963_v43 = vadd.f32 %v14910_v39, %v962_v41  ;;  %v14918_v47 = vpack.c.bf16 %v971_v40, %v968_v44  ;;  %v14963_v9 = vpop.f32.mrf.mxu0 }
 0x186   : > { %v12678_v45 = vpop.f32.mrf.mxu1 }
 0x187   : > { %v14916_v46 = vpack.c.bf16 %v963_v43, %v960_v42  ;;  %v984_v54 = vadd.f32 %v12678_v45, %v14910_v39  ;;  %v14968_v12 = vpop.f32.mrf.mxu0 }
 0x188   : > { %v975_v48 = vpop.f32.mrf.mxu1 }
 0x189   : > { %1675 = vrot.lane.b32.xlu0 %v14916_v46, %s14576_s20  ;;  %12706 = vmatprep.mubr.msk.bf16.mxu0 %vm1286_vm0, %v14916_v46  ;;  %v976_v52 = vadd.f32 %v14910_v39, %v975_v48  ;;  %v14974_v17 = vpop.f32.mrf.mxu0 }
 0x18a   : > { %v12679_v49 = vpop.f32.mrf.mxu1  ;;  %12707 = vmatmul.mubr.msk.bf16.vlgmr.msra.gmra.mxu0 %vm1286_vm0, %v14918_v47 }
 0x18b   : > { %12773 = vmatpush3.bf16.msra.mxu0 %v13338_v36  ;;  %v987_v50 = vadd.f32 %v12679_v49, %v14910_v39  ;;  %v14980_v20 = vpop.f32.mrf.mxu0 }
 0x18c   : > { %v978_v51 = vpop.f32.mrf.mxu1 }
 0x18d   : > { %v979_v53 = vadd.f32 %v14910_v39, %v978_v51  ;;  %1677 = vrot.lane.b32.xlu0 %v14918_v47, %s14576_s20  ;;  %v14934_v57 = vpack.c.bf16 %v987_v50, %v984_v54  ;;  %v14987_v23 = vpop.f32.mrf.mxu0 }
 0x18e   : > { %v12682_v55 = vpop.f32.mrf.mxu1 }
 0x18f   : > { %v14932_v56 = vpack.c.bf16 %v979_v53, %v976_v52  ;;  %v1000_v60 = vadd.f32 %v12682_v55, %v14910_v39  ;;  %v14992_v26 = vpop.f32.mrf.mxu0  ;;  %v15038_v55 = vld [vmem:[%s19623_s10] ss:$0 sm:$0xff] }
 0x190   : > { %v991_v58 = vpop.f32.mrf.mxu1 }
 0x191   : > { %1679 = vrot.lane.b32.xlu1 %v14932_v56, %s14576_s20  ;;  %12710 = vmatprep.mubr.msk.bf16.mxu0 %vm1286_vm0, %v14932_v56  ;;  %v992_v63 = vadd.f32 %v14910_v39, %v991_v58  ;;  %v14998_v31 = vpop.f32.mrf.mxu0 }
 0x192   : > { %v12683_v59 = vpop.f32.mrf.mxu1  ;;  %12711 = vmatmul.mubr.msk.bf16.gmra.mxu0 %vm1286_vm0, %v14934_v57 }
 0x193   : > { %v1003_v61 = vadd.f32 %v12683_v59, %v14910_v39  ;;  %v15004_v35 = vpop.f32.mrf.mxu0 }
 0x194   : > { %v994_v62 = vpop.f32.mrf.mxu1 }
 0x195   : > { %v995_v0 = vadd.f32 %v14910_v39, %v994_v62  ;;  %1681 = vrot.lane.b32.xlu1 %v14934_v57, %s14576_s20  ;;  %v14950_v3 = vpack.c.bf16 %v1003_v61, %v1000_v60  ;;  %v15011_v38 = vpop.f32.mrf.mxu0 }
 0x196   : > { %v12686_v1 = vpop.f32.mrf.mxu1 }
 0x197   : > { %v14952_v4 = vpack.c.bf16 %v995_v0, %v992_v63  ;;  %v1016_v7 = vadd.f32 %v12686_v1, %v14910_v39  ;;  %v15016_v42 = vpop.f32.mrf.mxu0  ;;  %v15053_v1 = vadd.f32 %v14948_v2, %v15038_v55 }
 0x198   : > { %v1007_v5 = vpop.f32.mrf.mxu1 }
 0x199   : > { %1685 = vrot.lane.b32.xlu1 %v14950_v3, %s14576_s20  ;;  %1683 = vrot.lane.b32.xlu0 %v14952_v4, %s14576_s20  ;;  %v1008_v13 = vadd.f32 %v14910_v39, %v1007_v5  ;;  %v15022_v49 = vpop.f32.mrf.mxu0 }
 0x19a   : > { %12714 = vmatprep.mubr.msk.bf16.mxu0 %vm1286_vm0, %v14952_v4  ;;  %v12687_v8 = vpop.f32.mrf.mxu1 }
 0x19b   : > { %v1019_v10 = vadd.f32 %v12687_v8, %v14910_v39  ;;  %12715 = vmatmul.mubr.msk.bf16.gmra.mxu0 %vm1286_vm0, %v14950_v3  ;;  %v15028_v52 = vpop.f32.mrf.mxu0 }
 0x19c   : > { %v1010_v11 = vpop.f32.mrf.mxu1 }
 0x19d   : > { %v14971_v14 = vpack.c.bf16 %v1019_v10, %v1016_v7  ;;  %v1011_v15 = vadd.f32 %v14910_v39, %v1010_v11  ;;  %v15040_v58 = vpop.f32.mrf.mxu0  ;;  %v15061_v10 = vadd.f32 %v15038_v55, %v14954_v6 }
 0x19e   : > { %v12690_v16 = vpop.f32.mrf.mxu1 }
 0x19f   : > { %v14976_v18 = vpack.c.bf16 %v1011_v15, %v1008_v13  ;;  %1689 = vrot.lane.b32.xlu1 %v14971_v14, %s14576_s20  ;;  %v1032_v21 = vadd.f32 %v12690_v16, %v14910_v39  ;;  %v15045_v61 = vpop.f32.mrf.mxu0  ;;  %v15068_v15 = vadd.f32 %v14963_v9, %v15038_v55 }
 0x1a0   : > { %v1023_v19 = vpop.f32.mrf.mxu1 }
 0x1a1   : > { %1687 = vrot.lane.b32.xlu0 %v14976_v18, %s14576_s20  ;;  %12718 = vmatprep.mubr.msk.bf16.mxu0 %vm1286_vm0, %v14976_v18  ;;  %v1024_v27 = vadd.f32 %v14910_v39, %v1023_v19  ;;  %v12642_v7 = vpop.f32.mrf.mxu0 }
 0x1a2   : > { %v12691_v22 = vpop.f32.mrf.mxu1  ;;  %v15064_v11 = vadd.f32 %v12642_v7, %v15038_v55  ;;  %v15150_v7 = vadd.f32 %v15038_v55, %v15004_v35 }
 0x1a3   : > { %v1035_v24 = vadd.f32 %v12691_v22, %v14910_v39  ;;  %12719 = vmatmul.mubr.msk.bf16.gmra.mxu0 %vm1286_vm0, %v14971_v14  ;;  %v791_v2 = vpop.f32.mrf.mxu0 }
 0x1a4   : > { %v1026_v25 = vpop.f32.mrf.mxu1  ;;  %v13195_v6 = vpack.i.bf16 %v15064_v11, %v15053_v1  ;;  %v15078_v19 = vadd.f32 %v15038_v55, %v791_v2 }
 0x1a5   : > { %v14995_v28 = vpack.c.bf16 %v1035_v24, %v1032_v21  ;;  %v1027_v29 = vadd.f32 %v14910_v39, %v1026_v25  ;;  %v12643_v22 = vpop.f32.mrf.mxu0 }
 0x1a6   : > { %v12694_v30 = vpop.f32.mrf.mxu1  ;;  %v13191_v24 = vpack.i.bf16 %v15078_v19, %v15061_v10  ;;  %v15086_v25 = vadd.f32 %v12643_v22, %v15038_v55 }
 0x1a7   : > { %v15000_v32 = vpack.c.bf16 %v1027_v29, %v1024_v27  ;;  %1693 = vrot.lane.b32.xlu1 %v14995_v28, %s14576_s20  ;;  %v1048_v36 = vadd.f32 %v12694_v30, %v14910_v39  ;;  %v15090_v29 = vadd.f32 %v14974_v17, %v15038_v55  ;;  %v15092_v30 = vpop.f32.mrf.mxu0  ;;  %v15106_v17 = vadd.f32 %v15038_v55, %v14980_v20 }
 0x1a8   : > { %v1039_v33 = vpop.f32.mrf.mxu1 }
 0x1a9   : > { %1691 = vrot.lane.b32.xlu0 %v15000_v32, %s14576_s20  ;;  %12722 = vmatprep.mubr.msk.bf16.mxu0 %vm1286_vm0, %v15000_v32  ;;  %v1040_v43 = vadd.f32 %v14910_v39, %v1039_v33 }
 0x1aa   : > { %v12695_v37 = vpop.f32.mrf.mxu1 }
 0x1ab   : > { %v1051_v40 = vadd.f32 %v12695_v37, %v14910_v39  ;;  %12723 = vmatmul.mubr.msk.bf16.gmra.mxu0 %vm1286_vm0, %v14995_v28 }
 0x1ac   : > { %v1042_v41 = vpop.f32.mrf.mxu1 }
 0x1ad   : > { %v15019_v44 = vpack.c.bf16 %v1051_v40, %v1048_v36  ;;  %v1043_v45 = vadd.f32 %v14910_v39, %v1042_v41  ;;  %v13197_v40 = vpack.i.bf16 %v15086_v25, %v15068_v15  ;;  %v12646_v41 = vpop.f32.mrf.mxu0 }
 0x1ae   : > { %v12698_v48 = vpop.f32.mrf.mxu1 }
 0x1af   : > { %v15024_v50 = vpack.c.bf16 %v1043_v45, %v1040_v43  ;;  %1697 = vrot.lane.b32.xlu1 %v15019_v44, %s14576_s20  ;;  %v1064_v53 = vadd.f32 %v12698_v48, %v14910_v39  ;;  %v15109_v45 = vadd.f32 %v12646_v41, %v15038_v55  ;;  %v15111_v48 = vld [vmem:[#allocation13 + $0x20] sm:$0xff]   ;;  %v15187_v41 = vadd.f32 %v15038_v55, %v15028_v52 }
 0x1b0   : > { %v1055_v51 = vpop.f32.mrf.mxu1  ;;  %12840 = vmatprep.subr.bf16.mxu0 %v15111_v48 }
 0x1b1   : > { %1695 = vrot.lane.b32.xlu0 %v15024_v50, %s14576_s20  ;;  %12726 = vmatprep.mubr.msk.bf16.mxu0 %vm1286_vm0, %v15024_v50  ;;  %v1056_v62 = vadd.f32 %v14910_v39, %v1055_v51  ;;  %v807_v51 = vpop.f32.mrf.mxu0 }
 0x1b2   : > { %v12699_v54 = vpop.f32.mrf.mxu1 }
 0x1b3   : > { %v1067_v59 = vadd.f32 %v12699_v54, %v14910_v39  ;;  %12727 = vmatmul.mubr.msk.bf16.gmra.mxu0 %vm1286_vm0, %v15019_v44  ;;  %v12647_v54 = vpop.f32.mrf.mxu0 }
 0x1b4   : > { %v1058_v60 = vpop.f32.mrf.mxu1 }
 0x1b5   : > { %v15048_v63 = vpack.c.bf16 %v1067_v59, %v1064_v53  ;;  %v1059_v0 = vadd.f32 %v14910_v39, %v1058_v60  ;;  %v15124_v53 = vadd.f32 %v15038_v55, %v807_v51  ;;  %v15134_v59 = vadd.f32 %v12647_v54, %v15038_v55  ;;  %v15136_v60 = vpop.f32.mrf.mxu0 }
 0x1b6   : > { %v12702_v5 = vpop.f32.mrf.mxu1  ;;  %v811_v1 = vadd.f32 %v15038_v55, %v15136_v60 }
 0x1b7   : > { %v15055_v8 = vpack.c.bf16 %v1059_v0, %v1056_v62  ;;  %1701 = vrot.lane.b32.xlu1 %v15048_v63, %s14576_s20  ;;  %v1080_v16 = vadd.f32 %v12702_v5, %v14910_v39  ;;  %v15142_v62 = vadd.f32 %v14998_v31, %v15038_v55  ;;  %v12650_v5 = vpop.f32.mrf.mxu0  ;;  %v15159_v31 = vadd.f32 %v15011_v38, %v15038_v55 }
 0x1b8   : > { %v1071_v13 = vpop.f32.mrf.mxu1  ;;  %v15179_v38 = vadd.f32 %v15022_v49, %v15038_v55  ;;  %v15196_v49 = vadd.f32 %v15040_v58, %v15038_v55 }
 0x1b9   : > { %1699 = vrot.lane.b32.xlu0 %v15055_v8, %s14576_s20  ;;  %12730 = vmatprep.mubr.msk.bf16.mxu0 %vm1286_vm0, %v15055_v8  ;;  %v1072_v33 = vadd.f32 %v14910_v39, %v1071_v13  ;;  %v15153_v13 = vadd.f32 %v12650_v5, %v15038_v55  ;;  %v823_v2 = vpop.f32.mrf.mxu0 }
 0x1ba   : > { %v12703_v21 = vpop.f32.mrf.mxu1 }
 0x1bb   : > { %v1083_v9 = vadd.f32 %v12703_v21, %v14910_v39  ;;  %12731 = vmatmul.mubr.msk.bf16.gmra.mxu0 %vm1286_vm0, %v15048_v63  ;;  %v15164_v21 = vadd.f32 %v15038_v55, %v823_v2  ;;  %v12651_v22 = vpop.f32.mrf.mxu0 }
 0x1bc   : > { %v1074_v27 = vpop.f32.mrf.mxu1 }
 0x1bd   : > { %v15095_v36 = vpack.c.bf16 %v1083_v9, %v1080_v16  ;;  %v1075_v37 = vadd.f32 %v14910_v39, %v1074_v27  ;;  %v15119_v39 = vadd.f32 %v14987_v23, %v15038_v55  ;;  %v13199_v23 = vpack.i.bf16 %v15124_v53, %v15106_v17  ;;  %v15173_v27 = vpop.f32.mrf.mxu0 }
 0x1be   : > { %v15171_v9 = vadd.f32 %v12651_v22, %v15038_v55 }
 0x1bf   : > { %v15100_v43 = vpack.c.bf16 %v1075_v37, %v1072_v33  ;;  %1705 = vrot.lane.b32.xlu1 %v15095_v36, %s14576_s20  ;;  %v12654_v37 = vpop.f32.mrf.mxu0  ;;  %v15336_v33 = vld [vmem:[#allocation13 + $0x30] sm:$0xff]  }
 0x1c0   : > { %v15190_v51 = vadd.f32 %v12654_v37, %v15038_v55 }
 0x1c1   : > { %1703 = vrot.lane.b32.xlu0 %v15100_v43, %s14576_s20  ;;  %12734 = vmatprep.mubr.msk.bf16.mxu0 %vm1286_vm0, %v15100_v43  ;;  %v839_v54 = vpop.f32.mrf.mxu0 }
 0x1c2   : > { %v15201_v2 = vadd.f32 %v15038_v55, %v839_v54 }
 0x1c3   : > { %12735 = vmatmul.mubr.msk.bf16.gmra.mxu0 %vm1286_vm0, %v15095_v36  ;;  %2497 = vrot.lane.b32.xlu1 %v14916_v46, %s14577_s8  ;;  %v12655_v22 = vpop.f32.mrf.mxu0 }
 0x1c4   : > { %v15208_v37 = vadd.f32 %v12655_v22, %v15038_v55  ;;  %v15255_v22 = vld [vmem:[#allocation13 + $0x28] sm:$0xff]  }
 0x1c5   : > { %2086 = vrot.lane.b32.xlu0 %v14916_v46, %s14578_s21 }
 0x1c7   : > { %2499 = vrot.lane.b32.xlu1 %v14918_v47, %s14577_s8 }
 0x1c9   : > { %2088 = vrot.lane.b32.xlu0 %v14918_v47, %s14578_s21 }
 0x1cb   : > { %2501 = vrot.lane.b32.xlu1 %v14932_v56, %s14577_s8 }
 0x1cd   : > { %2090 = vrot.lane.b32.xlu0 %v14932_v56, %s14578_s21 }
 0x1cf   : > { %2503 = vrot.lane.b32.xlu1 %v14934_v57, %s14577_s8 }
 0x1d1   : > { %2092 = vrot.lane.b32.xlu0 %v14934_v57, %s14578_s21 }
 0x1d3   : > { %2505 = vrot.lane.b32.xlu1 %v14952_v4, %s14577_s8 }
 0x1d5   : > { %2094 = vrot.lane.b32.xlu0 %v14952_v4, %s14578_s21 }
 0x1d7   : > { %2507 = vrot.lane.b32.xlu1 %v14950_v3, %s14577_s8 }
 0x1d9   : > { %2096 = vrot.lane.b32.xlu0 %v14950_v3, %s14578_s21 }
 0x1db   : > { %2509 = vrot.lane.b32.xlu1 %v14976_v18, %s14577_s8 }
 0x1dd   : > { %2098 = vrot.lane.b32.xlu0 %v14976_v18, %s14578_s21 }
 0x1df   : > { %2511 = vrot.lane.b32.xlu1 %v14971_v14, %s14577_s8 }
 0x1e1   : > { %2100 = vrot.lane.b32.xlu0 %v14971_v14, %s14578_s21 }
 0x1e3   : > { %2513 = vrot.lane.b32.xlu1 %v15000_v32, %s14577_s8 }
 0x1e5   : > { %2102 = vrot.lane.b32.xlu0 %v15000_v32, %s14578_s21 }
 0x1e7   : > { %2515 = vrot.lane.b32.xlu1 %v14995_v28, %s14577_s8 }
 0x1e9   : > { %2104 = vrot.lane.b32.xlu0 %v14995_v28, %s14578_s21 }
 0x1eb   : > { %2517 = vrot.lane.b32.xlu1 %v15024_v50, %s14577_s8 }
 0x1ed   : > { %2106 = vrot.lane.b32.xlu0 %v15024_v50, %s14578_s21 }
 0x1ef   : > { %2519 = vrot.lane.b32.xlu1 %v15019_v44, %s14577_s8 }
 0x1f1   : > { %2108 = vrot.lane.b32.xlu0 %v15019_v44, %s14578_s21 }
 0x1f3   : > { %2521 = vrot.lane.b32.xlu1 %v15055_v8, %s14577_s8 }
 0x1f5   : > { %2110 = vrot.lane.b32.xlu0 %v15055_v8, %s14578_s21 }
 0x1f7   : > { %2523 = vrot.lane.b32.xlu1 %v15048_v63, %s14577_s8 }
 0x1f9   : > { %2112 = vrot.lane.b32.xlu0 %v15048_v63, %s14578_s21 }
 0x1fb   : > { %2525 = vrot.lane.b32.xlu1 %v15100_v43, %s14577_s8  ;;  %v1676_v54 = vpop.permute.xlu0 %1675 }
 0x1fc   : > { %12740 = vmatprep.mubr.msk.bf16.mxu1 %vm1286_vm0, %v1676_v54 }
 0x1fd   : > { %2114 = vrot.lane.b32.xlu0 %v15100_v43, %s14578_s21 }
 0x1ff   : > { %2527 = vrot.lane.b32.xlu1 %v15095_v36, %s14577_s8  ;;  %v1678_v58 = vpop.permute.xlu0 %1677 }
 0x200   : > { %12741 = vmatmul.mubr.msk.bf16.vlgmr.msra.gmra.mxu1 %vm1286_vm0, %v1678_v58 }
 0x201   : > { %12807 = vmatpush3.bf16.msra.mxu1 %v14904_v34  ;;  %2116 = vrot.lane.b32.xlu0 %v15095_v36, %s14578_s21 }
 0x202   : > { %12874 = vmatprep.subr.bf16.mxu1 %v15255_v22 }
 0x203   : > { %v1680_v5 = vpop.permute.xlu1 %1679  ;;  %3319 = vrot.lane.b32.xlu1 %v14916_v46, %s14579_s2 }
 0x204   : > { %12744 = vmatprep.mubr.msk.bf16.mxu1 %vm1286_vm0, %v1680_v5 }
 0x205   : > { %2908 = vrot.lane.b32.xlu0 %v14916_v46, %s14580_s25 }
 0x207   : > { %v1682_v54 = vpop.permute.xlu1 %1681  ;;  %3321 = vrot.lane.b32.xlu1 %v14918_v47, %s14579_s2 }
 0x208   : > { %12745 = vmatmul.mubr.msk.bf16.gmra.mxu1 %vm1286_vm0, %v1682_v54 }
 0x209   : > { %2910 = vrot.lane.b32.xlu0 %v14918_v47, %s14580_s25 }
 0x20b   : > { %3323 = vrot.lane.b32.xlu1 %v14932_v56, %s14579_s2  ;;  %v1684_v34 = vpop.permute.xlu0 %1683  ;;  %v1686_v5 = vpop.permute.xlu1 %1685 }
 0x20c   : > { %12748 = vmatprep.mubr.msk.bf16.mxu1 %vm1286_vm0, %v1684_v34 }
 0x20d   : > { %2912 = vrot.lane.b32.xlu0 %v14932_v56, %s14580_s25 }
 0x20f   : > { %3325 = vrot.lane.b32.xlu1 %v14934_v57, %s14579_s2 }
 0x210   : > { %12749 = vmatmul.mubr.msk.bf16.gmra.mxu1 %vm1286_vm0, %v1686_v5 }
 0x211   : > { %2914 = vrot.lane.b32.xlu0 %v14934_v57, %s14580_s25  ;;  %v1690_v54 = vpop.permute.xlu1 %1689 }
 0x213   : > { %3327 = vrot.lane.b32.xlu1 %v14952_v4, %s14579_s2  ;;  %v1688_v58 = vpop.permute.xlu0 %1687 }
 0x214   : > { %12752 = vmatprep.mubr.msk.bf16.mxu1 %vm1286_vm0, %v1688_v58 }
 0x215   : > { %2916 = vrot.lane.b32.xlu0 %v14952_v4, %s14580_s25 }
 0x217   : > { %3329 = vrot.lane.b32.xlu1 %v14950_v3, %s14579_s2 }
 0x218   : > { %12753 = vmatmul.mubr.msk.bf16.gmra.mxu1 %vm1286_vm0, %v1690_v54 }
 0x219   : > { %2918 = vrot.lane.b32.xlu0 %v14950_v3, %s14580_s25  ;;  %v1694_v5 = vpop.permute.xlu1 %1693 }
 0x21b   : > { %3331 = vrot.lane.b32.xlu1 %v14976_v18, %s14579_s2  ;;  %v1692_v34 = vpop.permute.xlu0 %1691 }
 0x21c   : > { %12756 = vmatprep.mubr.msk.bf16.mxu1 %vm1286_vm0, %v1692_v34 }
 0x21d   : > { %2920 = vrot.lane.b32.xlu0 %v14976_v18, %s14580_s25 }
 0x21f   : > { %3333 = vrot.lane.b32.xlu1 %v14971_v14, %s14579_s2 }
 0x220   : > { %12757 = vmatmul.mubr.msk.bf16.gmra.mxu1 %vm1286_vm0, %v1694_v5 }
 0x221   : > { %2922 = vrot.lane.b32.xlu0 %v14971_v14, %s14580_s25  ;;  %v1698_v54 = vpop.permute.xlu1 %1697 }
 0x223   : > { %3335 = vrot.lane.b32.xlu1 %v15000_v32, %s14579_s2  ;;  %v1696_v58 = vpop.permute.xlu0 %1695 }
 0x224   : > { %12760 = vmatprep.mubr.msk.bf16.mxu1 %vm1286_vm0, %v1696_v58 }
 0x225   : > { %2924 = vrot.lane.b32.xlu0 %v15000_v32, %s14580_s25 }
 0x227   : > { %3337 = vrot.lane.b32.xlu1 %v14995_v28, %s14579_s2 }
 0x228   : > { %12761 = vmatmul.mubr.msk.bf16.gmra.mxu1 %vm1286_vm0, %v1698_v54 }
 0x229   : > { %2926 = vrot.lane.b32.xlu0 %v14995_v28, %s14580_s25  ;;  %v1702_v5 = vpop.permute.xlu1 %1701 }
 0x22b   : > { %3339 = vrot.lane.b32.xlu1 %v15024_v50, %s14579_s2  ;;  %v1700_v34 = vpop.permute.xlu0 %1699 }
 0x22c   : > { %12764 = vmatprep.mubr.msk.bf16.mxu1 %vm1286_vm0, %v1700_v34 }
 0x22d   : > { %2928 = vrot.lane.b32.xlu0 %v15024_v50, %s14580_s25 }
 0x22f   : > { %3341 = vrot.lane.b32.xlu1 %v15019_v44, %s14579_s2 }
 0x230   : > { %12765 = vmatmul.mubr.msk.bf16.gmra.mxu1 %vm1286_vm0, %v1702_v5 }
 0x231   : > { %v1706_v58 = vpop.permute.xlu1 %1705  ;;  %2930 = vrot.lane.b32.xlu0 %v15019_v44, %s14580_s25 }
 0x233   : > { %3343 = vrot.lane.b32.xlu1 %v15055_v8, %s14579_s2  ;;  %v1704_v54 = vpop.permute.xlu0 %1703 }
 0x234   : > { %12768 = vmatprep.mubr.msk.bf16.mxu1 %vm1286_vm0, %v1704_v54 }
 0x235   : > { %v2498_v34 = vpop.permute.xlu1 %2497  ;;  %2932 = vrot.lane.b32.xlu0 %v15055_v8, %s14580_s25 }
 0x237   : > { %3345 = vrot.lane.b32.xlu1 %v15048_v63, %s14579_s2  ;;  %v2087_v52 = vpop.permute.xlu0 %2086 }
 0x238   : > { %12769 = vmatmul.mubr.msk.bf16.gmra.mxu1 %vm1286_vm0, %v1706_v58  ;;  %12774 = vmatprep.mubr.msk.bf16.mxu0 %vm1286_vm0, %v2087_v52  ;;  %v15344_v52 = vld [vmem:[#allocation13 + $0x38] sm:$0xff]  }
 0x239   : > { %v2500_v5 = vpop.permute.xlu1 %2499  ;;  %2934 = vrot.lane.b32.xlu0 %v15048_v63, %s14580_s25  ;;  %12808 = vmatprep.mubr.msk.bf16.mxu1 %vm1286_vm0, %v2498_v34 }
 0x23b   : > { %3347 = vrot.lane.b32.xlu1 %v15100_v43, %s14579_s2  ;;  %v2089_v54 = vpop.permute.xlu0 %2088 }
 0x23c   : > { %12775 = vmatmul.mubr.msk.bf16.vlgmr.msra.gmra.mxu0 %vm1286_vm0, %v2089_v54 }
 0x23d   : > { %v2502_v16 = vpop.permute.xlu1 %2501  ;;  %2936 = vrot.lane.b32.xlu0 %v15100_v43, %s14580_s25  ;;  %12841 = vmatpush3.bf16.msra.mxu0 %v15111_v48 }
 0x23e   : > { %12908 = vmatprep.subr.bf16.mxu0 %v15336_v33 }
 0x23f   : > { %3349 = vrot.lane.b32.xlu1 %v15095_v36, %s14579_s2  ;;  %v2091_v58 = vpop.permute.xlu0 %2090 }
 0x240   : > { %12778 = vmatprep.mubr.msk.bf16.mxu0 %vm1286_vm0, %v2091_v58  ;;  %12809 = vmatmul.mubr.msk.bf16.vlgmr.msra.gmra.mxu1 %vm1286_vm0, %v2500_v5 }
 0x241   : > { %12875 = vmatpush3.bf16.msra.mxu1 %v15255_v22  ;;  %v2504_v34 = vpop.permute.xlu1 %2503  ;;  %2938 = vrot.lane.b32.xlu0 %v15095_v36, %s14580_s25  ;;  %v15361_v22 = vpop.f32.mrf.mxu0 }
 0x242   : > { %12812 = vmatprep.mubr.msk.bf16.mxu1 %vm1286_vm0, %v2502_v16  ;;  %12942 = vmatprep.subr.bf16.mxu1 %v15344_v52 }
 0x243   : > { %4141 = vrot.lane.b32.xlu1 %v14916_v46, %s14581_s3  ;;  %v2093_v48 = vpop.permute.xlu0 %2092 }
 0x244   : > { %12779 = vmatmul.mubr.msk.bf16.gmra.mxu0 %vm1286_vm0, %v2093_v48 }
 0x245   : > { %v2506_v54 = vpop.permute.xlu1 %2505  ;;  %3730 = vrot.lane.b32.xlu0 %v14916_v46, %s14582_s4 }
 0x247   : > { %4143 = vrot.lane.b32.xlu1 %v14918_v47, %s14581_s3  ;;  %v2095_v16 = vpop.permute.xlu0 %2094 }
 0x248   : > { %12782 = vmatprep.mubr.msk.bf16.mxu0 %vm1286_vm0, %v2095_v16  ;;  %12813 = vmatmul.mubr.msk.bf16.gmra.mxu1 %vm1286_vm0, %v2504_v34 }
 0x249   : > { %v2508_v5 = vpop.permute.xlu1 %2507  ;;  %3732 = vrot.lane.b32.xlu0 %v14918_v47, %s14582_s4  ;;  %12816 = vmatprep.mubr.msk.bf16.mxu1 %vm1286_vm0, %v2506_v54 }
 0x24a   : > { %v12708_v58 = vpop.f32.mrf.mxu0 }
 0x24b   : > { %4145 = vrot.lane.b32.xlu1 %v14932_v56, %s14581_s3  ;;  %v2097_v46 = vpop.permute.xlu0 %2096 }
 0x24c   : > { %v1369_v48 = vpop.f32.mrf.mxu0  ;;  %12783 = vmatmul.mubr.msk.bf16.gmra.mxu0 %vm1286_vm0, %v2097_v46 }
 0x24d   : > { %v2510_v35 = vpop.permute.xlu1 %2509  ;;  %3734 = vrot.lane.b32.xlu0 %v14932_v56, %s14582_s4 }
 0x24e   : > { %v12709_v16 = vpop.f32.mrf.mxu0 }
 0x24f   : > { %v11144_v34 = vpack.c.bf16 %v12709_v16, %v12708_v58  ;;  %4147 = vrot.lane.b32.xlu1 %v14934_v57, %s14581_s3  ;;  %v2099_v47 = vpop.permute.xlu0 %2098 }
 0x250   : > { %v1372_v0 = vpop.f32.mrf.mxu0  ;;  %12786 = vmatprep.mubr.msk.bf16.mxu0 %vm1286_vm0, %v2099_v47  ;;  %12817 = vmatmul.mubr.msk.bf16.gmra.mxu1 %vm1286_vm0, %v2508_v5 }
 0x251   : > { %11776 = vst [vmem:[#allocation3 + $0x8] sm:$0xff] %v11144_v34   ;;  %v11139_v54 = vpack.c.bf16 %v1372_v0, %v1369_v48  ;;  %v2512_v20 = vpop.permute.xlu1 %2511  ;;  %3736 = vrot.lane.b32.xlu0 %v14934_v57, %s14582_s4  ;;  %12820 = vmatprep.mubr.msk.bf16.mxu1 %vm1286_vm0, %v2510_v35 }
 0x252   : > { %v12712_v56 = vpop.f32.mrf.mxu0 }
 0x253   : > { %11140 = vst [vmem:[#allocation3] sm:$0xff] %v11139_v54   ;;  %4149 = vrot.lane.b32.xlu1 %v14952_v4, %s14581_s3  ;;  %v2101_v58 = vpop.permute.xlu0 %2100 }
 0x254   : > { %v1385_v46 = vpop.f32.mrf.mxu0  ;;  %12787 = vmatmul.mubr.msk.bf16.gmra.mxu0 %vm1286_vm0, %v2101_v58 }
 0x255   : > { %v2514_v16 = vpop.permute.xlu1 %2513  ;;  %3738 = vrot.lane.b32.xlu0 %v14952_v4, %s14582_s4 }
 0x256   : > { %v12713_v0 = vpop.f32.mrf.mxu0 }
 0x257   : > { %v11154_v5 = vpack.c.bf16 %v12713_v0, %v12712_v56  ;;  %4151 = vrot.lane.b32.xlu1 %v14950_v3, %s14581_s3  ;;  %v2103_v57 = vpop.permute.xlu0 %2102 }
 0x258   : > { %v1388_v35 = vpop.f32.mrf.mxu0  ;;  %12790 = vmatprep.mubr.msk.bf16.mxu0 %vm1286_vm0, %v2103_v57  ;;  %12821 = vmatmul.mubr.msk.bf16.gmra.mxu1 %vm1286_vm0, %v2512_v20 }
 0x259   : > { %11778 = vst [vmem:[#allocation3 + $0x18] sm:$0xff] %v11154_v5   ;;  %v11149_v48 = vpack.c.bf16 %v1388_v35, %v1385_v46  ;;  %v2516_v34 = vpop.permute.xlu1 %2515  ;;  %3740 = vrot.lane.b32.xlu0 %v14950_v3, %s14582_s4  ;;  %12824 = vmatprep.mubr.msk.bf16.mxu1 %vm1286_vm0, %v2514_v16 }
 0x25b   : > { %11777 = vst [vmem:[#allocation3 + $0x10] sm:$0xff] %v11149_v48   ;;  %v12716_v4 = vpop.f32.mrf.mxu0  ;;  %4153 = vrot.lane.b32.xlu1 %v14976_v18, %s14581_s3  ;;  %v2105_v47 = vpop.permute.xlu0 %2104 }
 0x25c   : > { %12791 = vmatmul.mubr.msk.bf16.gmra.mxu0 %vm1286_vm0, %v2105_v47 }
 0x25d   : > { %v1401_v54 = vpop.f32.mrf.mxu0  ;;  %v2518_v56 = vpop.permute.xlu1 %2517  ;;  %3742 = vrot.lane.b32.xlu0 %v14976_v18, %s14582_s4 }
 0x25f   : > { %v12717_v20 = vpop.f32.mrf.mxu0  ;;  %4155 = vrot.lane.b32.xlu1 %v14971_v14, %s14581_s3  ;;  %v2107_v3 = vpop.permute.xlu0 %2106 }
 0x260   : > { %v11164_v58 = vpack.c.bf16 %v12717_v20, %v12716_v4  ;;  %12794 = vmatprep.mubr.msk.bf16.mxu0 %vm1286_vm0, %v2107_v3  ;;  %12825 = vmatmul.mubr.msk.bf16.gmra.mxu1 %vm1286_vm0, %v2516_v34 }
 0x261   : > { %v1404_v46 = vpop.f32.mrf.mxu0  ;;  %v2520_v16 = vpop.permute.xlu1 %2519  ;;  %3744 = vrot.lane.b32.xlu0 %v14971_v14, %s14582_s4  ;;  %12828 = vmatprep.mubr.msk.bf16.mxu1 %vm1286_vm0, %v2518_v56 }
 0x262   : > { %11780 = vst [vmem:[#allocation3 + $0x28] sm:$0xff] %v11164_v58   ;;  %v11159_v0 = vpack.c.bf16 %v1404_v46, %v1401_v54 }
 0x263   : > { %v12720_v18 = vpop.f32.mrf.mxu0  ;;  %4157 = vrot.lane.b32.xlu1 %v15000_v32, %s14581_s3  ;;  %v2109_v5 = vpop.permute.xlu0 %2108 }
 0x264   : > { %11779 = vst [vmem:[#allocation3 + $0x20] sm:$0xff] %v11159_v0   ;;  %12795 = vmatmul.mubr.msk.bf16.gmra.mxu0 %vm1286_vm0, %v2109_v5 }
 0x265   : > { %v1417_v57 = vpop.f32.mrf.mxu0  ;;  %v2522_v35 = vpop.permute.xlu1 %2521  ;;  %3746 = vrot.lane.b32.xlu0 %v15000_v32, %s14582_s4 }
 0x267   : > { %v12721_v48 = vpop.f32.mrf.mxu0  ;;  %4159 = vrot.lane.b32.xlu1 %v14995_v28, %s14581_s3  ;;  %v2111_v14 = vpop.permute.xlu0 %2110 }
 0x268   : > { %v11174_v34 = vpack.c.bf16 %v12721_v48, %v12720_v18  ;;  %12798 = vmatprep.mubr.msk.bf16.mxu0 %vm1286_vm0, %v2111_v14  ;;  %12829 = vmatmul.mubr.msk.bf16.gmra.mxu1 %vm1286_vm0, %v2520_v16 }
 0x269   : > { %v1420_v4 = vpop.f32.mrf.mxu0  ;;  %v2524_v47 = vpop.permute.xlu1 %2523  ;;  %3748 = vrot.lane.b32.xlu0 %v14995_v28, %s14582_s4  ;;  %12832 = vmatprep.mubr.msk.bf16.mxu1 %vm1286_vm0, %v2522_v35 }
 0x26a   : > { %11782 = vst [vmem:[#allocation3 + $0x38] sm:$0xff] %v11174_v34   ;;  %v11169_v54 = vpack.c.bf16 %v1420_v4, %v1417_v57 }
 0x26b   : > { %v12724_v32 = vpop.f32.mrf.mxu0  ;;  %4161 = vrot.lane.b32.xlu1 %v15024_v50, %s14581_s3  ;;  %v2113_v56 = vpop.permute.xlu0 %2112 }
 0x26c   : > { %11781 = vst [vmem:[#allocation3 + $0x30] sm:$0xff] %v11169_v54   ;;  %12799 = vmatmul.mubr.msk.bf16.gmra.mxu0 %vm1286_vm0, %v2113_v56 }
 0x26d   : > { %v1433_v20 = vpop.f32.mrf.mxu0  ;;  %v2526_v3 = vpop.permute.xlu1 %2525  ;;  %3750 = vrot.lane.b32.xlu0 %v15024_v50, %s14582_s4 }
 0x26f   : > { %v12725_v58 = vpop.f32.mrf.mxu0  ;;  %4163 = vrot.lane.b32.xlu1 %v15019_v44, %s14581_s3  ;;  %v2115_v28 = vpop.permute.xlu0 %2114 }
 0x270   : > { %v11184_v46 = vpack.c.bf16 %v12725_v58, %v12724_v32  ;;  %12802 = vmatprep.mubr.msk.bf16.mxu0 %vm1286_vm0, %v2115_v28  ;;  %12833 = vmatmul.mubr.msk.bf16.gmra.mxu1 %vm1286_vm0, %v2524_v47 }
 0x271   : > { %v1436_v16 = vpop.f32.mrf.mxu0  ;;  %v2528_v0 = vpop.permute.xlu1 %2527  ;;  %3752 = vrot.lane.b32.xlu0 %v15019_v44, %s14582_s4  ;;  %12836 = vmatprep.mubr.msk.bf16.mxu1 %vm1286_vm0, %v2526_v3 }
 0x272   : > { %11784 = vst [vmem:[#allocation3 + $0x48] sm:$0xff] %v11184_v46   ;;  %v11179_v18 = vpack.c.bf16 %v1436_v16, %v1433_v20 }
 0x273   : > { %v12728_v50 = vpop.f32.mrf.mxu0  ;;  %4165 = vrot.lane.b32.xlu1 %v15055_v8, %s14581_s3  ;;  %v2117_v5 = vpop.permute.xlu0 %2116 }
 0x274   : > { %11783 = vst [vmem:[#allocation3 + $0x40] sm:$0xff] %v11179_v18   ;;  %12803 = vmatmul.mubr.msk.bf16.gmra.mxu0 %vm1286_vm0, %v2117_v5 }
 0x275   : > { %v1449_v57 = vpop.f32.mrf.mxu0  ;;  %v3320_v35 = vpop.permute.xlu1 %3319  ;;  %3754 = vrot.lane.b32.xlu0 %v15055_v8, %s14582_s4 }
 0x277   : > { %v12729_v48 = vpop.f32.mrf.mxu0  ;;  %4167 = vrot.lane.b32.xlu1 %v15048_v63, %s14581_s3  ;;  %v2909_v44 = vpop.permute.xlu0 %2908 }
 0x278   : > { %v11194_v14 = vpack.c.bf16 %v12729_v48, %v12728_v50  ;;  %12837 = vmatmul.mubr.msk.bf16.gmra.mxu1 %vm1286_vm0, %v2528_v0  ;;  %12842 = vmatprep.mubr.msk.bf16.mxu0 %vm1286_vm0, %v2909_v44 }
 0x279   : > { %v1452_v34 = vpop.f32.mrf.mxu0  ;;  %v3322_v4 = vpop.permute.xlu1 %3321  ;;  %3756 = vrot.lane.b32.xlu0 %v15048_v63, %s14582_s4  ;;  %12876 = vmatprep.mubr.msk.bf16.mxu1 %vm1286_vm0, %v3320_v35 }
 0x27a   : > { %11786 = vst [vmem:[#allocation3 + $0x58] sm:$0xff] %v11194_v14   ;;  %v11189_v47 = vpack.c.bf16 %v1452_v34, %v1449_v57 }
 0x27b   : > { %v12732_v8 = vpop.f32.mrf.mxu0  ;;  %4169 = vrot.lane.b32.xlu1 %v15100_v43, %s14581_s3  ;;  %v2911_v54 = vpop.permute.xlu0 %2910 }
 0x27c   : > { %11785 = vst [vmem:[#allocation3 + $0x50] sm:$0xff] %v11189_v47   ;;  %12843 = vmatmul.mubr.msk.bf16.vlgmr.msra.gmra.mxu0 %vm1286_vm0, %v2911_v54 }
 0x27d   : > { %v1465_v32 = vpop.f32.mrf.mxu0  ;;  %v3324_v56 = vpop.permute.xlu1 %3323  ;;  %3758 = vrot.lane.b32.xlu0 %v15100_v43, %s14582_s4  ;;  %12909 = vmatpush3.bf16.msra.mxu0 %v15336_v33 }
 0x27f   : > { %v12733_v63 = vpop.f32.mrf.mxu0  ;;  %4171 = vrot.lane.b32.xlu1 %v15095_v36, %s14581_s3  ;;  %v2913_v20 = vpop.permute.xlu0 %2912 }
 0x280   : > { %v11204_v3 = vpack.c.bf16 %v12733_v63, %v12732_v8  ;;  %12846 = vmatprep.mubr.msk.bf16.mxu0 %vm1286_vm0, %v2913_v20  ;;  %12877 = vmatmul.mubr.msk.bf16.vlgmr.msra.gmra.mxu1 %vm1286_vm0, %v3322_v4 }
 0x281   : > { %v1468_v58 = vpop.f32.mrf.mxu0  ;;  %12943 = vmatpush3.bf16.msra.mxu1 %v15344_v52  ;;  %v3326_v28 = vpop.permute.xlu1 %3325  ;;  %3760 = vrot.lane.b32.xlu0 %v15095_v36, %s14582_s4 }
 0x282   : > { %11788 = vst [vmem:[#allocation3 + $0x68] sm:$0xff] %v11204_v3   ;;  %v11199_v43 = vpack.c.bf16 %v1468_v58, %v1465_v32  ;;  %12880 = vmatprep.mubr.msk.bf16.mxu1 %vm1286_vm0, %v3324_v56  ;;  %v731_v32 = vadd.f32 %v15038_v55, %v14968_v12  ;;  %v795_v56 = vadd.f32 %v15038_v55, %v15092_v30 }
 0x283   : > { %v12736_v33 = vpop.f32.mrf.mxu0  ;;  %v2915_v46 = vpop.permute.xlu0 %2914 }
 0x284   : > { %11787 = vst [vmem:[#allocation3 + $0x60] sm:$0xff] %v11199_v43   ;;  %12847 = vmatmul.mubr.msk.bf16.gmra.mxu0 %vm1286_vm0, %v2915_v46  ;;  %v13193_v3 = vpack.i.bf16 %v795_v56, %v731_v32  ;;  %v19624_v43 = vpack.i.bf16 %v15109_v45, %v15090_v29  ;;  %v827_v29 = vadd.f32 %v15038_v55, %v15173_v27 }
 0x285   : > { %v1481_v16 = vpop.f32.mrf.mxu0  ;;  %v3328_v0 = vpop.permute.xlu1 %3327  ;;  %v19629_v56 = vpack.i.bf16 %v15201_v2, %v15187_v41 }
 0x287   : > { %v12737_v18 = vpop.f32.mrf.mxu0  ;;  %v2917_v50 = vpop.permute.xlu0 %2916 }
 0x288   : > { %v11214_v5 = vpack.c.bf16 %v12737_v18, %v12736_v33  ;;  %12850 = vmatprep.mubr.msk.bf16.mxu0 %vm1286_vm0, %v2917_v50  ;;  %12881 = vmatmul.mubr.msk.bf16.gmra.mxu1 %vm1286_vm0, %v3326_v28  ;;  %v763_v33 = vadd.f32 %v15038_v55, %v15016_v42 }
 0x289   : > { %v1484_v52 = vpop.f32.mrf.mxu0  ;;  %v3330_v36 = vpop.permute.xlu1 %3329  ;;  %12884 = vmatprep.mubr.msk.bf16.mxu1 %vm1286_vm0, %v3328_v0 }
 0x28a   : > { %11790 = vst [vmem:[#allocation3 + $0x78] sm:$0xff] %v11214_v5   ;;  %v11209_v57 = vpack.c.bf16 %v1484_v52, %v1481_v16  ;;  %v19626_v16 = vpack.i.bf16 %v15164_v21, %v15150_v7 }
 0x28b   : > { %v2919_v35 = vpop.permute.xlu0 %2918 }
 0x28c   : > { %11789 = vst [vmem:[#allocation3 + $0x70] sm:$0xff] %v11209_v57   ;;  %12851 = vmatmul.mubr.msk.bf16.gmra.mxu0 %vm1286_vm0, %v2919_v35 }
 0x28d   : > { %v3332_v48 = vpop.permute.xlu1 %3331 }
 0x28f   : > { %v2921_v44 = vpop.permute.xlu0 %2920 }
 0x290   : > { %12854 = vmatprep.mubr.msk.bf16.mxu0 %vm1286_vm0, %v2921_v44  ;;  %12885 = vmatmul.mubr.msk.bf16.gmra.mxu1 %vm1286_vm0, %v3330_v36  ;;  %v19627_v36 = vpack.i.bf16 %v15153_v13, %v15142_v62  ;;  %v779_v62 = vadd.f32 %v15038_v55, %v15045_v61  ;;  %v843_v13 = vadd.f32 %v15038_v55, %v15361_v22 }
 0x291   : > { %v3334_v14 = vpop.permute.xlu1 %3333  ;;  %12888 = vmatprep.mubr.msk.bf16.mxu1 %vm1286_vm0, %v3332_v48 }
 0x293   : > { %v2923_v34 = vpop.permute.xlu0 %2922 }
 0x294   : > { %12855 = vmatmul.mubr.msk.bf16.gmra.mxu0 %vm1286_vm0, %v2923_v34 }
 0x295   : > { %v3336_v4 = vpop.permute.xlu1 %3335 }
 0x297   : > { %v2925_v47 = vpop.permute.xlu0 %2924 }
 0x298   : > { %12858 = vmatprep.mubr.msk.bf16.mxu0 %vm1286_vm0, %v2925_v47  ;;  %12889 = vmatmul.mubr.msk.bf16.gmra.mxu1 %vm1286_vm0, %v3334_v14  ;;  %v19628_v14 = vpack.i.bf16 %v15171_v9, %v15159_v31  ;;  %v13217_v9 = vpack.i.bf16 %v843_v13, %v779_v62 }
 0x299   : > { %v3338_v8 = vpop.permute.xlu1 %3337  ;;  %12892 = vmatprep.mubr.msk.bf16.mxu1 %vm1286_vm0, %v3336_v4 }
 0x29b   : > { %v2927_v54 = vpop.permute.xlu0 %2926 }
 0x29c   : > { %12859 = vmatmul.mubr.msk.bf16.gmra.mxu0 %vm1286_vm0, %v2927_v54 }
 0x29d   : > { %v3340_v63 = vpop.permute.xlu1 %3339 }
 0x29f   : > { %v2929_v20 = vpop.permute.xlu0 %2928  ;;  %13192 = vxpose.xlu0.b32.start [1/16] %v13191_v24, 128  ;;  %v747_v24 = vadd.f32 %v15038_v55, %v14992_v26 }
 0x2a0   : > { %12862 = vmatprep.mubr.msk.bf16.mxu0 %vm1286_vm0, %v2929_v20  ;;  %12893 = vmatmul.mubr.msk.bf16.gmra.mxu1 %vm1286_vm0, %v3338_v8 }
 0x2a1   : > { %v3342_v58 = vpop.permute.xlu1 %3341  ;;  %12896 = vmatprep.mubr.msk.bf16.mxu1 %vm1286_vm0, %v3340_v63  ;;  %v13201_v15 = vpack.i.bf16 %v811_v1, %v747_v24  ;;  %v19631_v24 = vpack.i.bf16 %v15208_v37, %v15196_v49 }
 0x2a3   : > { %v2931_v28 = vpop.permute.xlu0 %2930  ;;  %13194 = vxpose.xlu0.b32.cont [2/16] %v13193_v3, 128 }
 0x2a4   : > { %12863 = vmatmul.mubr.msk.bf16.gmra.mxu0 %vm1286_vm0, %v2931_v28  ;;  %v19630_v28 = vpack.i.bf16 %v15190_v51, %v15179_v38 }
 0x2a5   : > { %v3344_v12 = vpop.permute.xlu1 %3343 }
 0x2a7   : > { %v2933_v30 = vpop.permute.xlu0 %2932  ;;  %13196 = vxpose.xlu0.b32.cont [3/16] %v13195_v6, 128 }
 0x2a8   : > { %12866 = vmatprep.mubr.msk.bf16.mxu0 %vm1286_vm0, %v2933_v30  ;;  %12897 = vmatmul.mubr.msk.bf16.gmra.mxu1 %vm1286_vm0, %v3342_v58 }
 0x2a9   : > { %v3346_v10 = vpop.permute.xlu1 %3345  ;;  %12900 = vmatprep.mubr.msk.bf16.mxu1 %vm1286_vm0, %v3344_v12 }
 0x2ab   : > { %v2935_v19 = vpop.permute.xlu0 %2934  ;;  %13198 = vxpose.xlu0.b32.cont [4/16] %v13197_v40, 128 }
 0x2ac   : > { %12867 = vmatmul.mubr.msk.bf16.gmra.mxu0 %vm1286_vm0, %v2935_v19 }
 0x2ad   : > { %v3348_v11 = vpop.permute.xlu1 %3347 }
 0x2af   : > { %v2937_v6 = vpop.permute.xlu0 %2936  ;;  %13200 = vxpose.xlu0.b32.cont [5/16] %v13199_v23, 128  ;;  %v19625_v23 = vpack.i.bf16 %v15134_v59, %v15119_v39  ;;  %v13209_v39 = vpack.i.bf16 %v827_v29, %v763_v33 }
 0x2b0   : > { %12870 = vmatprep.mubr.msk.bf16.mxu0 %vm1286_vm0, %v2937_v6  ;;  %12901 = vmatmul.mubr.msk.bf16.gmra.mxu1 %vm1286_vm0, %v3346_v10 }
 0x2b1   : > { %v3350_v25 = vpop.permute.xlu1 %3349  ;;  %12904 = vmatprep.mubr.msk.bf16.mxu1 %vm1286_vm0, %v3348_v11 }
 0x2b3   : > { %v2939_v40 = vpop.permute.xlu0 %2938  ;;  %13202 = vxpose.xlu0.b32.cont [6/16] %v13201_v15, 128 }
 0x2b4   : > { %12871 = vmatmul.mubr.msk.bf16.gmra.mxu0 %vm1286_vm0, %v2939_v40 }
 0x2b5   : > { %v4142_v26 = vpop.permute.xlu1 %4141 }
 0x2b7   : > { %v3731_v60 = vpop.permute.xlu0 %3730  ;;  %13204 = vxpose.xlu0.b32.cont [7/16] %v19624_v43, 128 }
 0x2b8   : > { %12905 = vmatmul.mubr.msk.bf16.gmra.mxu1 %vm1286_vm0, %v3350_v25  ;;  %12910 = vmatprep.mubr.msk.bf16.mxu0 %vm1286_vm0, %v3731_v60 }
 0x2b9   : > { %v4144_v17 = vpop.permute.xlu1 %4143  ;;  %12944 = vmatprep.mubr.msk.bf16.mxu1 %vm1286_vm0, %v4142_v26 }
 0x2bb   : > { %v3733_v53 = vpop.permute.xlu0 %3732  ;;  %13206 = vxpose.xlu0.b32.cont [8/16] %v19625_v23, 128 }
 0x2bc   : > { %12911 = vmatmul.mubr.msk.bf16.vlgmr.msra.gmra.mxu0 %vm1286_vm0, %v3733_v53 }
 0x2bd   : > { %v4146_v45 = vpop.permute.xlu1 %4145 }
 0x2bf   : > { %v3735_v46 = vpop.permute.xlu0 %3734  ;;  %13208 = vxpose.xlu0.b32.cont [9/16] %v19626_v16, 128 }
 0x2c0   : > { %v12742_v0 = vpop.f32.mrf.mxu1  ;;  %12914 = vmatprep.mubr.msk.bf16.mxu0 %vm1286_vm0, %v3735_v46  ;;  %12945 = vmatmul.mubr.msk.bf16.vlgmr.msra.gmra.mxu1 %vm1286_vm0, %v4144_v17 }
 0x2c1   : > { %v4148_v59 = vpop.permute.xlu1 %4147  ;;  %12948 = vmatprep.mubr.msk.bf16.mxu1 %vm1286_vm0, %v4146_v45 }
 0x2c2   : > { %v1795_v18 = vpop.f32.mrf.mxu1 }
 0x2c3   : > { %v3737_v42 = vpop.permute.xlu0 %3736  ;;  %13210 = vxpose.xlu0.b32.cont [10/16] %v13209_v39, 128 }
 0x2c4   : > { %v12743_v50 = vpop.f32.mrf.mxu1  ;;  %12915 = vmatmul.mubr.msk.bf16.gmra.mxu0 %vm1286_vm0, %v3737_v42 }
 0x2c5   : > { %v11224_v27 = vpack.c.bf16 %v12743_v50, %v12742_v0  ;;  %v4150_v5 = vpop.permute.xlu1 %4149 }
 0x2c6   : > { %v1798_v52 = vpop.f32.mrf.mxu1 }
 0x2c7   : > { %11791 = vst [vmem:[#allocation3 + $0x88] sm:$0xff] %v11224_v27   ;;  %v11219_v7 = vpack.c.bf16 %v1798_v52, %v1795_v18  ;;  %v3739_v21 = vpop.permute.xlu0 %3738  ;;  %13212 = vxpose.xlu0.b32.cont [11/16] %v19627_v36, 128 }
 0x2c8   : > { %v12746_v57 = vpop.f32.mrf.mxu1  ;;  %12918 = vmatprep.mubr.msk.bf16.mxu0 %vm1286_vm0, %v3739_v21  ;;  %12949 = vmatmul.mubr.msk.bf16.gmra.mxu1 %vm1286_vm0, %v4148_v59 }
 0x2c9   : > { %11220 = vst [vmem:[#allocation3 + $0x80] sm:$0xff] %v11219_v7   ;;  %v4152_v35 = vpop.permute.xlu1 %4151  ;;  %12952 = vmatprep.mubr.msk.bf16.mxu1 %vm1286_vm0, %v4150_v5 }
 0x2ca   : > { %v1811_v48 = vpop.f32.mrf.mxu1 }
 0x2cb   : > { %v3741_v44 = vpop.permute.xlu0 %3740  ;;  %13214 = vxpose.xlu0.b32.cont [12/16] %v19628_v14, 128 }
 0x2cc   : > { %v12747_v34 = vpop.f32.mrf.mxu1  ;;  %12919 = vmatmul.mubr.msk.bf16.gmra.mxu0 %vm1286_vm0, %v3741_v44 }
 0x2cd   : > { %v11234_v4 = vpack.c.bf16 %v12747_v34, %v12746_v57  ;;  %v4154_v47 = vpop.permute.xlu1 %4153 }
 0x2ce   : > { %v1814_v8 = vpop.f32.mrf.mxu1 }
 0x2cf   : > { %11793 = vst [vmem:[#allocation3 + $0x98] sm:$0xff] %v11234_v4   ;;  %v11229_v54 = vpack.c.bf16 %v1814_v8, %v1811_v48  ;;  %v3743_v32 = vpop.permute.xlu0 %3742  ;;  %13216 = vxpose.xlu0.b32.cont [13/16] %v19629_v56, 128 }
 0x2d0   : > { %v12750_v31 = vpop.f32.mrf.mxu1  ;;  %12922 = vmatprep.mubr.msk.bf16.mxu0 %vm1286_vm0, %v3743_v32  ;;  %12953 = vmatmul.mubr.msk.bf16.gmra.mxu1 %vm1286_vm0, %v4152_v35 }
 0x2d1   : > { %11792 = vst [vmem:[#allocation3 + $0x90] sm:$0xff] %v11229_v54   ;;  %v4156_v61 = vpop.permute.xlu1 %4155  ;;  %12956 = vmatprep.mubr.msk.bf16.mxu1 %vm1286_vm0, %v4154_v47 }
 0x2d2   : > { %v1827_v55 = vpop.f32.mrf.mxu1 }
 0x2d3   : > { %v3745_v22 = vpop.permute.xlu0 %3744  ;;  %13218 = vxpose.xlu0.b32.cont [14/16] %v13217_v9, 128 }
 0x2d4   : > { %v12751_v63 = vpop.f32.mrf.mxu1  ;;  %12923 = vmatmul.mubr.msk.bf16.gmra.mxu0 %vm1286_vm0, %v3745_v22 }
 0x2d5   : > { %v11244_v20 = vpack.c.bf16 %v12751_v63, %v12750_v31  ;;  %v4158_v3 = vpop.permute.xlu1 %4157 }
 0x2d6   : > { %v1830_v41 = vpop.f32.mrf.mxu1 }
 0x2d7   : > { %11795 = vst [vmem:[#allocation3 + $0xa8] sm:$0xff] %v11244_v20   ;;  %v11239_v2 = vpack.c.bf16 %v1830_v41, %v1827_v55  ;;  %v3747_v58 = vpop.permute.xlu0 %3746  ;;  %13220 = vxpose.xlu0.b32.cont [15/16] %v19630_v28, 128 }
 0x2d8   : > { %v12754_v12 = vpop.f32.mrf.mxu1  ;;  %12926 = vmatprep.mubr.msk.bf16.mxu0 %vm1286_vm0, %v3747_v58  ;;  %12957 = vmatmul.mubr.msk.bf16.gmra.mxu1 %vm1286_vm0, %v4156_v61 }
 0x2d9   : > { %11794 = vst [vmem:[#allocation3 + $0xa0] sm:$0xff] %v11239_v2   ;;  %v4160_v30 = vpop.permute.xlu1 %4159  ;;  %12960 = vmatprep.mubr.msk.bf16.mxu1 %vm1286_vm0, %v4158_v3 }
 0x2da   : > { %v1843_v10 = vpop.f32.mrf.mxu1 }
 0x2db   : > { %v3749_v19 = vpop.permute.xlu0 %3748  ;;  %13222 = vxpose.xlu0.b32.end [16/16] %v19631_v24, 128 }
 0x2dc   : > { %v12755_v1 = vpop.f32.mrf.mxu1  ;;  %12927 = vmatmul.mubr.msk.bf16.gmra.mxu0 %vm1286_vm0, %v3749_v19 }
 0x2dd   : > { %v11254_v38 = vpack.c.bf16 %v12755_v1, %v12754_v12  ;;  %v4162_v51 = vpop.permute.xlu1 %4161 }
 0x2de   : > { %v1846_v11 = vpop.f32.mrf.mxu1 }
 0x2df   : > { %11797 = vst [vmem:[#allocation3 + $0xb8] sm:$0xff] %v11254_v38   ;;  %v11249_v6 = vpack.c.bf16 %v1846_v11, %v1843_v10  ;;  %v3751_v15 = vpop.permute.xlu0 %3750 }
 0x2e0   : > { %v12758_v25 = vpop.f32.mrf.mxu1  ;;  %12930 = vmatprep.mubr.msk.bf16.mxu0 %vm1286_vm0, %v3751_v15  ;;  %12961 = vmatmul.mubr.msk.bf16.gmra.mxu1 %vm1286_vm0, %v4160_v30 }
 0x2e1   : > { %11796 = vst [vmem:[#allocation3 + $0xb0] sm:$0xff] %v11249_v6   ;;  %v4164_v40 = vpop.permute.xlu1 %4163  ;;  %12964 = vmatprep.mubr.msk.bf16.mxu1 %vm1286_vm0, %v4162_v51 }
 0x2e2   : > { %v1859_v49 = vpop.f32.mrf.mxu1 }
 0x2e3   : > { %v3753_v37 = vpop.permute.xlu0 %3752 }
 0x2e4   : > { %v12759_v26 = vpop.f32.mrf.mxu1  ;;  %12931 = vmatmul.mubr.msk.bf16.gmra.mxu0 %vm1286_vm0, %v3753_v37 }
 0x2e5   : > { %v11264_v60 = vpack.c.bf16 %v12759_v26, %v12758_v25  ;;  %v4166_v43 = vpop.permute.xlu1 %4165 }
 0x2e6   : > { %v1862_v17 = vpop.f32.mrf.mxu1 }
 0x2e7   : > { %11799 = vst [vmem:[#allocation3 + $0xc8] sm:$0xff] %v11264_v60   ;;  %v11259_v53 = vpack.c.bf16 %v1862_v17, %v1859_v49  ;;  %v3755_v23 = vpop.permute.xlu0 %3754 }
 0x2e8   : > { %v12762_v33 = vpop.f32.mrf.mxu1  ;;  %12934 = vmatprep.mubr.msk.bf16.mxu0 %vm1286_vm0, %v3755_v23  ;;  %12965 = vmatmul.mubr.msk.bf16.gmra.mxu1 %vm1286_vm0, %v4164_v40 }
 0x2e9   : > { %11798 = vst [vmem:[#allocation3 + $0xc0] sm:$0xff] %v11259_v53   ;;  %12968 = vmatprep.mubr.msk.bf16.mxu1 %vm1286_vm0, %v4166_v43  ;;  %v4168_v29 = vpop.permute.xlu1 %4167 }
 0x2ea   : > { %v1875_v45 = vpop.f32.mrf.mxu1 }
 0x2eb   : > { %v3757_v46 = vpop.permute.xlu0 %3756 }
 0x2ec   : > { %v12763_v16 = vpop.f32.mrf.mxu1  ;;  %12935 = vmatmul.mubr.msk.bf16.gmra.mxu0 %vm1286_vm0, %v3757_v46 }
 0x2ed   : > { %v11274_v0 = vpack.c.bf16 %v12763_v16, %v12762_v33  ;;  %v4170_v42 = vpop.permute.xlu1 %4169 }
 0x2ee   : > { %v1878_v39 = vpop.f32.mrf.mxu1 }
 0x2ef   : > { %11801 = vst [vmem:[#allocation3 + $0xd8] sm:$0xff] %v11274_v0   ;;  %v11269_v59 = vpack.c.bf16 %v1878_v39, %v1875_v45  ;;  %v3759_v18 = vpop.permute.xlu0 %3758 }
 0x2f0   : > { %v12766_v50 = vpop.f32.mrf.mxu1  ;;  %12938 = vmatprep.mubr.msk.bf16.mxu0 %vm1286_vm0, %v3759_v18  ;;  %12969 = vmatmul.mubr.msk.bf16.gmra.mxu1 %vm1286_vm0, %v4168_v29 }
 0x2f1   : > { %11800 = vst [vmem:[#allocation3 + $0xd0] sm:$0xff] %v11269_v59   ;;  %12972 = vmatprep.mubr.msk.bf16.mxu1 %vm1286_vm0, %v4170_v42  ;;  %v4172_v36 = vpop.permute.xlu1 %4171 }
 0x2f2   : > { %v1891_v27 = vpop.f32.mrf.mxu1 }
 0x2f3   : > { %v3761_v5 = vpop.permute.xlu0 %3760 }
 0x2f4   : > { %v12767_v52 = vpop.f32.mrf.mxu1  ;;  %12939 = vmatmul.mubr.msk.bf16.gmra.mxu0 %vm1286_vm0, %v3761_v5 }
 0x2f5   : > { %v11284_v7 = vpack.c.bf16 %v12767_v52, %v12766_v50 }
 0x2f6   : > { %v1894_v21 = vpop.f32.mrf.mxu1 }
 0x2f7   : > { %11803 = vst [vmem:[#allocation3 + $0xe8] sm:$0xff] %v11284_v7   ;;  %v11279_v57 = vpack.c.bf16 %v1894_v21, %v1891_v27 }
 0x2f8   : > { %v12770_v35 = vpop.f32.mrf.mxu1  ;;  %12973 = vmatmul.mubr.msk.bf16.gmra.mxu1 %vm1286_vm0, %v4172_v36 }
 0x2f9   : > { %11802 = vst [vmem:[#allocation3 + $0xe0] sm:$0xff] %v11279_v57  }
 0x2fa   : > { %v1907_v48 = vpop.f32.mrf.mxu1 }
 0x2fc   : > { %v12771_v44 = vpop.f32.mrf.mxu1  ;;  %v12776_v14 = vpop.f32.mrf.mxu0 }
 0x2fd   : > { %v11294_v34 = vpack.c.bf16 %v12771_v44, %v12770_v35 }
 0x2fe   : > { %v1910_v62 = vpop.f32.mrf.mxu1  ;;  %v2206_v13 = vpop.f32.mrf.mxu0 }
 0x2ff   : > { %11805 = vst [vmem:[#allocation3 + $0xf8] sm:$0xff] %v11294_v34   ;;  %v11289_v4 = vpack.c.bf16 %v1910_v62, %v1907_v48 }
 0x300   : > { %v12777_v47 = vpop.f32.mrf.mxu0  ;;  %v12810_v8 = vpop.f32.mrf.mxu1 }
 0x301   : > { %11804 = vst [vmem:[#allocation3 + $0xf0] sm:$0xff] %v11289_v4   ;;  %v11304_v54 = vpack.c.bf16 %v12777_v47, %v12776_v14 }
 0x302   : > { %v2209_v32 = vpop.f32.mrf.mxu0  ;;  %v2617_v56 = vpop.f32.mrf.mxu1 }
 0x303   : > { %11806 = vst [vmem:[#allocation3 + $0x108] sm:$0xff] %v11304_v54   ;;  %v11299_v31 = vpack.c.bf16 %v2209_v32, %v2206_v13 }
 0x304   : > { %v12780_v9 = vpop.f32.mrf.mxu0  ;;  %v12811_v61 = vpop.f32.mrf.mxu1 }
 0x305   : > { %11300 = vst [vmem:[#allocation3 + $0x100] sm:$0xff] %v11299_v31   ;;  %v11384_v55 = vpack.c.bf16 %v12811_v61, %v12810_v8 }
 0x306   : > { %v2222_v22 = vpop.f32.mrf.mxu0  ;;  %v2620_v63 = vpop.f32.mrf.mxu1 }
 0x307   : > { %11821 = vst [vmem:[#allocation3 + $0x188] sm:$0xff] %v11384_v55   ;;  %v11379_v20 = vpack.c.bf16 %v2620_v63, %v2617_v56 }
 0x308   : > { %v12781_v3 = vpop.f32.mrf.mxu0  ;;  %v12814_v41 = vpop.f32.mrf.mxu1 }
 0x309   : > { %11380 = vst [vmem:[#allocation3 + $0x180] sm:$0xff] %v11379_v20   ;;  %v11314_v2 = vpack.c.bf16 %v12781_v3, %v12780_v9 }
 0x30a   : > { %v2225_v58 = vpop.f32.mrf.mxu0  ;;  %v2633_v28 = vpop.f32.mrf.mxu1 }
 0x30b   : > { %11808 = vst [vmem:[#allocation3 + $0x118] sm:$0xff] %v11314_v2   ;;  %v11309_v12 = vpack.c.bf16 %v2225_v58, %v2222_v22 }
 0x30c   : > { %v12784_v30 = vpop.f32.mrf.mxu0  ;;  %v12815_v10 = vpop.f32.mrf.mxu1 }
 0x30d   : > { %11807 = vst [vmem:[#allocation3 + $0x110] sm:$0xff] %v11309_v12   ;;  %v11394_v19 = vpack.c.bf16 %v12815_v10, %v12814_v41 }
 0x30e   : > { %v2238_v24 = vpop.f32.mrf.mxu0  ;;  %v2636_v1 = vpop.f32.mrf.mxu1 }
 0x30f   : > { %11823 = vst [vmem:[#allocation3 + $0x198] sm:$0xff] %v11394_v19   ;;  %v11389_v38 = vpack.c.bf16 %v2636_v1, %v2633_v28 }
 0x310   : > { %v12785_v51 = vpop.f32.mrf.mxu0  ;;  %v12818_v11 = vpop.f32.mrf.mxu1 }
 0x311   : > { %11822 = vst [vmem:[#allocation3 + $0x190] sm:$0xff] %v11389_v38   ;;  %v11324_v6 = vpack.c.bf16 %v12785_v51, %v12784_v30 }
 0x312   : > { %v2241_v15 = vpop.f32.mrf.mxu0  ;;  %v2649_v25 = vpop.f32.mrf.mxu1 }
 0x313   : > { %11810 = vst [vmem:[#allocation3 + $0x128] sm:$0xff] %v11324_v6   ;;  %v11319_v40 = vpack.c.bf16 %v2241_v15, %v2238_v24 }
 0x314   : > { %v12788_v49 = vpop.f32.mrf.mxu0  ;;  %v12819_v37 = vpop.f32.mrf.mxu1 }
 0x315   : > { %11809 = vst [vmem:[#allocation3 + $0x120] sm:$0xff] %v11319_v40   ;;  %v11404_v26 = vpack.c.bf16 %v12819_v37, %v12818_v11 }
 0x316   : > { %v2254_v60 = vpop.f32.mrf.mxu0  ;;  %v2652_v43 = vpop.f32.mrf.mxu1 }
 0x317   : > { %11825 = vst [vmem:[#allocation3 + $0x1a8] sm:$0xff] %v11404_v26   ;;  %v11399_v17 = vpack.c.bf16 %v2652_v43, %v2649_v25 }
 0x318   : > { %v12789_v53 = vpop.f32.mrf.mxu0  ;;  %v12822_v23 = vpop.f32.mrf.mxu1 }
 0x319   : > { %11824 = vst [vmem:[#allocation3 + $0x1a0] sm:$0xff] %v11399_v17   ;;  %v11334_v33 = vpack.c.bf16 %v12789_v53, %v12788_v49 }
 0x31a   : > { %v2257_v29 = vpop.f32.mrf.mxu0  ;;  %v2665_v45 = vpop.f32.mrf.mxu1 }
 0x31b   : > { %11812 = vst [vmem:[#allocation3 + $0x138] sm:$0xff] %v11334_v33   ;;  %v11329_v46 = vpack.c.bf16 %v2257_v29, %v2254_v60  ;;  %v13223_v16 = vpop.trf.xlu0 }
 0x31c   : > { %v12792_v0 = vpop.f32.mrf.mxu0  ;;  %v12823_v39 = vpop.f32.mrf.mxu1  ;;  %v13227_v59 = vunpack.i.h.bf16 %v13223_v16  ;;  %v13224_v18 = vunpack.i.l.bf16 %v13223_v16 }
 0x31d   : > { %11811 = vst [vmem:[#allocation3 + $0x130] sm:$0xff] %v11329_v46   ;;  %v11414_v42 = vpack.c.bf16 %v12823_v39, %v12822_v23 }
 0x31e   : > { %v2270_v50 = vpop.f32.mrf.mxu0  ;;  %v2668_v27 = vpop.f32.mrf.mxu1  ;;  %v10864_v5 = vpack.c.bf16 %v13227_v59, %v13224_v18 }
 0x31f   : > { %11827 = vst [vmem:[#allocation3 + $0x1b8] sm:$0xff] %v11414_v42   ;;  %v11409_v52 = vpack.c.bf16 %v2668_v27, %v2665_v45  ;;  %v13228_v7 = vpop.trf.xlu0 }
 0x320   : > { %v12793_v21 = vpop.f32.mrf.mxu0  ;;  %v12826_v36 = vpop.f32.mrf.mxu1  ;;  %1262 = vst [vmem:[#allocation2 + $0x30] sm:$0xff] %v10864_v5  ;;  %v13232_v57 = vunpack.i.h.bf16 %v13228_v7  ;;  %v13229_v35 = vunpack.i.l.bf16 %v13228_v7 }
 0x321   : > { %11826 = vst [vmem:[#allocation3 + $0x1b0] sm:$0xff] %v11409_v52   ;;  %v11344_v48 = vpack.c.bf16 %v12793_v21, %v12792_v0 }
 0x322   : > { %v2273_v44 = vpop.f32.mrf.mxu0  ;;  %v2681_v14 = vpop.f32.mrf.mxu1  ;;  %v10865_v34 = vpack.c.bf16 %v13232_v57, %v13229_v35 }
 0x323   : > { %11814 = vst [vmem:[#allocation3 + $0x148] sm:$0xff] %v11344_v48   ;;  %v11339_v62 = vpack.c.bf16 %v2273_v44, %v2270_v50  ;;  %v13233_v13 = vpop.trf.xlu0 }
 0x324   : > { %v12796_v4 = vpop.f32.mrf.mxu0  ;;  %v12827_v47 = vpop.f32.mrf.mxu1  ;;  %1263 = vst [vmem:[#allocation2] sm:$0xff] %v10865_v34  ;;  %v13237_v8 = vunpack.i.h.bf16 %v13233_v13  ;;  %v13234_v54 = vunpack.i.l.bf16 %v13233_v13 }
 0x325   : > { %11813 = vst [vmem:[#allocation3 + $0x140] sm:$0xff] %v11339_v62   ;;  %v11424_v32 = vpack.c.bf16 %v12827_v47, %v12826_v36 }
 0x326   : > { %v2286_v56 = vpop.f32.mrf.mxu0  ;;  %v2684_v31 = vpop.f32.mrf.mxu1  ;;  %v10866_v9 = vpack.c.bf16 %v13237_v8, %v13234_v54 }
 0x327   : > { %11829 = vst [vmem:[#allocation3 + $0x1c8] sm:$0xff] %v11424_v32   ;;  %v11419_v61 = vpack.c.bf16 %v2684_v31, %v2681_v14  ;;  %v13238_v55 = vpop.trf.xlu0 }
 0x328   : > { %v12797_v22 = vpop.f32.mrf.mxu0  ;;  %v12830_v63 = vpop.f32.mrf.mxu1  ;;  %1264 = vst [vmem:[#allocation2 + $0x58] sm:$0xff] %v10866_v9  ;;  %v13242_v20 = vunpack.i.h.bf16 %v13238_v55  ;;  %v13239_v3 = vunpack.i.l.bf16 %v13238_v55 }
 0x329   : > { %11828 = vst [vmem:[#allocation3 + $0x1c0] sm:$0xff] %v11419_v61   ;;  %v11354_v41 = vpack.c.bf16 %v12797_v22, %v12796_v4 }
 0x32a   : > { %v2289_v2 = vpop.f32.mrf.mxu0  ;;  %v2697_v58 = vpop.f32.mrf.mxu1  ;;  %v10867_v28 = vpack.c.bf16 %v13242_v20, %v13239_v3 }
 0x32b   : > { %11816 = vst [vmem:[#allocation3 + $0x158] sm:$0xff] %v11354_v41   ;;  %v11349_v12 = vpack.c.bf16 %v2289_v2, %v2286_v56  ;;  %v13243_v30 = vpop.trf.xlu0 }
 0x32c   : > { %v12800_v10 = vpop.f32.mrf.mxu0  ;;  %v12831_v19 = vpop.f32.mrf.mxu1  ;;  %1265 = vst [vmem:[#allocation2 + $0x18] sm:$0xff] %v10867_v28  ;;  %v13247_v24 = vunpack.i.h.bf16 %v13243_v30  ;;  %v13244_v1 = vunpack.i.l.bf16 %v13243_v30 }
 0x32d   : > { %11815 = vst [vmem:[#allocation3 + $0x150] sm:$0xff] %v11349_v12   ;;  %v11434_v38 = vpack.c.bf16 %v12831_v19, %v12830_v63 }
 0x32e   : > { %v2302_v51 = vpop.f32.mrf.mxu0  ;;  %v2700_v11 = vpop.f32.mrf.mxu1  ;;  %v10868_v6 = vpack.c.bf16 %v13247_v24, %v13244_v1 }
 0x32f   : > { %11831 = vst [vmem:[#allocation3 + $0x1d8] sm:$0xff] %v11434_v38   ;;  %v11429_v15 = vpack.c.bf16 %v2700_v11, %v2697_v58  ;;  %v13248_v25 = vpop.trf.xlu0 }
 0x330   : > { %v12801_v40 = vpop.f32.mrf.mxu0  ;;  %v12834_v49 = vpop.f32.mrf.mxu1  ;;  %1266 = vst [vmem:[#allocation2 + $0x50] sm:$0xff] %v10868_v6  ;;  %v13252_v37 = vunpack.i.h.bf16 %v13248_v25  ;;  %v13249_v26 = vunpack.i.l.bf16 %v13248_v25 }
 0x331   : > { %11830 = vst [vmem:[#allocation3 + $0x1d0] sm:$0xff] %v11429_v15   ;;  %v11364_v60 = vpack.c.bf16 %v12801_v40, %v12800_v10 }
 0x332   : > { %v2305_v43 = vpop.f32.mrf.mxu0  ;;  %v2713_v17 = vpop.f32.mrf.mxu1  ;;  %v10869_v53 = vpack.c.bf16 %v13252_v37, %v13249_v26 }
 0x333   : > { %11818 = vst [vmem:[#allocation3 + $0x168] sm:$0xff] %v11364_v60   ;;  %v11359_v23 = vpack.c.bf16 %v2305_v43, %v2302_v51  ;;  %v13253_v33 = vpop.trf.xlu0 }
 0x334   : > { %v12804_v29 = vpop.f32.mrf.mxu0  ;;  %v12835_v45 = vpop.f32.mrf.mxu1  ;;  %1267 = vst [vmem:[#allocation2 + $0x68] sm:$0xff] %v10869_v53  ;;  %v13257_v46 = vunpack.i.h.bf16 %v13253_v33  ;;  %v13254_v16 = vunpack.i.l.bf16 %v13253_v33 }
 0x335   : > { %11817 = vst [vmem:[#allocation3 + $0x160] sm:$0xff] %v11359_v23   ;;  %v11444_v0 = vpack.c.bf16 %v12835_v45, %v12834_v49 }
 0x336   : > { %v2318_v39 = vpop.f32.mrf.mxu0  ;;  %v2716_v59 = vpop.f32.mrf.mxu1  ;;  %v10870_v18 = vpack.c.bf16 %v13257_v46, %v13254_v16 }
 0x337   : > { %11833 = vst [vmem:[#allocation3 + $0x1e8] sm:$0xff] %v11444_v0   ;;  %v11439_v42 = vpack.c.bf16 %v2716_v59, %v2713_v17  ;;  %v13258_v50 = vpop.trf.xlu0 }
 0x338   : > { %v12805_v27 = vpop.f32.mrf.mxu0  ;;  %v12838_v5 = vpop.f32.mrf.mxu1  ;;  %1268 = vst [vmem:[#allocation2 + $0x8] sm:$0xff] %v10870_v18  ;;  %v13262_v52 = vunpack.i.h.bf16 %v13258_v50  ;;  %v13259_v7 = vunpack.i.l.bf16 %v13258_v50 }
 0x339   : > { %11832 = vst [vmem:[#allocation3 + $0x1e0] sm:$0xff] %v11439_v42   ;;  %v11374_v21 = vpack.c.bf16 %v12805_v27, %v12804_v29 }
 0x33a   : > { %v2321_v36 = vpop.f32.mrf.mxu0  ;;  %v2729_v57 = vpop.f32.mrf.mxu1  ;;  %v10871_v35 = vpack.c.bf16 %v13262_v52, %v13259_v7 }
 0x33b   : > { %11820 = vst [vmem:[#allocation3 + $0x178] sm:$0xff] %v11374_v21   ;;  %v11369_v48 = vpack.c.bf16 %v2321_v36, %v2318_v39  ;;  %v13263_v44 = vpop.trf.xlu0 }
 0x33c   : > { %v12839_v14 = vpop.f32.mrf.mxu1  ;;  %v12844_v34 = vpop.f32.mrf.mxu0  ;;  %1269 = vst [vmem:[#allocation2 + $0x48] sm:$0xff] %v10871_v35  ;;  %v13267_v62 = vunpack.i.h.bf16 %v13263_v44  ;;  %v13264_v13 = vunpack.i.l.bf16 %v13263_v44 }
 0x33d   : > { %11819 = vst [vmem:[#allocation3 + $0x170] sm:$0xff] %v11369_v48   ;;  %v11454_v4 = vpack.c.bf16 %v12839_v14, %v12838_v5 }
 0x33e   : > { %v2732_v47 = vpop.f32.mrf.mxu1  ;;  %v3028_v8 = vpop.f32.mrf.mxu0  ;;  %v10872_v54 = vpack.c.bf16 %v13267_v62, %v13264_v13 }
 0x33f   : > { %11835 = vst [vmem:[#allocation3 + $0x1f8] sm:$0xff] %v11454_v4   ;;  %v11449_v32 = vpack.c.bf16 %v2732_v47, %v2729_v57  ;;  %v13268_v56 = vpop.trf.xlu0 }
 0x340   : > { %v12845_v31 = vpop.f32.mrf.mxu0  ;;  %v12878_v9 = vpop.f32.mrf.mxu1  ;;  %1270 = vst [vmem:[#allocation2 + $0x40] sm:$0xff] %v10872_v54  ;;  %v13272_v61 = vunpack.i.h.bf16 %v13268_v56  ;;  %v13269_v55 = vunpack.i.l.bf16 %v13268_v56 }
 0x341   : > { %11834 = vst [vmem:[#allocation3 + $0x1f0] sm:$0xff] %v11449_v32   ;;  %v11464_v22 = vpack.c.bf16 %v12845_v31, %v12844_v34 }
 0x342   : > { %v3031_v63 = vpop.f32.mrf.mxu0  ;;  %v3439_v20 = vpop.f32.mrf.mxu1  ;;  %v10873_v3 = vpack.c.bf16 %v13272_v61, %v13269_v55 }
 0x343   : > { %11836 = vst [vmem:[#allocation3 + $0x208] sm:$0xff] %v11464_v22   ;;  %v11459_v41 = vpack.c.bf16 %v3031_v63, %v3028_v8  ;;  %v13273_v2 = vpop.trf.xlu0 }
 0x344   : > { %v12848_v58 = vpop.f32.mrf.mxu0  ;;  %v12879_v28 = vpop.f32.mrf.mxu1  ;;  %1271 = vst [vmem:[#allocation2 + $0x20] sm:$0xff] %v10873_v3  ;;  %v13277_v12 = vunpack.i.h.bf16 %v13273_v2  ;;  %v13274_v30 = vunpack.i.l.bf16 %v13273_v2 }
 0x345   : > { %11460 = vst [vmem:[#allocation3 + $0x200] sm:$0xff] %v11459_v41   ;;  %v11544_v10 = vpack.c.bf16 %v12879_v28, %v12878_v9 }
 0x346   : > { %v3044_v19 = vpop.f32.mrf.mxu0  ;;  %v3442_v24 = vpop.f32.mrf.mxu1  ;;  %v10874_v1 = vpack.c.bf16 %v13277_v12, %v13274_v30 }
 0x347   : > { %11851 = vst [vmem:[#allocation3 + $0x288] sm:$0xff] %v11544_v10   ;;  %v11539_v38 = vpack.c.bf16 %v3442_v24, %v3439_v20  ;;  %v13278_v51 = vpop.trf.xlu0 }
 0x348   : > { %v12849_v11 = vpop.f32.mrf.mxu0  ;;  %v12882_v6 = vpop.f32.mrf.mxu1  ;;  %1272 = vst [vmem:[#allocation2 + $0x10] sm:$0xff] %v10874_v1  ;;  %v13282_v15 = vunpack.i.h.bf16 %v13278_v51  ;;  %v13279_v25 = vunpack.i.l.bf16 %v13278_v51 }
 0x349   : > { %11540 = vst [vmem:[#allocation3 + $0x280] sm:$0xff] %v11539_v38   ;;  %v11474_v40 = vpack.c.bf16 %v12849_v11, %v12848_v58 }
 0x34a   : > { %v3047_v49 = vpop.f32.mrf.mxu0  ;;  %v3455_v37 = vpop.f32.mrf.mxu1  ;;  %v10875_v26 = vpack.c.bf16 %v13282_v15, %v13279_v25 }
 0x34b   : > { %11838 = vst [vmem:[#allocation3 + $0x218] sm:$0xff] %v11474_v40   ;;  %v11469_v60 = vpack.c.bf16 %v3047_v49, %v3044_v19  ;;  %v13283_v43 = vpop.trf.xlu0 }
 0x34c   : > { %v12852_v17 = vpop.f32.mrf.mxu0  ;;  %v12883_v53 = vpop.f32.mrf.mxu1  ;;  %1273 = vst [vmem:[#allocation2 + $0x38] sm:$0xff] %v10875_v26  ;;  %v13287_v23 = vunpack.i.h.bf16 %v13283_v43  ;;  %v13284_v33 = vunpack.i.l.bf16 %v13283_v43 }
 0x34d   : > { %11837 = vst [vmem:[#allocation3 + $0x210] sm:$0xff] %v11469_v60   ;;  %v11554_v29 = vpack.c.bf16 %v12883_v53, %v12882_v6 }
 0x34e   : > { %v3060_v45 = vpop.f32.mrf.mxu0  ;;  %v3458_v46 = vpop.f32.mrf.mxu1  ;;  %v10876_v16 = vpack.c.bf16 %v13287_v23, %v13284_v33 }
 0x34f   : > { %11853 = vst [vmem:[#allocation3 + $0x298] sm:$0xff] %v11554_v29   ;;  %v11549_v0 = vpack.c.bf16 %v3458_v46, %v3455_v37  ;;  %v13288_v39 = vpop.trf.xlu0 }
 0x350   : > { %v12853_v59 = vpop.f32.mrf.mxu0  ;;  %v12886_v18 = vpop.f32.mrf.mxu1  ;;  %1274 = vst [vmem:[#allocation2 + $0x60] sm:$0xff] %v10876_v16  ;;  %v13292_v42 = vunpack.i.h.bf16 %v13288_v39  ;;  %v13289_v50 = vunpack.i.l.bf16 %v13288_v39 }
 0x351   : > { %11852 = vst [vmem:[#allocation3 + $0x290] sm:$0xff] %v11549_v0   ;;  %v11484_v27 = vpack.c.bf16 %v12853_v59, %v12852_v17 }
 0x352   : > { %v3063_v5 = vpop.f32.mrf.mxu0  ;;  %v3471_v52 = vpop.f32.mrf.mxu1  ;;  %v10877_v7 = vpack.c.bf16 %v13292_v42, %v13289_v50 }
 0x353   : > { %11840 = vst [vmem:[#allocation3 + $0x228] sm:$0xff] %v11484_v27   ;;  %v11479_v21 = vpack.c.bf16 %v3063_v5, %v3060_v45  ;;  %v13293_v36 = vpop.trf.xlu0 }
 0x354   : > { %v12856_v57 = vpop.f32.mrf.mxu0  ;;  %v12887_v35 = vpop.f32.mrf.mxu1  ;;  %1275 = vst [vmem:[#allocation2 + $0x70] sm:$0xff] %v10877_v7  ;;  %v13297_v48 = vunpack.i.h.bf16 %v13293_v36  ;;  %v13294_v44 = vunpack.i.l.bf16 %v13293_v36 }
 0x355   : > { %11839 = vst [vmem:[#allocation3 + $0x220] sm:$0xff] %v11479_v21   ;;  %v11564_v14 = vpack.c.bf16 %v12887_v35, %v12886_v18 }
 0x356   : > { %v3076_v34 = vpop.f32.mrf.mxu0  ;;  %v3474_v62 = vpop.f32.mrf.mxu1  ;;  %v10878_v13 = vpack.c.bf16 %v13297_v48, %v13294_v44 }
 0x357   : > { %11855 = vst [vmem:[#allocation3 + $0x2a8] sm:$0xff] %v11564_v14   ;;  %v11559_v4 = vpack.c.bf16 %v3474_v62, %v3471_v52  ;;  %v13298_v47 = vpop.trf.xlu0 }
 0x358   : > { %v12857_v8 = vpop.f32.mrf.mxu0  ;;  %v12890_v54 = vpop.f32.mrf.mxu1  ;;  %1276 = vst [vmem:[#allocation2 + $0x78] sm:$0xff] %v10878_v13  ;;  %v13302_v32 = vunpack.i.h.bf16 %v13298_v47  ;;  %v13299_v56 = vunpack.i.l.bf16 %v13298_v47 }
 0x359   : > { %11854 = vst [vmem:[#allocation3 + $0x2a0] sm:$0xff] %v11559_v4   ;;  %v11494_v31 = vpack.c.bf16 %v12857_v8, %v12856_v57 }
 0x35a   : > { %v3079_v9 = vpop.f32.mrf.mxu0  ;;  %v3487_v61 = vpop.f32.mrf.mxu1  ;;  %v10879_v55 = vpack.c.bf16 %v13302_v32, %v13299_v56 }
 0x35b   : > { %11842 = vst [vmem:[#allocation3 + $0x238] sm:$0xff] %v11494_v31   ;;  %v11489_v22 = vpack.c.bf16 %v3079_v9, %v3076_v34 }
 0x35c   : > { %v12860_v63 = vpop.f32.mrf.mxu0  ;;  %v12891_v20 = vpop.f32.mrf.mxu1  ;;  %1277 = vst [vmem:[#allocation2 + $0x28] sm:$0xff] %v10879_v55 }
 0x35d   : > { %11841 = vst [vmem:[#allocation3 + $0x230] sm:$0xff] %v11489_v22   ;;  %v11574_v3 = vpack.c.bf16 %v12891_v20, %v12890_v54 }
 0x35e   : > { %v3092_v41 = vpop.f32.mrf.mxu0  ;;  %v3490_v2 = vpop.f32.mrf.mxu1 }
 0x35f   : > { %11857 = vst [vmem:[#allocation3 + $0x2b8] sm:$0xff] %v11574_v3   ;;  %v11569_v58 = vpack.c.bf16 %v3490_v2, %v3487_v61 }
 0x360   : > { %v12861_v28 = vpop.f32.mrf.mxu0  ;;  %v12894_v12 = vpop.f32.mrf.mxu1 }
 0x361   : > { %11856 = vst [vmem:[#allocation3 + $0x2b0] sm:$0xff] %v11569_v58   ;;  %v11504_v30 = vpack.c.bf16 %v12861_v28, %v12860_v63 }
 0x362   : > { %v3095_v10 = vpop.f32.mrf.mxu0  ;;  %v3503_v19 = vpop.f32.mrf.mxu1 }
 0x363   : > { %11844 = vst [vmem:[#allocation3 + $0x248] sm:$0xff] %v11504_v30   ;;  %v11499_v24 = vpack.c.bf16 %v3095_v10, %v3092_v41 }
 0x364   : > { %v12864_v1 = vpop.f32.mrf.mxu0  ;;  %v12895_v38 = vpop.f32.mrf.mxu1 }
 0x365   : > { %11843 = vst [vmem:[#allocation3 + $0x240] sm:$0xff] %v11499_v24   ;;  %v11584_v51 = vpack.c.bf16 %v12895_v38, %v12894_v12 }
 0x366   : > { %v3108_v11 = vpop.f32.mrf.mxu0  ;;  %v3506_v6 = vpop.f32.mrf.mxu1 }
 0x367   : > { %11859 = vst [vmem:[#allocation3 + $0x2c8] sm:$0xff] %v11584_v51   ;;  %v11579_v15 = vpack.c.bf16 %v3506_v6, %v3503_v19 }
 0x368   : > { %v12865_v25 = vpop.f32.mrf.mxu0  ;;  %v12898_v40 = vpop.f32.mrf.mxu1 }
 0x369   : > { %11858 = vst [vmem:[#allocation3 + $0x2c0] sm:$0xff] %v11579_v15   ;;  %v11514_v49 = vpack.c.bf16 %v12865_v25, %v12864_v1 }
 0x36a   : > { %v3111_v37 = vpop.f32.mrf.mxu0  ;;  %v3519_v26 = vpop.f32.mrf.mxu1 }
 0x36b   : > { %11846 = vst [vmem:[#allocation3 + $0x258] sm:$0xff] %v11514_v49   ;;  %v11509_v60 = vpack.c.bf16 %v3111_v37, %v3108_v11 }
 0x36c   : > { %v12868_v43 = vpop.f32.mrf.mxu0  ;;  %v12899_v17 = vpop.f32.mrf.mxu1 }
 0x36d   : > { %11845 = vst [vmem:[#allocation3 + $0x250] sm:$0xff] %v11509_v60   ;;  %v11594_v53 = vpack.c.bf16 %v12899_v17, %v12898_v40 }
 0x36e   : > { %v3124_v23 = vpop.f32.mrf.mxu0  ;;  %v3522_v33 = vpop.f32.mrf.mxu1 }
 0x36f   : > { %11861 = vst [vmem:[#allocation3 + $0x2d8] sm:$0xff] %v11594_v53   ;;  %v11589_v29 = vpack.c.bf16 %v3522_v33, %v3519_v26 }
 0x370   : > { %v12869_v45 = vpop.f32.mrf.mxu0  ;;  %v12902_v46 = vpop.f32.mrf.mxu1 }
 0x371   : > { %11860 = vst [vmem:[#allocation3 + $0x2d0] sm:$0xff] %v11589_v29   ;;  %v11524_v16 = vpack.c.bf16 %v12869_v45, %v12868_v43 }
 0x372   : > { %v3127_v0 = vpop.f32.mrf.mxu0  ;;  %v3535_v39 = vpop.f32.mrf.mxu1 }
 0x373   : > { %11848 = vst [vmem:[#allocation3 + $0x268] sm:$0xff] %v11524_v16   ;;  %v11519_v59 = vpack.c.bf16 %v3127_v0, %v3124_v23 }
 0x374   : > { %v12872_v18 = vpop.f32.mrf.mxu0  ;;  %v12903_v42 = vpop.f32.mrf.mxu1 }
 0x375   : > { %11847 = vst [vmem:[#allocation3 + $0x260] sm:$0xff] %v11519_v59   ;;  %v11604_v50 = vpack.c.bf16 %v12903_v42, %v12902_v46 }
 0x376   : > { %v3140_v27 = vpop.f32.mrf.mxu0  ;;  %v3538_v5 = vpop.f32.mrf.mxu1 }
 0x377   : > { %11863 = vst [vmem:[#allocation3 + $0x2e8] sm:$0xff] %v11604_v50   ;;  %v11599_v52 = vpack.c.bf16 %v3538_v5, %v3535_v39 }
 0x378   : > { %v12873_v7 = vpop.f32.mrf.mxu0  ;;  %v12906_v21 = vpop.f32.mrf.mxu1 }
 0x379   : > { %11862 = vst [vmem:[#allocation3 + $0x2e0] sm:$0xff] %v11599_v52   ;;  %v11534_v36 = vpack.c.bf16 %v12873_v7, %v12872_v18 }
 0x37a   : > { %v3143_v57 = vpop.f32.mrf.mxu0  ;;  %v3551_v35 = vpop.f32.mrf.mxu1 }
 0x37b   : > { %11850 = vst [vmem:[#allocation3 + $0x278] sm:$0xff] %v11534_v36   ;;  %v11529_v48 = vpack.c.bf16 %v3143_v57, %v3140_v27 }
 0x37c   : > { %v12907_v44 = vpop.f32.mrf.mxu1  ;;  %v12912_v14 = vpop.f32.mrf.mxu0 }
 0x37d   : > { %11849 = vst [vmem:[#allocation3 + $0x270] sm:$0xff] %v11529_v48   ;;  %v11614_v34 = vpack.c.bf16 %v12907_v44, %v12906_v21 }
 0x37e   : > { %v3554_v62 = vpop.f32.mrf.mxu1  ;;  %v3850_v13 = vpop.f32.mrf.mxu0 }
 0x37f   : > { %11865 = vst [vmem:[#allocation3 + $0x2f8] sm:$0xff] %v11614_v34   ;;  %v11609_v4 = vpack.c.bf16 %v3554_v62, %v3551_v35 }
 0x380   : > { %v12913_v47 = vpop.f32.mrf.mxu0  ;;  %v12946_v8 = vpop.f32.mrf.mxu1 }
 0x381   : > { %11864 = vst [vmem:[#allocation3 + $0x2f0] sm:$0xff] %v11609_v4   ;;  %v11624_v54 = vpack.c.bf16 %v12913_v47, %v12912_v14 }
 0x382   : > { %v3853_v32 = vpop.f32.mrf.mxu0  ;;  %v4261_v56 = vpop.f32.mrf.mxu1 }
 0x383   : > { %11866 = vst [vmem:[#allocation3 + $0x308] sm:$0xff] %v11624_v54   ;;  %v11619_v31 = vpack.c.bf16 %v3853_v32, %v3850_v13 }
 0x384   : > { %v12916_v9 = vpop.f32.mrf.mxu0  ;;  %v12947_v61 = vpop.f32.mrf.mxu1 }
 0x385   : > { %11620 = vst [vmem:[#allocation3 + $0x300] sm:$0xff] %v11619_v31   ;;  %v11704_v55 = vpack.c.bf16 %v12947_v61, %v12946_v8 }
 0x386   : > { %v3866_v22 = vpop.f32.mrf.mxu0  ;;  %v4264_v63 = vpop.f32.mrf.mxu1 }
 0x387   : > { %11881 = vst [vmem:[#allocation3 + $0x388] sm:$0xff] %v11704_v55   ;;  %v11699_v20 = vpack.c.bf16 %v4264_v63, %v4261_v56 }
 0x388   : > { %v12917_v3 = vpop.f32.mrf.mxu0  ;;  %v12950_v41 = vpop.f32.mrf.mxu1 }
 0x389   : > { %11700 = vst [vmem:[#allocation3 + $0x380] sm:$0xff] %v11699_v20   ;;  %v11634_v2 = vpack.c.bf16 %v12917_v3, %v12916_v9 }
 0x38a   : > { %v3869_v58 = vpop.f32.mrf.mxu0  ;;  %v4277_v28 = vpop.f32.mrf.mxu1 }
 0x38b   : > { %11868 = vst [vmem:[#allocation3 + $0x318] sm:$0xff] %v11634_v2   ;;  %v11629_v12 = vpack.c.bf16 %v3869_v58, %v3866_v22 }
 0x38c   : > { %v12920_v30 = vpop.f32.mrf.mxu0  ;;  %v12951_v10 = vpop.f32.mrf.mxu1 }
 0x38d   : > { %11867 = vst [vmem:[#allocation3 + $0x310] sm:$0xff] %v11629_v12   ;;  %v11714_v19 = vpack.c.bf16 %v12951_v10, %v12950_v41 }
 0x38e   : > { %v3882_v24 = vpop.f32.mrf.mxu0  ;;  %v4280_v1 = vpop.f32.mrf.mxu1 }
 0x38f   : > { %11883 = vst [vmem:[#allocation3 + $0x398] sm:$0xff] %v11714_v19   ;;  %v11709_v38 = vpack.c.bf16 %v4280_v1, %v4277_v28 }
 0x390   : > { %v12921_v51 = vpop.f32.mrf.mxu0  ;;  %v12954_v11 = vpop.f32.mrf.mxu1 }
 0x391   : > { %11882 = vst [vmem:[#allocation3 + $0x390] sm:$0xff] %v11709_v38   ;;  %v11644_v6 = vpack.c.bf16 %v12921_v51, %v12920_v30 }
 0x392   : > { %v3885_v15 = vpop.f32.mrf.mxu0  ;;  %v4293_v25 = vpop.f32.mrf.mxu1 }
 0x393   : > { %11870 = vst [vmem:[#allocation3 + $0x328] sm:$0xff] %v11644_v6   ;;  %v11639_v40 = vpack.c.bf16 %v3885_v15, %v3882_v24 }
 0x394   : > { %v12924_v49 = vpop.f32.mrf.mxu0  ;;  %v12955_v37 = vpop.f32.mrf.mxu1 }
 0x395   : > { %11869 = vst [vmem:[#allocation3 + $0x320] sm:$0xff] %v11639_v40   ;;  %v11724_v26 = vpack.c.bf16 %v12955_v37, %v12954_v11 }
 0x396   : > { %v3898_v60 = vpop.f32.mrf.mxu0  ;;  %v4296_v43 = vpop.f32.mrf.mxu1 }
 0x397   : > { %11885 = vst [vmem:[#allocation3 + $0x3a8] sm:$0xff] %v11724_v26   ;;  %v11719_v17 = vpack.c.bf16 %v4296_v43, %v4293_v25 }
 0x398   : > { %v12925_v53 = vpop.f32.mrf.mxu0  ;;  %v12958_v23 = vpop.f32.mrf.mxu1 }
 0x399   : > { %11884 = vst [vmem:[#allocation3 + $0x3a0] sm:$0xff] %v11719_v17   ;;  %v11654_v33 = vpack.c.bf16 %v12925_v53, %v12924_v49 }
 0x39a   : > { %v3901_v29 = vpop.f32.mrf.mxu0  ;;  %v4309_v45 = vpop.f32.mrf.mxu1 }
 0x39b   : > { %11872 = vst [vmem:[#allocation3 + $0x338] sm:$0xff] %v11654_v33   ;;  %v11649_v46 = vpack.c.bf16 %v3901_v29, %v3898_v60 }
 0x39c   : > { %v12928_v16 = vpop.f32.mrf.mxu0  ;;  %v12959_v0 = vpop.f32.mrf.mxu1 }
 0x39d   : > { %11871 = vst [vmem:[#allocation3 + $0x330] sm:$0xff] %v11649_v46   ;;  %v11734_v39 = vpack.c.bf16 %v12959_v0, %v12958_v23 }
 0x39e   : > { %v3914_v59 = vpop.f32.mrf.mxu0  ;;  %v4312_v18 = vpop.f32.mrf.mxu1 }
 0x39f   : > { %11887 = vst [vmem:[#allocation3 + $0x3b8] sm:$0xff] %v11734_v39   ;;  %v11729_v42 = vpack.c.bf16 %v4312_v18, %v4309_v45 }
 0x3a0   : > { %v12929_v50 = vpop.f32.mrf.mxu0  ;;  %v12962_v27 = vpop.f32.mrf.mxu1 }
 0x3a1   : > { %11886 = vst [vmem:[#allocation3 + $0x3b0] sm:$0xff] %v11729_v42   ;;  %v11664_v5 = vpack.c.bf16 %v12929_v50, %v12928_v16 }
 0x3a2   : > { %v3917_v52 = vpop.f32.mrf.mxu0  ;;  %v4325_v7 = vpop.f32.mrf.mxu1 }
 0x3a3   : > { %11874 = vst [vmem:[#allocation3 + $0x348] sm:$0xff] %v11664_v5   ;;  %v11659_v21 = vpack.c.bf16 %v3917_v52, %v3914_v59 }
 0x3a4   : > { %v12932_v36 = vpop.f32.mrf.mxu0  ;;  %v12963_v57 = vpop.f32.mrf.mxu1 }
 0x3a5   : > { %11873 = vst [vmem:[#allocation3 + $0x340] sm:$0xff] %v11659_v21   ;;  %v11744_v35 = vpack.c.bf16 %v12963_v57, %v12962_v27 }
 0x3a6   : > { %v3930_v48 = vpop.f32.mrf.mxu0  ;;  %v4328_v44 = vpop.f32.mrf.mxu1 }
 0x3a7   : > { %11889 = vst [vmem:[#allocation3 + $0x3c8] sm:$0xff] %v11744_v35   ;;  %v11739_v14 = vpack.c.bf16 %v4328_v44, %v4325_v7 }
 0x3a8   : > { %v12933_v34 = vpop.f32.mrf.mxu0  ;;  %v12966_v62 = vpop.f32.mrf.mxu1 }
 0x3a9   : > { %11888 = vst [vmem:[#allocation3 + $0x3c0] sm:$0xff] %v11739_v14   ;;  %v11674_v13 = vpack.c.bf16 %v12933_v34, %v12932_v36 }
 0x3aa   : > { %v3933_v4 = vpop.f32.mrf.mxu0  ;;  %v4341_v47 = vpop.f32.mrf.mxu1 }
 0x3ab   : > { %11876 = vst [vmem:[#allocation3 + $0x358] sm:$0xff] %v11674_v13   ;;  %v11669_v8 = vpack.c.bf16 %v3933_v4, %v3930_v48 }
 0x3ac   : > { %v12936_v54 = vpop.f32.mrf.mxu0  ;;  %v12967_v32 = vpop.f32.mrf.mxu1 }
 0x3ad   : > { %11875 = vst [vmem:[#allocation3 + $0x350] sm:$0xff] %v11669_v8   ;;  %v11754_v56 = vpack.c.bf16 %v12967_v32, %v12966_v62 }
 0x3ae   : > { %v3946_v31 = vpop.f32.mrf.mxu0  ;;  %v4344_v9 = vpop.f32.mrf.mxu1 }
 0x3af   : > { %11891 = vst [vmem:[#allocation3 + $0x3d8] sm:$0xff] %v11754_v56   ;;  %v11749_v61 = vpack.c.bf16 %v4344_v9, %v4341_v47 }
 0x3b0   : > { %v12937_v55 = vpop.f32.mrf.mxu0  ;;  %v12970_v22 = vpop.f32.mrf.mxu1 }
 0x3b1   : > { %11890 = vst [vmem:[#allocation3 + $0x3d0] sm:$0xff] %v11749_v61   ;;  %v11684_v63 = vpack.c.bf16 %v12937_v55, %v12936_v54 }
 0x3b2   : > { %v3949_v20 = vpop.f32.mrf.mxu0  ;;  %v4357_v3 = vpop.f32.mrf.mxu1 }
 0x3b3   : > { %11878 = vst [vmem:[#allocation3 + $0x368] sm:$0xff] %v11684_v63   ;;  %v11679_v41 = vpack.c.bf16 %v3949_v20, %v3946_v31 }
 0x3b4   : > { %v12940_v2 = vpop.f32.mrf.mxu0  ;;  %v12971_v58 = vpop.f32.mrf.mxu1 }
 0x3b5   : > { %11877 = vst [vmem:[#allocation3 + $0x360] sm:$0xff] %v11679_v41   ;;  %v11764_v28 = vpack.c.bf16 %v12971_v58, %v12970_v22 }
 0x3b6   : > { %v3962_v12 = vpop.f32.mrf.mxu0  ;;  %v4360_v30 = vpop.f32.mrf.mxu1 }
 0x3b7   : > { %11893 = vst [vmem:[#allocation3 + $0x3e8] sm:$0xff] %v11764_v28   ;;  %v11759_v10 = vpack.c.bf16 %v4360_v30, %v4357_v3 }
 0x3b8   : > { %v12941_v19 = vpop.f32.mrf.mxu0  ;;  %v12974_v24 = vpop.f32.mrf.mxu1 }
 0x3b9   : > { %11892 = vst [vmem:[#allocation3 + $0x3e0] sm:$0xff] %v11759_v10   ;;  %v11694_v1 = vpack.c.bf16 %v12941_v19, %v12940_v2 }
 0x3ba   : > { %v3965_v38 = vpop.f32.mrf.mxu0  ;;  %v4373_v51 = vpop.f32.mrf.mxu1 }
 0x3bb   : > { %11880 = vst [vmem:[#allocation3 + $0x378] sm:$0xff] %v11694_v1   ;;  %v11689_v11 = vpack.c.bf16 %v3965_v38, %v3962_v12 }
 0x3bc   : > { %v12975_v6 = vpop.f32.mrf.mxu1 }
 0x3bd   : > { %11879 = vst [vmem:[#allocation3 + $0x370] sm:$0xff] %v11689_v11   ;;  %v11774_v15 = vpack.c.bf16 %v12975_v6, %v12974_v24 }
 0x3be   : > { %v4376_v25 = vpop.f32.mrf.mxu1 }
 0x3bf   : > { %11895 = vst [vmem:[#allocation3 + $0x3f8] sm:$0xff] %v11774_v15   ;;  %v11769_v40 = vpack.c.bf16 %v4376_v25, %v4373_v51 }
 0x3c1   : > { %11894 = vst [vmem:[#allocation3 + $0x3f0] sm:$0xff] %v11769_v40  }
 0x3c2 PF: > { %v13343_v49 = vld [vmem:[#allocation9 + $0x38] sm:$0xff]   ;;  %s10628_s12 = sshll.u32 %s14550_s19, 7  ;;  %v13344_v37 = vld [vmem:[#allocation9 + $0x30] sm:$0xff]   ;;  %v13345_v26 = vld [vmem:[#allocation9 + $0x28] sm:$0xff]   ;;  %v19435_v50 = vmov 0   ;;  %s19632_s30 = sld [smem:[#allocation202_spill]] }
 0x3c3   : > { %s4550_s11 = sshra.s32 %s10628_s12, 3  ;;  %12976 = vmatprep.subr.bf16.mxu0 %v13343_v49  ;;  %v13346_v60 = vld [vmem:[#allocation9 + $0x20] sm:$0xff]   ;;  %v13347_v17 = vld [vmem:[#allocation9 + $0x18] sm:$0xff]   ;;  %v13348_v53 = vld [vmem:[#allocation9 + $0x10] sm:$0xff]   ;;  %4875 = vmatprep.mubr.bf16.mxu1 %v19435_v50  ;;  %vm4818_vm1 = vcmask 130048   ;;  %s14585_s24 = smov 96  }
 0x3c4   : > { %s10629_s6 = sshll.u32 %s4550_s11, 2  ;;  %12977 = vmatpush3.bf16.msra.mxu0 %v13343_v49  ;;  %v13349_v23 = vld [vmem:[#allocation9 + $0x8] sm:$0xff]   ;;  %v13350_v33 = vld [vmem:[#allocation9] sm:$0xff]   ;;  %s14586_s9 = smov 80  }
 0x3c5   : > { %12978 = vmatprep.subr.bf16.mxu0 %v13344_v37  ;;  %s15568_s5 = scalar_lea.vmem %s14857_s26, %s10629_s6 [#allocation4]  ;;  %v13359_v18 = vld [vmem:[#allocation2 + $0x34] ss:$-48 sps:$4 sm:$0xff]   ;;  %v13361_v42 = vld [vmem:[#allocation2 + $0x30] ss:$-48 sps:$4 sm:$0xff]   ;;  %s14587_s20 = smov 64  }
 0x3c6   : > { %v13351_v43 = vld [vmem:[%s15568_s5] sm:$0xff]   ;;  %v13352_v29 = vld [vmem:[%s15568_s5 + $0x8] sm:$0xff]   ;;  %v13353_v45 = vld [vmem:[%s15568_s5 + $0x10] sm:$0xff]   ;;  %4857 = vmatprep.subr.bf16.mxu1 %v13359_v18  ;;  %s14588_s29 = smov 48   ;;  %s14589_s13 = smov 32  }
 0x3c7   : > { %12992 = vmatprep.mubr.bf16.mxu0 %v13351_v43  ;;  %v13354_v46 = vld [vmem:[%s15568_s5 + $0x18] sm:$0xff]   ;;  %v13355_v16 = vld [vmem:[%s15568_s5 + $0x20] sm:$0xff]   ;;  %v13356_v0 = vld [vmem:[%s15568_s5 + $0x28] sm:$0xff]   ;;  %4858 = vmatpush1.bf16.msra.mxu1 %v13361_v42  ;;  %s14590_s10 = smov 16   ;;  %s20344_s2 = sld [smem:[#allocation207_spill]] }
 0x3c8   : > { %12979 = vmatpush3.bf16.msra.mxu0 %v13344_v37  ;;  %v13357_v39 = vld [vmem:[%s15568_s5 + $0x30] sm:$0xff]   ;;  %v13358_v59 = vld [vmem:[%s15568_s5 + $0x38] sm:$0xff]   ;;  %v10630_v7 = vld [vmem:[%s19632_s30] ss:$0 sm:$0xff]  ;;  %s20345_s25 = sld [smem:[#allocation24_spill]]  ;;  %s10857_s3 = sshll.u32 %s14550_s19, 4 }
 0x3c9   : > { %12980 = vmatprep.subr.bf16.mxu0 %v13345_v26  ;;  %v13362_v37 = vld [vmem:[#allocation3 + $0x78] sm:$0xff]   ;;  %s10013_s11 = sshll.u32 %s14885_s16, 4  ;;  %s20347_s0 = sld [smem:[#allocation208_spill]]  ;;  %s19341_s11 = int_to_ptr.vmem [resolvable:$true] %s10013_s11 }
 0x3ca   : > { %13008 = vmatprep.subr.bf16.mxu1 %v13362_v37 }
 0x3cc   : > { %12981 = vmatpush3.bf16.msra.mxu0 %v13345_v26  ;;  %v13363_v26 = vld [vmem:[#allocation3 + $0x38] sm:$0xff]  }
 0x3cd   : > { %12982 = vmatprep.subr.bf16.mxu0 %v13346_v60 }
 0x3ce   : > { %s10858_s4 = sshll.u32 %s20345_s25, 5 }
 0x3cf   : > { %s10010_s12 = sadd.s32 %s10858_s4, %s10857_s3 }
 0x3d0   : > { %12983 = vmatpush3.bf16.msra.mxu0 %v13346_v60  ;;  %s10859_s6 = sshll.u32 %s10010_s12, 7 }
 0x3d1   : > { %12984 = vmatprep.subr.bf16.mxu0 %v13347_v17  ;;  %s19347_s30 = scalar_lea.hbm %s20347_s0, %s10859_s6 }
 0x3d4   : > { %12985 = vmatpush3.bf16.msra.mxu0 %v13347_v17  ;;  %v13364_v17 = vld [vmem:[#allocation3 + $0x70] sm:$0xff]  }
 0x3d5   : > { %12986 = vmatprep.subr.bf16.mxu0 %v13348_v53 }
 0x3d8   : > { %12987 = vmatpush3.bf16.msra.mxu0 %v13348_v53  ;;  %v13365_v53 = vld [vmem:[#allocation3 + $0x30] sm:$0xff]  }
 0x3d9   : > { %12988 = vmatprep.subr.bf16.mxu0 %v13349_v23 }
 0x3dc   : > { %12989 = vmatpush3.bf16.msra.mxu0 %v13349_v23  ;;  %v13366_v23 = vld [vmem:[#allocation3 + $0x68] sm:$0xff]  }
 0x3dd   : > { %12990 = vmatprep.subr.bf16.mxu0 %v13350_v33 }
 0x3e0   : > { %12991 = vmatpush3.bf16.msra.mxu0 %v13350_v33 }
 0x3e1   : > { %12096 = vmatprep.subr.bf16.mxu0 %v13362_v37 }
 0x3e3   : > { %12993 = vmatmul.mubr.bf16.vlgmr.msra.gmra.mxu0 %v13352_v29  ;;  %v13367_v29 = vld [vmem:[#allocation3 + $0x28] sm:$0xff]  }
 0x3e4   : > { %12996 = vmatprep.mubr.bf16.mxu0 %v13353_v45  ;;  %12097 = vmatpush3.bf16.msra.mxu0 %v13363_v26 }
 0x3e5   : > { %12098 = vmatprep.subr.bf16.mxu0 %v13364_v17 }
 0x3e8   : > { %12099 = vmatpush3.bf16.msra.mxu0 %v13365_v53 }
 0x3e9   : > { %12100 = vmatprep.subr.bf16.mxu0 %v13366_v23 }
 0x3eb   : > { %12997 = vmatmul.mubr.bf16.gmra.mxu0 %v13354_v46  ;;  %v13368_v46 = vld [vmem:[#allocation3 + $0x60] sm:$0xff]  }
 0x3ec   : > { %13000 = vmatprep.mubr.bf16.mxu0 %v13355_v16  ;;  %12101 = vmatpush3.bf16.msra.mxu0 %v13367_v29 }
 0x3ed   : > { %12102 = vmatprep.subr.bf16.mxu0 %v13368_v46 }
 0x3f3   : > { %13001 = vmatmul.mubr.bf16.gmra.mxu0 %v13356_v0  ;;  %v13369_v0 = vld [vmem:[#allocation3 + $0x20] sm:$0xff]  }
 0x3f4   : > { %13004 = vmatprep.mubr.bf16.mxu0 %v13357_v39  ;;  %12103 = vmatpush3.bf16.msra.mxu0 %v13369_v0 }
 0x3fb   : > { %13005 = vmatmul.mubr.bf16.gmra.mxu0 %v13358_v59  ;;  %v4798_v59 = vlaneseq }
 0x4a3   : > { %v12994_v27 = vpop.f32.mrf.mxu0 }
 0x4a4   : > { %v4732_v62 = vadd.f32 %v12994_v27, %v10630_v7  ;;  %v4799_v27 = vshrl.u32 %v4798_v59, 7 }
 0x4a5   : > { %v4723_v5 = vpop.f32.mrf.mxu0 }
 0x4a6   : > { %v4724_v36 = vadd.f32 %v10630_v7, %v4723_v5 }
 0x4a7   : > { %v12995_v52 = vpop.f32.mrf.mxu0 }
 0x4a8   : > { %v4735_v14 = vadd.f32 %v12995_v52, %v10630_v7 }
 0x4a9   : > { %v4726_v21 = vpop.f32.mrf.mxu0 }
 0x4aa   : > { %v4727_v57 = vadd.f32 %v10630_v7, %v4726_v21  ;;  %v15587_v13 = vpack.c.bf16 %v4735_v14, %v4732_v62  ;;  %v4804_v21 = vsub.s32 1, %v4799_v27 }
 0x4ab   : > { %v12998_v35 = vpop.f32.mrf.mxu0 }
 0x4ac   : > { %v15582_v48 = vpack.c.bf16 %v4727_v57, %v4724_v36  ;;  %v4748_v31 = vadd.f32 %v12998_v35, %v10630_v7  ;;  %v4794_v36 = vld [vmem:[%s14864_s18] sm:$0x3]  ;;  %s14584_s18 = smov 112  }
 0x4ad   : > { %v4739_v44 = vpop.f32.mrf.mxu0  ;;  %v15656_v14 = vrot.slane %v4794_v36, %v4804_v21 }
 0x4ae   : > { %10649 = vmatmul.mubr.msk.bf16.vlgmr.msra.gmra.mxu1 %vm4818_vm1, %v15582_v48  ;;  %v4740_v47 = vadd.f32 %v10630_v7, %v4739_v44 }
 0x4af   : > { %4885 = vmatprep.mubr.bf16.mxu1 %v19435_v50  ;;  %v12999_v34 = vpop.f32.mrf.mxu0  ;;  %13016 = vmatpush3.bf16.msra.mxu1 %v13363_v26 }
 0x4b0   : > { %v4751_v9 = vadd.f32 %v12999_v34, %v10630_v7  ;;  %13009 = vmatprep.subr.bf16.mxu1 %v13364_v17 }
 0x4b1   : > { %v4742_v4 = vpop.f32.mrf.mxu0 }
 0x4b2   : > { %v4743_v8 = vadd.f32 %v10630_v7, %v4742_v4  ;;  %v15597_v55 = vpack.c.bf16 %v4751_v9, %v4748_v31 }
 0x4b3   : > { %v13002_v54 = vpop.f32.mrf.mxu0  ;;  %13017 = vmatpush3.bf16.msra.mxu1 %v13365_v53 }
 0x4b4   : > { %v15592_v32 = vpack.c.bf16 %v4743_v8, %v4740_v47  ;;  %v4764_v58 = vadd.f32 %v13002_v54, %v10630_v7  ;;  %13010 = vmatprep.subr.bf16.mxu1 %v13366_v23 }
 0x4b5   : > { %v4755_v56 = vpop.f32.mrf.mxu0 }
 0x4b6   : > { %10650 = vmatmul.mubr.msk.bf16.gmra.mxu1 %vm4818_vm1, %v15587_v13  ;;  %v4756_v63 = vadd.f32 %v10630_v7, %v4755_v56 }
 0x4b7   : > { %4895 = vmatprep.mubr.bf16.mxu1 %v19435_v50  ;;  %v13003_v61 = vpop.f32.mrf.mxu0  ;;  %13018 = vmatpush3.bf16.msra.mxu1 %v13367_v29  ;;  %v13372_v29 = vld [vmem:[#allocation3 + $0x50] sm:$0xff]  }
 0x4b8   : > { %v4767_v28 = vadd.f32 %v13003_v61, %v10630_v7  ;;  %13011 = vmatprep.subr.bf16.mxu1 %v13368_v46  ;;  %v13370_v61 = vld [vmem:[#allocation3 + $0x58] sm:$0xff]   ;;  %v13373_v46 = vld [vmem:[#allocation3 + $0x10] sm:$0xff]  }
 0x4b9   : > { %v4758_v22 = vpop.f32.mrf.mxu0  ;;  %12104 = vmatprep.subr.bf16.mxu0 %v13370_v61 }
 0x4ba   : > { %v4759_v20 = vadd.f32 %v10630_v7, %v4758_v22  ;;  %v15607_v30 = vpack.c.bf16 %v4767_v28, %v4764_v58  ;;  %v13371_v22 = vld [vmem:[#allocation3 + $0x18] sm:$0xff]  }
 0x4bb   : > { %v13006_v3 = vpop.f32.mrf.mxu0  ;;  %13019 = vmatpush3.bf16.msra.mxu1 %v13369_v0  ;;  %12105 = vmatpush3.bf16.msra.mxu0 %v13371_v22 }
 0x4bc   : > { %v15602_v41 = vpack.c.bf16 %v4759_v20, %v4756_v63  ;;  %v4780_v38 = vadd.f32 %v13006_v3, %v10630_v7  ;;  %13012 = vmatprep.subr.bf16.mxu1 %v13370_v61  ;;  %12106 = vmatprep.subr.bf16.mxu0 %v13372_v29 }
 0x4bd   : > { %v4771_v2 = vpop.f32.mrf.mxu0 }
 0x4be   : > { %10651 = vmatmul.mubr.msk.bf16.gmra.mxu1 %vm4818_vm1, %v15592_v32  ;;  %v4772_v19 = vadd.f32 %v10630_v7, %v4771_v2 }
 0x4bf   : > { %4905 = vmatprep.mubr.bf16.mxu1 %v19435_v50  ;;  %v13007_v12 = vpop.f32.mrf.mxu0  ;;  %13020 = vmatpush3.bf16.msra.mxu1 %v13371_v22 }
 0x4c0   : > { %v4783_v51 = vadd.f32 %v13007_v12, %v10630_v7  ;;  %13013 = vmatprep.subr.bf16.mxu1 %v13372_v29  ;;  %12107 = vmatpush3.bf16.msra.mxu0 %v13373_v46 }
 0x4c1   : > { %v4774_v10 = vpop.f32.mrf.mxu0 }
 0x4c2   : > { %v4775_v24 = vadd.f32 %v10630_v7, %v4774_v10  ;;  %v15617_v11 = vpack.c.bf16 %v4783_v51, %v4780_v38  ;;  %v4800_v7 = vsub.s32 0, %v4799_v27 }
 0x4c3   : > { %13021 = vmatpush3.bf16.msra.mxu1 %v13373_v46 }
 0x4c4   : > { %v15612_v1 = vpack.c.bf16 %v4775_v24, %v4772_v19  ;;  %19634 = vst [vmem:[#allocation32_spill] sm:$0xff] %v15617_v11  ;;  %v15654_v44 = vrot.slane %v4794_v36, %v4800_v7 }
 0x4c6   : > { %10652 = vmatmul.mubr.msk.bf16.gmra.mxu1 %vm4818_vm1, %v15597_v55  ;;  %19633 = vst [vmem:[#allocation31_spill] sm:$0xff] %v15612_v1 }
 0x4c7   : > { %4915 = vmatprep.mubr.bf16.mxu1 %v19435_v50 }
 0x4ce   : > { %10653 = vmatmul.mubr.msk.bf16.gmra.mxu1 %vm4818_vm1, %v15602_v41 }
 0x4cf   : > { %4925 = vmatprep.mubr.bf16.mxu1 %v19435_v50 }
 0x4d6   : > { %10654 = vmatmul.mubr.msk.bf16.gmra.mxu1 %vm4818_vm1, %v15607_v30 }
 0x4d7   : > { %4935 = vmatprep.mubr.bf16.mxu1 %v19435_v50 }
 0x4de   : > { %10655 = vmatmul.mubr.msk.bf16.gmra.mxu1 %vm4818_vm1, %v15612_v1 }
 0x4df   : > { %4945 = vmatprep.mubr.bf16.mxu1 %v19435_v50 }
 0x4e6   : > { %10656 = vmatmul.mubr.msk.bf16.gmra.mxu1 %vm4818_vm1, %v15617_v11 }
 0x56e   : > { %v15621_v6 = vpop.f32.mrf.mxu1 }
 0x56f   : > { %v15780_v29 = vadd.f32 %v15621_v6, %v15654_v44 }
 0x570   : > { %v15623_v15 = vpop.f32.mrf.mxu1 }
 0x572   : > { %v15625_v25 = vpop.f32.mrf.mxu1 }
 0x574   : > { %v15627_v40 = vpop.f32.mrf.mxu1 }
 0x576   : > { %v15629_v49 = vpop.f32.mrf.mxu1 }
 0x577   : > { %v15790_v46 = vadd.f32 %v15629_v49, %v15654_v44 }
 0x578   : > { %v15631_v60 = vpop.f32.mrf.mxu1 }
 0x57a   : > { %v15633_v43 = vpop.f32.mrf.mxu1 }
 0x57c   : > { %v15635_v33 = vpop.f32.mrf.mxu1 }
 0x57d   : > { %v15796_v6 = vadd.f32 %v15635_v33, %v15656_v14 }
 0x57e   : > { %v15637_v45 = vpop.f32.mrf.mxu1 }
 0x580   : > { %v15639_v16 = vpop.f32.mrf.mxu1 }
 0x582   : > { %v15641_v39 = vpop.f32.mrf.mxu1 }
 0x584   : > { %v15643_v18 = vpop.f32.mrf.mxu1 }
 0x586   : > { %v15645_v42 = vpop.f32.mrf.mxu1 }
 0x588   : > { %v15647_v5 = vpop.f32.mrf.mxu1 }
 0x58a   : > { %v15649_v52 = vpop.f32.mrf.mxu1 }
 0x58c   : > { %v15652_v57 = vpop.f32.mrf.mxu1 }
 0x58e   : > { %v4917_v35 = vpop.f32.mrf.mxu1 }
 0x58f   : > { %v15659_v62 = vadd.f32 %v4917_v35, %v15654_v44 }
 0x590   : > { %v4919_v34 = vpop.f32.mrf.mxu1 }
 0x591   : > { %v15662_v4 = vadd.f32 %v4919_v34, %v15656_v14 }
 0x592   : > { %v4921_v47 = vpop.f32.mrf.mxu1 }
 0x593   : > { %v4980_v8 = vmax.f32 %v15659_v62, %v15662_v4  ;;  %v15667_v56 = vadd.f32 %v4921_v47, %v15654_v44 }
 0x594   : > { %v4923_v54 = vpop.f32.mrf.mxu1 }
 0x595   : > { %v15670_v31 = vadd.f32 %v4923_v54, %v15656_v14  ;;  %4981 = vmax.xlane.f32.xlu0 %v4980_v8  ;;  %v13374_v54 = vld [vmem:[#allocation3 + $0x48] sm:$0xff]  }
 0x596   : > { %v4927_v9 = vpop.f32.mrf.mxu1  ;;  %13014 = vmatprep.subr.bf16.mxu1 %v13374_v54  ;;  %12108 = vmatprep.subr.bf16.mxu0 %v13374_v54 }
 0x597   : > { %v4983_v63 = vmax.f32 %v15667_v56, %v15670_v31  ;;  %v15675_v3 = vadd.f32 %v4927_v9, %v15654_v44  ;;  %v13375_v9 = vld [vmem:[#allocation3 + $0x8] sm:$0xff]  }
 0x598   : > { %v4929_v20 = vpop.f32.mrf.mxu1  ;;  %13022 = vmatpush3.bf16.msra.mxu1 %v13375_v9  ;;  %12109 = vmatpush3.bf16.msra.mxu0 %v13375_v9 }
 0x599   : > { %v15678_v2 = vadd.f32 %v4929_v20, %v15656_v14  ;;  %4984 = vmax.xlane.f32.xlu0 %v4983_v63  ;;  %v13376_v20 = vld [vmem:[#allocation3 + $0x40] sm:$0xff]  }
 0x59a   : > { %v4931_v58 = vpop.f32.mrf.mxu1  ;;  %13015 = vmatprep.subr.bf16.mxu1 %v13376_v20  ;;  %12110 = vmatprep.subr.bf16.mxu0 %v13376_v20 }
 0x59b   : > { %v4986_v28 = vmax.f32 %v15675_v3, %v15678_v2  ;;  %v15683_v10 = vadd.f32 %v4931_v58, %v15654_v44  ;;  %v13377_v58 = vld [vmem:[#allocation3] sm:$0xff]  }
 0x59c   : > { %v4933_v12 = vpop.f32.mrf.mxu1  ;;  %13023 = vmatpush3.bf16.msra.mxu1 %v13377_v58  ;;  %12111 = vmatpush3.bf16.msra.mxu0 %v13377_v58 }
 0x59d   : > { %v15686_v19 = vadd.f32 %v4933_v12, %v15656_v14  ;;  %4987 = vmax.xlane.f32.xlu1 %v4986_v28  ;;  %v15722_v28 = vld [vmem:[#allocation2 + $0x58] sm:$0xff] }
 0x59e   : > { %v4937_v24 = vpop.f32.mrf.mxu1  ;;  %v15724_v12 = vld [vmem:[#allocation2 + $0x18] sm:$0xff] }
 0x59f   : > { %v4989_v38 = vmax.f32 %v15683_v10, %v15686_v19  ;;  %v15691_v37 = vadd.f32 %v4937_v24, %v15654_v44  ;;  %v10673_v24 = vcombine.low %v15722_v28, %v15724_v12 }
 0x5a0   : > { %v4939_v51 = vpop.f32.mrf.mxu1 }
 0x5a1   : > { %v15694_v26 = vadd.f32 %v4939_v51, %v15656_v14  ;;  %4990 = vmax.xlane.f32.xlu1 %v4989_v38  ;;  %v10674_v38 = vcombine.high %v15722_v28, %v15724_v12  ;;  %v15766_v51 = vadd.f32 %v15627_v40, %v15656_v14  ;;  %v15784_v40 = vadd.f32 %v15631_v60, %v15656_v14 }
 0x5a2   : > { %v4941_v17 = vpop.f32.mrf.mxu1 }
 0x5a3   : > { %v4992_v53 = vmax.f32 %v15691_v37, %v15694_v26  ;;  %v15699_v0 = vadd.f32 %v4941_v17, %v15654_v44  ;;  %5495 = vmatprep.subr.bf16.mxu1 %v10674_v38  ;;  %v15770_v17 = vadd.f32 %v15625_v25, %v15654_v44  ;;  %v4962_v60 = vmax.f32 %v15790_v46, %v15784_v40 }
 0x5a4   : > { %v4943_v23 = vpop.f32.mrf.mxu1 }
 0x5a5   : > { %v15702_v59 = vadd.f32 %v4943_v23, %v15656_v14  ;;  %4993 = vmax.xlane.f32.xlu0 %v4992_v53  ;;  %v4959_v53 = vmax.f32 %v15770_v17, %v15766_v51  ;;  %v15776_v23 = vadd.f32 %v15623_v15, %v15656_v14 }
 0x5a6   : > { %v4947_v27 = vpop.f32.mrf.mxu1 }
 0x5a7   : > { %v4995_v7 = vmax.f32 %v15699_v0, %v15702_v59  ;;  %v15707_v36 = vadd.f32 %v4947_v27, %v15654_v44  ;;  %v4956_v25 = vmax.f32 %v15780_v29, %v15776_v23 }
 0x5a8   : > { %v4949_v21 = vpop.f32.mrf.mxu1 }
 0x5a9   : > { %v15710_v35 = vadd.f32 %v4949_v21, %v15656_v14  ;;  %4996 = vmax.xlane.f32.xlu1 %v4995_v7 }
 0x5aa   : > { %v4951_v34 = vpop.f32.mrf.mxu1 }
 0x5ab   : > { %v4998_v47 = vmax.f32 %v15707_v36, %v15710_v35  ;;  %v15715_v61 = vadd.f32 %v4951_v34, %v15654_v44 }
 0x5ac   : > { %v4953_v8 = vpop.f32.mrf.mxu1 }
 0x5ad   : > { %v15718_v22 = vadd.f32 %v4953_v8, %v15656_v14  ;;  %4999 = vmax.xlane.f32.xlu0 %v4998_v47  ;;  %v15802_v47 = vadd.f32 %v15633_v43, %v15654_v44 }
 0x5af   : > { %v5001_v63 = vmax.f32 %v15715_v61, %v15718_v22  ;;  %v4965_v33 = vmax.f32 %v15802_v47, %v15796_v6 }
 0x5b1   : > { %5002 = vmax.xlane.f32.xlu1 %v5001_v63 }
 0x5c2   : > { %5433 = vrot.lane.b32.xlu1 %v15587_v13, %s14584_s18 }
 0x5c3   : > { %5431 = vrot.lane.b32.xlu0 %v15582_v48, %s14584_s18 }
 0x5c6   : > { %5435 = vrot.lane.b32.xlu1 %v15592_v32, %s14584_s18 }
 0x5c7   : > { %5439 = vrot.lane.b32.xlu0 %v15602_v41, %s14584_s18 }
 0x5ca   : > { %5437 = vrot.lane.b32.xlu1 %v15597_v55, %s14584_s18 }
 0x5cb   : > { %5443 = vrot.lane.b32.xlu0 %v15612_v1, %s14584_s18 }
 0x5ce   : > { %5441 = vrot.lane.b32.xlu1 %v15607_v30, %s14584_s18 }
 0x5cf   : > { %6078 = vrot.lane.b32.xlu0 %v15582_v48, %s14585_s24 }
 0x5d2   : > { %5445 = vrot.lane.b32.xlu1 %v15617_v11, %s14584_s18  ;;  %s19352_s18 = scalar_lea.sflag [#allocation6], %s485_s27 }
 0x5d3   : > { %6082 = vrot.lane.b32.xlu0 %v15592_v32, %s14585_s24 }
 0x5d6   : > { %6080 = vrot.lane.b32.xlu1 %v15587_v13, %s14585_s24 }
 0x5d7   : > { %6086 = vrot.lane.b32.xlu0 %v15602_v41, %s14585_s24 }
 0x5da   : > { %6084 = vrot.lane.b32.xlu1 %v15597_v55, %s14585_s24 }
 0x5db   : > { %6090 = vrot.lane.b32.xlu0 %v15612_v1, %s14585_s24 }
 0x5de   : > { %6088 = vrot.lane.b32.xlu1 %v15607_v30, %s14585_s24 }
 0x5df   : > { %6725 = vrot.lane.b32.xlu0 %v15582_v48, %s14586_s9 }
 0x5e2   : > { %6092 = vrot.lane.b32.xlu1 %v15617_v11, %s14585_s24  ;;  %s14430_s24 = scalar_lea.vmem %s19341_s11, 2048 }
 0x5e3   : > { %6729 = vrot.lane.b32.xlu0 %v15592_v32, %s14586_s9  ;;  %p14431_p10 = scmp.ne.s32.totalorder %s19341_s11, %s14430_s24 }
 0x5e5   : > { %p14432_p1 = pnand %p14431_p10, %p14720_p7 }
 0x5e6   : > { %6727 = vrot.lane.b32.xlu1 %v15587_v13, %s14586_s9 }
 0x5e7   : > { %6733 = vrot.lane.b32.xlu0 %v15602_v41, %s14586_s9  ;;  %p14433_p12 = pneg %p14432_p1 }
 0x5ea   : > { %6731 = vrot.lane.b32.xlu1 %v15597_v55, %s14586_s9 }
 0x5eb   : > { %6737 = vrot.lane.b32.xlu0 %v15612_v1, %s14586_s9 }
 0x5ee   : > { %6735 = vrot.lane.b32.xlu1 %v15607_v30, %s14586_s9 }
 0x5ef   : > { %7372 = vrot.lane.b32.xlu0 %v15582_v48, %s14587_s20 }
 0x5f2   : > { %6739 = vrot.lane.b32.xlu1 %v15617_v11, %s14586_s9  ;;  %s14591_s9 = smov [#allocation15]  }
 0x5f3   : > { %7376 = vrot.lane.b32.xlu0 %v15592_v32, %s14587_s20 }
 0x5f6   : > { %7374 = vrot.lane.b32.xlu1 %v15587_v13, %s14587_s20 }
 0x5f7   : > { %7380 = vrot.lane.b32.xlu0 %v15602_v41, %s14587_s20 }
 0x5fa   : > { %7378 = vrot.lane.b32.xlu1 %v15597_v55, %s14587_s20 }
 0x616   : > { %4960 = vmax.xlane.f32.xlu0 %v4959_v53 }
 0x61e   : > { %v4982_v27 = vpop.xlane.xlu0 %4981  ;;  %4957 = vmax.xlane.f32.xlu1 %v4956_v25 }
 0x61f   : > { %v5020_v15 = vsub.f32 %v15659_v62, %v4982_v27  ;;  %v5021_v7 = vsub.f32 %v15662_v4, %v4982_v27 }
 0x621   : > { %v5068_v21 = vmul.f32 1.442695, %v5020_v15  ;;  %v5070_v34 = vmul.f32 1.442695, %v5021_v7 }
 0x622   : > { %v4985_v49 = vpop.xlane.xlu0 %4984  ;;  %4963 = vmax.xlane.f32.xlu1 %v4962_v60 }
 0x623   : > { %13502 = vpow2.f32 %v5068_v21  ;;  %v5022_v62 = vsub.f32 %v15667_v56, %v4985_v49  ;;  %v5023_v4 = vsub.f32 %v15670_v31, %v4985_v49 }
 0x624   : > { %13504 = vpow2.f32 %v5070_v34 }
 0x625   : > { %v5072_v8 = vmul.f32 1.442695, %v5022_v62  ;;  %v5074_v54 = vmul.f32 1.442695, %v5023_v4 }
 0x626   : > { %v4988_v9 = vpop.xlane.xlu1 %4987  ;;  %4966 = vmax.xlane.f32.xlu1 %v4965_v33 }
 0x627   : > { %13506 = vpow2.f32 %v5072_v8  ;;  %v5024_v63 = vsub.f32 %v15675_v3, %v4988_v9  ;;  %v5025_v43 = vsub.f32 %v15678_v2, %v4988_v9 }
 0x628   : > { %13508 = vpow2.f32 %v5074_v54 }
 0x629   : > { %v5076_v20 = vmul.f32 1.442695, %v5024_v63  ;;  %v5078_v58 = vmul.f32 1.442695, %v5025_v43 }
 0x62a   : > { %v4991_v38 = vpop.xlane.xlu1 %4990 }
 0x62b   : > { %13510 = vpow2.f32 %v5076_v20  ;;  %v5026_v56 = vsub.f32 %v15683_v10, %v4991_v38  ;;  %v5027_v31 = vsub.f32 %v15686_v19, %v4991_v38 }
 0x62c   : > { %13512 = vpow2.f32 %v5078_v58  ;;  %7382 = vrot.lane.b32.xlu0 %v15607_v30, %s14587_s20 }
 0x62d   : > { %v5080_v53 = vmul.f32 1.442695, %v5026_v56  ;;  %v5082_v25 = vmul.f32 1.442695, %v5027_v31 }
 0x62e   : > { %v4994_v27 = vpop.xlane.xlu0 %4993 }
 0x62f   : > { %13514 = vpow2.f32 %v5080_v53  ;;  %v5028_v3 = vsub.f32 %v15691_v37, %v4994_v27  ;;  %v5029_v2 = vsub.f32 %v15694_v26, %v4994_v27 }
 0x630   : > { %v13503_v15 = vpop.eup %13502  ;;  %13516 = vpow2.f32 %v5082_v25 }
 0x631   : > { %v13505_v7 = vpop.eup %13504  ;;  %v5084_v60 = vmul.f32 1.442695, %v5028_v3  ;;  %v5086_v21 = vmul.f32 1.442695, %v5029_v2 }
 0x632   : > { %v4997_v10 = vpop.xlane.xlu1 %4996  ;;  %v15816_v34 = vadd.f32 %v13505_v7, %v13503_v15 }
 0x633   : > { %13518 = vpow2.f32 %v5084_v60  ;;  %v5030_v19 = vsub.f32 %v15699_v0, %v4997_v10  ;;  %v5031_v49 = vsub.f32 %v15702_v59, %v4997_v10  ;;  %v13380_v0 = vld [vmem:[#allocation2 + $0x54] ss:$24 sps:$4 sm:$0xff]   ;;  %v15839_v60 = vadd.f32 %v15639_v16, %v15656_v14 }
 0x634   : > { %19635 = vst [vmem:[#allocation33_spill] sm:$0xff] %v15816_v34  ;;  %v13507_v62 = vpop.eup %13506  ;;  %13520 = vpow2.f32 %v5086_v21 }
 0x635   : > { %v13509_v4 = vpop.eup %13508  ;;  %v5088_v33 = vmul.f32 1.442695, %v5030_v19  ;;  %v5090_v37 = vmul.f32 1.442695, %v5031_v49  ;;  %v5172_v8 = vpack.c.bf16 %v13507_v62, %v13503_v15  ;;  %v15845_v49 = vadd.f32 %v15637_v45, %v15654_v44 }
 0x636   : > { %v5000_v26 = vpop.xlane.xlu0 %4999  ;;  %v5173_v54 = vpack.c.bf16 %v13509_v4, %v13505_v7  ;;  %v15820_v9 = vadd.f32 %v13509_v4, %v13507_v62 }
 0x637   : > { %13522 = vpow2.f32 %v5088_v33  ;;  %v5032_v63 = vsub.f32 %v15707_v36, %v5000_v26  ;;  %v5033_v43 = vsub.f32 %v15710_v35, %v5000_v26  ;;  %7384 = vrot.lane.b32.xlu1 %v15612_v1, %s14587_s20  ;;  %v4968_v33 = vmax.f32 %v15845_v49, %v15839_v60 }
 0x638   : > { %19636 = vst [vmem:[#allocation34_spill] sm:$0xff] %v15820_v9  ;;  %v13511_v59 = vpop.eup %13510  ;;  %13524 = vpow2.f32 %v5090_v37  ;;  %5372 = vmatprep.mubr.bf16.mxu1 %v5173_v54 }
 0x639   : > { %v13513_v20 = vpop.eup %13512  ;;  %v5092_v58 = vmul.f32 1.442695, %v5032_v63  ;;  %v5094_v38 = vmul.f32 1.442695, %v5033_v43  ;;  %5373 = vmatmul.mubr.bf16.vlgmr.msra.gmra.mxu1 %v5172_v8 }
 0x63a   : > { %5496 = vmatpush1.bf16.msra.mxu1 %v10673_v24  ;;  %v5003_v56 = vpop.xlane.xlu1 %5002  ;;  %v15829_v31 = vadd.f32 %v13513_v20, %v13511_v59  ;;  %v5432_v26 = vpop.permute.xlu0 %5431 }
 0x63b   : > { %13526 = vpow2.f32 %v5092_v58  ;;  %v5034_v36 = vsub.f32 %v15715_v61, %v5003_v56  ;;  %v5035_v35 = vsub.f32 %v15718_v22, %v5003_v56  ;;  %6142 = vmatprep.subr.bf16.mxu1 %v13380_v0  ;;  %v15860_v58 = vadd.f32 %v15643_v18, %v15656_v14  ;;  %v13378_v56 = vld [vmem:[#allocation2 + $0x50] ss:$24 sps:$4 sm:$0xff]  }
 0x63c   : > { %19637 = vst [vmem:[#allocation35_spill] sm:$0xff] %v15829_v31  ;;  %v13515_v53 = vpop.eup %13514  ;;  %13528 = vpow2.f32 %v5094_v38 }
 0x63d   : > { %v13517_v25 = vpop.eup %13516  ;;  %v5096_v27 = vmul.f32 1.442695, %v5034_v36  ;;  %v5098_v3 = vmul.f32 1.442695, %v5035_v35  ;;  %v5174_v2 = vpack.c.bf16 %v13515_v53, %v13511_v59  ;;  %v15854_v59 = vld [vmem:[#allocation2 + $0x8] sm:$0xff]  ;;  %v15864_v36 = vadd.f32 %v15641_v39, %v15654_v44 }
 0x63e   : > { %v5175_v15 = vpack.c.bf16 %v13517_v25, %v13513_v20  ;;  %v15833_v7 = vadd.f32 %v13517_v25, %v13515_v53  ;;  %v5434_v0 = vpop.permute.xlu1 %5433  ;;  %v5440_v45 = vpop.permute.xlu0 %5439  ;;  %v15856_v20 = vld [vmem:[#allocation2 + $0x48] sm:$0xff]  ;;  %v15870_v53 = vadd.f32 %v15647_v5, %v15656_v14  ;;  %v15878_v39 = vadd.f32 %v15645_v42, %v15654_v44 }
 0x63f   : > { %13530 = vpow2.f32 %v5096_v27  ;;  %v10726_v35 = vcombine.high %v15854_v59, %v15856_v20  ;;  %v4971_v18 = vmax.f32 %v15864_v36, %v15860_v58  ;;  %v15882_v5 = vadd.f32 %v15652_v57, %v15656_v14 }
 0x640   : > { %19638 = vst [vmem:[#allocation36_spill] sm:$0xff] %v15833_v7  ;;  %v13519_v28 = vpop.eup %13518  ;;  %13532 = vpow2.f32 %v5098_v3  ;;  %5380 = vmatprep.mubr.bf16.mxu1 %v5175_v15  ;;  %v4974_v3 = vmax.f32 %v15878_v39, %v15870_v53 }
 0x641   : > { %v13521_v12 = vpop.eup %13520  ;;  %5381 = vmatmul.mubr.bf16.gmra.mxu1 %v5174_v2  ;;  %v15888_v2 = vadd.f32 %v15649_v52, %v15654_v44 }
 0x642   : > { %v15835_v24 = vadd.f32 %v13521_v12, %v13519_v28  ;;  %v5436_v38 = vpop.permute.xlu1 %5435  ;;  %v5444_v25 = vpop.permute.xlu0 %5443 }
 0x643   : > { %v4977_v42 = vmax.f32 %v15888_v2, %v15882_v5 }
 0x644   : > { %19639 = vst [vmem:[#allocation37_spill] sm:$0xff] %v15835_v24  ;;  %v13523_v61 = vpop.eup %13522 }
 0x645   : > { %v13525_v22 = vpop.eup %13524  ;;  %v5176_v21 = vpack.c.bf16 %v13523_v61, %v13519_v28 }
 0x646   : > { %v5177_v10 = vpack.c.bf16 %v13525_v22, %v13521_v12  ;;  %v15841_v19 = vadd.f32 %v13525_v22, %v13523_v61  ;;  %v5438_v27 = vpop.permute.xlu1 %5437  ;;  %v15890_v15 = vpop.permute.xlu0 %6078 }
 0x648   : > { %19640 = vst [vmem:[#allocation38_spill] sm:$0xff] %v15841_v19  ;;  %v13527_v62 = vpop.eup %13526  ;;  %5388 = vmatprep.mubr.bf16.mxu1 %v5177_v10 }
 0x649   : > { %v13529_v4 = vpop.eup %13528  ;;  %5389 = vmatmul.mubr.bf16.gmra.mxu1 %v5176_v21 }
 0x64a   : > { %v15849_v37 = vadd.f32 %v13529_v4, %v13527_v62  ;;  %v5442_v28 = vpop.permute.xlu1 %5441  ;;  %v15898_v57 = vpop.permute.xlu0 %6082 }
 0x64b   : > { %4969 = vmax.xlane.f32.xlu0 %v4968_v33 }
 0x64c   : > { %19641 = vst [vmem:[#allocation39_spill] sm:$0xff] %v15849_v37  ;;  %v13531_v16 = vpop.eup %13530 }
 0x64d   : > { %v13533_v8 = vpop.eup %13532  ;;  %v5178_v54 = vpack.c.bf16 %v13531_v16, %v13527_v62 }
 0x64e   : > { %v5179_v63 = vpack.c.bf16 %v13533_v8, %v13529_v4  ;;  %v15851_v43 = vadd.f32 %v13533_v8, %v13531_v16  ;;  %v5446_v52 = vpop.permute.xlu1 %5445  ;;  %v15904_v12 = vpop.permute.xlu0 %6086 }
 0x650   : > { %19642 = vst [vmem:[#allocation40_spill] sm:$0xff] %v15851_v43  ;;  %5396 = vmatprep.mubr.bf16.mxu1 %v5179_v63 }
 0x651   : > { %5397 = vmatmul.mubr.bf16.gmra.mxu1 %v5178_v54 }
 0x652   : > { %5513 = vmatprep.mubr.bf16.mxu1 %v19435_v50  ;;  %v6081_v61 = vpop.permute.xlu1 %6080  ;;  %v15907_v22 = vpop.permute.xlu0 %6090 }
 0x656   : > { %v15912_v21 = vpop.permute.xlu1 %6084  ;;  %v15916_v10 = vpop.permute.xlu0 %6725 }
 0x659   : > { %10675 = vmatmul.mubr.msk.bf16.vlgmr.msra.gmra.mxu1 %vm4818_vm1, %v5432_v26 }
 0x65a   : > { %6143 = vmatpush1.bf16.msra.mxu1 %v13378_v56  ;;  %5523 = vmatprep.mubr.bf16.mxu1 %v19435_v50  ;;  %v15919_v62 = vpop.permute.xlu1 %6088  ;;  %v15925_v4 = vpop.permute.xlu0 %6729 }
 0x65b   : > { %4972 = vmax.xlane.f32.xlu1 %v4971_v18  ;;  %6789 = vmatprep.subr.bf16.mxu1 %v10726_v35 }
 0x65e   : > { %v15928_v33 = vpop.permute.xlu1 %6092  ;;  %v15934_v16 = vpop.permute.xlu0 %6733 }
 0x65f   : > { %4975 = vmax.xlane.f32.xlu1 %v4974_v3 }
 0x661   : > { %10676 = vmatmul.mubr.msk.bf16.gmra.mxu1 %vm4818_vm1, %v5434_v0  ;;  %7386 = vrot.lane.b32.xlu0 %v15617_v11, %s14587_s20  ;;  %v15962_v0 = vld [vmem:[#allocation2 + $0x20] sm:$0xff]  ;;  %s14434_s20 = sshll.u32 %s14591_s9, 4  ;;  %s14435_s20 = int_to_ptr.vmem [resolvable:$false] %s14434_s20 }
 0x662   : > { %5533 = vmatprep.mubr.bf16.mxu1 %v19435_v50  ;;  %v15937_v8 = vpop.permute.xlu1 %6727  ;;  %v15942_v26 = vpop.permute.xlu0 %6737  ;;  %p14437_p13 = scmp.lt.s32.totalorder %s19341_s11, %s14435_s20 }
 0x663   : > { %4978 = vmax.xlane.f32.xlu1 %v4977_v42 }
 0x665   : > { %8021 = vrot.lane.b32.xlu0 %v15587_v13, %s14588_s29 }
 0x666   : > { %v15948_v54 = vpop.permute.xlu1 %6731  ;;  %v15951_v63 = vpop.permute.xlu0 %7372 }
 0x669   : > { %10677 = vmatmul.mubr.msk.bf16.gmra.mxu1 %vm4818_vm1, %v5436_v38  ;;  %8025 = vrot.lane.b32.xlu0 %v15597_v55, %s14588_s29  ;;  %v10725_v38 = vcombine.low %v15854_v59, %v15856_v20 }
 0x66a   : > { %5543 = vmatprep.mubr.bf16.mxu1 %v19435_v50 }
 0x66d   : > { %8029 = vrot.lane.b32.xlu0 %v15607_v30, %s14588_s29 }
 0x671   : > { %10678 = vmatmul.mubr.msk.bf16.gmra.mxu1 %vm4818_vm1, %v5438_v27  ;;  %8033 = vrot.lane.b32.xlu0 %v15617_v11, %s14588_s29 }
 0x672   : > { %5553 = vmatprep.mubr.bf16.mxu1 %v19435_v50 }
 0x674   : > { %8019 = vrot.lane.b32.xlu1 %v15582_v48, %s14588_s29 }
 0x675   : > { %8668 = vrot.lane.b32.xlu0 %v15587_v13, %s14589_s13 }
 0x678   : > { %8023 = vrot.lane.b32.xlu1 %v15592_v32, %s14588_s29 }
 0x679   : > { %10679 = vmatmul.mubr.msk.bf16.gmra.mxu1 %vm4818_vm1, %v5440_v45  ;;  %8672 = vrot.lane.b32.xlu0 %v15597_v55, %s14589_s13  ;;  %v15964_v45 = vpop.permute.xlu0 %7376 }
 0x67a   : > { %5563 = vmatprep.mubr.bf16.mxu1 %v19435_v50 }
 0x67c   : > { %8027 = vrot.lane.b32.xlu1 %v15602_v41, %s14588_s29 }
 0x67d   : > { %8676 = vrot.lane.b32.xlu0 %v15607_v30, %s14589_s13 }
 0x680   : > { %8031 = vrot.lane.b32.xlu1 %v15612_v1, %s14588_s29  ;;  %s14436_s29 = scalar_lea.vmem %s14435_s20, 4096 }
 0x681   : > { %10680 = vmatmul.mubr.msk.bf16.gmra.mxu1 %vm4818_vm1, %v5442_v28  ;;  %8680 = vrot.lane.b32.xlu0 %v15617_v11, %s14589_s13  ;;  %p14438_p2 = scmp.lt.s32.totalorder %s14436_s29, %s14430_s24 }
 0x682   : > { %5573 = vmatprep.mubr.bf16.mxu1 %v19435_v50 }
 0x683   : > { %p14439_p11 = por %p14438_p2, %p14437_p13 }
 0x684   : > { %8666 = vrot.lane.b32.xlu1 %v15582_v48, %s14589_s13 }
 0x685   : > { %9315 = vrot.lane.b32.xlu0 %v15587_v13, %s14590_s10  ;;  %v15954_v13 = vpop.permute.xlu1 %6735  ;;  %p14440_p6 = pnand %p14439_p11, %p14433_p12 }
 0x688   : > { %8670 = vrot.lane.b32.xlu1 %v15592_v32, %s14589_s13 }
 0x689   : > { %10681 = vmatmul.mubr.msk.bf16.gmra.mxu1 %vm4818_vm1, %v5444_v25  ;;  %9319 = vrot.lane.b32.xlu0 %v15597_v55, %s14590_s10  ;;  %v15960_v55 = vld [vmem:[#allocation2 + $0x40] sm:$0xff]  ;;  %v15968_v56 = vpop.permute.xlu1 %6739 }
 0x68a   : > { %5583 = vmatprep.mubr.bf16.mxu1 %v19435_v50  ;;  %v10752_v35 = vcombine.high %v15960_v55, %v15962_v0 }
 0x68c   : > { %8674 = vrot.lane.b32.xlu1 %v15602_v41, %s14589_s13 }
 0x68d   : > { %v15979_v25 = vpop.permute.xlu1 %7374 }
 0x690   : > { %8678 = vrot.lane.b32.xlu1 %v15612_v1, %s14589_s13 }
 0x691   : > { %10682 = vmatmul.mubr.msk.bf16.gmra.mxu1 %vm4818_vm1, %v5446_v52  ;;  %v15985_v3 = vpop.permute.xlu1 %7378 }
 0x692   : > { %6160 = vmatprep.mubr.bf16.mxu1 %v19435_v50 }
 0x694   : > { %9313 = vrot.lane.b32.xlu1 %v15582_v48, %s14590_s10  ;;  %v15977_v48 = vpop.permute.xlu0 %7380 }
 0x698   : > { %9317 = vrot.lane.b32.xlu1 %v15592_v32, %s14590_s10 }
 0x699   : > { %10701 = vmatmul.mubr.msk.bf16.vlgmr.msra.gmra.mxu1 %vm4818_vm1, %v15890_v15 }
 0x69a   : > { %6790 = vmatpush1.bf16.msra.mxu1 %v10725_v38  ;;  %6170 = vmatprep.mubr.bf16.mxu1 %v19435_v50 }
 0x69b   : > { %7436 = vmatprep.subr.bf16.mxu1 %v10752_v35 }
 0x69f   : > { %v4961_v59 = vpop.xlane.xlu0 %4960 }
 0x6a0   : > { %v5006_v20 = vsub.f32 %v15770_v17, %v4961_v59  ;;  %v5007_v18 = vsub.f32 %v15766_v51, %v4961_v59 }
 0x6a1   : > { %10702 = vmatmul.mubr.msk.bf16.gmra.mxu1 %vm4818_vm1, %v6081_v61 }
 0x6a2   : > { %v5040_v27 = vmul.f32 1.442695, %v5006_v20  ;;  %v5042_v32 = vmul.f32 1.442695, %v5007_v18  ;;  %6180 = vmatprep.mubr.bf16.mxu1 %v19435_v50 }
 0x6a4   : > { %13534 = vpow2.f32 %v5040_v27 }
 0x6a5   : > { %13536 = vpow2.f32 %v5042_v32 }
 0x6a7   : > { %v4958_v15 = vpop.xlane.xlu1 %4957 }
 0x6a8   : > { %v5004_v28 = vsub.f32 %v15780_v29, %v4958_v15  ;;  %v5005_v42 = vsub.f32 %v15776_v23, %v4958_v15 }
 0x6a9   : > { %10703 = vmatmul.mubr.msk.bf16.gmra.mxu1 %vm4818_vm1, %v15898_v57 }
 0x6aa   : > { %v5036_v17 = vmul.f32 1.442695, %v5004_v28  ;;  %v5038_v51 = vmul.f32 1.442695, %v5005_v42  ;;  %6190 = vmatprep.mubr.bf16.mxu1 %v19435_v50 }
 0x6ab   : > { %v4964_v52 = vpop.xlane.xlu1 %4963 }
 0x6ac   : > { %13538 = vpow2.f32 %v5036_v17  ;;  %v5008_v61 = vsub.f32 %v15790_v46, %v4964_v52  ;;  %v5009_v38 = vsub.f32 %v15784_v40, %v4964_v52 }
 0x6ad   : > { %13540 = vpow2.f32 %v5038_v51 }
 0x6ae   : > { %v5044_v35 = vmul.f32 1.442695, %v5008_v61  ;;  %v5046_v59 = vmul.f32 1.442695, %v5009_v38 }
 0x6af   : > { %v4967_v20 = vpop.xlane.xlu1 %4966 }
 0x6b0   : > { %13542 = vpow2.f32 %v5044_v35  ;;  %v5010_v23 = vsub.f32 %v15802_v47, %v4967_v20  ;;  %v5011_v29 = vsub.f32 %v15796_v6, %v4967_v20  ;;  %v16016_v35 = vpop.permute.xlu0 %7382 }
 0x6b1   : > { %v13535_v57 = vpop.eup %13534  ;;  %13544 = vpow2.f32 %v5046_v59  ;;  %10704 = vmatmul.mubr.msk.bf16.gmra.mxu1 %vm4818_vm1, %v15912_v21 }
 0x6b2   : > { %v13537_v18 = vpop.eup %13536  ;;  %v5048_v27 = vmul.f32 1.442695, %v5010_v23  ;;  %v5050_v32 = vmul.f32 1.442695, %v5011_v29  ;;  %6200 = vmatprep.mubr.bf16.mxu1 %v19435_v50  ;;  %v10751_v23 = vcombine.low %v15960_v55, %v15962_v0 }
 0x6b3   : > { %v15999_v40 = vadd.f32 %v13537_v18, %v13535_v57 }
 0x6b4   : > { %13546 = vpow2.f32 %v5048_v27 }
 0x6b5   : > { %19643 = vst [vmem:[#allocation41_spill] sm:$0xff] %v15999_v40  ;;  %13548 = vpow2.f32 %v5050_v32 }
 0x6b9   : > { %v13539_v46 = vpop.eup %13538  ;;  %10705 = vmatmul.mubr.msk.bf16.gmra.mxu1 %vm4818_vm1, %v15904_v12 }
 0x6ba   : > { %v13541_v47 = vpop.eup %13540  ;;  %v5164_v6 = vpack.c.bf16 %v13535_v57, %v13539_v46  ;;  %6210 = vmatprep.mubr.bf16.mxu1 %v19435_v50 }
 0x6bb   : > { %v5165_v15 = vpack.c.bf16 %v13537_v18, %v13541_v47  ;;  %v16004_v28 = vadd.f32 %v13541_v47, %v13539_v46 }
 0x6bd   : > { %19644 = vst [vmem:[#allocation42_spill] sm:$0xff] %v16004_v28  ;;  %v13543_v21 = vpop.eup %13542  ;;  %5340 = vmatprep.mubr.bf16.mxu0 %v5165_v15 }
 0x6be   : > { %v13545_v42 = vpop.eup %13544  ;;  %5341 = vmatmul.mubr.bf16.vlgmr.msra.gmra.mxu0 %v5164_v6 }
 0x6bf   : > { %v16006_v17 = vadd.f32 %v13545_v42, %v13543_v21 }
 0x6c1   : > { %19645 = vst [vmem:[#allocation43_spill] sm:$0xff] %v16006_v17  ;;  %v13547_v51 = vpop.eup %13546  ;;  %10706 = vmatmul.mubr.msk.bf16.gmra.mxu1 %vm4818_vm1, %v15919_v62 }
 0x6c2   : > { %v13549_v52 = vpop.eup %13548  ;;  %v5166_v61 = vpack.c.bf16 %v13547_v51, %v13543_v21  ;;  %6220 = vmatprep.mubr.bf16.mxu1 %v19435_v50 }
 0x6c3   : > { %v5167_v12 = vpack.c.bf16 %v13549_v52, %v13545_v42  ;;  %v16011_v38 = vadd.f32 %v13549_v52, %v13547_v51 }
 0x6c5   : > { %19646 = vst [vmem:[#allocation44_spill] sm:$0xff] %v16011_v38  ;;  %5348 = vmatprep.mubr.bf16.mxu0 %v5167_v12 }
 0x6c6   : > { %5349 = vmatmul.mubr.bf16.gmra.mxu0 %v5166_v61 }
 0x6c9   : > { %10707 = vmatmul.mubr.msk.bf16.gmra.mxu1 %vm4818_vm1, %v15907_v22  ;;  %v13383_v22 = vld [vmem:[#allocation2 + $0x14] ss:$40 sps:$4 sm:$0xff]  }
 0x6ca   : > { %6230 = vmatprep.mubr.bf16.mxu1 %v19435_v50 }
 0x6d1   : > { %10708 = vmatmul.mubr.msk.bf16.gmra.mxu1 %vm4818_vm1, %v15928_v33  ;;  %v16028_v33 = vpop.permute.xlu1 %7384 }
 0x6d2   : > { %6807 = vmatprep.mubr.bf16.mxu1 %v19435_v50 }
 0x6d4   : > { %v4970_v62 = vpop.xlane.xlu0 %4969 }
 0x6d5   : > { %v5012_v59 = vsub.f32 %v15845_v49, %v4970_v62  ;;  %v5013_v20 = vsub.f32 %v15839_v60, %v4970_v62 }
 0x6d7   : > { %v5052_v29 = vmul.f32 1.442695, %v5012_v59  ;;  %v5054_v57 = vmul.f32 1.442695, %v5013_v20 }
 0x6d9   : > { %13550 = vpow2.f32 %v5052_v29  ;;  %10727 = vmatmul.mubr.msk.bf16.vlgmr.msra.gmra.mxu1 %vm4818_vm1, %v15916_v10 }
 0x6da   : > { %13552 = vpow2.f32 %v5054_v57  ;;  %6817 = vmatprep.mubr.bf16.mxu1 %v19435_v50  ;;  %7437 = vmatpush1.bf16.msra.mxu1 %v10751_v23 }
 0x6db   : > { %8083 = vmatprep.subr.bf16.mxu1 %v13383_v22 }
 0x6e1   : > { %10728 = vmatmul.mubr.msk.bf16.gmra.mxu1 %vm4818_vm1, %v15937_v8 }
 0x6e2   : > { %6827 = vmatprep.mubr.bf16.mxu1 %v19435_v50 }
 0x6e4   : > { %v4973_v60 = vpop.xlane.xlu1 %4972 }
 0x6e5   : > { %v5014_v49 = vsub.f32 %v15864_v36, %v4973_v60  ;;  %v5015_v55 = vsub.f32 %v15860_v58, %v4973_v60 }
 0x6e6   : > { %v13551_v0 = vpop.eup %13550 }
 0x6e7   : > { %v13553_v18 = vpop.eup %13552  ;;  %v5056_v10 = vmul.f32 1.442695, %v5014_v49  ;;  %v5058_v27 = vmul.f32 1.442695, %v5015_v55 }
 0x6e8   : > { %v4976_v32 = vpop.xlane.xlu1 %4975  ;;  %v16035_v46 = vadd.f32 %v13553_v18, %v13551_v0 }
 0x6e9   : > { %13554 = vpow2.f32 %v5056_v10  ;;  %10729 = vmatmul.mubr.msk.bf16.gmra.mxu1 %vm4818_vm1, %v15925_v4  ;;  %v5016_v8 = vsub.f32 %v15878_v39, %v4976_v32  ;;  %v5017_v47 = vsub.f32 %v15870_v53, %v4976_v32 }
 0x6ea   : > { %19647 = vst [vmem:[#allocation45_spill] sm:$0xff] %v16035_v46  ;;  %13556 = vpow2.f32 %v5058_v27  ;;  %6837 = vmatprep.mubr.bf16.mxu1 %v19435_v50 }
 0x6eb   : > { %v5060_v36 = vmul.f32 1.442695, %v5016_v8  ;;  %v5062_v58 = vmul.f32 1.442695, %v5017_v47 }
 0x6ec   : > { %v4979_v6 = vpop.xlane.xlu1 %4978 }
 0x6ed   : > { %13558 = vpow2.f32 %v5060_v36  ;;  %v5018_v15 = vsub.f32 %v15888_v2, %v4979_v6  ;;  %v5019_v21 = vsub.f32 %v15882_v5, %v4979_v6 }
 0x6ee   : > { %13560 = vpow2.f32 %v5062_v58 }
 0x6ef   : > { %v5064_v42 = vmul.f32 1.442695, %v5018_v15  ;;  %v5066_v51 = vmul.f32 1.442695, %v5019_v21 }
 0x6f1   : > { %13562 = vpow2.f32 %v5064_v42  ;;  %10730 = vmatmul.mubr.msk.bf16.gmra.mxu1 %vm4818_vm1, %v15948_v54 }
 0x6f2   : > { %13564 = vpow2.f32 %v5066_v51  ;;  %6847 = vmatprep.mubr.bf16.mxu1 %v19435_v50 }
 0x6f6   : > { %v13555_v53 = vpop.eup %13554 }
 0x6f7   : > { %v13557_v39 = vpop.eup %13556  ;;  %v5168_v4 = vpack.c.bf16 %v13555_v53, %v13551_v0 }
 0x6f8   : > { %v5169_v52 = vpack.c.bf16 %v13557_v39, %v13553_v18  ;;  %v16047_v61 = vadd.f32 %v13557_v39, %v13555_v53  ;;  %v13386_v39 = vld [vmem:[#allocation2 + $0x64] ss:$16 sps:$4 sm:$0xff]  }
 0x6f9   : > { %v12136_v12 = vpop.f32.mrf.mxu1  ;;  %10731 = vmatmul.mubr.msk.bf16.gmra.mxu1 %vm4818_vm1, %v15934_v16 }
 0x6fa   : > { %19648 = vst [vmem:[#allocation46_spill] sm:$0xff] %v16047_v61  ;;  %v13559_v5 = vpop.eup %13558  ;;  %5356 = vmatprep.mubr.bf16.mxu0 %v5169_v52  ;;  %6857 = vmatprep.mubr.bf16.mxu1 %v19435_v50 }
 0x6fb   : > { %v13561_v2 = vpop.eup %13560  ;;  %5357 = vmatmul.mubr.bf16.gmra.mxu0 %v5168_v4  ;;  %v12137_v54 = vpop.f32.mrf.mxu1 }
 0x6fc   : > { %v16052_v62 = vadd.f32 %v12137_v54, %v12136_v12  ;;  %v16054_v59 = vadd.f32 %v13561_v2, %v13559_v5 }
 0x6fd   : > { %v12139_v20 = vpop.f32.mrf.mxu1 }
 0x6fe   : > { %19649 = vst [vmem:[#allocation47_spill] sm:$0xff] %v16052_v62  ;;  %19650 = vst [vmem:[#allocation48_spill] sm:$0xff] %v16054_v59  ;;  %v13563_v23 = vpop.eup %13562 }
 0x6ff   : > { %v13565_v29 = vpop.eup %13564  ;;  %v12140_v57 = vpop.f32.mrf.mxu1  ;;  %v5170_v22 = vpack.c.bf16 %v13563_v23, %v13559_v5 }
 0x700   : > { %v16056_v60 = vadd.f32 %v12140_v57, %v12139_v20  ;;  %v5171_v49 = vpack.c.bf16 %v13565_v29, %v13561_v2  ;;  %v16058_v16 = vadd.f32 %v13565_v29, %v13563_v23  ;;  %v13387_v57 = vld [vmem:[#allocation3 + $0xf8] sm:$0xff]  }
 0x701   : > { %v12142_v55 = vpop.f32.mrf.mxu1  ;;  %10732 = vmatmul.mubr.msk.bf16.gmra.mxu1 %vm4818_vm1, %v15954_v13  ;;  %12160 = vmatprep.subr.bf16.mxu0 %v13387_v57 }
 0x702   : > { %19651 = vst [vmem:[#allocation49_spill] sm:$0xff] %v16056_v60  ;;  %19652 = vst [vmem:[#allocation50_spill] sm:$0xff] %v16058_v16  ;;  %5364 = vmatprep.mubr.bf16.mxu0 %v5171_v49  ;;  %6867 = vmatprep.mubr.bf16.mxu1 %v19435_v50  ;;  %v13388_v49 = vld [vmem:[#allocation3 + $0xb8] sm:$0xff]   ;;  %v8020_v60 = vpop.permute.xlu1 %8019 }
 0x703   : > { %5365 = vmatmul.mubr.bf16.gmra.mxu0 %v5170_v22  ;;  %v12143_v0 = vpop.f32.mrf.mxu1 }
 0x704   : > { %v16063_v18 = vadd.f32 %v12143_v0, %v12142_v55  ;;  %12161 = vmatpush3.bf16.msra.mxu0 %v13388_v49 }
 0x705   : > { %v12145_v10 = vpop.f32.mrf.mxu1 }
 0x706   : > { %19653 = vst [vmem:[#allocation51_spill] sm:$0xff] %v16063_v18  ;;  %v8024_v7 = vpop.permute.xlu1 %8023 }
 0x707   : > { %v12146_v27 = vpop.f32.mrf.mxu1 }
 0x708   : > { %v16065_v32 = vadd.f32 %v12146_v27, %v12145_v10 }
 0x709   : > { %v12148_v8 = vpop.f32.mrf.mxu1  ;;  %10733 = vmatmul.mubr.msk.bf16.gmra.mxu1 %vm4818_vm1, %v15942_v26  ;;  %v13381_v26 = vld [vmem:[#allocation2 + $0x10] ss:$40 sps:$4 sm:$0xff]  }
 0x70a   : > { %19654 = vst [vmem:[#allocation52_spill] sm:$0xff] %v16065_v32  ;;  %6877 = vmatprep.mubr.bf16.mxu1 %v19435_v50 }
 0x70b   : > { %v12149_v47 = vpop.f32.mrf.mxu1 }
 0x70c   : > { %v16070_v36 = vadd.f32 %v12149_v47, %v12148_v8  ;;  %v13389_v8 = vld [vmem:[#allocation3 + $0xf0] sm:$0xff]  }
 0x70d   : > { %v12151_v13 = vpop.f32.mrf.mxu1  ;;  %v13390_v47 = vld [vmem:[#allocation3 + $0xb0] sm:$0xff]   ;;  %12162 = vmatprep.subr.bf16.mxu0 %v13389_v8 }
 0x70e   : > { %19655 = vst [vmem:[#allocation53_spill] sm:$0xff] %v16070_v36  ;;  %12163 = vmatpush3.bf16.msra.mxu0 %v13390_v47 }
 0x70f   : > { %v12152_v58 = vpop.f32.mrf.mxu1 }
 0x710   : > { %v16072_v6 = vadd.f32 %v12152_v58, %v12151_v13 }
 0x711   : > { %v12154_v15 = vpop.f32.mrf.mxu1  ;;  %10734 = vmatmul.mubr.msk.bf16.gmra.mxu1 %vm4818_vm1, %v15968_v56 }
 0x712   : > { %19656 = vst [vmem:[#allocation54_spill] sm:$0xff] %v16072_v6  ;;  %7454 = vmatprep.mubr.bf16.mxu1 %v19435_v50 }
 0x713   : > { %v12155_v21 = vpop.f32.mrf.mxu1 }
 0x714   : > { %v16077_v42 = vadd.f32 %v12155_v21, %v12154_v15 }
 0x715   : > { %v12157_v51 = vpop.f32.mrf.mxu1 }
 0x716   : > { %19657 = vst [vmem:[#allocation55_spill] sm:$0xff] %v16077_v42 }
 0x717   : > { %v12158_v53 = vpop.f32.mrf.mxu1 }
 0x718   : > { %v16079_v4 = vadd.f32 %v12158_v53, %v12157_v51 }
 0x719   : > { %v5515_v52 = vpop.f32.mrf.mxu1  ;;  %10753 = vmatmul.mubr.msk.bf16.vlgmr.msra.gmra.mxu1 %vm4818_vm1, %v15951_v63 }
 0x71a   : > { %19658 = vst [vmem:[#allocation56_spill] sm:$0xff] %v16079_v4  ;;  %7464 = vmatprep.mubr.bf16.mxu1 %v19435_v50  ;;  %8084 = vmatpush1.bf16.msra.mxu1 %v13381_v26  ;;  %v16085_v56 = vadd.f32 %v5515_v52, %v15654_v44  ;;  %v13391_v26 = vld [vmem:[#allocation3 + $0xe8] sm:$0xff]   ;;  %v7387_v4 = vpop.permute.xlu0 %7386 }
 0x71b   : > { %v5517_v12 = vpop.f32.mrf.mxu1  ;;  %8730 = vmatprep.subr.bf16.mxu1 %v13386_v39  ;;  %v13392_v39 = vld [vmem:[#allocation3 + $0xa8] sm:$0xff]   ;;  %12164 = vmatprep.subr.bf16.mxu0 %v13391_v26 }
 0x71c   : > { %v16088_v5 = vadd.f32 %v5517_v12, %v15656_v14  ;;  %12165 = vmatpush3.bf16.msra.mxu0 %v13392_v39 }
 0x71d   : > { %v5519_v2 = vpop.f32.mrf.mxu1 }
 0x71e   : > { %v5594_v54 = vmax.f32 %v16085_v56, %v16088_v5  ;;  %v16093_v23 = vadd.f32 %v5519_v2, %v15654_v44  ;;  %v8022_v37 = vpop.permute.xlu0 %8021 }
 0x71f   : > { %v5521_v20 = vpop.f32.mrf.mxu1 }
 0x720   : > { %v16096_v63 = vadd.f32 %v5521_v20, %v15656_v14  ;;  %5595 = vmax.xlane.f32.xlu0 %v5594_v54  ;;  %v13393_v54 = vld [vmem:[#allocation3 + $0xe0] sm:$0xff]  }
 0x721   : > { %v5525_v29 = vpop.f32.mrf.mxu1  ;;  %10754 = vmatmul.mubr.msk.bf16.gmra.mxu1 %vm4818_vm1, %v15979_v25  ;;  %12166 = vmatprep.subr.bf16.mxu0 %v13393_v54 }
 0x722   : > { %v5597_v22 = vmax.f32 %v16093_v23, %v16096_v63  ;;  %7474 = vmatprep.mubr.bf16.mxu1 %v19435_v50  ;;  %v16104_v0 = vadd.f32 %v5525_v29, %v15654_v44  ;;  %v13394_v29 = vld [vmem:[#allocation3 + $0xa0] sm:$0xff]   ;;  %v8026_v16 = vpop.permute.xlu0 %8025 }
 0x723   : > { %v5527_v55 = vpop.f32.mrf.mxu1  ;;  %12167 = vmatpush3.bf16.msra.mxu0 %v13394_v29 }
 0x724   : > { %v16107_v10 = vadd.f32 %v5527_v55, %v15656_v14  ;;  %5598 = vmax.xlane.f32.xlu1 %v5597_v22 }
 0x725   : > { %v5529_v27 = vpop.f32.mrf.mxu1 }
 0x726   : > { %v5600_v25 = vmax.f32 %v16104_v0, %v16107_v10  ;;  %v16112_v58 = vadd.f32 %v5529_v27, %v15654_v44  ;;  %v13395_v27 = vld [vmem:[#allocation3 + $0xd8] sm:$0xff]  }
 0x727   : > { %v5531_v13 = vpop.f32.mrf.mxu1  ;;  %12168 = vmatprep.subr.bf16.mxu0 %v13395_v27 }
 0x728   : > { %v16115_v15 = vadd.f32 %v5531_v13, %v15656_v14  ;;  %5601 = vmax.xlane.f32.xlu1 %v5600_v25  ;;  %v13396_v25 = vld [vmem:[#allocation3 + $0x98] sm:$0xff]  }
 0x729   : > { %v5535_v21 = vpop.f32.mrf.mxu1  ;;  %10755 = vmatmul.mubr.msk.bf16.gmra.mxu1 %vm4818_vm1, %v15964_v45  ;;  %12169 = vmatpush3.bf16.msra.mxu0 %v13396_v25  ;;  %v13401_v25 = vld [vmem:[#allocation3 + $0xc0] sm:$0xff]  }
 0x72a   : > { %v5603_v51 = vmax.f32 %v16112_v58, %v16115_v15  ;;  %7484 = vmatprep.mubr.bf16.mxu1 %v19435_v50  ;;  %v16123_v52 = vadd.f32 %v5535_v21, %v15654_v44 }
 0x72b   : > { %v5537_v53 = vpop.f32.mrf.mxu1 }
 0x72c   : > { %v16126_v12 = vadd.f32 %v5537_v53, %v15656_v14  ;;  %5604 = vmax.xlane.f32.xlu0 %v5603_v51  ;;  %v13397_v51 = vld [vmem:[#allocation3 + $0xd0] sm:$0xff]  }
 0x72d   : > { %v5539_v2 = vpop.f32.mrf.mxu1  ;;  %v13398_v53 = vld [vmem:[#allocation3 + $0x90] sm:$0xff]   ;;  %12170 = vmatprep.subr.bf16.mxu0 %v13397_v51 }
 0x72e   : > { %v5606_v45 = vmax.f32 %v16123_v52, %v16126_v12  ;;  %v16131_v57 = vadd.f32 %v5539_v2, %v15654_v44  ;;  %12171 = vmatpush3.bf16.msra.mxu0 %v13398_v53 }
 0x72f   : > { %v5541_v20 = vpop.f32.mrf.mxu1 }
 0x730   : > { %v16134_v22 = vadd.f32 %v5541_v20, %v15656_v14  ;;  %5607 = vmax.xlane.f32.xlu1 %v5606_v45  ;;  %v13399_v20 = vld [vmem:[#allocation3 + $0xc8] sm:$0xff]  }
 0x731   : > { %v5545_v49 = vpop.f32.mrf.mxu1  ;;  %10756 = vmatmul.mubr.msk.bf16.gmra.mxu1 %vm4818_vm1, %v15985_v3  ;;  %12172 = vmatprep.subr.bf16.mxu0 %v13399_v20 }
 0x732   : > { %v5609_v55 = vmax.f32 %v16131_v57, %v16134_v22  ;;  %7494 = vmatprep.mubr.bf16.mxu1 %v19435_v50  ;;  %v16142_v47 = vadd.f32 %v5545_v49, %v15654_v44  ;;  %v13400_v49 = vld [vmem:[#allocation3 + $0x88] sm:$0xff]  }
 0x733   : > { %v5547_v8 = vpop.f32.mrf.mxu1  ;;  %12173 = vmatpush3.bf16.msra.mxu0 %v13400_v49 }
 0x734   : > { %v16145_v13 = vadd.f32 %v5547_v8, %v15656_v14  ;;  %5610 = vmax.xlane.f32.xlu0 %v5609_v55  ;;  %12174 = vmatprep.subr.bf16.mxu0 %v13401_v25 }
 0x735   : > { %v5549_v21 = vpop.f32.mrf.mxu1 }
 0x736   : > { %v5612_v3 = vmax.f32 %v16142_v47, %v16145_v13  ;;  %v16150_v39 = vadd.f32 %v5549_v21, %v15654_v44 }
 0x737   : > { %v5551_v26 = vpop.f32.mrf.mxu1 }
 0x738   : > { %v16153_v2 = vadd.f32 %v5551_v26, %v15656_v14  ;;  %5613 = vmax.xlane.f32.xlu1 %v5612_v3  ;;  %v13402_v3 = vld [vmem:[#allocation3 + $0x80] sm:$0xff]  }
 0x739   : > { %v5555_v45 = vpop.f32.mrf.mxu1  ;;  %10757 = vmatmul.mubr.msk.bf16.gmra.mxu1 %vm4818_vm1, %v15977_v48  ;;  %12175 = vmatpush3.bf16.msra.mxu0 %v13402_v3 }
 0x73a   : > { %v5615_v54 = vmax.f32 %v16150_v39, %v16153_v2  ;;  %7504 = vmatprep.mubr.bf16.mxu1 %v19435_v50  ;;  %v16161_v55 = vadd.f32 %v5555_v45, %v15654_v44 }
 0x73b   : > { %v5557_v29 = vpop.f32.mrf.mxu1 }
 0x73c   : > { %v16164_v27 = vadd.f32 %v5557_v29, %v15656_v14  ;;  %5616 = vmax.xlane.f32.xlu0 %v5615_v54 }
 0x73d   : > { %v5559_v8 = vpop.f32.mrf.mxu1 }
 0x73e   : > { %v5618_v48 = vmax.f32 %v16161_v55, %v16164_v27  ;;  %v16169_v51 = vadd.f32 %v5559_v8, %v15654_v44 }
 0x73f   : > { %v5561_v21 = vpop.f32.mrf.mxu1 }
 0x740   : > { %v16172_v26 = vadd.f32 %v5561_v21, %v15656_v14  ;;  %5619 = vmax.xlane.f32.xlu1 %v5618_v48 }
 0x741   : > { %v5565_v53 = vpop.f32.mrf.mxu1  ;;  %10758 = vmatmul.mubr.msk.bf16.gmra.mxu1 %vm4818_vm1, %v16016_v35 }
 0x742   : > { %v5621_v45 = vmax.f32 %v16169_v51, %v16172_v26  ;;  %7514 = vmatprep.mubr.bf16.mxu1 %v19435_v50  ;;  %v16180_v20 = vadd.f32 %v5565_v53, %v15654_v44 }
 0x743   : > { %v5567_v54 = vpop.f32.mrf.mxu1 }
 0x744   : > { %v16183_v29 = vadd.f32 %v5567_v54, %v15656_v14  ;;  %5622 = vmax.xlane.f32.xlu0 %v5621_v45 }
 0x745   : > { %v5569_v49 = vpop.f32.mrf.mxu1 }
 0x746   : > { %v5624_v8 = vmax.f32 %v16180_v20, %v16183_v29  ;;  %v16188_v35 = vadd.f32 %v5569_v49, %v15654_v44 }
 0x747   : > { %v5571_v48 = vpop.f32.mrf.mxu1 }
 0x748   : > { %v16191_v25 = vadd.f32 %v5571_v48, %v15656_v14  ;;  %5625 = vmax.xlane.f32.xlu1 %v5624_v8 }
 0x749   : > { %v5575_v21 = vpop.f32.mrf.mxu1  ;;  %10759 = vmatmul.mubr.msk.bf16.gmra.mxu1 %vm4818_vm1, %v16028_v33 }
 0x74a   : > { %19659 = vst [vmem:[#allocation57_spill] sm:$0xff] %v16191_v25  ;;  %v5627_v3 = vmax.f32 %v16188_v35, %v16191_v25  ;;  %7524 = vmatprep.mubr.bf16.mxu1 %v19435_v50  ;;  %v16199_v45 = vadd.f32 %v5575_v21, %v15654_v44 }
 0x74b   : > { %v5577_v53 = vpop.f32.mrf.mxu1 }
 0x74c   : > { %19660 = vst [vmem:[#allocation58_spill] sm:$0xff] %v16199_v45  ;;  %v16202_v54 = vadd.f32 %v5577_v53, %v15656_v14  ;;  %5628 = vmax.xlane.f32.xlu0 %v5627_v3  ;;  %v19664_v3 = vmov 0  }
 0x74d   : > { %v5579_v49 = vpop.f32.mrf.mxu1 }
 0x74e   : > { %19661 = vst [vmem:[#allocation59_spill] sm:$0xff] %v16202_v54  ;;  %v5630_v8 = vmax.f32 %v16199_v45, %v16202_v54  ;;  %v16207_v33 = vadd.f32 %v5579_v49, %v15654_v44 }
 0x74f   : > { %v5581_v48 = vpop.f32.mrf.mxu1 }
 0x750   : > { %19662 = vst [vmem:[#allocation60_spill] sm:$0xff] %v16207_v33  ;;  %v16210_v6 = vadd.f32 %v5581_v48, %v15656_v14  ;;  %5631 = vmax.xlane.f32.xlu1 %v5630_v8  ;;  %v13384_v48 = vld [vmem:[#allocation2 + $0x60] ss:$16 sps:$4 sm:$0xff]  }
 0x751   : > { %v5585_v50 = vpop.f32.mrf.mxu1  ;;  %10760 = vmatmul.mubr.msk.bf16.gmra.mxu1 %vm4818_vm1, %v7387_v4  ;;  %v13405_v4 = vld [vmem:[#allocation2 + $0x7c] ss:$-80 sps:$4 sm:$0xff]  }
 0x752   : > { %19663 = vst [vmem:[#allocation61_spill] sm:$0xff] %v16210_v6  ;;  %v5633_v21 = vmax.f32 %v16207_v33, %v16210_v6  ;;  %8101 = vmatprep.mubr.bf16.mxu1 %v19664_v3  ;;  %v16217_v42 = vadd.f32 %v5585_v50, %v15654_v44 }
 0x753   : > { %v5587_v53 = vpop.f32.mrf.mxu1 }
 0x754   : > { %19665 = vst [vmem:[#allocation62_spill] sm:$0xff] %v16217_v42  ;;  %v16220_v32 = vadd.f32 %v5587_v53, %v15656_v14  ;;  %5634 = vmax.xlane.f32.xlu0 %v5633_v21 }
 0x755   : > { %v5589_v49 = vpop.f32.mrf.mxu1 }
 0x756   : > { %19666 = vst [vmem:[#allocation63_spill] sm:$0xff] %v16220_v32  ;;  %v5636_v8 = vmax.f32 %v16217_v42, %v16220_v32  ;;  %v16225_v18 = vadd.f32 %v5589_v49, %v15654_v44 }
 0x757   : > { %v5591_v36 = vpop.f32.mrf.mxu1 }
 0x758   : > { %19667 = vst [vmem:[#allocation64_spill] sm:$0xff] %v16225_v18  ;;  %v16228_v62 = vadd.f32 %v5591_v36, %v15656_v14  ;;  %5637 = vmax.xlane.f32.xlu1 %v5636_v8 }
 0x759   : > { %v6162_v50 = vpop.f32.mrf.mxu1  ;;  %10779 = vmatmul.mubr.msk.bf16.vlgmr.msra.gmra.mxu1 %vm4818_vm1, %v8020_v60 }
 0x75a   : > { %19668 = vst [vmem:[#allocation65_spill] sm:$0xff] %v16228_v62  ;;  %v5639_v21 = vmax.f32 %v16225_v18, %v16228_v62  ;;  %8111 = vmatprep.mubr.bf16.mxu1 %v19664_v3  ;;  %8731 = vmatpush1.bf16.msra.mxu1 %v13384_v48  ;;  %v16235_v43 = vadd.f32 %v6162_v50, %v15654_v44 }
 0x75b   : > { %v6164_v53 = vpop.f32.mrf.mxu1  ;;  %9377 = vmatprep.subr.bf16.mxu1 %v13405_v4 }
 0x75c   : > { %19669 = vst [vmem:[#allocation66_spill] sm:$0xff] %v16235_v43  ;;  %v16238_v49 = vadd.f32 %v6164_v53, %v15656_v14  ;;  %5640 = vmax.xlane.f32.xlu0 %v5639_v21  ;;  %v13406_v21 = vld [vmem:[#allocation3 + $0x178] sm:$0xff]  }
 0x75d   : > { %v6166_v36 = vpop.f32.mrf.mxu1  ;;  %12224 = vmatprep.subr.bf16.mxu0 %v13406_v21 }
 0x75e   : > { %19670 = vst [vmem:[#allocation67_spill] sm:$0xff] %v16238_v49  ;;  %v6241_v8 = vmax.f32 %v16235_v43, %v16238_v49  ;;  %v16243_v19 = vadd.f32 %v6166_v36, %v15654_v44 }
 0x75f   : > { %v6168_v60 = vpop.f32.mrf.mxu1 }
 0x760   : > { %19671 = vst [vmem:[#allocation68_spill] sm:$0xff] %v16243_v19  ;;  %v16246_v48 = vadd.f32 %v6168_v60, %v15656_v14  ;;  %6242 = vmax.xlane.f32.xlu1 %v6241_v8 }
 0x761   : > { %v6172_v4 = vpop.f32.mrf.mxu1  ;;  %10780 = vmatmul.mubr.msk.bf16.gmra.mxu1 %vm4818_vm1, %v8022_v37 }
 0x762   : > { %19672 = vst [vmem:[#allocation69_spill] sm:$0xff] %v16246_v48  ;;  %v6244_v50 = vmax.f32 %v16243_v19, %v16246_v48  ;;  %8121 = vmatprep.mubr.bf16.mxu1 %v19664_v3  ;;  %v16253_v24 = vadd.f32 %v6172_v4, %v15654_v44 }
 0x763   : > { %v6174_v53 = vpop.f32.mrf.mxu1 }
 0x764   : > { %19673 = vst [vmem:[#allocation70_spill] sm:$0xff] %v16253_v24  ;;  %v16256_v36 = vadd.f32 %v6174_v53, %v15656_v14  ;;  %6245 = vmax.xlane.f32.xlu0 %v6244_v50 }
 0x765   : > { %v6176_v60 = vpop.f32.mrf.mxu1 }
 0x766   : > { %19674 = vst [vmem:[#allocation71_spill] sm:$0xff] %v16256_v36  ;;  %v6247_v8 = vmax.f32 %v16253_v24, %v16256_v36  ;;  %v16261_v31 = vadd.f32 %v6176_v60, %v15654_v44 }
 0x767   : > { %v6178_v37 = vpop.f32.mrf.mxu1 }
 0x768   : > { %19675 = vst [vmem:[#allocation72_spill] sm:$0xff] %v16261_v31  ;;  %v16264_v9 = vadd.f32 %v6178_v37, %v15656_v14  ;;  %6248 = vmax.xlane.f32.xlu1 %v6247_v8 }
 0x769   : > { %v16266_v4 = vpop.f32.mrf.mxu1  ;;  %10781 = vmatmul.mubr.msk.bf16.gmra.mxu1 %vm4818_vm1, %v8024_v7 }
 0x76a   : > { %19676 = vst [vmem:[#allocation73_spill] sm:$0xff] %v16264_v9  ;;  %v6250_v50 = vmax.f32 %v16261_v31, %v16264_v9  ;;  %8131 = vmatprep.mubr.bf16.mxu1 %v19664_v3 }
 0x76b   : > { %v6184_v21 = vpop.f32.mrf.mxu1 }
 0x76c   : > { %6251 = vmax.xlane.f32.xlu0 %v6250_v50  ;;  %v16331_v18 = vadd.f32 %v6184_v21, %v15656_v14 }
 0x76d   : > { %v6186_v53 = vpop.f32.mrf.mxu1 }
 0x76e   : > { %v16273_v60 = vadd.f32 %v6186_v53, %v15654_v44  ;;  %v8028_v53 = vpop.permute.xlu1 %8027  ;;  %19683 = vst [vmem:[#allocation80_spill] sm:$0xff] %v16331_v18 }
 0x76f   : > { %v6188_v34 = vpop.f32.mrf.mxu1 }
 0x770   : > { %19677 = vst [vmem:[#allocation74_spill] sm:$0xff] %v16273_v60  ;;  %v16276_v37 = vadd.f32 %v6188_v34, %v15656_v14  ;;  %v8030_v34 = vpop.permute.xlu0 %8029 }
 0x771   : > { %v16278_v8 = vpop.f32.mrf.mxu1  ;;  %10782 = vmatmul.mubr.msk.bf16.gmra.mxu1 %vm4818_vm1, %v8026_v16 }
 0x772   : > { %19678 = vst [vmem:[#allocation75_spill] sm:$0xff] %v16276_v37  ;;  %v6256_v7 = vmax.f32 %v16273_v60, %v16276_v37  ;;  %8141 = vmatprep.mubr.bf16.mxu1 %v19664_v3 }
 0x773   : > { %v6194_v59 = vpop.f32.mrf.mxu1 }
 0x774   : > { %6257 = vmax.xlane.f32.xlu0 %v6256_v7  ;;  %v8034_v28 = vpop.permute.xlu0 %8033  ;;  %v16346_v33 = vadd.f32 %v6194_v59, %v15656_v14 }
 0x775   : > { %v16284_v50 = vpop.f32.mrf.mxu1 }
 0x776   : > { %19685 = vst [vmem:[#allocation82_spill] sm:$0xff] %v16346_v33 }
 0x777   : > { %v16286_v61 = vpop.f32.mrf.mxu1 }
 0x778   : > { %v8669_v48 = vpop.permute.xlu0 %8668 }
 0x779   : > { %v6202_v46 = vpop.f32.mrf.mxu1  ;;  %9321 = vrot.lane.b32.xlu1 %v15602_v41, %s14590_s10  ;;  %10783 = vmatmul.mubr.msk.bf16.gmra.mxu1 %vm4818_vm1, %v8028_v53  ;;  %v8032_v53 = vpop.permute.xlu1 %8031 }
 0x77a   : > { %8151 = vmatprep.mubr.bf16.mxu1 %v19664_v3 }
 0x77b   : > { %v6204_v16 = vpop.f32.mrf.mxu1 }
 0x77d   : > { %v16292_v38 = vpop.f32.mrf.mxu1 }
 0x77e   : > { %v12112_v17 = vpop.f32.mrf.mxu0 }
 0x77f   : > { %v16294_v40 = vpop.f32.mrf.mxu1 }
 0x780   : > { %v12113_v7 = vpop.f32.mrf.mxu0 }
 0x781   : > { %v16296_v37 = vadd.f32 %v12113_v7, %v12112_v17  ;;  %v6212_v60 = vpop.f32.mrf.mxu1  ;;  %10784 = vmatmul.mubr.msk.bf16.gmra.mxu1 %vm4818_vm1, %v8030_v34  ;;  %v8667_v34 = vpop.permute.xlu1 %8666 }
 0x782   : > { %v16299_v9 = vpop.f32.mrf.mxu0  ;;  %8161 = vmatprep.mubr.bf16.mxu1 %v19664_v3 }
 0x783   : > { %19679 = vst [vmem:[#allocation76_spill] sm:$0xff] %v16296_v37  ;;  %19680 = vst [vmem:[#allocation77_spill] sm:$0xff] %v16299_v9  ;;  %v6214_v41 = vpop.f32.mrf.mxu1 }
 0x784   : > { %v16302_v31 = vpop.f32.mrf.mxu0 }
 0x785   : > { %19681 = vst [vmem:[#allocation78_spill] sm:$0xff] %v16302_v31  ;;  %v16304_v36 = vpop.f32.mrf.mxu1  ;;  %v16314_v31 = vpop.permute.xlu0 %8672 }
 0x786   : > { %v12118_v24 = vpop.f32.mrf.mxu0  ;;  %v8671_v43 = vpop.permute.xlu1 %8670 }
 0x787   : > { %v16306_v19 = vpop.f32.mrf.mxu1 }
 0x788   : > { %v12119_v11 = vpop.f32.mrf.mxu0 }
 0x789   : > { %v16308_v17 = vadd.f32 %v12119_v11, %v12118_v24  ;;  %v6222_v7 = vpop.f32.mrf.mxu1  ;;  %10785 = vmatmul.mubr.msk.bf16.gmra.mxu1 %vm4818_vm1, %v8032_v53  ;;  %v16324_v11 = vpop.permute.xlu0 %8676 }
 0x78a   : > { %9323 = vrot.lane.b32.xlu0 %v15607_v30, %s14590_s10  ;;  %8171 = vmatprep.mubr.bf16.mxu1 %v19664_v3  ;;  %v16328_v53 = vpop.permute.xlu1 %8674 }
 0x78b   : > { %19682 = vst [vmem:[#allocation79_spill] sm:$0xff] %v16308_v17  ;;  %v6224_v9 = vpop.f32.mrf.mxu1  ;;  %v13403_v17 = vld [vmem:[#allocation2 + $0x78] ss:$-80 sps:$4 sm:$0xff]  }
 0x78d   : > { %v16316_v37 = vpop.f32.mrf.mxu1  ;;  %v16335_v42 = vpop.permute.xlu0 %8680 }
 0x78e   : > { %v16350_v1 = vpop.permute.xlu1 %8678 }
 0x78f   : > { %v16318_v49 = vpop.f32.mrf.mxu1 }
 0x791   : > { %v16320_v62 = vpop.f32.mrf.mxu1  ;;  %10786 = vmatmul.mubr.msk.bf16.gmra.mxu1 %vm4818_vm1, %v8034_v28  ;;  %v16339_v28 = vadd.f32 %v16266_v4, %v15654_v44  ;;  %v16354_v4 = vadd.f32 %v16278_v8, %v15654_v44 }
 0x792   : > { %8748 = vmatprep.mubr.bf16.mxu1 %v19664_v3  ;;  %v16373_v8 = vpop.permute.xlu1 %9313 }
 0x793   : > { %v6234_v24 = vpop.f32.mrf.mxu1  ;;  %19684 = vst [vmem:[#allocation81_spill] sm:$0xff] %v16339_v28  ;;  %v6253_v54 = vmax.f32 %v16339_v28, %v16331_v18  ;;  %19686 = vst [vmem:[#allocation83_spill] sm:$0xff] %v16354_v4  ;;  %v6259_v25 = vmax.f32 %v16354_v4, %v16346_v33  ;;  %v16368_v18 = vadd.f32 %v6202_v46, %v15654_v44 }
 0x794   : > { %v16383_v33 = vadd.f32 %v6214_v41, %v15656_v14 }
 0x795   : > { %v16326_v30 = vpop.f32.mrf.mxu1  ;;  %19689 = vst [vmem:[#allocation86_spill] sm:$0xff] %v16368_v18 }
 0x796   : > { %19691 = vst [vmem:[#allocation88_spill] sm:$0xff] %v16383_v33 }
 0x797   : > { %v16333_v32 = vpop.f32.mrf.mxu1 }
 0x799   : > { %v16341_v6 = vpop.f32.mrf.mxu1  ;;  %10805 = vmatmul.mubr.msk.bf16.vlgmr.msra.gmra.mxu1 %vm4818_vm1, %v8667_v34  ;;  %v16358_v34 = vpop.permute.xlu0 %9315 }
 0x79a   : > { %8758 = vmatprep.mubr.bf16.mxu1 %v19664_v3  ;;  %9378 = vmatpush1.bf16.msra.mxu1 %v13403_v17  ;;  %19687 = vst [vmem:[#allocation84_spill] sm:$0xff] %v16358_v34  ;;  %v16361_v17 = vadd.f32 %v6204_v16, %v15656_v14 }
 0x79b   : > { %v6811_v21 = vpop.f32.mrf.mxu1 }
 0x79c   : > { %19688 = vst [vmem:[#allocation85_spill] sm:$0xff] %v16361_v17  ;;  %v6265_v16 = vmax.f32 %v16368_v18, %v16361_v17  ;;  %v16403_v17 = vadd.f32 %v6224_v9, %v15656_v14  ;;  %v16422_v9 = vadd.f32 %v16306_v19, %v15656_v14  ;;  %v16437_v19 = vadd.f32 %v16304_v36, %v15654_v44 }
 0x79d   : > { %v16356_v45 = vpop.f32.mrf.mxu1  ;;  %6254 = vmax.xlane.f32.xlu1 %v6253_v54  ;;  %v16378_v54 = vadd.f32 %v16286_v61, %v15656_v14  ;;  %v16385_v4 = vpop.permute.xlu0 %9319  ;;  %v16398_v61 = vadd.f32 %v16294_v40, %v15656_v14  ;;  %v16416_v40 = vadd.f32 %v6222_v7, %v15654_v44  ;;  %v16430_v7 = vadd.f32 %v6234_v24, %v15656_v14 }
 0x79e   : > { %19692 = vst [vmem:[#allocation89_spill] sm:$0xff] %v16385_v4  ;;  %19695 = vst [vmem:[#allocation92_spill] sm:$0xff] %v16403_v17  ;;  %v6274_v36 = vmax.f32 %v16437_v19, %v16422_v9 }
 0x79f   : > { %v16363_v59 = vpop.f32.mrf.mxu1  ;;  %19690 = vst [vmem:[#allocation87_spill] sm:$0xff] %v16378_v54  ;;  %19696 = vst [vmem:[#allocation93_spill] sm:$0xff] %v16422_v9 }
 0x7a1   : > { %v16370_v28 = vpop.f32.mrf.mxu1  ;;  %6260 = vmax.xlane.f32.xlu1 %v6259_v25  ;;  %10806 = vmatmul.mubr.msk.bf16.gmra.mxu1 %vm4818_vm1, %v8669_v48  ;;  %v16389_v25 = vadd.f32 %v16284_v50, %v15654_v44  ;;  %v16392_v48 = vadd.f32 %v6212_v60, %v15654_v44  ;;  %v16409_v60 = vpop.permute.xlu1 %9317 }
 0x7a2   : > { %8768 = vmatprep.mubr.bf16.mxu1 %v19664_v3 }
 0x7a3   : > { %v6821_v46 = vpop.f32.mrf.mxu1  ;;  %19693 = vst [vmem:[#allocation90_spill] sm:$0xff] %v16389_v25  ;;  %19694 = vst [vmem:[#allocation91_spill] sm:$0xff] %v16392_v48  ;;  %v6271_v41 = vmax.f32 %v16392_v48, %v16383_v33  ;;  %v6262_v50 = vmax.f32 %v16389_v25, %v16378_v54 }
 0x7a5   : > { %v16394_v34 = vpop.f32.mrf.mxu1  ;;  %6266 = vmax.xlane.f32.xlu1 %v6265_v16  ;;  %v16413_v16 = vadd.f32 %v16292_v38, %v15654_v44  ;;  %v6277_v38 = vmax.f32 %v16416_v40, %v16403_v17 }
 0x7a7   : > { %v16405_v18 = vpop.f32.mrf.mxu1 }
 0x7a9   : > { %v16418_v4 = vpop.f32.mrf.mxu1  ;;  %6263 = vmax.xlane.f32.xlu0 %v6262_v50  ;;  %v5596_v33 = vpop.xlane.xlu0 %5595  ;;  %6272 = vmax.xlane.f32.xlu1 %v6271_v41  ;;  %v6268_v41 = vmax.f32 %v16413_v16, %v16398_v61  ;;  %v16447_v50 = vadd.f32 %v16318_v49, %v15656_v14  ;;  %v16462_v49 = vadd.f32 %v16316_v37, %v15654_v44 }
 0x7aa   : > { %v5642_v48 = vsub.f32 %v16085_v56, %v5596_v33  ;;  %v5643_v54 = vsub.f32 %v16088_v5, %v5596_v33  ;;  %10807 = vmatmul.mubr.msk.bf16.gmra.mxu1 %vm4818_vm1, %v8671_v43  ;;  %v16441_v43 = vadd.f32 %v16320_v62, %v15654_v44  ;;  %v16455_v62 = vadd.f32 %v6811_v21, %v15656_v14 }
 0x7ab   : > { %v6831_v25 = vpop.f32.mrf.mxu1  ;;  %8778 = vmatprep.mubr.bf16.mxu1 %v19664_v3  ;;  %v6280_v37 = vmax.f32 %v16462_v49, %v16447_v50 }
 0x7ac   : > { %v5674_v56 = vmul.f32 1.442695, %v5642_v48  ;;  %v5676_v5 = vmul.f32 1.442695, %v5643_v54  ;;  %v6283_v54 = vmax.f32 %v16441_v43, %v16430_v7 }
 0x7ad   : > { %v16443_v33 = vpop.f32.mrf.mxu1  ;;  %6269 = vmax.xlane.f32.xlu0 %v6268_v41  ;;  %6278 = vmax.xlane.f32.xlu1 %v6277_v38  ;;  %v5599_v24 = vpop.xlane.xlu1 %5598 }
 0x7ae   : > { %13566 = vpow2.f32 %v5674_v56  ;;  %v5644_v17 = vsub.f32 %v16093_v23, %v5599_v24  ;;  %v5645_v48 = vsub.f32 %v16096_v63, %v5599_v24  ;;  %v16466_v23 = vadd.f32 %v16341_v6, %v15654_v44 }
 0x7af   : > { %13568 = vpow2.f32 %v5676_v5  ;;  %v16458_v38 = vpop.f32.mrf.mxu1  ;;  %v16470_v5 = vadd.f32 %v16333_v32, %v15656_v14 }
 0x7b0   : > { %v5678_v41 = vmul.f32 1.442695, %v5644_v17  ;;  %v5680_v56 = vmul.f32 1.442695, %v5645_v48  ;;  %v6888_v6 = vmax.f32 %v16466_v23, %v16455_v62  ;;  %v16480_v17 = vadd.f32 %v6821_v46, %v15656_v14 }
 0x7b1   : > { %v6839_v9 = vpop.f32.mrf.mxu1  ;;  %6275 = vmax.xlane.f32.xlu0 %v6274_v36  ;;  %6284 = vmax.xlane.f32.xlu1 %v6283_v54  ;;  %v5602_v21 = vpop.xlane.xlu1 %5601  ;;  %v16492_v54 = vadd.f32 %v16370_v28, %v15654_v44 }
 0x7b2   : > { %13570 = vpow2.f32 %v5678_v41  ;;  %10808 = vmatmul.mubr.msk.bf16.gmra.mxu1 %vm4818_vm1, %v16314_v31  ;;  %v5646_v63 = vsub.f32 %v16104_v0, %v5602_v21  ;;  %v5647_v24 = vsub.f32 %v16107_v10, %v5602_v21  ;;  %v16484_v36 = vpop.f32.mrf.mxu0  ;;  %v16488_v31 = vadd.f32 %v16326_v30, %v15654_v44 }
 0x7b3   : > { %13572 = vpow2.f32 %v5680_v56  ;;  %v6841_v32 = vpop.f32.mrf.mxu1  ;;  %8788 = vmatprep.mubr.bf16.mxu1 %v19664_v3  ;;  %19697 = vst [vmem:[#allocation94_spill] sm:$0xff] %v16484_v36  ;;  %v16498_v10 = vadd.f32 %v16363_v59, %v15656_v14  ;;  %v6894_v28 = vmax.f32 %v16492_v54, %v16480_v17  ;;  %v16506_v21 = vadd.f32 %v6831_v25, %v15656_v14 }
 0x7b4   : > { %v5682_v0 = vmul.f32 1.442695, %v5646_v63  ;;  %v5684_v48 = vmul.f32 1.442695, %v5647_v24  ;;  %v6286_v30 = vmax.f32 %v16488_v31, %v16470_v5  ;;  %v16513_v59 = vadd.f32 %v16356_v45, %v15654_v44 }
 0x7b5   : > { %v16494_v46 = vpop.f32.mrf.mxu1  ;;  %6281 = vmax.xlane.f32.xlu0 %v6280_v37  ;;  %v5605_v41 = vpop.xlane.xlu0 %5604  ;;  %6889 = vmax.xlane.f32.xlu1 %v6888_v6  ;;  %19698 = vst [vmem:[#allocation95_spill] sm:$0xff] %v16506_v21  ;;  %v16517_v24 = vadd.f32 %v16405_v18, %v15656_v14  ;;  %v16526_v45 = vadd.f32 %v6841_v32, %v15656_v14 }
 0x7b6   : > { %13574 = vpow2.f32 %v5682_v0  ;;  %v5648_v56 = vsub.f32 %v16112_v58, %v5605_v41  ;;  %v5649_v63 = vsub.f32 %v16115_v15, %v5605_v41  ;;  %v16509_v6 = vpop.f32.mrf.mxu0  ;;  %v16521_v0 = vadd.f32 %v16418_v4, %v15654_v44 }
 0x7b7   : > { %13576 = vpow2.f32 %v5684_v48  ;;  %v6845_v37 = vpop.f32.mrf.mxu1  ;;  %19699 = vst [vmem:[#allocation96_spill] sm:$0xff] %v16509_v6  ;;  %19700 = vst [vmem:[#allocation97_spill] sm:$0xff] %v16517_v24  ;;  %v6891_v41 = vmax.f32 %v16513_v59, %v16498_v10  ;;  %v16533_v4 = vadd.f32 %v16394_v34, %v15654_v44 }
 0x7b8   : > { %v5686_v58 = vmul.f32 1.442695, %v5648_v56  ;;  %v5688_v25 = vmul.f32 1.442695, %v5649_v63  ;;  %19701 = vst [vmem:[#allocation98_spill] sm:$0xff] %v16526_v45 }
 0x7b9   : > { %v6849_v48 = vpop.f32.mrf.mxu1  ;;  %6287 = vmax.xlane.f32.xlu0 %v6286_v30  ;;  %6895 = vmax.xlane.f32.xlu1 %v6894_v28  ;;  %v5608_v15 = vpop.xlane.xlu1 %5607  ;;  %19702 = vst [vmem:[#allocation99_spill] sm:$0xff] %v16533_v4  ;;  %v6900_v30 = vmax.f32 %v16521_v0, %v16506_v21  ;;  %v6897_v6 = vmax.f32 %v16533_v4, %v16517_v24 }
 0x7ba   : > { %13578 = vpow2.f32 %v5686_v58  ;;  %10809 = vmatmul.mubr.msk.bf16.gmra.mxu1 %vm4818_vm1, %v16328_v53  ;;  %v5650_v18 = vsub.f32 %v16123_v52, %v5608_v15  ;;  %v5651_v28 = vsub.f32 %v16126_v12, %v5608_v15  ;;  %v16540_v53 = vadd.f32 %v6839_v9, %v15654_v44 }
 0x7bb   : > { %v13567_v56 = vpop.eup %13566  ;;  %13580 = vpow2.f32 %v5688_v25  ;;  %v12124_v63 = vpop.f32.mrf.mxu0  ;;  %8798 = vmatprep.mubr.bf16.mxu1 %v19664_v3  ;;  %v16550_v12 = vadd.f32 %v16458_v38, %v15656_v14  ;;  %v16563_v38 = vadd.f32 %v16443_v33, %v15654_v44 }
 0x7bc   : > { %v6851_v32 = vpop.f32.mrf.mxu1  ;;  %v13569_v58 = vpop.eup %13568  ;;  %19703 = vst [vmem:[#allocation100_spill] sm:$0xff] %v16540_v53  ;;  %v5690_v52 = vmul.f32 1.442695, %v5650_v18  ;;  %v5692_v34 = vmul.f32 1.442695, %v5651_v28  ;;  %v6906_v9 = vmax.f32 %v16540_v53, %v16526_v45  ;;  %v16568_v53 = vadd.f32 %v6849_v48, %v15654_v44 }
 0x7bd   : > { %6892 = vmax.xlane.f32.xlu0 %v6891_v41  ;;  %v5611_v21 = vpop.xlane.xlu0 %5610  ;;  %6901 = vmax.xlane.f32.xlu1 %v6900_v30  ;;  %v16546_v25 = vadd.f32 %v13569_v58, %v13567_v56  ;;  %v12125_v18 = vpop.f32.mrf.mxu0  ;;  %v16556_v28 = vadd.f32 %v6851_v32, %v15656_v14 }
 0x7be   : > { %v16544_v36 = vpop.f32.mrf.mxu1  ;;  %13582 = vpow2.f32 %v5690_v52  ;;  %v5652_v15 = vsub.f32 %v16131_v57, %v5611_v21  ;;  %v5653_v41 = vsub.f32 %v16134_v22, %v5611_v21  ;;  %v16559_v30 = vadd.f32 %v12125_v18, %v12124_v63  ;;  %19708 = vst [vmem:[#allocation105_spill] sm:$0xff] %v16568_v53 }
 0x7bf   : > { %19704 = vst [vmem:[#allocation101_spill] sm:$0xff] %v16546_v25  ;;  %v13571_v24 = vpop.eup %13570  ;;  %13584 = vpow2.f32 %v5692_v34  ;;  %19705 = vst [vmem:[#allocation102_spill] sm:$0xff] %v16556_v28  ;;  %v16565_v52 = vpop.f32.mrf.mxu0  ;;  %v16573_v18 = vadd.f32 %v6845_v37, %v15656_v14 }
 0x7c0   : > { %19706 = vst [vmem:[#allocation103_spill] sm:$0xff] %v16559_v30  ;;  %v6855_v25 = vpop.f32.mrf.mxu1  ;;  %v13573_v4 = vpop.eup %13572  ;;  %v5694_v45 = vmul.f32 1.442695, %v5652_v15  ;;  %19707 = vst [vmem:[#allocation104_spill] sm:$0xff] %v16565_v52  ;;  %v5802_v57 = vpack.c.bf16 %v13571_v24, %v13567_v56  ;;  %v5696_v34 = vmul.f32 1.442695, %v5653_v41 }
 0x7c1   : > { %6898 = vmax.xlane.f32.xlu0 %v6897_v6  ;;  %6907 = vmax.xlane.f32.xlu1 %v6906_v9  ;;  %v5614_v22 = vpop.xlane.xlu1 %5613  ;;  %v5803_v21 = vpack.c.bf16 %v13573_v4, %v13569_v58  ;;  %v16570_v63 = vadd.f32 %v13573_v4, %v13571_v24  ;;  %19710 = vst [vmem:[#allocation107_spill] sm:$0xff] %v16573_v18  ;;  %v16575_v33 = vpop.f32.mrf.mxu0  ;;  %v13407_v56 = vld [vmem:[#allocation3 + $0x138] sm:$0xff]   ;;  %v13408_v4 = vld [vmem:[#allocation3 + $0x170] sm:$0xff]  }
 0x7c2   : > { %v6859_v32 = vpop.f32.mrf.mxu1  ;;  %13586 = vpow2.f32 %v5694_v45  ;;  %19711 = vst [vmem:[#allocation108_spill] sm:$0xff] %v16575_v33  ;;  %10810 = vmatmul.mubr.msk.bf16.gmra.mxu1 %vm4818_vm1, %v16324_v11  ;;  %v5654_v48 = vsub.f32 %v16142_v47, %v5614_v22  ;;  %v6903_v6 = vmax.f32 %v16563_v38, %v16550_v12  ;;  %v6912_v24 = vmax.f32 %v16568_v53, %v16556_v28  ;;  %v13423_v53 = vld [vmem:[#allocation3 + $0x1b8] sm:$0xff]  }
 0x7c3   : > { %19709 = vst [vmem:[#allocation106_spill] sm:$0xff] %v16570_v63  ;;  %v16580_v15 = vpop.eup %13574  ;;  %13588 = vpow2.f32 %v5696_v34  ;;  %v5655_v37 = vsub.f32 %v16145_v13, %v5614_v22  ;;  %5979 = vmatprep.mubr.bf16.mxu0 %v5803_v21  ;;  %8808 = vmatprep.mubr.bf16.mxu1 %v19664_v3  ;;  %v16590_v47 = vadd.f32 %v16494_v46, %v15654_v44  ;;  %v12130_v41 = vpop.f32.mrf.mxu0 }
 0x7c4   : > { %v6861_v45 = vpop.f32.mrf.mxu1  ;;  %v13577_v11 = vpop.eup %13576  ;;  %v16593_v58 = vadd.f32 %v6859_v32, %v15654_v44  ;;  %v5698_v9 = vmul.f32 1.442695, %v5654_v48  ;;  %5980 = vmatmul.mubr.bf16.vlgmr.msra.gmra.mxu0 %v5802_v57 }
 0x7c5   : > { %19712 = vst [vmem:[#allocation109_spill] sm:$0xff] %v16590_v47  ;;  %v16596_v34 = vadd.f32 %v6861_v45, %v15656_v14  ;;  %v5700_v13 = vmul.f32 1.442695, %v5655_v37  ;;  %6904 = vmax.xlane.f32.xlu0 %v6903_v6  ;;  %v5617_v21 = vpop.xlane.xlu0 %5616  ;;  %6913 = vmax.xlane.f32.xlu1 %v6912_v24  ;;  %v16599_v33 = vadd.f32 %v13577_v11, %v16580_v15  ;;  %v12131_v48 = vpop.f32.mrf.mxu0  ;;  %v13409_v45 = vld [vmem:[#allocation3 + $0x130] sm:$0xff]  }
 0x7c6   : > { %19713 = vst [vmem:[#allocation110_spill] sm:$0xff] %v16593_v58  ;;  %v6863_v22 = vpop.f32.mrf.mxu1  ;;  %v6909_v46 = vmax.f32 %v16590_v47, %v16573_v18  ;;  %13590 = vpow2.f32 %v5698_v9  ;;  %v5656_v57 = vsub.f32 %v16150_v39, %v5617_v21  ;;  %12225 = vmatpush3.bf16.msra.mxu0 %v13407_v56  ;;  %v16607_v6 = vadd.f32 %v6855_v25, %v15656_v14 }
 0x7c7   : > { %19714 = vst [vmem:[#allocation111_spill] sm:$0xff] %v16596_v34  ;;  %19715 = vst [vmem:[#allocation112_spill] sm:$0xff] %v16599_v33  ;;  %v6918_v32 = vmax.f32 %v16593_v58, %v16596_v34  ;;  %v13579_v37 = vpop.eup %13578  ;;  %13592 = vpow2.f32 %v5700_v13  ;;  %v5657_v24 = vsub.f32 %v16153_v2, %v5617_v21  ;;  %v16610_v52 = vadd.f32 %v12131_v48, %v12130_v41  ;;  %v13410_v34 = vld [vmem:[#allocation3 + $0x168] sm:$0xff]  }
 0x7c8   : > { %19716 = vst [vmem:[#allocation113_spill] sm:$0xff] %v16607_v6  ;;  %v6865_v30 = vpop.f32.mrf.mxu1  ;;  %12226 = vmatprep.subr.bf16.mxu0 %v13408_v4  ;;  %v13581_v9 = vpop.eup %13580  ;;  %v5702_v33 = vmul.f32 1.442695, %v5656_v57  ;;  %v5804_v63 = vpack.c.bf16 %v13579_v37, %v16580_v15  ;;  %v16615_v39 = vadd.f32 %v16544_v36, %v15654_v44  ;;  %v13411_v4 = vld [vmem:[#allocation3 + $0x128] sm:$0xff]  }
 0x7c9   : > { %19717 = vst [vmem:[#allocation114_spill] sm:$0xff] %v16610_v52  ;;  %v5704_v56 = vmul.f32 1.442695, %v5657_v24  ;;  %6910 = vmax.xlane.f32.xlu0 %v6909_v46  ;;  %6919 = vmax.xlane.f32.xlu1 %v6918_v32  ;;  %v5620_v25 = vpop.xlane.xlu1 %5619  ;;  %v5805_v2 = vpack.c.bf16 %v13581_v9, %v13577_v11  ;;  %v16619_v41 = vadd.f32 %v13581_v9, %v13579_v37  ;;  %v13413_v37 = vld [vmem:[#allocation3 + $0x120] sm:$0xff]   ;;  %v13417_v52 = vld [vmem:[#allocation3 + $0x110] sm:$0xff]  }
 0x7ca   : > { %19718 = vst [vmem:[#allocation115_spill] sm:$0xff] %v16615_v39  ;;  %v16617_v58 = vpop.f32.mrf.mxu1  ;;  %13594 = vpow2.f32 %v5702_v33  ;;  %10811 = vmatmul.mubr.msk.bf16.gmra.mxu1 %vm4818_vm1, %v16350_v1  ;;  %v5658_v15 = vsub.f32 %v16161_v55, %v5620_v25  ;;  %12227 = vmatpush3.bf16.msra.mxu0 %v13409_v45  ;;  %v6915_v36 = vmax.f32 %v16615_v39, %v16607_v6  ;;  %v13412_v1 = vld [vmem:[#allocation3 + $0x160] sm:$0xff]  }
 0x7cb   : > { %19719 = vst [vmem:[#allocation116_spill] sm:$0xff] %v16619_v41  ;;  %v13583_v13 = vpop.eup %13582  ;;  %13596 = vpow2.f32 %v5704_v56  ;;  %v16627_v21 = vadd.f32 %v6865_v30, %v15656_v14  ;;  %v5659_v11 = vsub.f32 %v16164_v27, %v5620_v25  ;;  %5987 = vmatprep.mubr.bf16.mxu0 %v5805_v2  ;;  %8818 = vmatprep.mubr.bf16.mxu1 %v19664_v3 }
 0x7cc   : > { %v16630_v46 = vpop.f32.mrf.mxu1  ;;  %v13585_v33 = vpop.eup %13584  ;;  %v5706_v55 = vmul.f32 1.442695, %v5658_v15  ;;  %5988 = vmatmul.mubr.bf16.gmra.mxu0 %v5804_v63  ;;  %12228 = vmatprep.subr.bf16.mxu0 %v13410_v34  ;;  %v16634_v32 = vadd.f32 %v6863_v22, %v15654_v44  ;;  %v13414_v15 = vld [vmem:[#allocation3 + $0x158] sm:$0xff]  }
 0x7cd   : > { %19720 = vst [vmem:[#allocation117_spill] sm:$0xff] %v16627_v21  ;;  %v5708_v57 = vmul.f32 1.442695, %v5659_v11  ;;  %6916 = vmax.xlane.f32.xlu0 %v6915_v36  ;;  %v5623_v30 = vpop.xlane.xlu0 %5622  ;;  %v16636_v45 = vadd.f32 %v13585_v33, %v13583_v13 }
 0x7ce   : > { %19721 = vst [vmem:[#allocation118_spill] sm:$0xff] %v16634_v32  ;;  %v6873_v48 = vpop.f32.mrf.mxu1  ;;  %13598 = vpow2.f32 %v5706_v55  ;;  %v5660_v27 = vsub.f32 %v16169_v51, %v5623_v30  ;;  %12229 = vmatpush3.bf16.msra.mxu0 %v13411_v4  ;;  %v6921_v9 = vmax.f32 %v16634_v32, %v16627_v21  ;;  %v5661_v63 = vsub.f32 %v16172_v26, %v5623_v30 }
 0x7cf   : > { %19722 = vst [vmem:[#allocation119_spill] sm:$0xff] %v16636_v45  ;;  %v13587_v24 = vpop.eup %13586  ;;  %13600 = vpow2.f32 %v5708_v57  ;;  %12230 = vmatprep.subr.bf16.mxu0 %v13412_v1  ;;  %v16643_v56 = vadd.f32 %v6873_v48, %v15654_v44 }
 0x7d0   : > { %v6875_v34 = vpop.f32.mrf.mxu1  ;;  %v13589_v22 = vpop.eup %13588  ;;  %v5710_v25 = vmul.f32 1.442695, %v5660_v27  ;;  %v5806_v51 = vpack.c.bf16 %v13587_v24, %v13583_v13  ;;  %v5712_v4 = vmul.f32 1.442695, %v5661_v63  ;;  %v13415_v13 = vld [vmem:[#allocation3 + $0x118] sm:$0xff]  }
 0x7d1   : > { %19723 = vst [vmem:[#allocation120_spill] sm:$0xff] %v16643_v56  ;;  %v16646_v2 = vadd.f32 %v6875_v34, %v15656_v14  ;;  %6922 = vmax.xlane.f32.xlu0 %v6921_v9  ;;  %v5626_v11 = vpop.xlane.xlu1 %5625  ;;  %v5807_v55 = vpack.c.bf16 %v13589_v22, %v13585_v33  ;;  %v16650_v57 = vadd.f32 %v13589_v22, %v13587_v24  ;;  %v13416_v33 = vld [vmem:[#allocation3 + $0x150] sm:$0xff]  }
 0x7d2   : > { %v16648_v36 = vpop.f32.mrf.mxu1  ;;  %13602 = vpow2.f32 %v5710_v25  ;;  %10812 = vmatmul.mubr.msk.bf16.gmra.mxu1 %vm4818_vm1, %v16335_v42  ;;  %v5662_v1 = vsub.f32 %v16180_v20, %v5626_v11  ;;  %12231 = vmatpush3.bf16.msra.mxu0 %v13413_v37  ;;  %v5663_v30 = vsub.f32 %v16183_v29, %v5626_v11  ;;  %v19727_v22 = vld [vmem:[#allocation57_spill] sm:$0xff] }
 0x7d3   : > { %19724 = vst [vmem:[#allocation121_spill] sm:$0xff] %v16646_v2  ;;  %19725 = vst [vmem:[#allocation122_spill] sm:$0xff] %v16650_v57  ;;  %v6927_v26 = vmax.f32 %v16643_v56, %v16646_v2  ;;  %v13591_v48 = vpop.eup %13590  ;;  %13604 = vpow2.f32 %v5712_v4  ;;  %5995 = vmatprep.mubr.bf16.mxu0 %v5807_v55  ;;  %9395 = vmatprep.mubr.bf16.mxu1 %v19664_v3 }
 0x7d4   : > { %v16658_v27 = vpop.f32.mrf.mxu1  ;;  %v13593_v24 = vpop.eup %13592  ;;  %v5714_v9 = vmul.f32 1.442695, %v5662_v1  ;;  %5996 = vmatmul.mubr.bf16.gmra.mxu0 %v5806_v51  ;;  %12232 = vmatprep.subr.bf16.mxu0 %v13414_v15  ;;  %v5716_v63 = vmul.f32 1.442695, %v5663_v30 }
 0x7d5   : > { %6928 = vmax.xlane.f32.xlu0 %v6927_v26  ;;  %v5629_v20 = vpop.xlane.xlu0 %5628  ;;  %v16663_v37 = vadd.f32 %v13593_v24, %v13591_v48 }
 0x7d6   : > { %v16661_v42 = vpop.f32.mrf.mxu1  ;;  %13606 = vpow2.f32 %v5714_v9  ;;  %v5664_v29 = vsub.f32 %v16188_v35, %v5629_v20  ;;  %12233 = vmatpush3.bf16.msra.mxu0 %v13415_v13  ;;  %v5665_v25 = vsub.f32 %v19727_v22, %v5629_v20  ;;  %v19729_v35 = vld [vmem:[#allocation58_spill] sm:$0xff] }
 0x7d7   : > { %19726 = vst [vmem:[#allocation123_spill] sm:$0xff] %v16663_v37  ;;  %v13595_v34 = vpop.eup %13594  ;;  %13608 = vpow2.f32 %v5716_v63  ;;  %12234 = vmatprep.subr.bf16.mxu0 %v13416_v33  ;;  %v19730_v63 = vld [vmem:[#allocation31_spill] sm:$0xff] }
 0x7d8   : > { %v16667_v4 = vpop.f32.mrf.mxu1  ;;  %v13597_v51 = vpop.eup %13596  ;;  %v5718_v15 = vmul.f32 1.442695, %v5664_v29  ;;  %v5808_v11 = vpack.c.bf16 %v13595_v34, %v13591_v48  ;;  %v5720_v55 = vmul.f32 1.442695, %v5665_v25  ;;  %v13418_v33 = vld [vmem:[#allocation3 + $0x148] sm:$0xff]  }
 0x7d9   : > { %v5632_v26 = vpop.xlane.xlu1 %5631  ;;  %v5809_v30 = vpack.c.bf16 %v13597_v51, %v13593_v24  ;;  %v16671_v9 = vadd.f32 %v13597_v51, %v13595_v34  ;;  %v19731_v48 = vld [vmem:[#allocation59_spill] sm:$0xff] }
 0x7da   : > { %v16669_v1 = vpop.f32.mrf.mxu1  ;;  %13610 = vpow2.f32 %v5718_v15  ;;  %10831 = vmatmul.mubr.msk.bf16.vlgmr.msra.gmra.mxu1 %vm4818_vm1, %v16373_v8  ;;  %v5666_v13 = vsub.f32 %v19729_v35, %v5632_v26  ;;  %9325 = vrot.lane.b32.xlu1 %v19730_v63, %s14590_s10  ;;  %v5667_v29 = vsub.f32 %v19731_v48, %v5632_v26  ;;  %v13419_v15 = vld [vmem:[#allocation3 + $0x108] sm:$0xff]   ;;  %v13420_v26 = vld [vmem:[#allocation3 + $0x140] sm:$0xff]   ;;  %v19734_v48 = vld [vmem:[#allocation61_spill] sm:$0xff] }
 0x7db   : > { %19728 = vst [vmem:[#allocation57_spill] sm:$0xff] %v16671_v9  ;;  %v13599_v20 = vpop.eup %13598  ;;  %13612 = vpow2.f32 %v5720_v55  ;;  %6003 = vmatprep.mubr.bf16.mxu0 %v5809_v30  ;;  %9405 = vmatprep.mubr.bf16.mxu1 %v19664_v3  ;;  %v19733_v55 = vld [vmem:[#allocation60_spill] sm:$0xff] }
 0x7dc   : > { %v16679_v22 = vpop.f32.mrf.mxu1  ;;  %v13601_v24 = vpop.eup %13600  ;;  %v5722_v34 = vmul.f32 1.442695, %v5666_v13  ;;  %6004 = vmatmul.mubr.bf16.gmra.mxu0 %v5808_v11  ;;  %v5724_v25 = vmul.f32 1.442695, %v5667_v29 }
 0x7dd   : > { %v5635_v51 = vpop.xlane.xlu0 %5634  ;;  %12235 = vmatpush3.bf16.msra.mxu0 %v13417_v52  ;;  %v16684_v35 = vadd.f32 %v13601_v24, %v13599_v20 }
 0x7de   : > { %v16682_v8 = vpop.f32.mrf.mxu1  ;;  %13614 = vpow2.f32 %v5722_v34  ;;  %v5668_v63 = vsub.f32 %v19733_v55, %v5635_v51  ;;  %12236 = vmatprep.subr.bf16.mxu0 %v13418_v33  ;;  %v5669_v9 = vsub.f32 %v19734_v48, %v5635_v51  ;;  %v13421_v34 = vld [vmem:[#allocation3 + $0x100] sm:$0xff]   ;;  %v19736_v33 = vld [vmem:[#allocation84_spill] sm:$0xff]  ;;  %v13422_v55 = vld [vmem:[#allocation3 + $0x1f8] sm:$0xff]  }
 0x7df   : > { %19732 = vst [vmem:[#allocation58_spill] sm:$0xff] %v16684_v35  ;;  %v13603_v30 = vpop.eup %13602  ;;  %13616 = vpow2.f32 %v5724_v25  ;;  %v19737_v25 = vld [vmem:[#allocation62_spill] sm:$0xff] }
 0x7e0   : > { %v16688_v37 = vpop.f32.mrf.mxu1  ;;  %v13605_v11 = vpop.eup %13604  ;;  %v5726_v13 = vmul.f32 1.442695, %v5668_v63  ;;  %v5810_v29 = vpack.c.bf16 %v13603_v30, %v13599_v20  ;;  %v5728_v57 = vmul.f32 1.442695, %v5669_v9  ;;  %v19738_v20 = vld [vmem:[#allocation63_spill] sm:$0xff] }
 0x7e1   : > { %v5638_v52 = vpop.xlane.xlu1 %5637  ;;  %v5811_v41 = vpack.c.bf16 %v13605_v11, %v13601_v24  ;;  %12237 = vmatpush3.bf16.msra.mxu0 %v13419_v15  ;;  %v16692_v35 = vadd.f32 %v13605_v11, %v13603_v30 }
 0x7e2   : > { %v16690_v45 = vpop.f32.mrf.mxu1  ;;  %13618 = vpow2.f32 %v5726_v13  ;;  %10832 = vmatmul.mubr.msk.bf16.gmra.mxu1 %vm4818_vm1, %v19736_v33  ;;  %v5670_v51 = vsub.f32 %v19737_v25, %v5638_v52  ;;  %12238 = vmatprep.subr.bf16.mxu0 %v13420_v26  ;;  %v5671_v9 = vsub.f32 %v19738_v20, %v5638_v52  ;;  %v19740_v26 = vld [vmem:[#allocation64_spill] sm:$0xff] }
 0x7e3   : > { %19735 = vst [vmem:[#allocation31_spill] sm:$0xff] %v16692_v35  ;;  %v13607_v48 = vpop.eup %13606  ;;  %13620 = vpow2.f32 %v5728_v57  ;;  %6011 = vmatprep.mubr.bf16.mxu0 %v5811_v41  ;;  %9415 = vmatprep.mubr.bf16.mxu1 %v19664_v3  ;;  %v19741_v41 = vld [vmem:[#allocation65_spill] sm:$0xff] }
 0x7e4   : > { %v16698_v63 = vpop.f32.mrf.mxu1  ;;  %v13609_v24 = vpop.eup %13608  ;;  %v5730_v15 = vmul.f32 1.442695, %v5670_v51  ;;  %6012 = vmatmul.mubr.bf16.gmra.mxu0 %v5810_v29  ;;  %v5732_v30 = vmul.f32 1.442695, %v5671_v9 }
 0x7e5   : > { %v5641_v13 = vpop.xlane.xlu0 %5640  ;;  %12239 = vmatpush3.bf16.msra.mxu0 %v13421_v34  ;;  %v16703_v33 = vadd.f32 %v13609_v24, %v13607_v48 }
 0x7e6   : > { %v16701_v11 = vpop.f32.mrf.mxu1  ;;  %13622 = vpow2.f32 %v5730_v15  ;;  %v5672_v57 = vsub.f32 %v19740_v26, %v5641_v13  ;;  %12288 = vmatprep.subr.bf16.mxu0 %v13422_v55  ;;  %v5673_v25 = vsub.f32 %v19741_v41, %v5641_v13  ;;  %v19743_v55 = vld [vmem:[#allocation66_spill] sm:$0xff]  ;;  %v19744_v13 = vld [vmem:[#allocation67_spill] sm:$0xff] }
 0x7e7   : > { %19739 = vst [vmem:[#allocation59_spill] sm:$0xff] %v16703_v33  ;;  %v13611_v52 = vpop.eup %13610  ;;  %13624 = vpow2.f32 %v5732_v30 }
 0x7e8   : > { %v16707_v20 = vpop.f32.mrf.mxu1  ;;  %v13613_v35 = vpop.eup %13612  ;;  %v5734_v51 = vmul.f32 1.442695, %v5672_v57  ;;  %v5812_v29 = vpack.c.bf16 %v13611_v52, %v13607_v48  ;;  %v5736_v9 = vmul.f32 1.442695, %v5673_v25  ;;  %v19745_v48 = vld [vmem:[#allocation32_spill] sm:$0xff] }
 0x7e9   : > { %v6243_v56 = vpop.xlane.xlu1 %6242  ;;  %v5813_v34 = vpack.c.bf16 %v13613_v35, %v13609_v24  ;;  %v16711_v21 = vadd.f32 %v13613_v35, %v13611_v52 }
 0x7ea   : > { %v16709_v2 = vpop.f32.mrf.mxu1  ;;  %13626 = vpow2.f32 %v5734_v51  ;;  %10833 = vmatmul.mubr.msk.bf16.gmra.mxu1 %vm4818_vm1, %v16409_v60  ;;  %v6289_v15 = vsub.f32 %v19743_v55, %v6243_v56  ;;  %v6290_v26 = vsub.f32 %v19744_v13, %v6243_v56  ;;  %v19747_v51 = vld [vmem:[#allocation68_spill] sm:$0xff] }
 0x7eb   : > { %19742 = vst [vmem:[#allocation60_spill] sm:$0xff] %v16711_v21  ;;  %v13615_v30 = vpop.eup %13614  ;;  %13628 = vpow2.f32 %v5736_v9  ;;  %6019 = vmatprep.mubr.bf16.mxu0 %v5813_v34  ;;  %9327 = vrot.lane.b32.xlu0 %v19745_v48, %s14590_s10  ;;  %v19748_v34 = vld [vmem:[#allocation69_spill] sm:$0xff] }
 0x7ec   : > { %v16717_v57 = vpop.f32.mrf.mxu1  ;;  %v13617_v41 = vpop.eup %13616  ;;  %v6321_v24 = vmul.f32 1.442695, %v6289_v15  ;;  %6020 = vmatmul.mubr.bf16.gmra.mxu0 %v5812_v29  ;;  %9425 = vmatprep.mubr.bf16.mxu1 %v19664_v3  ;;  %v6323_v35 = vmul.f32 1.442695, %v6290_v26 }
 0x7ed   : > { %v6246_v60 = vpop.xlane.xlu0 %6245  ;;  %v16724_v25 = vadd.f32 %v13617_v41, %v13615_v30 }
 0x7ee   : > { %v16722_v52 = vpop.f32.mrf.mxu1  ;;  %13630 = vpow2.f32 %v6321_v24  ;;  %v6291_v56 = vsub.f32 %v19747_v51, %v6246_v60  ;;  %v6292_v55 = vsub.f32 %v19748_v34, %v6246_v60  ;;  %v19750_v24 = vld [vmem:[#allocation89_spill] sm:$0xff]  ;;  %v19751_v51 = vld [vmem:[#allocation70_spill] sm:$0xff]  ;;  %v19752_v60 = vld [vmem:[#allocation71_spill] sm:$0xff] }
 0x7ef   : > { %19746 = vst [vmem:[#allocation61_spill] sm:$0xff] %v16724_v25  ;;  %v13619_v9 = vpop.eup %13618  ;;  %13632 = vpow2.f32 %v6323_v35 }
 0x7f0   : > { %v16728_v13 = vpop.f32.mrf.mxu1  ;;  %v13621_v48 = vpop.eup %13620  ;;  %v6325_v15 = vmul.f32 1.442695, %v6291_v56  ;;  %v5814_v29 = vpack.c.bf16 %v13619_v9, %v13615_v30  ;;  %v6327_v21 = vmul.f32 1.442695, %v6292_v55 }
 0x7f1   : > { %v6249_v26 = vpop.xlane.xlu1 %6248  ;;  %v5815_v32 = vpack.c.bf16 %v13621_v48, %v13617_v41  ;;  %v16732_v6 = vadd.f32 %v13621_v48, %v13619_v9 }
 0x7f2   : > { %v16730_v33 = vpop.f32.mrf.mxu1  ;;  %13634 = vpow2.f32 %v6325_v15  ;;  %10834 = vmatmul.mubr.msk.bf16.gmra.mxu1 %vm4818_vm1, %v19750_v24  ;;  %v6293_v35 = vsub.f32 %v19751_v51, %v6249_v26  ;;  %v6294_v34 = vsub.f32 %v19752_v60, %v6249_v26  ;;  %v19754_v24 = vld [vmem:[#allocation72_spill] sm:$0xff]  ;;  %v19755_v26 = vld [vmem:[#allocation73_spill] sm:$0xff] }
 0x7f3   : > { %19749 = vst [vmem:[#allocation84_spill] sm:$0xff] %v16732_v6  ;;  %v13623_v25 = vpop.eup %13622  ;;  %13636 = vpow2.f32 %v6327_v21  ;;  %6027 = vmatprep.mubr.bf16.mxu0 %v5815_v32  ;;  %9435 = vmatprep.mubr.bf16.mxu1 %v19664_v3 }
 0x7f4   : > { %v16738_v56 = vpop.f32.mrf.mxu1  ;;  %v13625_v30 = vpop.eup %13624  ;;  %v6329_v55 = vmul.f32 1.442695, %v6293_v35  ;;  %6028 = vmatmul.mubr.bf16.gmra.mxu0 %v5814_v29  ;;  %v6331_v41 = vmul.f32 1.442695, %v6294_v34  ;;  %v16751_v35 = vadd.f32 %v16630_v46, %v15656_v14  ;;  %v16764_v46 = vadd.f32 %v16658_v27, %v15656_v14  ;;  %v19760_v27 = vld [vmem:[#allocation74_spill] sm:$0xff] }
 0x7f5   : > { %v6252_v48 = vpop.xlane.xlu0 %6251  ;;  %v16743_v15 = vadd.f32 %v13625_v30, %v13623_v25  ;;  %v9322_v18 = vpop.permute.xlu1 %9321 }
 0x7f6   : > { %v16741_v9 = vpop.f32.mrf.mxu1  ;;  %13638 = vpow2.f32 %v6329_v55  ;;  %v6295_v51 = vsub.f32 %v19754_v24, %v6252_v48  ;;  %v6296_v32 = vsub.f32 %v19755_v26, %v6252_v48  ;;  %19756 = vst [vmem:[#allocation63_spill] sm:$0xff] %v16751_v35 }
 0x7f7   : > { %19753 = vst [vmem:[#allocation62_spill] sm:$0xff] %v16743_v15  ;;  %v13627_v21 = vpop.eup %13626  ;;  %13640 = vpow2.f32 %v6331_v41  ;;  %v16759_v41 = vadd.f32 %v16617_v58, %v15654_v44  ;;  %v16771_v58 = vadd.f32 %v16648_v36, %v15654_v44  ;;  %v16785_v36 = vadd.f32 %v16679_v22, %v15656_v14 }
 0x7f8   : > { %v16747_v60 = vpop.f32.mrf.mxu1  ;;  %v13629_v6 = vpop.eup %13628  ;;  %v6333_v29 = vmul.f32 1.442695, %v6295_v51  ;;  %v5816_v34 = vpack.c.bf16 %v13627_v21, %v13623_v25  ;;  %v6335_v39 = vmul.f32 1.442695, %v6296_v32 }
 0x7f9   : > { %v5817_v55 = vpack.c.bf16 %v13629_v6, %v13625_v30  ;;  %v16755_v15 = vadd.f32 %v13629_v6, %v13627_v21  ;;  %19758 = vst [vmem:[#allocation65_spill] sm:$0xff] %v16759_v41  ;;  %v6924_v6 = vmax.f32 %v16759_v41, %v16751_v35  ;;  %v19761_v21 = vld [vmem:[#allocation75_spill] sm:$0xff] }
 0x7fa   : > { %v16753_v47 = vpop.f32.mrf.mxu1  ;;  %13642 = vpow2.f32 %v6333_v29  ;;  %10835 = vmatmul.mubr.msk.bf16.gmra.mxu1 %vm4818_vm1, %v9322_v18  ;;  %v6930_v29 = vmax.f32 %v16771_v58, %v16764_v46 }
 0x7fb   : > { %19757 = vst [vmem:[#allocation64_spill] sm:$0xff] %v16755_v15  ;;  %v13631_v48 = vpop.eup %13630  ;;  %13644 = vpow2.f32 %v6335_v39  ;;  %6035 = vmatprep.mubr.bf16.mxu0 %v5817_v55  ;;  %9445 = vmatprep.mubr.bf16.mxu1 %v19664_v3 }
 0x7fc   : > { %v7498_v25 = vpop.f32.mrf.mxu1  ;;  %v13633_v30 = vpop.eup %13632  ;;  %6036 = vmatmul.mubr.bf16.gmra.mxu0 %v5816_v34 }
 0x7fd   : > { %v6258_v24 = vpop.xlane.xlu0 %6257  ;;  %v16775_v51 = vadd.f32 %v13633_v30, %v13631_v48 }
 0x7fe   : > { %v16773_v18 = vpop.f32.mrf.mxu1  ;;  %v6299_v39 = vsub.f32 %v19760_v27, %v6258_v24  ;;  %v6300_v26 = vsub.f32 %v19761_v21, %v6258_v24  ;;  %6925 = vmax.xlane.f32.xlu1 %v6924_v6  ;;  %v16791_v6 = vadd.f32 %v16669_v1, %v15654_v44  ;;  %v13424_v21 = vld [vmem:[#allocation3 + $0x1f0] sm:$0xff]  }
 0x7ff   : > { %19759 = vst [vmem:[#allocation66_spill] sm:$0xff] %v16775_v51  ;;  %v13635_v32 = vpop.eup %13634 }
 0x800   : > { %v16781_v55 = vpop.f32.mrf.mxu1  ;;  %v13637_v34 = vpop.eup %13636  ;;  %v6341_v15 = vmul.f32 1.442695, %v6299_v39  ;;  %v6343_v41 = vmul.f32 1.442695, %v6300_v26  ;;  %v6449_v35 = vpack.c.bf16 %v13635_v32, %v13631_v48  ;;  %v16796_v39 = vadd.f32 %v16667_v4, %v15656_v14 }
 0x801   : > { %v9324_v28 = vpop.permute.xlu0 %9323  ;;  %v6450_v27 = vpack.c.bf16 %v13637_v34, %v13633_v30  ;;  %v16787_v24 = vadd.f32 %v13637_v34, %v13635_v32  ;;  %v7535_v1 = vmax.f32 %v16791_v6, %v16785_v36  ;;  %v16815_v32 = vadd.f32 %v16682_v8, %v15654_v44 }
 0x802   : > { %v7506_v51 = vpop.f32.mrf.mxu1  ;;  %13646 = vpow2.f32 %v6341_v15  ;;  %6931 = vmax.xlane.f32.xlu1 %v6930_v29  ;;  %10836 = vmatmul.mubr.msk.bf16.gmra.mxu1 %vm4818_vm1, %v9324_v28  ;;  %19763 = vst [vmem:[#allocation32_spill] sm:$0xff] %v16796_v39  ;;  %v16803_v15 = vadd.f32 %v16688_v37, %v15656_v14  ;;  %v16807_v28 = vadd.f32 %v16661_v42, %v15654_v44  ;;  %v13426_v42 = vld [vmem:[#allocation3 + $0x1e8] sm:$0xff]  }
 0x803   : > { %19762 = vst [vmem:[#allocation67_spill] sm:$0xff] %v16787_v24  ;;  %v13639_v22 = vpop.eup %13638  ;;  %13648 = vpow2.f32 %v6343_v41  ;;  %6626 = vmatprep.mubr.bf16.mxu0 %v6450_v27  ;;  %9455 = vmatprep.mubr.bf16.mxu1 %v19664_v3  ;;  %v13425_v41 = vld [vmem:[#allocation3 + $0x1b0] sm:$0xff]   ;;  %v16825_v27 = vadd.f32 %v16698_v63, %v15656_v14  ;;  %v16828_v8 = vadd.f32 %v7498_v25, %v15656_v14  ;;  %v13428_v25 = vld [vmem:[#allocation3 + $0x1e0] sm:$0xff]  }
 0x804   : > { %v7508_v48 = vpop.f32.mrf.mxu1  ;;  %v13641_v30 = vpop.eup %13640  ;;  %19764 = vst [vmem:[#allocation68_spill] sm:$0xff] %v16803_v15  ;;  %6627 = vmatmul.mubr.bf16.vlgmr.msra.gmra.mxu0 %v6449_v35  ;;  %19765 = vst [vmem:[#allocation69_spill] sm:$0xff] %v16807_v28  ;;  %v6933_v37 = vmax.f32 %v16807_v28, %v16796_v39  ;;  %v16834_v28 = vadd.f32 %v16690_v45, %v15654_v44 }
 0x805   : > { %12289 = vmatpush3.bf16.msra.mxu0 %v13423_v53  ;;  %v16811_v26 = vadd.f32 %v13641_v30, %v13639_v22  ;;  %v7538_v53 = vmax.f32 %v16815_v32, %v16803_v15  ;;  %v16838_v15 = vadd.f32 %v16753_v47, %v15654_v44 }
 0x806   : > { %v16809_v4 = vpop.f32.mrf.mxu1  ;;  %7536 = vmax.xlane.f32.xlu1 %v7535_v1  ;;  %12290 = vmatprep.subr.bf16.mxu0 %v13424_v21 }
 0x807   : > { %19766 = vst [vmem:[#allocation89_spill] sm:$0xff] %v16811_v26  ;;  %v13643_v29 = vpop.eup %13642  ;;  %v13427_v26 = vld [vmem:[#allocation3 + $0x1a8] sm:$0xff]   ;;  %v7559_v45 = vmax.f32 %v16838_v15, %v16828_v8 }
 0x808   : > { %v16819_v35 = vpop.f32.mrf.mxu1  ;;  %v13645_v34 = vpop.eup %13644  ;;  %v6451_v1 = vpack.c.bf16 %v13643_v29, %v13639_v22  ;;  %v7541_v22 = vmax.f32 %v16834_v28, %v16825_v27 }
 0x809   : > { %v6452_v24 = vpack.c.bf16 %v13645_v34, %v13641_v30  ;;  %12291 = vmatpush3.bf16.msra.mxu0 %v13425_v41  ;;  %v16830_v39 = vadd.f32 %v13645_v34, %v13643_v29  ;;  %v16844_v30 = vadd.f32 %v16707_v20, %v15656_v14  ;;  %v16849_v41 = vadd.f32 %v7508_v48, %v15656_v14  ;;  %v13430_v48 = vld [vmem:[#allocation3 + $0x1d8] sm:$0xff]  }
 0x80a   : > { %v7516_v21 = vpop.f32.mrf.mxu1  ;;  %6934 = vmax.xlane.f32.xlu0 %v6933_v37  ;;  %7539 = vmax.xlane.f32.xlu1 %v7538_v53  ;;  %v16855_v29 = vadd.f32 %v16701_v11, %v15654_v44  ;;  %v16858_v37 = vadd.f32 %v7506_v51, %v15654_v44  ;;  %v16870_v11 = vadd.f32 %v16717_v57, %v15656_v14 }
 0x80b   : > { %19767 = vst [vmem:[#allocation70_spill] sm:$0xff] %v16830_v39  ;;  %6634 = vmatprep.mubr.bf16.mxu0 %v6452_v24  ;;  %12292 = vmatprep.subr.bf16.mxu0 %v13426_v42  ;;  %19768 = vst [vmem:[#allocation71_spill] sm:$0xff] %v16844_v30  ;;  %v13429_v24 = vld [vmem:[#allocation3 + $0x1a0] sm:$0xff]   ;;  %v16886_v57 = vadd.f32 %v7516_v21, %v15654_v44 }
 0x80c   : > { %v7518_v63 = vpop.f32.mrf.mxu1  ;;  %6635 = vmatmul.mubr.bf16.gmra.mxu0 %v6451_v1  ;;  %19769 = vst [vmem:[#allocation72_spill] sm:$0xff] %v16870_v11  ;;  %v7565_v51 = vmax.f32 %v16858_v37, %v16849_v41 }
 0x80d   : > { %12293 = vmatpush3.bf16.msra.mxu0 %v13427_v26  ;;  %v7544_v26 = vmax.f32 %v16855_v29, %v16844_v30  ;;  %v16875_v53 = vadd.f32 %v7518_v63, %v15656_v14  ;;  %v13432_v63 = vld [vmem:[#allocation3 + $0x1d0] sm:$0xff]   ;;  %v16892_v30 = vadd.f32 %v16728_v13, %v15656_v14 }
 0x80e   : > { %v16851_v47 = vpop.f32.mrf.mxu1  ;;  %7560 = vmax.xlane.f32.xlu0 %v7559_v45  ;;  %7542 = vmax.xlane.f32.xlu1 %v7541_v22  ;;  %v13431_v22 = vld [vmem:[#allocation3 + $0x198] sm:$0xff]   ;;  %v16883_v45 = vadd.f32 %v16709_v2, %v15654_v44 }
 0x80f   : > { %v16860_v20 = vpop.eup %13646  ;;  %12294 = vmatprep.subr.bf16.mxu0 %v13428_v25  ;;  %19770 = vst [vmem:[#allocation73_spill] sm:$0xff] %v16875_v53  ;;  %19773 = vst [vmem:[#allocation124_spill] sm:$0xff] %v16892_v30 }
 0x810   : > { %v16862_v42 = vpop.f32.mrf.mxu1  ;;  %v16864_v34 = vpop.eup %13648  ;;  %19772 = vst [vmem:[#allocation75_spill] sm:$0xff] %v16883_v45 }
 0x811   : > { %12295 = vmatpush3.bf16.msra.mxu0 %v13429_v24  ;;  %v16879_v25 = vadd.f32 %v16864_v34, %v16860_v20  ;;  %v7547_v24 = vmax.f32 %v16883_v45, %v16870_v11  ;;  %v13434_v11 = vld [vmem:[#allocation3 + $0x1c8] sm:$0xff]   ;;  %v16912_v45 = vadd.f32 %v16738_v56, %v15656_v14  ;;  %v16924_v56 = vadd.f32 %v16747_v60, %v15656_v14  ;;  %v13438_v60 = vld [vmem:[#allocation3 + $0x278] sm:$0xff]  }
 0x812   : > { %v7526_v1 = vpop.f32.mrf.mxu1  ;;  %7566 = vmax.xlane.f32.xlu0 %v7565_v51  ;;  %7545 = vmax.xlane.f32.xlu1 %v7544_v26  ;;  %v13433_v26 = vld [vmem:[#allocation3 + $0x190] sm:$0xff]  }
 0x813   : > { %19771 = vst [vmem:[#allocation74_spill] sm:$0xff] %v16879_v25  ;;  %12296 = vmatprep.subr.bf16.mxu0 %v13430_v48  ;;  %v7571_v25 = vmax.f32 %v16886_v57, %v16875_v53  ;;  %v16903_v48 = vadd.f32 %v16722_v52, %v15654_v44  ;;  %v16906_v51 = vadd.f32 %v7526_v1, %v15654_v44  ;;  %19775 = vst [vmem:[#allocation126_spill] sm:$0xff] %v16912_v45  ;;  %v13435_v53 = vld [vmem:[#allocation3 + $0x188] sm:$0xff]  }
 0x814   : > { %v7528_v39 = vpop.f32.mrf.mxu1  ;;  %v16918_v1 = vadd.f32 %v16730_v33, %v15654_v44  ;;  %19777 = vst [vmem:[#allocation128_spill] sm:$0xff] %v16924_v56 }
 0x815   : > { %v16897_v2 = vadd.f32 %v7528_v39, %v15656_v14  ;;  %12297 = vmatpush3.bf16.msra.mxu0 %v13431_v22  ;;  %19774 = vst [vmem:[#allocation125_spill] sm:$0xff] %v16903_v48  ;;  %v7550_v39 = vmax.f32 %v16903_v48, %v16892_v30 }
 0x816   : > { %v16899_v21 = vpop.f32.mrf.mxu1  ;;  %7548 = vmax.xlane.f32.xlu1 %v7547_v24  ;;  %7572 = vmax.xlane.f32.xlu0 %v7571_v25  ;;  %19776 = vst [vmem:[#allocation127_spill] sm:$0xff] %v16918_v1  ;;  %v13436_v25 = vld [vmem:[#allocation3 + $0x1c0] sm:$0xff]   ;;  %v7553_v24 = vmax.f32 %v16918_v1, %v16912_v45 }
 0x817   : > { %12298 = vmatprep.subr.bf16.mxu0 %v13432_v63  ;;  %v7577_v22 = vmax.f32 %v16906_v51, %v16897_v2 }
 0x818   : > { %v7532_v13 = vpop.f32.mrf.mxu1 }
 0x819   : > { %12299 = vmatpush3.bf16.msra.mxu0 %v13433_v26 }
 0x81a   : > { %v8103_v52 = vpop.f32.mrf.mxu1  ;;  %7551 = vmax.xlane.f32.xlu1 %v7550_v39  ;;  %7578 = vmax.xlane.f32.xlu0 %v7577_v22  ;;  %v13437_v39 = vld [vmem:[#allocation3 + $0x180] sm:$0xff]   ;;  %v16934_v22 = vadd.f32 %v16741_v9, %v15654_v44  ;;  %v16946_v9 = vadd.f32 %v16773_v18, %v15654_v44  ;;  %v16962_v18 = vadd.f32 %v16809_v4, %v15654_v44 }
 0x81b   : > { %12300 = vmatprep.subr.bf16.mxu0 %v13434_v11  ;;  %v16927_v30 = vadd.f32 %v8103_v52, %v15654_v44  ;;  %v16976_v4 = vadd.f32 %v16851_v47, %v15654_v44  ;;  %v19794_v47 = vld [vmem:[#allocation82_spill] sm:$0xff] }
 0x81c   : > { %v8105_v63 = vpop.f32.mrf.mxu1  ;;  %19780 = vst [vmem:[#allocation131_spill] sm:$0xff] %v16934_v22  ;;  %v7556_v52 = vmax.f32 %v16934_v22, %v16924_v56  ;;  %19782 = vst [vmem:[#allocation133_spill] sm:$0xff] %v16946_v9  ;;  %v16952_v56 = vadd.f32 %v16819_v35, %v15656_v14  ;;  %v16968_v35 = vadd.f32 %v16862_v42, %v15656_v14 }
 0x81d   : > { %19778 = vst [vmem:[#allocation129_spill] sm:$0xff] %v16927_v30  ;;  %v16930_v26 = vadd.f32 %v8105_v63, %v15656_v14  ;;  %12301 = vmatpush3.bf16.msra.mxu0 %v13435_v53  ;;  %v16942_v63 = vadd.f32 %v16781_v55, %v15656_v14  ;;  %19786 = vst [vmem:[#allocation137_spill] sm:$0xff] %v16962_v18 }
 0x81e   : > { %v8107_v33 = vpop.f32.mrf.mxu1  ;;  %7554 = vmax.xlane.f32.xlu1 %v7553_v24  ;;  %12302 = vmatprep.subr.bf16.mxu0 %v13436_v25  ;;  %19783 = vst [vmem:[#allocation134_spill] sm:$0xff] %v16952_v56  ;;  %19787 = vst [vmem:[#allocation138_spill] sm:$0xff] %v16968_v35  ;;  %v7574_v42 = vmax.f32 %v16976_v4, %v16968_v35  ;;  %v19801_v35 = vld [vmem:[#allocation85_spill] sm:$0xff] }
 0x81f   : > { %19779 = vst [vmem:[#allocation130_spill] sm:$0xff] %v16930_v26  ;;  %v8182_v11 = vmax.f32 %v16927_v30, %v16930_v26  ;;  %19781 = vst [vmem:[#allocation132_spill] sm:$0xff] %v16942_v63  ;;  %v7562_v25 = vmax.f32 %v16946_v9, %v16942_v63  ;;  %v19788_v63 = vld [vmem:[#allocation81_spill] sm:$0xff]  ;;  %v19789_v9 = vld [vmem:[#allocation80_spill] sm:$0xff]  ;;  %v7568_v26 = vmax.f32 %v16962_v18, %v16952_v56 }
 0x820   : > { %v8109_v45 = vpop.f32.mrf.mxu1  ;;  %19790 = vst [vmem:[#allocation81_spill] sm:$0xff] %v16976_v4 }
 0x821   : > { %8183 = vmax.xlane.f32.xlu0 %v8182_v11  ;;  %12303 = vmatpush3.bf16.msra.mxu0 %v13437_v39 }
 0x822   : > { %v8113_v53 = vpop.f32.mrf.mxu1  ;;  %7557 = vmax.xlane.f32.xlu1 %v7556_v52  ;;  %12352 = vmatprep.subr.bf16.mxu0 %v13438_v60 }
 0x823   : > { %v16955_v55 = vadd.f32 %v8113_v53, %v15654_v44 }
 0x824   : > { %v8115_v24 = vpop.f32.mrf.mxu1 }
 0x825   : > { %19784 = vst [vmem:[#allocation135_spill] sm:$0xff] %v16955_v55  ;;  %v16958_v11 = vadd.f32 %v8115_v24, %v15656_v14 }
 0x826   : > { %v8117_v39 = vpop.f32.mrf.mxu1  ;;  %7563 = vmax.xlane.f32.xlu1 %v7562_v25  ;;  %v6255_v52 = vpop.xlane.xlu1 %6254 }
 0x827   : > { %19785 = vst [vmem:[#allocation136_spill] sm:$0xff] %v16958_v11  ;;  %v8188_v60 = vmax.f32 %v16955_v55, %v16958_v11  ;;  %v6297_v53 = vsub.f32 %v19788_v63, %v6255_v52  ;;  %v6298_v22 = vsub.f32 %v19789_v9, %v6255_v52  ;;  %v16981_v63 = vadd.f32 %v7532_v13, %v15656_v14  ;;  %v19792_v9 = vld [vmem:[#allocation83_spill] sm:$0xff] }
 0x828   : > { %v8119_v24 = vpop.f32.mrf.mxu1  ;;  %v16996_v13 = vadd.f32 %v16899_v21, %v15654_v44 }
 0x829   : > { %8189 = vmax.xlane.f32.xlu0 %v8188_v60  ;;  %v6339_v11 = vmul.f32 1.442695, %v6298_v22  ;;  %v6337_v55 = vmul.f32 1.442695, %v6297_v53  ;;  %19791 = vst [vmem:[#allocation80_spill] sm:$0xff] %v16981_v63 }
 0x82a   : > { %v8123_v25 = vpop.f32.mrf.mxu1  ;;  %7569 = vmax.xlane.f32.xlu1 %v7568_v26  ;;  %v6261_v30 = vpop.xlane.xlu1 %6260  ;;  %v16992_v26 = vadd.f32 %v8109_v45, %v15656_v14  ;;  %19797 = vst [vmem:[#allocation140_spill] sm:$0xff] %v16996_v13  ;;  %v19800_v45 = vld [vmem:[#allocation86_spill] sm:$0xff]  ;;  %v7580_v21 = vmax.f32 %v16996_v13, %v16981_v63  ;;  %v19806_v13 = vld [vmem:[#allocation87_spill] sm:$0xff] }
 0x82b   : > { %v6301_v52 = vsub.f32 %v19792_v9, %v6261_v30  ;;  %13650 = vpow2.f32 %v6339_v11  ;;  %v16985_v60 = vadd.f32 %v8123_v25, %v15654_v44  ;;  %v6302_v56 = vsub.f32 %v19794_v47, %v6261_v30 }
 0x82c   : > { %v8125_v1 = vpop.f32.mrf.mxu1  ;;  %19796 = vst [vmem:[#allocation139_spill] sm:$0xff] %v16992_v26  ;;  %13652 = vpow2.f32 %v6337_v55  ;;  %v16999_v9 = vadd.f32 %v8119_v24, %v15656_v14  ;;  %v17011_v55 = vadd.f32 %v8117_v39, %v15654_v44 }
 0x82d   : > { %19793 = vst [vmem:[#allocation83_spill] sm:$0xff] %v16985_v60  ;;  %v16989_v22 = vadd.f32 %v8125_v1, %v15656_v14  ;;  %v17004_v1 = vadd.f32 %v8107_v33, %v15654_v44  ;;  %v6345_v25 = vmul.f32 1.442695, %v6301_v52  ;;  %v6347_v24 = vmul.f32 1.442695, %v6302_v56  ;;  %v19805_v56 = vld [vmem:[#allocation90_spill] sm:$0xff] }
 0x82e   : > { %v8127_v53 = vpop.f32.mrf.mxu1  ;;  %19798 = vst [vmem:[#allocation141_spill] sm:$0xff] %v16999_v9  ;;  %7575 = vmax.xlane.f32.xlu1 %v7574_v42  ;;  %v6267_v30 = vpop.xlane.xlu1 %6266  ;;  %19802 = vst [vmem:[#allocation86_spill] sm:$0xff] %v17011_v55  ;;  %v8191_v52 = vmax.f32 %v17011_v55, %v16999_v9 }
 0x82f   : > { %19795 = vst [vmem:[#allocation82_spill] sm:$0xff] %v16989_v22  ;;  %v8194_v11 = vmax.f32 %v16985_v60, %v16989_v22  ;;  %19799 = vst [vmem:[#allocation142_spill] sm:$0xff] %v17004_v1  ;;  %v6305_v47 = vsub.f32 %v19800_v45, %v6267_v30  ;;  %v6306_v4 = vsub.f32 %v19801_v35, %v6267_v30  ;;  %13654 = vpow2.f32 %v6345_v25 }
 0x830   : > { %v8129_v18 = vpop.f32.mrf.mxu1  ;;  %v8185_v42 = vmax.f32 %v17004_v1, %v16992_v26  ;;  %v17018_v45 = vadd.f32 %v8127_v53, %v15654_v44  ;;  %13656 = vpow2.f32 %v6347_v24  ;;  %v19808_v53 = vld [vmem:[#allocation88_spill] sm:$0xff] }
 0x831   : > { %8195 = vmax.xlane.f32.xlu0 %v8194_v11  ;;  %v6353_v22 = vmul.f32 1.442695, %v6305_v47  ;;  %v6355_v35 = vmul.f32 1.442695, %v6306_v4  ;;  %v17021_v30 = vadd.f32 %v8129_v18, %v15656_v14  ;;  %v19807_v47 = vld [vmem:[#allocation91_spill] sm:$0xff] }
 0x832   : > { %v8133_v33 = vpop.f32.mrf.mxu1  ;;  %19803 = vst [vmem:[#allocation85_spill] sm:$0xff] %v17018_v45  ;;  %v6264_v63 = vpop.xlane.xlu0 %6263  ;;  %7581 = vmax.xlane.f32.xlu1 %v7580_v21 }
 0x833   : > { %19804 = vst [vmem:[#allocation143_spill] sm:$0xff] %v17021_v30  ;;  %v6273_v39 = vpop.xlane.xlu1 %6272  ;;  %v6303_v11 = vsub.f32 %v19805_v56, %v6264_v63  ;;  %v6304_v26 = vsub.f32 %v19806_v13, %v6264_v63  ;;  %v17027_v9 = vadd.f32 %v8133_v33, %v15654_v44  ;;  %13658 = vpow2.f32 %v6353_v22 }
 0x834   : > { %v6309_v1 = vsub.f32 %v19807_v47, %v6273_v39  ;;  %v8135_v60 = vpop.f32.mrf.mxu1  ;;  %v6310_v4 = vsub.f32 %v19808_v53, %v6273_v39  ;;  %13660 = vpow2.f32 %v6355_v35  ;;  %v8197_v63 = vmax.f32 %v17018_v45, %v17021_v30  ;;  %v19810_v39 = vld [vmem:[#allocation92_spill] sm:$0xff] }
 0x835   : > { %v17031_v18 = vadd.f32 %v8135_v60, %v15656_v14  ;;  %v6349_v21 = vmul.f32 1.442695, %v6303_v11  ;;  %v6351_v55 = vmul.f32 1.442695, %v6304_v26 }
 0x836   : > { %v6361_v25 = vmul.f32 1.442695, %v6309_v1  ;;  %v8137_v48 = vpop.f32.mrf.mxu1  ;;  %v6363_v13 = vmul.f32 1.442695, %v6310_v4  ;;  %v6270_v33 = vpop.xlane.xlu0 %6269  ;;  %8186 = vmax.xlane.f32.xlu1 %v8185_v42 }
 0x837   : > { %v8200_v24 = vmax.f32 %v17027_v9, %v17031_v18  ;;  %v6279_v56 = vpop.xlane.xlu1 %6278  ;;  %13662 = vpow2.f32 %v6349_v21  ;;  %v6307_v60 = vsub.f32 %v16413_v16, %v6270_v33  ;;  %v6308_v22 = vsub.f32 %v16398_v61, %v6270_v33 }
 0x838   : > { %v6313_v26 = vsub.f32 %v16416_v40, %v6279_v56  ;;  %v8139_v1 = vpop.f32.mrf.mxu1  ;;  %13664 = vpow2.f32 %v6351_v55  ;;  %v17041_v35 = vadd.f32 %v8137_v48, %v15654_v44  ;;  %v6314_v11 = vsub.f32 %v19810_v39, %v6279_v56  ;;  %v13651_v42 = vpop.eup %13650 }
 0x839   : > { %v17045_v47 = vadd.f32 %v8139_v1, %v15656_v14  ;;  %8201 = vmax.xlane.f32.xlu0 %v8200_v24  ;;  %13666 = vpow2.f32 %v6361_v25  ;;  %v6357_v53 = vmul.f32 1.442695, %v6307_v60  ;;  %v6359_v4 = vmul.f32 1.442695, %v6308_v22  ;;  %v13653_v56 = vpop.eup %13652  ;;  %v19813_v25 = vld [vmem:[#allocation93_spill] sm:$0xff] }
 0x83a   : > { %19809 = vst [vmem:[#allocation90_spill] sm:$0xff] %v17041_v35  ;;  %v6369_v16 = vmul.f32 1.442695, %v6313_v26  ;;  %v8143_v21 = vpop.f32.mrf.mxu1  ;;  %13668 = vpow2.f32 %v6363_v13  ;;  %v6371_v61 = vmul.f32 1.442695, %v6314_v11  ;;  %v6276_v55 = vpop.xlane.xlu0 %6275  ;;  %8192 = vmax.xlane.f32.xlu1 %v8191_v52  ;;  %v6454_v1 = vpack.c.bf16 %v16864_v34, %v13651_v42 }
 0x83b   : > { %19811 = vst [vmem:[#allocation87_spill] sm:$0xff] %v17045_v47  ;;  %v8203_v40 = vmax.f32 %v17041_v35, %v17045_v47  ;;  %v17050_v48 = vadd.f32 %v8143_v21, %v15654_v44  ;;  %v6285_v33 = vpop.xlane.xlu1 %6284  ;;  %13670 = vpow2.f32 %v6357_v53  ;;  %v6311_v24 = vsub.f32 %v16437_v19, %v6276_v55 }
 0x83c   : > { %v6312_v60 = vsub.f32 %v19813_v25, %v6276_v55  ;;  %v6317_v22 = vsub.f32 %v16441_v43, %v6285_v33  ;;  %v8145_v26 = vpop.f32.mrf.mxu1  ;;  %13672 = vpow2.f32 %v6359_v4  ;;  %v6318_v13 = vsub.f32 %v16430_v7, %v6285_v33  ;;  %6642 = vmatprep.mubr.bf16.mxu0 %v6454_v1 }
 0x83d   : > { %19812 = vst [vmem:[#allocation91_spill] sm:$0xff] %v17050_v48  ;;  %v17058_v39 = vadd.f32 %v8145_v26, %v15656_v14  ;;  %13674 = vpow2.f32 %v6369_v16  ;;  %v6365_v52 = vmul.f32 1.442695, %v6311_v24  ;;  %v6453_v4 = vpack.c.bf16 %v16860_v20, %v13653_v56 }
 0x83e   : > { %v6367_v11 = vmul.f32 1.442695, %v6312_v60  ;;  %v6377_v21 = vmul.f32 1.442695, %v6317_v22  ;;  %v8147_v53 = vpop.f32.mrf.mxu1  ;;  %13676 = vpow2.f32 %v6371_v61  ;;  %v6379_v19 = vmul.f32 1.442695, %v6318_v13  ;;  %v6282_v55 = vpop.xlane.xlu0 %6281  ;;  %8198 = vmax.xlane.f32.xlu1 %v8197_v63 }
 0x83f   : > { %19814 = vst [vmem:[#allocation88_spill] sm:$0xff] %v17058_v39  ;;  %v8206_v43 = vmax.f32 %v17050_v48, %v17058_v39  ;;  %v6890_v7 = vpop.xlane.xlu1 %6889  ;;  %13678 = vpow2.f32 %v6365_v52  ;;  %v17064_v34 = vadd.f32 %v8147_v53, %v15654_v44  ;;  %v6315_v16 = vsub.f32 %v16462_v49, %v6282_v55  ;;  %v17068_v61 = vpop.eup %13654  ;;  %6643 = vmatmul.mubr.bf16.gmra.mxu0 %v6453_v4 }
 0x840   : > { %v6316_v33 = vsub.f32 %v16447_v50, %v6282_v55  ;;  %v8149_v24 = vpop.f32.mrf.mxu1  ;;  %13680 = vpow2.f32 %v6367_v11  ;;  %v6936_v25 = vsub.f32 %v16466_v23, %v6890_v7  ;;  %v6937_v20 = vsub.f32 %v16455_v62, %v6890_v7  ;;  %v17075_v60 = vpop.eup %13656 }
 0x841   : > { %19815 = vst [vmem:[#allocation92_spill] sm:$0xff] %v17064_v34  ;;  %v17073_v63 = vadd.f32 %v8149_v24, %v15656_v14  ;;  %8207 = vmax.xlane.f32.xlu0 %v8206_v43  ;;  %13682 = vpow2.f32 %v6377_v21  ;;  %v6373_v22 = vmul.f32 1.442695, %v6315_v16  ;;  %v17077_v50 = vadd.f32 %v13653_v56, %v13651_v42  ;;  %v17079_v13 = vpop.eup %13658 }
 0x842   : > { %v6375_v49 = vmul.f32 1.442695, %v6316_v33  ;;  %v8153_v26 = vpop.f32.mrf.mxu1  ;;  %13684 = vpow2.f32 %v6379_v19  ;;  %v6968_v1 = vmul.f32 1.442695, %v6936_v25  ;;  %v6970_v52 = vmul.f32 1.442695, %v6937_v20  ;;  %v6288_v23 = vpop.xlane.xlu0 %6287  ;;  %8204 = vmax.xlane.f32.xlu1 %v8203_v40 }
 0x843   : > { %19816 = vst [vmem:[#allocation93_spill] sm:$0xff] %v17073_v63  ;;  %19817 = vst [vmem:[#allocation144_spill] sm:$0xff] %v17077_v50  ;;  %v8209_v62 = vmax.f32 %v17064_v34, %v17073_v63  ;;  %v6896_v11 = vpop.xlane.xlu1 %6895  ;;  %v17083_v53 = vpop.eup %13660  ;;  %13686 = vpow2.f32 %v6373_v22  ;;  %v17086_v21 = vadd.f32 %v8153_v26, %v15654_v44  ;;  %v6319_v42 = vsub.f32 %v16488_v31, %v6288_v23 }
 0x844   : > { %v6320_v56 = vsub.f32 %v16470_v5, %v6288_v23  ;;  %v8155_v43 = vpop.f32.mrf.mxu1  ;;  %v17090_v19 = vpop.eup %13662  ;;  %13688 = vpow2.f32 %v6375_v49  ;;  %v6940_v4 = vsub.f32 %v16492_v54, %v6896_v11  ;;  %v6941_v55 = vsub.f32 %v16480_v17, %v6896_v11 }
 0x845   : > { %19818 = vst [vmem:[#allocation145_spill] sm:$0xff] %v17086_v21  ;;  %v17095_v40 = vadd.f32 %v8155_v43, %v15656_v14  ;;  %v17097_v7 = vpop.eup %13664  ;;  %13690 = vpow2.f32 %v6968_v1  ;;  %v6381_v16 = vmul.f32 1.442695, %v6319_v42  ;;  %v6455_v5 = vpack.c.bf16 %v17090_v19, %v17068_v61 }
 0x846   : > { %v6383_v33 = vmul.f32 1.442695, %v6320_v56  ;;  %v8157_v24 = vpop.f32.mrf.mxu1  ;;  %v17101_v31 = vpop.eup %13666  ;;  %13692 = vpow2.f32 %v6970_v52  ;;  %v6976_v25 = vmul.f32 1.442695, %v6940_v4  ;;  %v6978_v20 = vmul.f32 1.442695, %v6941_v55  ;;  %8210 = vmax.xlane.f32.xlu1 %v8209_v62 }
 0x847   : > { %19819 = vst [vmem:[#allocation146_spill] sm:$0xff] %v17095_v40  ;;  %v8212_v17 = vmax.f32 %v17086_v21, %v17095_v40  ;;  %v6893_v54 = vpop.xlane.xlu0 %6892  ;;  %v6902_v22 = vpop.xlane.xlu1 %6901  ;;  %13694 = vpow2.f32 %v6381_v16  ;;  %v17108_v26 = vadd.f32 %v8157_v24, %v15654_v44  ;;  %v19821_v56 = vld [vmem:[#allocation95_spill] sm:$0xff]  ;;  %v6456_v62 = vpack.c.bf16 %v17097_v7, %v17075_v60 }
 0x848   : > { %v17105_v49 = vpop.eup %13668  ;;  %v6938_v1 = vsub.f32 %v16513_v59, %v6893_v54  ;;  %v6939_v23 = vsub.f32 %v16498_v10, %v6893_v54  ;;  %v8159_v11 = vpop.f32.mrf.mxu1  ;;  %13696 = vpow2.f32 %v6383_v33  ;;  %v6944_v42 = vsub.f32 %v16521_v0, %v6902_v22 }
 0x849   : > { %19820 = vst [vmem:[#allocation147_spill] sm:$0xff] %v17108_v26  ;;  %v17112_v52 = vpop.eup %13670  ;;  %v6945_v43 = vsub.f32 %v19821_v56, %v6902_v22  ;;  %8213 = vmax.xlane.f32.xlu0 %v8212_v17  ;;  %13698 = vpow2.f32 %v6976_v25  ;;  %v17121_v59 = vadd.f32 %v8159_v11, %v15656_v14  ;;  %6650 = vmatprep.mubr.bf16.mxu0 %v6456_v62  ;;  %v19825_v11 = vld [vmem:[#allocation97_spill] sm:$0xff] }
 0x84a   : > { %v17118_v4 = vpop.eup %13672  ;;  %v6972_v55 = vmul.f32 1.442695, %v6938_v1  ;;  %v6974_v16 = vmul.f32 1.442695, %v6939_v23  ;;  %v8163_v10 = vpop.f32.mrf.mxu1  ;;  %13700 = vpow2.f32 %v6978_v20  ;;  %v6984_v33 = vmul.f32 1.442695, %v6944_v42  ;;  %6651 = vmatmul.mubr.bf16.gmra.mxu0 %v6455_v5 }
 0x84b   : > { %19822 = vst [vmem:[#allocation95_spill] sm:$0xff] %v17121_v59  ;;  %v17123_v24 = vpop.eup %13674  ;;  %v6986_v0 = vmul.f32 1.442695, %v6945_v43  ;;  %v17126_v54 = vadd.f32 %v8163_v10, %v15654_v44  ;;  %v6899_v22 = vpop.xlane.xlu0 %6898  ;;  %v8215_v25 = vmax.f32 %v17108_v26, %v17121_v59  ;;  %v19824_v1 = vld [vmem:[#allocation99_spill] sm:$0xff]  ;;  %v19826_v43 = vld [vmem:[#allocation100_spill] sm:$0xff]  ;;  %v19827_v10 = vld [vmem:[#allocation98_spill] sm:$0xff]  ;;  %v6458_v21 = vpack.c.bf16 %v17118_v4, %v17083_v53 }
 0x84c   : > { %v6908_v17 = vpop.xlane.xlu1 %6907  ;;  %v17128_v56 = vpop.eup %13676  ;;  %13702 = vpow2.f32 %v6972_v55  ;;  %v6942_v23 = vsub.f32 %v19824_v1, %v6899_v22  ;;  %v6943_v50 = vsub.f32 %v19825_v11, %v6899_v22 }
 0x84d   : > { %19823 = vst [vmem:[#allocation148_spill] sm:$0xff] %v17126_v54  ;;  %v8165_v20 = vpop.f32.mrf.mxu1  ;;  %v17134_v42 = vpop.eup %13678  ;;  %13704 = vpow2.f32 %v6974_v16  ;;  %v6948_v62 = vsub.f32 %v19826_v43, %v6908_v17  ;;  %v6949_v40 = vsub.f32 %v19827_v10, %v6908_v17  ;;  %8216 = vmax.xlane.f32.xlu1 %v8215_v25  ;;  %6658 = vmatprep.mubr.bf16.mxu0 %v6458_v21  ;;  %v19830_v21 = vld [vmem:[#allocation105_spill] sm:$0xff] }
 0x84e   : > { %v17140_v55 = vpop.eup %13680  ;;  %13706 = vpow2.f32 %v6984_v33  ;;  %v6980_v59 = vmul.f32 1.442695, %v6942_v23  ;;  %v6982_v5 = vmul.f32 1.442695, %v6943_v50  ;;  %v17143_v1 = vadd.f32 %v8165_v20, %v15656_v14  ;;  %v19831_v20 = vld [vmem:[#allocation102_spill] sm:$0xff] }
 0x84f   : > { %v8167_v22 = vpop.f32.mrf.mxu1  ;;  %v17145_v11 = vpop.eup %13682  ;;  %13708 = vpow2.f32 %v6986_v0  ;;  %v6992_v16 = vmul.f32 1.442695, %v6948_v62  ;;  %v6994_v43 = vmul.f32 1.442695, %v6949_v40 }
 0x850   : > { %19828 = vst [vmem:[#allocation99_spill] sm:$0xff] %v17143_v1  ;;  %v17148_v17 = vadd.f32 %v8167_v22, %v15654_v44  ;;  %v6905_v10 = vpop.xlane.xlu0 %6904  ;;  %v6914_v26 = vpop.xlane.xlu1 %6913  ;;  %13710 = vpow2.f32 %v6980_v59  ;;  %v8218_v50 = vmax.f32 %v17126_v54, %v17143_v1 }
 0x851   : > { %v17150_v63 = vpop.eup %13684  ;;  %v6946_v33 = vsub.f32 %v16563_v38, %v6905_v10  ;;  %v6947_v25 = vsub.f32 %v16550_v12, %v6905_v10  ;;  %v8169_v23 = vpop.f32.mrf.mxu1  ;;  %13712 = vpow2.f32 %v6982_v5  ;;  %v6952_v40 = vsub.f32 %v19830_v21, %v6914_v26 }
 0x852   : > { %19829 = vst [vmem:[#allocation97_spill] sm:$0xff] %v17148_v17  ;;  %v17156_v0 = vpop.eup %13686  ;;  %v6953_v62 = vsub.f32 %v19831_v20, %v6914_v26  ;;  %v17161_v22 = vadd.f32 %v8169_v23, %v15656_v14  ;;  %13714 = vpow2.f32 %v6992_v16  ;;  %8219 = vmax.xlane.f32.xlu0 %v8218_v50  ;;  %v6457_v12 = vpack.c.bf16 %v17112_v52, %v17079_v13  ;;  %v19833_v50 = vld [vmem:[#allocation109_spill] sm:$0xff] }
 0x853   : > { %v17163_v34 = vpop.eup %13688  ;;  %v6988_v59 = vmul.f32 1.442695, %v6946_v33  ;;  %v6990_v1 = vmul.f32 1.442695, %v6947_v25  ;;  %v8173_v38 = vpop.f32.mrf.mxu1  ;;  %13716 = vpow2.f32 %v6994_v43  ;;  %v7000_v5 = vmul.f32 1.442695, %v6952_v40 }
 0x854   : > { %19832 = vst [vmem:[#allocation100_spill] sm:$0xff] %v17161_v22  ;;  %v17167_v10 = vpop.eup %13690  ;;  %v7002_v21 = vmul.f32 1.442695, %v6953_v62  ;;  %v8221_v26 = vmax.f32 %v17148_v17, %v17161_v22  ;;  %v6911_v23 = vpop.xlane.xlu0 %6910  ;;  %6659 = vmatmul.mubr.bf16.gmra.mxu0 %v6457_v12  ;;  %v6460_v16 = vpack.c.bf16 %v17140_v55, %v17105_v49  ;;  %v19834_v43 = vld [vmem:[#allocation107_spill] sm:$0xff]  ;;  %v19835_v62 = vld [vmem:[#allocation110_spill] sm:$0xff] }
 0x855   : > { %v6920_v20 = vpop.xlane.xlu1 %6919  ;;  %v17171_v54 = vpop.eup %13692  ;;  %13718 = vpow2.f32 %v6988_v59  ;;  %v6950_v33 = vsub.f32 %v19833_v50, %v6911_v23  ;;  %v6951_v40 = vsub.f32 %v19834_v43, %v6911_v23  ;;  %v19836_v22 = vld [vmem:[#allocation111_spill] sm:$0xff]  ;;  %v17184_v59 = vadd.f32 %v8173_v38, %v15654_v44 }
 0x856   : > { %v8175_v25 = vpop.f32.mrf.mxu1  ;;  %v17176_v47 = vpop.eup %13694  ;;  %13720 = vpow2.f32 %v6990_v1  ;;  %v6956_v35 = vsub.f32 %v19835_v62, %v6920_v20  ;;  %v6957_v17 = vsub.f32 %v19836_v22, %v6920_v20  ;;  %8222 = vmax.xlane.f32.xlu1 %v8221_v26  ;;  %6666 = vmatprep.mubr.bf16.mxu0 %v6460_v16 }
 0x857   : > { %v17181_v39 = vpop.eup %13696  ;;  %13722 = vpow2.f32 %v7000_v5  ;;  %19837 = vst [vmem:[#allocation98_spill] sm:$0xff] %v17184_v59  ;;  %v6996_v12 = vmul.f32 1.442695, %v6950_v33  ;;  %v17187_v50 = vadd.f32 %v8175_v25, %v15656_v14  ;;  %v6998_v23 = vmul.f32 1.442695, %v6951_v40  ;;  %v19839_v5 = vld [vmem:[#allocation115_spill] sm:$0xff] }
 0x858   : > { %v8177_v48 = vpop.f32.mrf.mxu1  ;;  %v17189_v1 = vpop.eup %13698  ;;  %13724 = vpow2.f32 %v7002_v21  ;;  %v7008_v43 = vmul.f32 1.442695, %v6956_v35  ;;  %v7010_v62 = vmul.f32 1.442695, %v6957_v17  ;;  %v19841_v35 = vld [vmem:[#allocation113_spill] sm:$0xff] }
 0x859   : > { %19838 = vst [vmem:[#allocation105_spill] sm:$0xff] %v17187_v50  ;;  %v6917_v22 = vpop.xlane.xlu0 %6916  ;;  %v9326_v26 = vpop.permute.xlu1 %9325  ;;  %13726 = vpow2.f32 %v6996_v12  ;;  %v8224_v38 = vmax.f32 %v17184_v59, %v17187_v50  ;;  %v17200_v21 = vadd.f32 %v8177_v48, %v15654_v44 }
 0x85a   : > { %v17191_v20 = vpop.eup %13700  ;;  %v6954_v16 = vsub.f32 %v19839_v5, %v6917_v22  ;;  %v8179_v33 = vpop.f32.mrf.mxu1  ;;  %10837 = vmatmul.mubr.msk.bf16.gmra.mxu1 %vm4818_vm1, %v9326_v26  ;;  %13728 = vpow2.f32 %v6998_v23  ;;  %v6955_v17 = vsub.f32 %v19841_v35, %v6917_v22  ;;  %v6459_v26 = vpack.c.bf16 %v17134_v42, %v17101_v31 }
 0x85b   : > { %v17197_v25 = vpop.eup %13702  ;;  %19840 = vst [vmem:[#allocation102_spill] sm:$0xff] %v17200_v21  ;;  %v17204_v40 = vadd.f32 %v8179_v33, %v15656_v14  ;;  %9465 = vmatprep.mubr.bf16.mxu1 %v19664_v3  ;;  %13730 = vpow2.f32 %v7008_v43  ;;  %8225 = vmax.xlane.f32.xlu0 %v8224_v38  ;;  %v6462_v33 = vpack.c.bf16 %v17163_v34, %v17128_v56  ;;  %v19843_v43 = vld [vmem:[#allocation118_spill] sm:$0xff] }
 0x85c   : > { %v17207_v12 = vpop.eup %13704  ;;  %v7004_v5 = vmul.f32 1.442695, %v6954_v16  ;;  %v8750_v50 = vpop.f32.mrf.mxu1  ;;  %13732 = vpow2.f32 %v7010_v62  ;;  %v7006_v48 = vmul.f32 1.442695, %v6955_v17  ;;  %6667 = vmatmul.mubr.bf16.gmra.mxu0 %v6459_v26  ;;  %v19844_v16 = vld [vmem:[#allocation117_spill] sm:$0xff] }
 0x85d   : > { %19842 = vst [vmem:[#allocation109_spill] sm:$0xff] %v17204_v40  ;;  %v17211_v23 = vpop.eup %13706  ;;  %v8227_v22 = vmax.f32 %v17200_v21, %v17204_v40  ;;  %v6923_v3 = vpop.xlane.xlu0 %6922  ;;  %6674 = vmatprep.mubr.bf16.mxu0 %v6462_v33  ;;  %v17224_v62 = vadd.f32 %v8750_v50, %v15654_v44 }
 0x85e   : > { %v17217_v35 = vpop.eup %13708  ;;  %13734 = vpow2.f32 %v7004_v5  ;;  %v6958_v38 = vsub.f32 %v19843_v43, %v6923_v3  ;;  %v6959_v59 = vsub.f32 %v19844_v16, %v6923_v3  ;;  %v8752_v30 = vpop.f32.mrf.mxu1  ;;  %v17233_v3 = vadd.f32 %v17075_v60, %v17068_v61  ;;  %v19849_v61 = vld [vmem:[#allocation121_spill] sm:$0xff] }
 0x85f   : > { %v17221_v45 = vpop.eup %13710  ;;  %13736 = vpow2.f32 %v7006_v48  ;;  %v17227_v17 = vadd.f32 %v8752_v30, %v15656_v14  ;;  %8228 = vmax.xlane.f32.xlu1 %v8227_v22  ;;  %v17244_v22 = vadd.f32 %v17083_v53, %v17079_v13  ;;  %v17261_v13 = vadd.f32 %v17105_v49, %v17101_v31 }
 0x860   : > { %v17229_v40 = vpop.eup %13712  ;;  %v7012_v5 = vmul.f32 1.442695, %v6958_v38  ;;  %v7014_v26 = vmul.f32 1.442695, %v6959_v59  ;;  %v8754_v21 = vpop.f32.mrf.mxu1  ;;  %19846 = vst [vmem:[#allocation110_spill] sm:$0xff] %v17233_v3  ;;  %v19848_v59 = vld [vmem:[#allocation120_spill] sm:$0xff]  ;;  %v17252_v3 = vadd.f32 %v17097_v7, %v17090_v19  ;;  %v17265_v53 = vadd.f32 %v17118_v4, %v17112_v52 }
 0x861   : > { %19845 = vst [vmem:[#allocation107_spill] sm:$0xff] %v17227_v17  ;;  %v17235_v43 = vpop.eup %13714  ;;  %v8829_v48 = vmax.f32 %v17224_v62, %v17227_v17  ;;  %v17240_v50 = vadd.f32 %v8754_v21, %v15654_v44  ;;  %v6929_v30 = vpop.xlane.xlu0 %6928  ;;  %19847 = vst [vmem:[#allocation111_spill] sm:$0xff] %v17244_v22  ;;  %v6461_v7 = vpack.c.bf16 %v17156_v0, %v17123_v24 }
 0x862   : > { %v17246_v33 = vpop.eup %13716  ;;  %13738 = vpow2.f32 %v7012_v5  ;;  %v6962_v38 = vsub.f32 %v19848_v59, %v6929_v30  ;;  %v6963_v60 = vsub.f32 %v19849_v61, %v6929_v30  ;;  %v8756_v16 = vpop.f32.mrf.mxu1  ;;  %19850 = vst [vmem:[#allocation115_spill] sm:$0xff] %v17252_v3  ;;  %19851 = vst [vmem:[#allocation113_spill] sm:$0xff] %v17261_v13  ;;  %v17273_v59 = vadd.f32 %v17128_v56, %v17123_v24 }
 0x863   : > { %v17254_v17 = vpop.eup %13718  ;;  %13740 = vpow2.f32 %v7014_v26  ;;  %v17257_v21 = vadd.f32 %v8756_v16, %v15656_v14  ;;  %8830 = vmax.xlane.f32.xlu0 %v8829_v48  ;;  %19852 = vst [vmem:[#allocation118_spill] sm:$0xff] %v17265_v53  ;;  %v6464_v49 = vpack.c.bf16 %v17181_v39, %v17150_v63  ;;  %v17293_v56 = vadd.f32 %v17150_v63, %v17145_v11 }
 0x864   : > { %v17267_v5 = vpop.eup %13720  ;;  %v7020_v30 = vmul.f32 1.442695, %v6962_v38  ;;  %v7022_v19 = vmul.f32 1.442695, %v6963_v60  ;;  %v8760_v26 = vpop.f32.mrf.mxu1  ;;  %19853 = vst [vmem:[#allocation117_spill] sm:$0xff] %v17273_v59  ;;  %v17286_v38 = vadd.f32 %v17140_v55, %v17134_v42  ;;  %6675 = vmatmul.mubr.bf16.gmra.mxu0 %v6461_v7  ;;  %v17297_v60 = vadd.f32 %v17163_v34, %v17156_v0 }
 0x865   : > { %v17275_v48 = vpop.eup %13722  ;;  %v8832_v31 = vmax.f32 %v17240_v50, %v17257_v21  ;;  %v17282_v52 = vadd.f32 %v8760_v26, %v15654_v44  ;;  %v9328_v4 = vpop.permute.xlu0 %9327  ;;  %19855 = vst [vmem:[#allocation121_spill] sm:$0xff] %v17293_v56  ;;  %v17301_v16 = vadd.f32 %v17171_v54, %v17167_v10  ;;  %6682 = vmatprep.mubr.bf16.mxu0 %v6464_v49 }
 0x866   : > { %19854 = vst [vmem:[#allocation120_spill] sm:$0xff] %v17286_v38  ;;  %v17288_v61 = vpop.eup %13724  ;;  %13742 = vpow2.f32 %v7020_v30  ;;  %v8762_v24 = vpop.f32.mrf.mxu1  ;;  %10838 = vmatmul.mubr.msk.bf16.gmra.mxu1 %vm4818_vm1, %v9328_v4  ;;  %19856 = vst [vmem:[#allocation149_spill] sm:$0xff] %v17297_v60  ;;  %v17310_v63 = vadd.f32 %v17181_v39, %v17176_v47  ;;  %v17314_v34 = vadd.f32 %v17191_v20, %v17189_v1 }
 0x867   : > { %19857 = vst [vmem:[#allocation150_spill] sm:$0xff] %v17301_v16  ;;  %v17303_v42 = vpop.eup %13726  ;;  %13744 = vpow2.f32 %v7022_v19  ;;  %v17306_v55 = vadd.f32 %v8762_v24, %v15656_v14  ;;  %8833 = vmax.xlane.f32.xlu1 %v8832_v31  ;;  %v17320_v7 = vadd.f32 %v17207_v12, %v17197_v25  ;;  %v17324_v19 = vadd.f32 %v17217_v35, %v17211_v23 }
 0x868   : > { %19858 = vst [vmem:[#allocation151_spill] sm:$0xff] %v17310_v63  ;;  %19859 = vst [vmem:[#allocation152_spill] sm:$0xff] %v17314_v34  ;;  %v17316_v0 = vpop.eup %13728  ;;  %v8764_v30 = vpop.f32.mrf.mxu1  ;;  %v17328_v26 = vadd.f32 %v17229_v40, %v17221_v45  ;;  %v17336_v49 = vadd.f32 %v17246_v33, %v17235_v43  ;;  %v7096_v59 = vpack.c.bf16 %v17197_v25, %v17167_v10 }
 0x869   : > { %19860 = vst [vmem:[#allocation153_spill] sm:$0xff] %v17320_v7  ;;  %19861 = vst [vmem:[#allocation154_spill] sm:$0xff] %v17324_v19  ;;  %v17330_v39 = vpop.eup %13730  ;;  %v8835_v31 = vmax.f32 %v17282_v52, %v17306_v55  ;;  %v17342_v7 = vadd.f32 %v17267_v5, %v17254_v17  ;;  %v17346_v19 = vadd.f32 %v17288_v61, %v17275_v48 }
 0x86a   : > { %19862 = vst [vmem:[#allocation155_spill] sm:$0xff] %v17328_v26  ;;  %19863 = vst [vmem:[#allocation156_spill] sm:$0xff] %v17336_v49  ;;  %v17338_v4 = vpop.eup %13732  ;;  %v8766_v24 = vpop.f32.mrf.mxu1  ;;  %v17350_v26 = vadd.f32 %v17316_v0, %v17303_v42  ;;  %v17355_v63 = vadd.f32 %v8764_v30, %v15654_v44  ;;  %v7097_v30 = vpack.c.bf16 %v17207_v12, %v17171_v54 }
 0x86b   : > { %19864 = vst [vmem:[#allocation157_spill] sm:$0xff] %v17342_v7  ;;  %19865 = vst [vmem:[#allocation158_spill] sm:$0xff] %v17346_v19  ;;  %v17352_v34 = vpop.eup %13734  ;;  %v17358_v49 = vadd.f32 %v8766_v24, %v15656_v14  ;;  %8836 = vmax.xlane.f32.xlu0 %v8835_v31  ;;  %v17362_v7 = vadd.f32 %v17338_v4, %v17330_v39  ;;  %v6463_v19 = vpack.c.bf16 %v17176_v47, %v17145_v11 }
 0x86c   : > { %19866 = vst [vmem:[#allocation159_spill] sm:$0xff] %v17350_v26  ;;  %v17364_v16 = vpop.eup %13736  ;;  %v8770_v60 = vpop.f32.mrf.mxu1  ;;  %v7099_v53 = vpack.c.bf16 %v17229_v40, %v17191_v20  ;;  %v13442_v20 = vld [vmem:[#allocation3 + $0x268] sm:$0xff]  }
 0x86d   : > { %19867 = vst [vmem:[#allocation160_spill] sm:$0xff] %v17362_v7  ;;  %v8838_v26 = vmax.f32 %v17355_v63, %v17358_v49  ;;  %v17374_v24 = vadd.f32 %v17364_v16, %v17352_v34  ;;  %6683 = vmatmul.mubr.bf16.gmra.mxu0 %v6463_v19  ;;  %v17381_v47 = vadd.f32 %v8770_v60, %v15654_v44 }
 0x86e   : > { %7273 = vmatprep.mubr.bf16.mxu0 %v7097_v30  ;;  %v8772_v7 = vpop.f32.mrf.mxu1 }
 0x86f   : > { %19868 = vst [vmem:[#allocation161_spill] sm:$0xff] %v17374_v24  ;;  %v17376_v31 = vpop.eup %13738  ;;  %8839 = vmax.xlane.f32.xlu1 %v8838_v26  ;;  %v17384_v11 = vadd.f32 %v8772_v7, %v15656_v14  ;;  %v13439_v26 = vld [vmem:[#allocation3 + $0x238] sm:$0xff]  }
 0x870   : > { %v17378_v56 = vpop.eup %13740  ;;  %v8774_v54 = vpop.f32.mrf.mxu1 }
 0x871   : > { %v17388_v12 = vadd.f32 %v17378_v56, %v17376_v31  ;;  %v8841_v19 = vmax.f32 %v17381_v47, %v17384_v11  ;;  %v17397_v60 = vadd.f32 %v8774_v54, %v15654_v44 }
 0x872   : > { %v8776_v30 = vpop.f32.mrf.mxu1 }
 0x873   : > { %19869 = vst [vmem:[#allocation162_spill] sm:$0xff] %v17388_v12  ;;  %v17392_v24 = vpop.eup %13742  ;;  %v17400_v7 = vadd.f32 %v8776_v30, %v15656_v14  ;;  %8842 = vmax.xlane.f32.xlu0 %v8841_v19  ;;  %v13440_v12 = vld [vmem:[#allocation3 + $0x270] sm:$0xff]  }
 0x874   : > { %v17394_v38 = vpop.eup %13744  ;;  %v8780_v13 = vpop.f32.mrf.mxu1  ;;  %v13441_v19 = vld [vmem:[#allocation3 + $0x230] sm:$0xff]  }
 0x875   : > { %v17408_v3 = vadd.f32 %v17394_v38, %v17392_v24  ;;  %v8844_v54 = vmax.f32 %v17397_v60, %v17400_v7  ;;  %7274 = vmatmul.mubr.bf16.vlgmr.msra.gmra.mxu0 %v7096_v59  ;;  %v17413_v22 = vadd.f32 %v8780_v13, %v15654_v44  ;;  %v13443_v59 = vld [vmem:[#allocation3 + $0x228] sm:$0xff]   ;;  %v7098_v13 = vpack.c.bf16 %v17221_v45, %v17189_v1  ;;  %v19873_v45 = vld [vmem:[#allocation42_spill] sm:$0xff]  ;;  %v17439_v1 = vpop.f32.mrf.mxu0 }
 0x876   : > { %7281 = vmatprep.mubr.bf16.mxu0 %v7099_v53  ;;  %v8782_v30 = vpop.f32.mrf.mxu1  ;;  %12353 = vmatpush3.bf16.msra.mxu0 %v13439_v26  ;;  %19874 = vst [vmem:[#allocation42_spill] sm:$0xff] %v17439_v1 }
 0x877   : > { %19870 = vst [vmem:[#allocation163_spill] sm:$0xff] %v17408_v3  ;;  %v17416_v10 = vadd.f32 %v8782_v30, %v15656_v14  ;;  %8845 = vmax.xlane.f32.xlu1 %v8844_v54  ;;  %12354 = vmatprep.subr.bf16.mxu0 %v13440_v12  ;;  %v7101_v12 = vpack.c.bf16 %v17267_v5, %v17217_v35  ;;  %v13444_v30 = vld [vmem:[#allocation3 + $0x260] sm:$0xff]   ;;  %v13446_v5 = vld [vmem:[#allocation3 + $0x258] sm:$0xff]  }
 0x878   : > { %v8784_v25 = vpop.f32.mrf.mxu1 }
 0x879   : > { %19871 = vst [vmem:[#allocation164_spill] sm:$0xff] %v17416_v10  ;;  %v8847_v40 = vmax.f32 %v17413_v22, %v17416_v10  ;;  %v17421_v53 = vadd.f32 %v8784_v25, %v15654_v44  ;;  %v13445_v10 = vld [vmem:[#allocation3 + $0x220] sm:$0xff]  }
 0x87a   : > { %v8786_v3 = vpop.f32.mrf.mxu1  ;;  %12355 = vmatpush3.bf16.msra.mxu0 %v13441_v19 }
 0x87b   : > { %v17424_v26 = vadd.f32 %v8786_v3, %v15656_v14  ;;  %8848 = vmax.xlane.f32.xlu0 %v8847_v40  ;;  %12356 = vmatprep.subr.bf16.mxu0 %v13442_v20 }
 0x87c   : > { %v8790_v54 = vpop.f32.mrf.mxu1 }
 0x87d   : > { %v8850_v19 = vmax.f32 %v17421_v53, %v17424_v26  ;;  %7282 = vmatmul.mubr.bf16.gmra.mxu0 %v7098_v13  ;;  %v17433_v3 = vadd.f32 %v8790_v54, %v15654_v44 }
 0x87e   : > { %7289 = vmatprep.mubr.bf16.mxu0 %v7101_v12  ;;  %v8792_v25 = vpop.f32.mrf.mxu1  ;;  %12357 = vmatpush3.bf16.msra.mxu0 %v13443_v59  ;;  %v13447_v59 = vld [vmem:[#allocation3 + $0x218] sm:$0xff]  }
 0x87f   : > { %v17436_v40 = vadd.f32 %v8792_v25, %v15656_v14  ;;  %5101 = vadd.xlane.f32.xlu0 %v19873_v45  ;;  %8851 = vmax.xlane.f32.xlu1 %v8850_v19  ;;  %v19877_v25 = vld [vmem:[#allocation41_spill] sm:$0xff]  ;;  %v7100_v19 = vpack.c.bf16 %v17254_v17, %v17211_v23  ;;  %v7103_v45 = vpack.c.bf16 %v17316_v0, %v17246_v33  ;;  %v19881_v17 = vld [vmem:[#allocation43_spill] sm:$0xff] }
 0x880   : > { %v8794_v35 = vpop.f32.mrf.mxu1  ;;  %12358 = vmatprep.subr.bf16.mxu0 %v13444_v30  ;;  %v17452_v30 = vpop.f32.mrf.mxu0 }
 0x881   : > { %19872 = vst [vmem:[#allocation165_spill] sm:$0xff] %v17436_v40  ;;  %v8853_v20 = vmax.f32 %v17433_v3, %v17436_v40  ;;  %v17444_v12 = vadd.f32 %v8794_v35, %v15654_v44  ;;  %19878 = vst [vmem:[#allocation41_spill] sm:$0xff] %v17452_v30 }
 0x882   : > { %v8796_v13 = vpop.f32.mrf.mxu1  ;;  %12359 = vmatpush3.bf16.msra.mxu0 %v13445_v10  ;;  %v13448_v10 = vld [vmem:[#allocation3 + $0x250] sm:$0xff]  }
 0x883   : > { %19875 = vst [vmem:[#allocation166_spill] sm:$0xff] %v17444_v12  ;;  %v17447_v54 = vadd.f32 %v8796_v13, %v15656_v14  ;;  %8854 = vmax.xlane.f32.xlu0 %v8853_v20  ;;  %5104 = vadd.xlane.f32.xlu1 %v19877_v25  ;;  %v13449_v25 = vld [vmem:[#allocation3 + $0x210] sm:$0xff]  }
 0x884   : > { %v8800_v1 = vpop.f32.mrf.mxu1  ;;  %12360 = vmatprep.subr.bf16.mxu0 %v13446_v5  ;;  %v12176_v13 = vpop.f32.mrf.mxu0  ;;  %v13450_v5 = vld [vmem:[#allocation3 + $0x248] sm:$0xff]  }
 0x885   : > { %19876 = vst [vmem:[#allocation167_spill] sm:$0xff] %v17447_v54  ;;  %v8856_v35 = vmax.f32 %v17444_v12, %v17447_v54  ;;  %7290 = vmatmul.mubr.bf16.gmra.mxu0 %v7100_v19  ;;  %v17459_v40 = vadd.f32 %v8800_v1, %v15654_v44  ;;  %v19884_v54 = vld [vmem:[#allocation63_spill] sm:$0xff] }
 0x886   : > { %7297 = vmatprep.mubr.bf16.mxu0 %v7103_v45  ;;  %v8802_v20 = vpop.f32.mrf.mxu1  ;;  %12361 = vmatpush3.bf16.msra.mxu0 %v13447_v59  ;;  %v12177_v33 = vpop.f32.mrf.mxu0 }
 0x887   : > { %19879 = vst [vmem:[#allocation168_spill] sm:$0xff] %v17459_v40  ;;  %v17462_v23 = vadd.f32 %v8802_v20, %v15656_v14  ;;  %5107 = vadd.xlane.f32.xlu0 %v19881_v17  ;;  %8857 = vmax.xlane.f32.xlu1 %v8856_v35  ;;  %v17467_v45 = vadd.f32 %v12177_v33, %v12176_v13  ;;  %v6926_v59 = vpop.xlane.xlu1 %6925  ;;  %v13451_v20 = vld [vmem:[#allocation3 + $0x208] sm:$0xff]   ;;  %v19888_v33 = vld [vmem:[#allocation65_spill] sm:$0xff] }
 0x888   : > { %v8804_v0 = vpop.f32.mrf.mxu1  ;;  %12362 = vmatprep.subr.bf16.mxu0 %v13448_v10  ;;  %v17469_v30 = vpop.f32.mrf.mxu0  ;;  %v6961_v12 = vsub.f32 %v19884_v54, %v6926_v59  ;;  %v19887_v10 = vld [vmem:[#allocation44_spill] sm:$0xff]  ;;  %v7102_v13 = vpack.c.bf16 %v17303_v42, %v17235_v43  ;;  %v7105_v54 = vpack.c.bf16 %v17364_v16, %v17288_v61  ;;  %v13453_v42 = vld [vmem:[#allocation3 + $0x200] sm:$0xff]  }
 0x889   : > { %19880 = vst [vmem:[#allocation169_spill] sm:$0xff] %v17462_v23  ;;  %v8859_v19 = vmax.f32 %v17459_v40, %v17462_v23  ;;  %19882 = vst [vmem:[#allocation43_spill] sm:$0xff] %v17467_v45  ;;  %v17473_v17 = vadd.f32 %v8804_v0, %v15654_v44  ;;  %v6960_v45 = vsub.f32 %v19888_v33, %v6926_v59  ;;  %v13452_v0 = vld [vmem:[#allocation3 + $0x240] sm:$0xff]  }
 0x88a   : > { %19883 = vst [vmem:[#allocation170_spill] sm:$0xff] %v17469_v30  ;;  %v8806_v1 = vpop.f32.mrf.mxu1  ;;  %12363 = vmatpush3.bf16.msra.mxu0 %v13449_v25  ;;  %v7018_v30 = vmul.f32 1.442695, %v6961_v12  ;;  %v17482_v23 = vpop.f32.mrf.mxu0 }
 0x88b   : > { %19885 = vst [vmem:[#allocation63_spill] sm:$0xff] %v17473_v17  ;;  %v17476_v35 = vadd.f32 %v8806_v1, %v15656_v14  ;;  %8860 = vmax.xlane.f32.xlu0 %v8859_v19  ;;  %5110 = vadd.xlane.f32.xlu1 %v19887_v10  ;;  %19889 = vst [vmem:[#allocation44_spill] sm:$0xff] %v17482_v23  ;;  %v6932_v19 = vpop.xlane.xlu1 %6931  ;;  %v7016_v59 = vmul.f32 1.442695, %v6960_v45 }
 0x88c   : > { %v8810_v25 = vpop.f32.mrf.mxu1  ;;  %12364 = vmatprep.subr.bf16.mxu0 %v13450_v5  ;;  %v12182_v10 = vpop.f32.mrf.mxu0  ;;  %v6964_v43 = vsub.f32 %v16771_v58, %v6932_v19  ;;  %v6965_v16 = vsub.f32 %v16764_v46, %v6932_v19  ;;  %v19892_v5 = vld [vmem:[#allocation45_spill] sm:$0xff]  ;;  %13746 = vpow2.f32 %v7018_v30  ;;  %v19897_v19 = vld [vmem:[#allocation46_spill] sm:$0xff] }
 0x88d   : > { %19886 = vst [vmem:[#allocation171_spill] sm:$0xff] %v17476_v35  ;;  %v8862_v1 = vmax.f32 %v17473_v17, %v17476_v35  ;;  %7298 = vmatmul.mubr.bf16.gmra.mxu0 %v7102_v13  ;;  %v17490_v12 = vadd.f32 %v8810_v25, %v15654_v44  ;;  %13748 = vpow2.f32 %v7016_v59  ;;  %v19900_v59 = vld [vmem:[#allocation32_spill] sm:$0xff] }
 0x88e   : > { %7305 = vmatprep.mubr.bf16.mxu0 %v7105_v54  ;;  %v8812_v40 = vpop.f32.mrf.mxu1  ;;  %12365 = vmatpush3.bf16.msra.mxu0 %v13451_v20  ;;  %v12183_v13 = vpop.f32.mrf.mxu0  ;;  %v13454_v54 = vld [vmem:[#allocation3 + $0x2f8] sm:$0xff]   ;;  %v7024_v23 = vmul.f32 1.442695, %v6964_v43  ;;  %v7026_v30 = vmul.f32 1.442695, %v6965_v16 }
 0x88f   : > { %19890 = vst [vmem:[#allocation65_spill] sm:$0xff] %v17490_v12  ;;  %v17493_v61 = vadd.f32 %v8812_v40, %v15656_v14  ;;  %5113 = vadd.xlane.f32.xlu0 %v19892_v5  ;;  %8863 = vmax.xlane.f32.xlu1 %v8862_v1  ;;  %v17499_v20 = vadd.f32 %v12183_v13, %v12182_v10  ;;  %v7537_v25 = vpop.xlane.xlu1 %7536 }
 0x890   : > { %v8814_v33 = vpop.f32.mrf.mxu1  ;;  %12366 = vmatprep.subr.bf16.mxu0 %v13452_v0  ;;  %v17501_v40 = vpop.f32.mrf.mxu0  ;;  %v7583_v46 = vsub.f32 %v16791_v6, %v7537_v25  ;;  %v7584_v1 = vsub.f32 %v16785_v36, %v7537_v25  ;;  %v7104_v10 = vpack.c.bf16 %v17352_v34, %v17275_v48  ;;  %v7107_v36 = vpack.c.bf16 %v17378_v56, %v17338_v4  ;;  %v19899_v48 = vld [vmem:[#allocation69_spill] sm:$0xff] }
 0x891   : > { %19891 = vst [vmem:[#allocation172_spill] sm:$0xff] %v17493_v61  ;;  %v8865_v58 = vmax.f32 %v17490_v12, %v17493_v61  ;;  %19893 = vst [vmem:[#allocation45_spill] sm:$0xff] %v17499_v20  ;;  %v17506_v45 = vadd.f32 %v8814_v33, %v15654_v44  ;;  %v7106_v33 = vpack.c.bf16 %v17376_v31, %v17330_v39  ;;  %13750 = vpow2.f32 %v7024_v23  ;;  %v19904_v39 = vld [vmem:[#allocation48_spill] sm:$0xff]  ;;  %v19933_v20 = vld [vmem:[#allocation127_spill] sm:$0xff] }
 0x892   : > { %19894 = vst [vmem:[#allocation173_spill] sm:$0xff] %v17501_v40  ;;  %v8816_v35 = vpop.f32.mrf.mxu1  ;;  %12367 = vmatpush3.bf16.msra.mxu0 %v13453_v42  ;;  %v7615_v43 = vmul.f32 1.442695, %v7583_v46  ;;  %v17514_v5 = vpop.f32.mrf.mxu0  ;;  %13752 = vpow2.f32 %v7026_v30  ;;  %v19957_v61 = vld [vmem:[#allocation39_spill] sm:$0xff] }
 0x893   : > { %19895 = vst [vmem:[#allocation174_spill] sm:$0xff] %v17506_v45  ;;  %v17509_v0 = vadd.f32 %v8816_v35, %v15656_v14  ;;  %8866 = vmax.xlane.f32.xlu0 %v8865_v58  ;;  %5116 = vadd.xlane.f32.xlu1 %v19897_v19  ;;  %19898 = vst [vmem:[#allocation46_spill] sm:$0xff] %v17514_v5  ;;  %v7617_v35 = vmul.f32 1.442695, %v7584_v1  ;;  %v6935_v16 = vpop.xlane.xlu0 %6934  ;;  %v7540_v13 = vpop.xlane.xlu1 %7539  ;;  %v19903_v1 = vld [vmem:[#allocation68_spill] sm:$0xff] }
 0x894   : > { %v8820_v6 = vpop.f32.mrf.mxu1  ;;  %12416 = vmatprep.subr.bf16.mxu0 %v13454_v54  ;;  %v6966_v34 = vsub.f32 %v19899_v48, %v6935_v16  ;;  %v6967_v58 = vsub.f32 %v19900_v59, %v6935_v16  ;;  %v12188_v25 = vpop.f32.mrf.mxu0  ;;  %v7585_v4 = vsub.f32 %v16815_v32, %v7540_v13  ;;  %v7586_v19 = vsub.f32 %v19903_v1, %v7540_v13 }
 0x895   : > { %19896 = vst [vmem:[#allocation175_spill] sm:$0xff] %v17509_v0  ;;  %v8868_v42 = vmax.f32 %v17506_v45, %v17509_v0  ;;  %7306 = vmatmul.mubr.bf16.gmra.mxu0 %v7104_v10  ;;  %v17526_v54 = vadd.f32 %v8820_v6, %v15654_v44  ;;  %13754 = vpow2.f32 %v7615_v43 }
 0x896   : > { %7313 = vmatprep.mubr.bf16.mxu0 %v7107_v36  ;;  %v8822_v56 = vpop.f32.mrf.mxu1  ;;  %v7028_v31 = vmul.f32 1.442695, %v6966_v34  ;;  %v7030_v23 = vmul.f32 1.442695, %v6967_v58  ;;  %v7619_v10 = vmul.f32 1.442695, %v7585_v4  ;;  %v12189_v36 = vpop.f32.mrf.mxu0  ;;  %13756 = vpow2.f32 %v7617_v35 }
 0x897   : > { %19901 = vst [vmem:[#allocation69_spill] sm:$0xff] %v17526_v54  ;;  %v17529_v46 = vadd.f32 %v8822_v56, %v15656_v14  ;;  %5119 = vadd.xlane.f32.xlu0 %v19904_v39  ;;  %8869 = vmax.xlane.f32.xlu1 %v8868_v42  ;;  %v7621_v30 = vmul.f32 1.442695, %v7586_v19  ;;  %v17535_v6 = vadd.f32 %v12189_v36, %v12188_v25  ;;  %v7561_v48 = vpop.xlane.xlu0 %7560  ;;  %v7543_v59 = vpop.xlane.xlu1 %7542  ;;  %v19909_v4 = vld [vmem:[#allocation50_spill] sm:$0xff] }
 0x898   : > { %v8824_v16 = vpop.f32.mrf.mxu1  ;;  %13758 = vpow2.f32 %v7028_v31  ;;  %v7599_v13 = vsub.f32 %v16838_v15, %v7561_v48  ;;  %v7600_v42 = vsub.f32 %v16828_v8, %v7561_v48  ;;  %v17539_v43 = vpop.f32.mrf.mxu0  ;;  %v7587_v58 = vsub.f32 %v16834_v28, %v7543_v59 }
 0x899   : > { %19902 = vst [vmem:[#allocation32_spill] sm:$0xff] %v17529_v46  ;;  %v8871_v32 = vmax.f32 %v17526_v54, %v17529_v46  ;;  %19905 = vst [vmem:[#allocation68_spill] sm:$0xff] %v17535_v6  ;;  %13760 = vpow2.f32 %v7030_v23  ;;  %v17543_v35 = vadd.f32 %v8824_v16, %v15654_v44  ;;  %v7588_v25 = vsub.f32 %v16825_v27, %v7543_v59  ;;  %v17552_v28 = vpop.eup %13746 }
 0x89a   : > { %19906 = vst [vmem:[#allocation48_spill] sm:$0xff] %v17539_v43  ;;  %v8826_v34 = vpop.f32.mrf.mxu1  ;;  %13762 = vpow2.f32 %v7619_v10  ;;  %v7647_v15 = vmul.f32 1.442695, %v7599_v13  ;;  %v7649_v8 = vmul.f32 1.442695, %v7600_v42  ;;  %v17550_v19 = vpop.f32.mrf.mxu0  ;;  %v19913_v42 = vld [vmem:[#allocation71_spill] sm:$0xff] }
 0x89b   : > { %19907 = vst [vmem:[#allocation176_spill] sm:$0xff] %v17543_v35  ;;  %v17546_v56 = vadd.f32 %v8826_v34, %v15656_v14  ;;  %8872 = vmax.xlane.f32.xlu0 %v8871_v32  ;;  %5122 = vadd.xlane.f32.xlu1 %v19909_v4  ;;  %v7623_v1 = vmul.f32 1.442695, %v7587_v58  ;;  %19910 = vst [vmem:[#allocation50_spill] sm:$0xff] %v17550_v19  ;;  %13764 = vpow2.f32 %v7621_v30  ;;  %v7625_v23 = vmul.f32 1.442695, %v7588_v25  ;;  %v7567_v36 = vpop.xlane.xlu0 %7566  ;;  %v7546_v27 = vpop.xlane.xlu1 %7545 }
 0x89c   : > { %v9397_v39 = vpop.f32.mrf.mxu1  ;;  %13766 = vpow2.f32 %v7647_v15  ;;  %v7603_v10 = vsub.f32 %v16858_v37, %v7567_v36  ;;  %v7604_v32 = vsub.f32 %v16849_v41, %v7567_v36  ;;  %v12194_v48 = vpop.f32.mrf.mxu0  ;;  %v7589_v13 = vsub.f32 %v16855_v29, %v7546_v27  ;;  %v19914_v34 = vld [vmem:[#allocation33_spill] sm:$0xff] }
 0x89d   : > { %19908 = vst [vmem:[#allocation177_spill] sm:$0xff] %v17546_v56  ;;  %v8874_v31 = vmax.f32 %v17543_v35, %v17546_v56  ;;  %7314 = vmatmul.mubr.bf16.gmra.mxu0 %v7106_v33  ;;  %v17557_v16 = vadd.f32 %v9397_v39, %v15654_v44  ;;  %13768 = vpow2.f32 %v7649_v8  ;;  %v7590_v33 = vsub.f32 %v19913_v42, %v7546_v27  ;;  %v17569_v15 = vpop.eup %13748 }
 0x89e   : > { %v9399_v59 = vpop.f32.mrf.mxu1  ;;  %13770 = vpow2.f32 %v7623_v1  ;;  %v7655_v58 = vmul.f32 1.442695, %v7603_v10  ;;  %v7657_v25 = vmul.f32 1.442695, %v7604_v32  ;;  %v7109_v37 = vpack.c.bf16 %v17394_v38, %v17552_v28  ;;  %v12195_v41 = vpop.f32.mrf.mxu0 }
 0x89f   : > { %19911 = vst [vmem:[#allocation178_spill] sm:$0xff] %v17557_v16  ;;  %v17562_v30 = vadd.f32 %v9399_v59, %v15656_v14  ;;  %5125 = vadd.xlane.f32.xlu0 %v19914_v34  ;;  %8875 = vmax.xlane.f32.xlu1 %v8874_v31  ;;  %13772 = vpow2.f32 %v7625_v23  ;;  %v7627_v29 = vmul.f32 1.442695, %v7589_v13  ;;  %v7629_v39 = vmul.f32 1.442695, %v7590_v33  ;;  %v7573_v36 = vpop.xlane.xlu0 %7572  ;;  %v7549_v27 = vpop.xlane.xlu1 %7548  ;;  %v19918_v59 = vld [vmem:[#allocation73_spill] sm:$0xff] }
 0x8a0   : > { %v9401_v4 = vpop.f32.mrf.mxu1  ;;  %13774 = vpow2.f32 %v7655_v58  ;;  %7321 = vmatprep.mubr.bf16.mxu0 %v7109_v37  ;;  %v17573_v1 = vadd.f32 %v12195_v41, %v12194_v48  ;;  %v7607_v38 = vsub.f32 %v16886_v57, %v7573_v36  ;;  %v17579_v10 = vpop.f32.mrf.mxu0  ;;  %v7608_v13 = vsub.f32 %v19918_v59, %v7573_v36  ;;  %v19920_v33 = vld [vmem:[#allocation75_spill] sm:$0xff]  ;;  %v19921_v48 = vld [vmem:[#allocation34_spill] sm:$0xff]  ;;  %v19922_v37 = vld [vmem:[#allocation72_spill] sm:$0xff] }
 0x8a1   : > { %19912 = vst [vmem:[#allocation179_spill] sm:$0xff] %v17562_v30  ;;  %v9476_v8 = vmax.f32 %v17557_v16, %v17562_v30  ;;  %v17576_v31 = vadd.f32 %v9401_v4, %v15654_v44  ;;  %19917 = vst [vmem:[#allocation180_spill] sm:$0xff] %v17579_v10  ;;  %v17581_v23 = vpop.eup %13750  ;;  %13776 = vpow2.f32 %v7657_v25  ;;  %v7591_v34 = vsub.f32 %v19920_v33, %v7549_v27 }
 0x8a2   : > { %19915 = vst [vmem:[#allocation71_spill] sm:$0xff] %v17573_v1  ;;  %v9403_v32 = vpop.f32.mrf.mxu1  ;;  %v17589_v58 = vpop.eup %13752  ;;  %13778 = vpow2.f32 %v7627_v29  ;;  %v7663_v57 = vmul.f32 1.442695, %v7607_v38  ;;  %v7592_v41 = vsub.f32 %v19922_v37, %v7549_v27  ;;  %v7108_v4 = vpack.c.bf16 %v17392_v24, %v17569_v15  ;;  %v19926_v1 = vld [vmem:[#allocation35_spill] sm:$0xff] }
 0x8a3   : > { %19916 = vst [vmem:[#allocation33_spill] sm:$0xff] %v17576_v31  ;;  %v17585_v42 = vadd.f32 %v9403_v32, %v15656_v14  ;;  %9477 = vmax.xlane.f32.xlu0 %v9476_v8  ;;  %5128 = vadd.xlane.f32.xlu1 %v19921_v48  ;;  %v17594_v25 = vpop.f32.mrf.mxu0  ;;  %v17596_v59 = vpop.eup %13754  ;;  %13780 = vpow2.f32 %v7629_v39  ;;  %v7665_v32 = vmul.f32 1.442695, %v7608_v13  ;;  %v7631_v33 = vmul.f32 1.442695, %v7591_v34 }
 0x8a4   : > { %19923 = vst [vmem:[#allocation75_spill] sm:$0xff] %v17594_v25  ;;  %v9407_v36 = vpop.f32.mrf.mxu1  ;;  %v7579_v48 = vpop.xlane.xlu0 %7578  ;;  %13782 = vpow2.f32 %v7663_v57  ;;  %v7633_v27 = vmul.f32 1.442695, %v7592_v41  ;;  %v19927_v41 = vld [vmem:[#allocation125_spill] sm:$0xff]  ;;  %v17717_v17 = vadd.f32 %v17569_v15, %v17552_v28 }
 0x8a5   : > { %19919 = vst [vmem:[#allocation73_spill] sm:$0xff] %v17585_v42  ;;  %v9479_v8 = vmax.f32 %v17576_v31, %v17585_v42  ;;  %v7552_v10 = vpop.xlane.xlu1 %7551  ;;  %v17600_v29 = vpop.eup %13756  ;;  %7322 = vmatmul.mubr.bf16.gmra.mxu0 %v7108_v4  ;;  %v17603_v24 = vadd.f32 %v9407_v36, %v15654_v44  ;;  %13784 = vpow2.f32 %v7665_v32  ;;  %v7611_v39 = vsub.f32 %v16906_v51, %v7579_v48  ;;  %v19928_v36 = vld [vmem:[#allocation124_spill] sm:$0xff] }
 0x8a6   : > { %v12200_v38 = vpop.f32.mrf.mxu0  ;;  %v9409_v37 = vpop.f32.mrf.mxu1  ;;  %v7612_v13 = vsub.f32 %v16897_v2, %v7579_v48  ;;  %13786 = vpow2.f32 %v7631_v33  ;;  %v7593_v4 = vsub.f32 %v19927_v41, %v7552_v10  ;;  %v7594_v19 = vsub.f32 %v19928_v36, %v7552_v10  ;;  %v13457_v28 = vld [vmem:[#allocation3 + $0x2b0] sm:$0xff]  }
 0x8a7   : > { %19924 = vst [vmem:[#allocation34_spill] sm:$0xff] %v17603_v24  ;;  %v17605_v25 = vpop.eup %13758  ;;  %v17610_v34 = vadd.f32 %v9409_v37, %v15656_v14  ;;  %5131 = vadd.xlane.f32.xlu0 %v19926_v1  ;;  %9480 = vmax.xlane.f32.xlu1 %v9479_v8  ;;  %v7671_v51 = vmul.f32 1.442695, %v7611_v39  ;;  %13788 = vpow2.f32 %v7633_v27 }
 0x8a8   : > { %v17613_v57 = vpop.eup %13760  ;;  %v12201_v43 = vpop.f32.mrf.mxu0  ;;  %v7673_v5 = vmul.f32 1.442695, %v7612_v13  ;;  %v7110_v1 = vpack.c.bf16 %v17605_v25, %v17581_v23  ;;  %v7637_v33 = vmul.f32 1.442695, %v7594_v19  ;;  %v7635_v36 = vmul.f32 1.442695, %v7593_v4 }
 0x8a9   : > { %19925 = vst [vmem:[#allocation72_spill] sm:$0xff] %v17610_v34  ;;  %v9411_v6 = vpop.f32.mrf.mxu1  ;;  %v17617_v32 = vpop.eup %13762  ;;  %v9482_v2 = vmax.f32 %v17603_v24, %v17610_v34  ;;  %v17625_v37 = vadd.f32 %v12201_v43, %v12200_v38  ;;  %v19934_v24 = vld [vmem:[#allocation126_spill] sm:$0xff]  ;;  %v19935_v19 = vld [vmem:[#allocation36_spill] sm:$0xff]  ;;  %13790 = vpow2.f32 %v7671_v51  ;;  %v19936_v38 = vld [vmem:[#allocation129_spill] sm:$0xff] }
 0x8aa   : > { %v7555_v48 = vpop.xlane.xlu1 %7554  ;;  %v17623_v8 = vpop.eup %13764  ;;  %v17628_v10 = vadd.f32 %v9411_v6, %v15654_v44  ;;  %v7111_v6 = vpack.c.bf16 %v17613_v57, %v17589_v58  ;;  %v19937_v4 = vld [vmem:[#allocation130_spill] sm:$0xff]  ;;  %13792 = vpow2.f32 %v7673_v5 }
 0x8ab   : > { %19929 = vst [vmem:[#allocation35_spill] sm:$0xff] %v17625_v37  ;;  %v17630_v41 = vpop.f32.mrf.mxu0  ;;  %v9413_v39 = vpop.f32.mrf.mxu1  ;;  %v7595_v34 = vsub.f32 %v19933_v20, %v7555_v48  ;;  %v7596_v42 = vsub.f32 %v19934_v24, %v7555_v48  ;;  %9483 = vmax.xlane.f32.xlu0 %v9482_v2  ;;  %5134 = vadd.xlane.f32.xlu1 %v19935_v19  ;;  %13794 = vpow2.f32 %v7637_v33 }
 0x8ac   : > { %19930 = vst [vmem:[#allocation125_spill] sm:$0xff] %v17628_v10  ;;  %19931 = vst [vmem:[#allocation124_spill] sm:$0xff] %v17630_v41  ;;  %v17632_v13 = vpop.eup %13766  ;;  %v17635_v40 = vadd.f32 %v9413_v39, %v15656_v14  ;;  %v8184_v43 = vpop.xlane.xlu0 %8183  ;;  %7329 = vmatprep.mubr.bf16.mxu0 %v7111_v6  ;;  %v7744_v5 = vpack.c.bf16 %v17623_v8, %v17600_v29  ;;  %13796 = vpow2.f32 %v7635_v36  ;;  %v19942_v6 = vld [vmem:[#allocation131_spill] sm:$0xff] }
 0x8ad   : > { %v17640_v27 = vpop.eup %13768  ;;  %v8230_v41 = vsub.f32 %v19936_v38, %v8184_v43  ;;  %v8231_v37 = vsub.f32 %v19937_v4, %v8184_v43  ;;  %v17646_v39 = vpop.f32.mrf.mxu0  ;;  %v7639_v2 = vmul.f32 1.442695, %v7595_v34  ;;  %v7641_v51 = vmul.f32 1.442695, %v7596_v42  ;;  %7330 = vmatmul.mubr.bf16.gmra.mxu0 %v7110_v1 }
 0x8ae   : > { %19932 = vst [vmem:[#allocation181_spill] sm:$0xff] %v17635_v40  ;;  %19938 = vst [vmem:[#allocation127_spill] sm:$0xff] %v17646_v39  ;;  %v9417_v31 = vpop.f32.mrf.mxu1  ;;  %v17648_v20 = vpop.eup %13770  ;;  %v9485_v24 = vmax.f32 %v17628_v10, %v17635_v40  ;;  %v19941_v39 = vld [vmem:[#allocation37_spill] sm:$0xff]  ;;  %v19943_v10 = vld [vmem:[#allocation128_spill] sm:$0xff]  ;;  %7920 = vmatprep.mubr.bf16.mxu0 %v7744_v5 }
 0x8af   : > { %v7558_v48 = vpop.xlane.xlu1 %7557  ;;  %v17652_v19 = vpop.eup %13772  ;;  %v8262_v43 = vmul.f32 1.442695, %v8230_v41  ;;  %v17657_v4 = vadd.f32 %v9417_v31, %v15654_v44  ;;  %5137 = vadd.xlane.f32.xlu0 %v19941_v39  ;;  %v8264_v42 = vmul.f32 1.442695, %v8231_v37  ;;  %13798 = vpow2.f32 %v7639_v2  ;;  %v19949_v5 = vld [vmem:[#allocation132_spill] sm:$0xff] }
 0x8b0   : > { %v12206_v30 = vpop.f32.mrf.mxu0  ;;  %v9419_v38 = vpop.f32.mrf.mxu1  ;;  %v7597_v40 = vsub.f32 %v19942_v6, %v7558_v48  ;;  %v7598_v41 = vsub.f32 %v19943_v10, %v7558_v48  ;;  %9486 = vmax.xlane.f32.xlu1 %v9485_v24  ;;  %13800 = vpow2.f32 %v7641_v51  ;;  %v19946_v24 = vld [vmem:[#allocation133_spill] sm:$0xff]  ;;  %19958 = vst [vmem:[#allocation132_spill] sm:$0xff] %v17717_v17 }
 0x8b1   : > { %v17654_v16 = vpop.eup %13774  ;;  %19939 = vst [vmem:[#allocation126_spill] sm:$0xff] %v17657_v4  ;;  %v17662_v34 = vadd.f32 %v9419_v38, %v15656_v14  ;;  %13802 = vpow2.f32 %v8262_v43  ;;  %v19976_v17 = vld [vmem:[#allocation101_spill] sm:$0xff] }
 0x8b2   : > { %v17665_v33 = vpop.eup %13776  ;;  %v12207_v1 = vpop.f32.mrf.mxu0  ;;  %v7643_v37 = vmul.f32 1.442695, %v7597_v40  ;;  %v7645_v36 = vmul.f32 1.442695, %v7598_v41  ;;  %13804 = vpow2.f32 %v8264_v42  ;;  %v7743_v42 = vpack.c.bf16 %v17617_v32, %v17596_v59 }
 0x8b3   : > { %19940 = vst [vmem:[#allocation36_spill] sm:$0xff] %v17662_v34  ;;  %v9421_v31 = vpop.f32.mrf.mxu1  ;;  %v17669_v56 = vpop.eup %13778  ;;  %v9488_v38 = vmax.f32 %v17657_v4, %v17662_v34  ;;  %v17673_v35 = vadd.f32 %v12207_v1, %v12206_v30  ;;  %v19952_v34 = vld [vmem:[#allocation136_spill] sm:$0xff] }
 0x8b4   : > { %v7564_v39 = vpop.xlane.xlu1 %7563  ;;  %v17675_v46 = vpop.eup %13780  ;;  %v17683_v2 = vadd.f32 %v9421_v31, %v15654_v44  ;;  %13806 = vpow2.f32 %v7645_v36  ;;  %v13456_v36 = vld [vmem:[#allocation3 + $0x2f0] sm:$0xff]  }
 0x8b5   : > { %19944 = vst [vmem:[#allocation129_spill] sm:$0xff] %v17673_v35  ;;  %v17677_v6 = vpop.f32.mrf.mxu0  ;;  %v9423_v10 = vpop.f32.mrf.mxu1  ;;  %v7601_v48 = vsub.f32 %v19946_v24, %v7564_v39  ;;  %v7602_v1 = vsub.f32 %v19949_v5, %v7564_v39  ;;  %9489 = vmax.xlane.f32.xlu0 %v9488_v38  ;;  %v19951_v24 = vld [vmem:[#allocation135_spill] sm:$0xff]  ;;  %13808 = vpow2.f32 %v7643_v37  ;;  %7921 = vmatmul.mubr.bf16.vlgmr.msra.gmra.mxu0 %v7743_v42  ;;  %v19956_v37 = vld [vmem:[#allocation134_spill] sm:$0xff] }
 0x8b6   : > { %19945 = vst [vmem:[#allocation130_spill] sm:$0xff] %v17677_v6  ;;  %v17680_v54 = vpop.eup %13782  ;;  %19947 = vst [vmem:[#allocation37_spill] sm:$0xff] %v17683_v2  ;;  %v17686_v30 = vadd.f32 %v9423_v10, %v15656_v14  ;;  %v8190_v51 = vpop.xlane.xlu0 %8189  ;;  %v19950_v6 = vld [vmem:[#allocation38_spill] sm:$0xff] }
 0x8b7   : > { %v17689_v40 = vpop.eup %13784  ;;  %v7651_v41 = vmul.f32 1.442695, %v7601_v48  ;;  %5140 = vadd.xlane.f32.xlu1 %v19950_v6  ;;  %v8234_v35 = vsub.f32 %v19951_v24, %v8190_v51  ;;  %v8235_v43 = vsub.f32 %v19952_v34, %v8190_v51  ;;  %v17694_v4 = vpop.f32.mrf.mxu0  ;;  %v7653_v39 = vmul.f32 1.442695, %v7602_v1  ;;  %v13455_v48 = vld [vmem:[#allocation3 + $0x2b8] sm:$0xff]  }
 0x8b8   : > { %19948 = vst [vmem:[#allocation131_spill] sm:$0xff] %v17686_v30  ;;  %19953 = vst [vmem:[#allocation128_spill] sm:$0xff] %v17694_v4  ;;  %v9427_v31 = vpop.f32.mrf.mxu1  ;;  %v17696_v0 = vpop.eup %13786  ;;  %v9491_v38 = vmax.f32 %v17683_v2, %v17686_v30  ;;  %v7746_v34 = vpack.c.bf16 %v17675_v46, %v17652_v19  ;;  %v19955_v2 = vld [vmem:[#allocation137_spill] sm:$0xff]  ;;  %12417 = vmatpush3.bf16.msra.mxu0 %v13455_v48 }
 0x8b9   : > { %v7570_v10 = vpop.xlane.xlu1 %7569  ;;  %v8270_v6 = vmul.f32 1.442695, %v8234_v35  ;;  %v17703_v5 = vadd.f32 %v9427_v31, %v15654_v44  ;;  %v12212_v51 = vpop.f32.mrf.mxu0  ;;  %v8272_v30 = vmul.f32 1.442695, %v8235_v43  ;;  %5143 = vadd.xlane.f32.xlu0 %v19957_v61  ;;  %13810 = vpow2.f32 %v7651_v41  ;;  %12418 = vmatprep.subr.bf16.mxu0 %v13456_v36  ;;  %v19968_v36 = vld [vmem:[#allocation40_spill] sm:$0xff] }
 0x8ba   : > { %v9429_v24 = vpop.f32.mrf.mxu1  ;;  %v17707_v4 = vpop.eup %13788  ;;  %v7605_v45 = vsub.f32 %v19955_v2, %v7570_v10  ;;  %v7606_v35 = vsub.f32 %v19956_v37, %v7570_v10  ;;  %7928 = vmatprep.mubr.bf16.mxu0 %v7746_v34  ;;  %v17721_v43 = vadd.f32 %v17589_v58, %v17581_v23  ;;  %v17725_v2 = vadd.f32 %v17600_v29, %v17596_v59  ;;  %v19963_v29 = vld [vmem:[#allocation81_spill] sm:$0xff]  ;;  %v13458_v37 = vld [vmem:[#allocation3 + $0x2e8] sm:$0xff]  }
 0x8bb   : > { %v17710_v1 = vadd.f32 %v9429_v24, %v15656_v14  ;;  %9492 = vmax.xlane.f32.xlu1 %v9491_v38  ;;  %v12213_v31 = vpop.f32.mrf.mxu0  ;;  %v17727_v42 = vpop.eup %13790  ;;  %13812 = vpow2.f32 %v7653_v39  ;;  %v19964_v24 = vld [vmem:[#allocation138_spill] sm:$0xff] }
 0x8bc   : > { %v9431_v12 = vpop.f32.mrf.mxu1  ;;  %19959 = vst [vmem:[#allocation38_spill] sm:$0xff] %v17721_v43  ;;  %19960 = vst [vmem:[#allocation135_spill] sm:$0xff] %v17725_v2  ;;  %v7659_v41 = vmul.f32 1.442695, %v7605_v45  ;;  %v7661_v38 = vmul.f32 1.442695, %v7606_v35  ;;  %v17731_v15 = vpop.eup %13792  ;;  %13814 = vpow2.f32 %v8270_v6  ;;  %v17733_v23 = vadd.f32 %v12213_v31, %v12212_v51  ;;  %12419 = vmatpush3.bf16.msra.mxu0 %v13457_v28 }
 0x8bd   : > { %19954 = vst [vmem:[#allocation133_spill] sm:$0xff] %v17710_v1  ;;  %v9494_v61 = vmax.f32 %v17703_v5, %v17710_v1  ;;  %v7576_v10 = vpop.xlane.xlu1 %7575  ;;  %v17735_v58 = vpop.f32.mrf.mxu0  ;;  %13816 = vpow2.f32 %v8272_v30  ;;  %v17742_v45 = vadd.f32 %v9431_v12, %v15654_v44  ;;  %v17749_v51 = vadd.f32 %v17613_v57, %v17605_v25  ;;  %12420 = vmatprep.subr.bf16.mxu0 %v13458_v37  ;;  %v20006_v1 = vld [vmem:[#allocation119_spill] sm:$0xff] }
 0x8be   : > { %19961 = vst [vmem:[#allocation136_spill] sm:$0xff] %v17733_v23  ;;  %19962 = vst [vmem:[#allocation137_spill] sm:$0xff] %v17735_v58  ;;  %v9433_v59 = vpop.f32.mrf.mxu1  ;;  %v7609_v34 = vsub.f32 %v19963_v29, %v7576_v10  ;;  %v7610_v39 = vsub.f32 %v19964_v24, %v7576_v10  ;;  %v17739_v2 = vpop.eup %13794  ;;  %13818 = vpow2.f32 %v7659_v41  ;;  %v19969_v10 = vld [vmem:[#allocation83_spill] sm:$0xff]  ;;  %v7745_v25 = vpack.c.bf16 %v17669_v56, %v17648_v20  ;;  %v19973_v23 = vld [vmem:[#allocation140_spill] sm:$0xff] }
 0x8bf   : > { %19965 = vst [vmem:[#allocation134_spill] sm:$0xff] %v17742_v45  ;;  %v17745_v48 = vadd.f32 %v9433_v59, %v15656_v14  ;;  %9495 = vmax.xlane.f32.xlu0 %v9494_v61  ;;  %v8196_v6 = vpop.xlane.xlu0 %8195  ;;  %19967 = vst [vmem:[#allocation81_spill] sm:$0xff] %v17749_v51  ;;  %5146 = vadd.xlane.f32.xlu1 %v19968_v36  ;;  %v17753_v30 = vpop.f32.mrf.mxu0  ;;  %13820 = vpow2.f32 %v7661_v38  ;;  %v19971_v59 = vld [vmem:[#allocation82_spill] sm:$0xff]  ;;  %v13459_v41 = vld [vmem:[#allocation3 + $0x2a8] sm:$0xff]   ;;  %v7748_v38 = vpack.c.bf16 %v17739_v2, %v17707_v4 }
 0x8c0   : > { %v7667_v35 = vmul.f32 1.442695, %v7609_v34  ;;  %v7669_v31 = vmul.f32 1.442695, %v7610_v39  ;;  %v8238_v29 = vsub.f32 %v19969_v10, %v8196_v6  ;;  %19970 = vst [vmem:[#allocation138_spill] sm:$0xff] %v17753_v30  ;;  %v9437_v12 = vpop.f32.mrf.mxu1  ;;  %v17755_v24 = vpop.eup %13796  ;;  %v8239_v58 = vsub.f32 %v19971_v59, %v8196_v6  ;;  %v13460_v6 = vld [vmem:[#allocation3 + $0x2e0] sm:$0xff]   ;;  %7929 = vmatmul.mubr.bf16.gmra.mxu0 %v7745_v25 }
 0x8c1   : > { %19966 = vst [vmem:[#allocation39_spill] sm:$0xff] %v17745_v48  ;;  %v9497_v61 = vmax.f32 %v17742_v45, %v17745_v48  ;;  %v7582_v57 = vpop.xlane.xlu1 %7581  ;;  %v17762_v34 = vpop.eup %13798  ;;  %v17765_v36 = vadd.f32 %v9437_v12, %v15654_v44  ;;  %7936 = vmatprep.mubr.bf16.mxu0 %v7748_v38  ;;  %12421 = vmatpush3.bf16.msra.mxu0 %v13459_v41  ;;  %v19982_v38 = vld [vmem:[#allocation139_spill] sm:$0xff] }
 0x8c2   : > { %v8278_v39 = vmul.f32 1.442695, %v8238_v29  ;;  %v12218_v10 = vpop.f32.mrf.mxu0  ;;  %v9439_v30 = vpop.f32.mrf.mxu1  ;;  %v7613_v51 = vsub.f32 %v19973_v23, %v7582_v57  ;;  %13822 = vpow2.f32 %v7667_v35  ;;  %v8280_v28 = vmul.f32 1.442695, %v8239_v58  ;;  %v19975_v29 = vld [vmem:[#allocation80_spill] sm:$0xff]  ;;  %12422 = vmatprep.subr.bf16.mxu0 %v13460_v6 }
 0x8c3   : > { %19972 = vst [vmem:[#allocation40_spill] sm:$0xff] %v17765_v36  ;;  %v17770_v59 = vpop.eup %13800  ;;  %v17773_v43 = vadd.f32 %v9439_v30, %v15656_v14  ;;  %v7614_v12 = vsub.f32 %v19975_v29, %v7582_v57  ;;  %5739 = vadd.xlane.f32.xlu0 %v19976_v17  ;;  %13824 = vpow2.f32 %v7669_v31  ;;  %9498 = vmax.xlane.f32.xlu1 %v9497_v61  ;;  %v13461_v61 = vld [vmem:[#allocation3 + $0x2a0] sm:$0xff]  }
 0x8c4   : > { %v17777_v48 = vpop.eup %13802  ;;  %v7675_v45 = vmul.f32 1.442695, %v7613_v51  ;;  %v12219_v23 = vpop.f32.mrf.mxu0  ;;  %v17781_v35 = vadd.f32 %v17652_v19, %v17648_v20  ;;  %v17785_v58 = vadd.f32 %v17623_v8, %v17617_v32  ;;  %13826 = vpow2.f32 %v8278_v39  ;;  %v19981_v32 = vld [vmem:[#allocation142_spill] sm:$0xff] }
 0x8c5   : > { %19974 = vst [vmem:[#allocation83_spill] sm:$0xff] %v17773_v43  ;;  %v9441_v37 = vpop.f32.mrf.mxu1  ;;  %v17787_v30 = vpop.eup %13804  ;;  %v9500_v17 = vmax.f32 %v17765_v36, %v17773_v43  ;;  %v7677_v31 = vmul.f32 1.442695, %v7614_v12  ;;  %v17791_v25 = vadd.f32 %v12219_v23, %v12218_v10  ;;  %13828 = vpow2.f32 %v8280_v28  ;;  %v13462_v39 = vld [vmem:[#allocation3 + $0x2d8] sm:$0xff]   ;;  %12423 = vmatpush3.bf16.msra.mxu0 %v13461_v61 }
 0x8c6   : > { %19977 = vst [vmem:[#allocation82_spill] sm:$0xff] %v17781_v35  ;;  %19978 = vst [vmem:[#allocation140_spill] sm:$0xff] %v17785_v58  ;;  %v8187_v51 = vpop.xlane.xlu1 %8186  ;;  %v17793_v57 = vpop.eup %13806  ;;  %13830 = vpow2.f32 %v7675_v45  ;;  %v17802_v10 = vadd.f32 %v9441_v37, %v15654_v44  ;;  %12424 = vmatprep.subr.bf16.mxu0 %v13462_v39  ;;  %v13464_v35 = vld [vmem:[#allocation3 + $0x2d0] sm:$0xff]  }
 0x8c7   : > { %19979 = vst [vmem:[#allocation80_spill] sm:$0xff] %v17791_v25  ;;  %v17795_v20 = vpop.f32.mrf.mxu0  ;;  %v9443_v19 = vpop.f32.mrf.mxu1  ;;  %v8232_v8 = vsub.f32 %v19981_v32, %v8187_v51  ;;  %v8233_v29 = vsub.f32 %v19982_v38, %v8187_v51  ;;  %9501 = vmax.xlane.f32.xlu0 %v9500_v17  ;;  %13832 = vpow2.f32 %v7677_v31  ;;  %v7747_v17 = vpack.c.bf16 %v17755_v24, %v17696_v0  ;;  %v19989_v61 = vld [vmem:[#allocation141_spill] sm:$0xff] }
 0x8c8   : > { %19980 = vst [vmem:[#allocation101_spill] sm:$0xff] %v17795_v20  ;;  %v17799_v58 = vpop.eup %13808  ;;  %19983 = vst [vmem:[#allocation142_spill] sm:$0xff] %v17802_v10  ;;  %v17805_v41 = vadd.f32 %v9443_v19, %v15656_v14  ;;  %v8202_v28 = vpop.xlane.xlu0 %8201  ;;  %v19985_v20 = vld [vmem:[#allocation106_spill] sm:$0xff]  ;;  %v7750_v19 = vpack.c.bf16 %v17793_v57, %v17770_v59 }
 0x8c9   : > { %v8266_v12 = vmul.f32 1.442695, %v8232_v8  ;;  %v8268_v23 = vmul.f32 1.442695, %v8233_v29  ;;  %5742 = vadd.xlane.f32.xlu1 %v19985_v20  ;;  %v8242_v32 = vsub.f32 %v17027_v9, %v8202_v28  ;;  %v8243_v6 = vsub.f32 %v17031_v18, %v8202_v28  ;;  %v17810_v51 = vpop.f32.mrf.mxu0  ;;  %v9447_v38 = vpop.f32.mrf.mxu1  ;;  %v13463_v9 = vld [vmem:[#allocation3 + $0x298] sm:$0xff]   ;;  %7937 = vmatmul.mubr.bf16.gmra.mxu0 %v7747_v17 }
 0x8ca   : > { %19984 = vst [vmem:[#allocation139_spill] sm:$0xff] %v17805_v41  ;;  %19986 = vst [vmem:[#allocation106_spill] sm:$0xff] %v17810_v51  ;;  %v17812_v45 = vpop.eup %13810  ;;  %v9503_v37 = vmax.f32 %v17802_v10, %v17805_v41  ;;  %v8193_v20 = vpop.xlane.xlu1 %8192  ;;  %v19987_v51 = vld [vmem:[#allocation86_spill] sm:$0xff]  ;;  %v17826_v10 = vadd.f32 %v9447_v38, %v15654_v44  ;;  %7944 = vmatprep.mubr.bf16.mxu0 %v7750_v19  ;;  %v17841_v38 = vadd.f32 %v17675_v46, %v17669_v56  ;;  %v19997_v56 = vld [vmem:[#allocation143_spill] sm:$0xff] }
 0x8cb   : > { %v17820_v8 = vpop.eup %13812  ;;  %13834 = vpow2.f32 %v8266_v12  ;;  %v8286_v18 = vmul.f32 1.442695, %v8242_v32  ;;  %v8288_v29 = vmul.f32 1.442695, %v8243_v6  ;;  %v12240_v28 = vpop.f32.mrf.mxu0  ;;  %v8236_v31 = vsub.f32 %v19987_v51, %v8193_v20  ;;  %v19991_v12 = vld [vmem:[#allocation112_spill] sm:$0xff]  ;;  %12425 = vmatpush3.bf16.msra.mxu0 %v13463_v9 }
 0x8cc   : > { %v9449_v25 = vpop.f32.mrf.mxu1  ;;  %v17823_v41 = vpop.eup %13814  ;;  %13836 = vpow2.f32 %v8268_v23  ;;  %19988 = vst [vmem:[#allocation86_spill] sm:$0xff] %v17826_v10  ;;  %v8237_v43 = vsub.f32 %v19989_v61, %v8193_v20  ;;  %5745 = vadd.xlane.f32.xlu0 %v19991_v12  ;;  %v17837_v23 = vadd.f32 %v17707_v4, %v17696_v0  ;;  %19993 = vst [vmem:[#allocation182_spill] sm:$0xff] %v17841_v38  ;;  %v19996_v4 = vld [vmem:[#allocation85_spill] sm:$0xff]  ;;  %12426 = vmatprep.subr.bf16.mxu0 %v13464_v35 }
 0x8cd   : > { %v17830_v36 = vadd.f32 %v9449_v25, %v15656_v14  ;;  %v17833_v32 = vpop.eup %13816  ;;  %13838 = vpow2.f32 %v8286_v18  ;;  %v8274_v39 = vmul.f32 1.442695, %v8236_v31  ;;  %9504 = vmax.xlane.f32.xlu1 %v9503_v37  ;;  %v12241_v6 = vpop.f32.mrf.mxu0  ;;  %v13465_v18 = vld [vmem:[#allocation3 + $0x290] sm:$0xff]  }
 0x8ce   : > { %v9451_v51 = vpop.f32.mrf.mxu1  ;;  %19992 = vst [vmem:[#allocation112_spill] sm:$0xff] %v17837_v23  ;;  %v17843_v25 = vpop.eup %13818  ;;  %13840 = vpow2.f32 %v8288_v29  ;;  %v8276_v17 = vmul.f32 1.442695, %v8237_v43  ;;  %v17847_v19 = vadd.f32 %v12241_v6, %v12240_v28  ;;  %v13466_v43 = vld [vmem:[#allocation3 + $0x2c8] sm:$0xff]  }
 0x8cf   : > { %19990 = vst [vmem:[#allocation141_spill] sm:$0xff] %v17830_v36  ;;  %v9506_v20 = vmax.f32 %v17826_v10, %v17830_v36  ;;  %v8199_v37 = vpop.xlane.xlu1 %8198  ;;  %v17849_v31 = vpop.eup %13820  ;;  %13842 = vpow2.f32 %v8274_v39  ;;  %v17856_v29 = vadd.f32 %v9451_v51, %v15654_v44  ;;  %12427 = vmatpush3.bf16.msra.mxu0 %v13465_v18  ;;  %v13468_v36 = vld [vmem:[#allocation3 + $0x2c0] sm:$0xff]   ;;  %v17885_v18 = vadd.f32 %v17770_v59, %v17762_v34 }
 0x8d0   : > { %19994 = vst [vmem:[#allocation183_spill] sm:$0xff] %v17847_v19  ;;  %v17851_v0 = vpop.f32.mrf.mxu0  ;;  %v8240_v46 = vsub.f32 %v19996_v4, %v8199_v37  ;;  %v8241_v61 = vsub.f32 %v19997_v56, %v8199_v37  ;;  %v9453_v12 = vpop.f32.mrf.mxu1  ;;  %13844 = vpow2.f32 %v8276_v17  ;;  %v20000_v19 = vld [vmem:[#allocation116_spill] sm:$0xff]  ;;  %v20001_v4 = vld [vmem:[#allocation91_spill] sm:$0xff]  ;;  %12428 = vmatprep.subr.bf16.mxu0 %v13466_v43 }
 0x8d1   : > { %19995 = vst [vmem:[#allocation184_spill] sm:$0xff] %v17851_v0  ;;  %19998 = vst [vmem:[#allocation85_spill] sm:$0xff] %v17856_v29  ;;  %v17859_v28 = vadd.f32 %v9453_v12, %v15656_v14  ;;  %v8208_v9 = vpop.xlane.xlu0 %8207  ;;  %9507 = vmax.xlane.f32.xlu0 %v9506_v20  ;;  %v17861_v6 = vpop.eup %13822  ;;  %5748 = vadd.xlane.f32.xlu1 %v20000_v19  ;;  %v20002_v56 = vld [vmem:[#allocation88_spill] sm:$0xff]  ;;  %v7749_v20 = vpack.c.bf16 %v17799_v58, %v17762_v34  ;;  %v13469_v59 = vld [vmem:[#allocation3 + $0x280] sm:$0xff]  }
 0x8d2   : > { %v8282_v39 = vmul.f32 1.442695, %v8240_v46  ;;  %v8284_v0 = vmul.f32 1.442695, %v8241_v61  ;;  %v8246_v37 = vsub.f32 %v20001_v4, %v8208_v9  ;;  %v8247_v35 = vsub.f32 %v20002_v56, %v8208_v9  ;;  %v17866_v38 = vpop.f32.mrf.mxu0  ;;  %v17868_v17 = vpop.eup %13824  ;;  %v13467_v19 = vld [vmem:[#allocation3 + $0x288] sm:$0xff]  }
 0x8d3   : > { %19999 = vst [vmem:[#allocation143_spill] sm:$0xff] %v17859_v28  ;;  %20003 = vst [vmem:[#allocation116_spill] sm:$0xff] %v17866_v38  ;;  %v9509_v51 = vmax.f32 %v17856_v29, %v17859_v28  ;;  %v7752_v46 = vpack.c.bf16 %v17820_v8, %v17640_v27  ;;  %v8205_v61 = vpop.xlane.xlu1 %8204  ;;  %v17876_v12 = vpop.eup %13826  ;;  %v20004_v38 = vld [vmem:[#allocation90_spill] sm:$0xff]  ;;  %7945 = vmatmul.mubr.bf16.gmra.mxu0 %v7749_v20  ;;  %v20005_v29 = vld [vmem:[#allocation87_spill] sm:$0xff] }
 0x8d4   : > { %13846 = vpow2.f32 %v8282_v39  ;;  %v8294_v9 = vmul.f32 1.442695, %v8246_v37  ;;  %v8296_v4 = vmul.f32 1.442695, %v8247_v35  ;;  %v12246_v56 = vpop.f32.mrf.mxu0  ;;  %v8244_v23 = vsub.f32 %v20004_v38, %v8205_v61  ;;  %v17879_v28 = vpop.eup %13828  ;;  %12429 = vmatpush3.bf16.msra.mxu0 %v13467_v19  ;;  %v20009_v20 = vld [vmem:[#allocation93_spill] sm:$0xff] }
 0x8d5   : > { %13848 = vpow2.f32 %v8284_v0  ;;  %v8245_v10 = vsub.f32 %v20005_v29, %v8205_v61  ;;  %5751 = vadd.xlane.f32.xlu0 %v20006_v1  ;;  %v17889_v39 = vadd.f32 %v17755_v24, %v17739_v2  ;;  %v17891_v37 = vpop.eup %13830  ;;  %7952 = vmatprep.mubr.bf16.mxu0 %v7752_v46  ;;  %v17895_v0 = vadd.f32 %v17640_v27, %v17632_v13  ;;  %v20008_v24 = vld [vmem:[#allocation92_spill] sm:$0xff] }
 0x8d6   : > { %13850 = vpow2.f32 %v8294_v9  ;;  %v8290_v38 = vmul.f32 1.442695, %v8244_v23  ;;  %v12247_v43 = vpop.f32.mrf.mxu0  ;;  %9510 = vmax.xlane.f32.xlu1 %v9509_v51  ;;  %v17899_v2 = vpop.eup %13832  ;;  %12430 = vmatprep.subr.bf16.mxu0 %v13468_v36  ;;  %v13470_v51 = vld [vmem:[#allocation3 + $0x378] sm:$0xff]   ;;  %v17905_v27 = vadd.f32 %v17799_v58, %v17793_v57  ;;  %v17911_v61 = vadd.f32 %v17665_v33, %v17654_v16 }
 0x8d7   : > { %13852 = vpow2.f32 %v8296_v4  ;;  %v8292_v1 = vmul.f32 1.442695, %v8245_v10  ;;  %v17897_v29 = vadd.f32 %v12247_v43, %v12246_v56  ;;  %v8211_v34 = vpop.xlane.xlu1 %8210  ;;  %v8214_v10 = vpop.xlane.xlu0 %8213  ;;  %v17915_v19 = vadd.f32 %v17820_v8, %v17812_v45  ;;  %v20012_v4 = vld [vmem:[#allocation145_spill] sm:$0xff] }
 0x8d8   : > { %13854 = vpow2.f32 %v8290_v38  ;;  %v8248_v35 = vsub.f32 %v20008_v24, %v8211_v34  ;;  %v8249_v23 = vsub.f32 %v20009_v20, %v8211_v34  ;;  %v17907_v46 = vpop.eup %13834  ;;  %v17919_v36 = vadd.f32 %v17689_v40, %v17680_v54  ;;  %v20013_v38 = vld [vmem:[#allocation146_spill] sm:$0xff]  ;;  %12431 = vmatpush3.bf16.msra.mxu0 %v13469_v59 }
 0x8d9   : > { %20007 = vst [vmem:[#allocation91_spill] sm:$0xff] %v17897_v29  ;;  %13856 = vpow2.f32 %v8292_v1  ;;  %20010 = vst [vmem:[#allocation88_spill] sm:$0xff] %v17915_v19  ;;  %v17921_v9 = vpop.eup %13836  ;;  %v8250_v56 = vsub.f32 %v20012_v4, %v8214_v10  ;;  %v8251_v43 = vsub.f32 %v20013_v38, %v8214_v10  ;;  %v20014_v1 = vld [vmem:[#allocation122_spill] sm:$0xff]  ;;  %v7751_v8 = vpack.c.bf16 %v17812_v45, %v17632_v13 }
 0x8da   : > { %20011 = vst [vmem:[#allocation90_spill] sm:$0xff] %v17919_v36  ;;  %v8298_v58 = vmul.f32 1.442695, %v8248_v35  ;;  %v8300_v57 = vmul.f32 1.442695, %v8249_v23  ;;  %5754 = vadd.xlane.f32.xlu1 %v20014_v1  ;;  %v17926_v34 = vpop.eup %13838  ;;  %v7754_v24 = vpack.c.bf16 %v17849_v31, %v17665_v33  ;;  %v17934_v20 = vadd.f32 %v17849_v31, %v17843_v25  ;;  %12480 = vmatprep.subr.bf16.mxu0 %v13470_v51 }
 0x8db   : > { %v17936_v35 = vpop.eup %13840  ;;  %v8302_v23 = vmul.f32 1.442695, %v8250_v56  ;;  %v8304_v10 = vmul.f32 1.442695, %v8251_v43  ;;  %v17940_v4 = vadd.f32 %v17731_v15, %v17727_v42  ;;  %7953 = vmatmul.mubr.bf16.gmra.mxu0 %v7751_v8  ;;  %v17946_v13 = vadd.f32 %v17868_v17, %v17861_v6  ;;  %v8217_v59 = vpop.xlane.xlu1 %8216  ;;  %v20023_v43 = vld [vmem:[#allocation95_spill] sm:$0xff] }
 0x8dc   : > { %20015 = vst [vmem:[#allocation87_spill] sm:$0xff] %v17934_v20  ;;  %13858 = vpow2.f32 %v8298_v58  ;;  %v17942_v38 = vpop.eup %13842  ;;  %v17950_v33 = vadd.f32 %v17787_v30, %v17777_v48  ;;  %v17954_v45 = vadd.f32 %v17899_v2, %v17891_v37  ;;  %7960 = vmatprep.mubr.bf16.mxu0 %v7754_v24  ;;  %v17960_v51 = vadd.f32 %v17833_v32, %v17823_v41 }
 0x8dd   : > { %20016 = vst [vmem:[#allocation119_spill] sm:$0xff] %v17940_v4  ;;  %13860 = vpow2.f32 %v8300_v57  ;;  %20017 = vst [vmem:[#allocation92_spill] sm:$0xff] %v17946_v13  ;;  %v17956_v31 = vpop.eup %13844  ;;  %v17964_v58 = vadd.f32 %v17921_v9, %v17907_v46  ;;  %v20022_v57 = vld [vmem:[#allocation147_spill] sm:$0xff]  ;;  %v8253_v1 = vsub.f32 %v20023_v43, %v8217_v59  ;;  %v17970_v8 = vadd.f32 %v17879_v28, %v17876_v12  ;;  %v20027_v43 = vld [vmem:[#allocation148_spill] sm:$0xff] }
 0x8de   : > { %20018 = vst [vmem:[#allocation93_spill] sm:$0xff] %v17950_v33  ;;  %20019 = vst [vmem:[#allocation145_spill] sm:$0xff] %v17954_v45  ;;  %13862 = vpow2.f32 %v8302_v23  ;;  %v8252_v56 = vsub.f32 %v20022_v57, %v8217_v59  ;;  %v17974_v24 = vadd.f32 %v17956_v31, %v17942_v38  ;;  %v17978_v23 = vadd.f32 %v17936_v35, %v17926_v34  ;;  %v8220_v57 = vpop.xlane.xlu0 %8219  ;;  %v20028_v45 = vld [vmem:[#allocation99_spill] sm:$0xff] }
 0x8df   : > { %20020 = vst [vmem:[#allocation146_spill] sm:$0xff] %v17960_v51  ;;  %20021 = vst [vmem:[#allocation122_spill] sm:$0xff] %v17964_v58  ;;  %13864 = vpow2.f32 %v8304_v10  ;;  %v8308_v10 = vmul.f32 1.442695, %v8253_v1  ;;  %v8255_v33 = vsub.f32 %v20028_v45, %v8220_v57 }
 0x8e0   : > { %20024 = vst [vmem:[#allocation147_spill] sm:$0xff] %v17970_v8  ;;  %20025 = vst [vmem:[#allocation95_spill] sm:$0xff] %v17974_v24  ;;  %v8306_v58 = vmul.f32 1.442695, %v8252_v56  ;;  %v8254_v8 = vsub.f32 %v20027_v43, %v8220_v57  ;;  %v7753_v24 = vpack.c.bf16 %v17843_v25, %v17654_v16  ;;  %v7756_v56 = vpack.c.bf16 %v17868_v17, %v17689_v40  ;;  %v8223_v43 = vpop.xlane.xlu1 %8222  ;;  %v20031_v25 = vld [vmem:[#allocation97_spill] sm:$0xff]  ;;  %v20032_v40 = vld [vmem:[#allocation100_spill] sm:$0xff] }
 0x8e1   : > { %20026 = vst [vmem:[#allocation185_spill] sm:$0xff] %v17978_v23  ;;  %v17980_v29 = vpop.eup %13846  ;;  %v8312_v4 = vmul.f32 1.442695, %v8255_v33  ;;  %v8257_v17 = vsub.f32 %v20032_v40, %v8223_v43  ;;  %v7755_v40 = vpack.c.bf16 %v17861_v6, %v17680_v54  ;;  %v20039_v6 = vld [vmem:[#allocation109_spill] sm:$0xff] }
 0x8e2   : > { %v17982_v51 = vpop.eup %13848  ;;  %13866 = vpow2.f32 %v8306_v58  ;;  %v8310_v58 = vmul.f32 1.442695, %v8254_v8 }
 0x8e3   : > { %v17984_v59 = vpop.eup %13850  ;;  %13868 = vpow2.f32 %v8308_v10  ;;  %v17996_v1 = vadd.f32 %v17982_v51, %v17980_v29  ;;  %7961 = vmatmul.mubr.bf16.gmra.mxu0 %v7753_v24  ;;  %v8256_v10 = vsub.f32 %v20031_v25, %v8223_v43  ;;  %v8316_v8 = vmul.f32 1.442695, %v8257_v17  ;;  %v20035_v43 = vld [vmem:[#allocation105_spill] sm:$0xff] }
 0x8e4   : > { %v17990_v13 = vpop.eup %13852  ;;  %7968 = vmatprep.mubr.bf16.mxu0 %v7756_v56  ;;  %13870 = vpow2.f32 %v8310_v58  ;;  %v20034_v56 = vld [vmem:[#allocation98_spill] sm:$0xff] }
 0x8e5   : > { %20029 = vst [vmem:[#allocation148_spill] sm:$0xff] %v17996_v1  ;;  %v17998_v23 = vpop.eup %13854  ;;  %v18002_v45 = vadd.f32 %v17990_v13, %v17984_v59  ;;  %13872 = vpow2.f32 %v8312_v4  ;;  %v8314_v33 = vmul.f32 1.442695, %v8256_v10  ;;  %v7758_v4 = vpack.c.bf16 %v17899_v2, %v17731_v15 }
 0x8e6   : > { %v18004_v16 = vpop.eup %13856 }
 0x8e7   : > { %20030 = vst [vmem:[#allocation99_spill] sm:$0xff] %v18002_v45  ;;  %v18010_v57 = vadd.f32 %v18004_v16, %v17998_v23  ;;  %13874 = vpow2.f32 %v8314_v33  ;;  %v8226_v45 = vpop.xlane.xlu0 %8225 }
 0x8e8   : > { %13876 = vpow2.f32 %v8316_v8  ;;  %v8258_v25 = vsub.f32 %v20034_v56, %v8226_v45  ;;  %v8259_v58 = vsub.f32 %v20035_v43, %v8226_v45  ;;  %v8229_v8 = vpop.xlane.xlu1 %8228  ;;  %v20038_v45 = vld [vmem:[#allocation102_spill] sm:$0xff] }
 0x8e9   : > { %20033 = vst [vmem:[#allocation97_spill] sm:$0xff] %v18010_v57  ;;  %v18012_v24 = vpop.eup %13858  ;;  %v8260_v54 = vsub.f32 %v20038_v45, %v8229_v8  ;;  %v8261_v43 = vsub.f32 %v20039_v6, %v8229_v8 }
 0x8ea   : > { %v18014_v1 = vpop.eup %13860  ;;  %v8318_v17 = vmul.f32 1.442695, %v8258_v25  ;;  %v8320_v33 = vmul.f32 1.442695, %v8259_v58 }
 0x8eb   : > { %v18016_v20 = vpop.eup %13862  ;;  %v18028_v10 = vadd.f32 %v18014_v1, %v18012_v24  ;;  %7969 = vmatmul.mubr.bf16.gmra.mxu0 %v7755_v40  ;;  %v8322_v15 = vmul.f32 1.442695, %v8260_v54  ;;  %v8324_v2 = vmul.f32 1.442695, %v8261_v43  ;;  %v20040_v40 = vld [vmem:[#allocation107_spill] sm:$0xff]  ;;  %v8391_v54 = vpack.c.bf16 %v17921_v9, %v17787_v30 }
 0x8ec   : > { %v18022_v57 = vpop.eup %13864  ;;  %7976 = vmatprep.mubr.bf16.mxu0 %v7758_v4  ;;  %13878 = vpow2.f32 %v8318_v17  ;;  %v8831_v25 = vpop.xlane.xlu0 %8830  ;;  %v7757_v4 = vpack.c.bf16 %v17891_v37, %v17727_v42 }
 0x8ed   : > { %20036 = vst [vmem:[#allocation100_spill] sm:$0xff] %v18028_v10  ;;  %v18032_v56 = vadd.f32 %v18022_v57, %v18016_v20  ;;  %13880 = vpow2.f32 %v8320_v33  ;;  %v8877_v58 = vsub.f32 %v17224_v62, %v8831_v25  ;;  %v8878_v19 = vsub.f32 %v20040_v40, %v8831_v25 }
 0x8ee   : > { %13882 = vpow2.f32 %v8322_v15  ;;  %v8390_v40 = vpack.c.bf16 %v17907_v46, %v17777_v48  ;;  %v13473_v48 = vld [vmem:[#allocation3 + $0x330] sm:$0xff]  }
 0x8ef   : > { %20037 = vst [vmem:[#allocation98_spill] sm:$0xff] %v18032_v56  ;;  %v18036_v36 = vpop.eup %13866  ;;  %13884 = vpow2.f32 %v8324_v2  ;;  %v8909_v33 = vmul.f32 1.442695, %v8877_v58  ;;  %v8911_v45 = vmul.f32 1.442695, %v8878_v19  ;;  %v13471_v58 = vld [vmem:[#allocation3 + $0x338] sm:$0xff]  }
 0x8f0   : > { %v18038_v10 = vpop.eup %13868  ;;  %v8834_v62 = vpop.xlane.xlu1 %8833 }
 0x8f1   : > { %v18046_v17 = vadd.f32 %v18038_v10, %v18036_v36  ;;  %v18048_v8 = vpop.eup %13870  ;;  %13886 = vpow2.f32 %v8909_v33  ;;  %v8879_v43 = vsub.f32 %v17240_v50, %v8834_v62  ;;  %v8880_v42 = vsub.f32 %v17257_v21, %v8834_v62 }
 0x8f2   : > { %v18052_v6 = vpop.eup %13872  ;;  %13888 = vpow2.f32 %v8911_v45  ;;  %v8393_v62 = vpack.c.bf16 %v17956_v31, %v17833_v32  ;;  %v13474_v32 = vld [vmem:[#allocation3 + $0x368] sm:$0xff]  }
 0x8f3   : > { %20041 = vst [vmem:[#allocation105_spill] sm:$0xff] %v18046_v17  ;;  %7977 = vmatmul.mubr.bf16.gmra.mxu0 %v7757_v4  ;;  %v18058_v37 = vadd.f32 %v18052_v6, %v18048_v8  ;;  %v8913_v30 = vmul.f32 1.442695, %v8879_v43  ;;  %v8915_v9 = vmul.f32 1.442695, %v8880_v42  ;;  %v13472_v4 = vld [vmem:[#allocation3 + $0x370] sm:$0xff]  }
 0x8f4   : > { %8567 = vmatprep.mubr.bf16.mxu0 %v8391_v54  ;;  %v18060_v15 = vpop.eup %13874  ;;  %v8837_v2 = vpop.xlane.xlu0 %8836  ;;  %v20080_v17 = vld [vmem:[#allocation123_spill] sm:$0xff] }
 0x8f5   : > { %20042 = vst [vmem:[#allocation102_spill] sm:$0xff] %v18058_v37  ;;  %v18062_v19 = vpop.eup %13876  ;;  %13890 = vpow2.f32 %v8913_v30  ;;  %v8881_v50 = vsub.f32 %v17282_v52, %v8837_v2  ;;  %v8882_v21 = vsub.f32 %v17306_v55, %v8837_v2 }
 0x8f6   : > { %v18066_v25 = vadd.f32 %v18062_v19, %v18060_v15  ;;  %13892 = vpow2.f32 %v8915_v9 }
 0x8f7   : > { %v8917_v45 = vmul.f32 1.442695, %v8881_v50  ;;  %v8919_v54 = vmul.f32 1.442695, %v8882_v21  ;;  %v13475_v21 = vld [vmem:[#allocation3 + $0x328] sm:$0xff]  }
 0x8f8   : > { %20043 = vst [vmem:[#allocation109_spill] sm:$0xff] %v18066_v25  ;;  %v8840_v42 = vpop.xlane.xlu1 %8839 }
 0x8f9   : > { %v18072_v33 = vpop.eup %13878  ;;  %13894 = vpow2.f32 %v8917_v45  ;;  %v8883_v52 = vsub.f32 %v17355_v63, %v8840_v42  ;;  %v8884_v55 = vsub.f32 %v17358_v49, %v8840_v42  ;;  %v18092_v49 = vpop.f32.mrf.mxu0  ;;  %v8392_v45 = vpack.c.bf16 %v17942_v38, %v17823_v41  ;;  %v13477_v41 = vld [vmem:[#allocation3 + $0x320] sm:$0xff]  }
 0x8fa   : > { %v18076_v43 = vpop.eup %13880  ;;  %13896 = vpow2.f32 %v8919_v54  ;;  %20046 = vst [vmem:[#allocation187_spill] sm:$0xff] %v18092_v49  ;;  %v13476_v54 = vld [vmem:[#allocation3 + $0x360] sm:$0xff]   ;;  %v8395_v42 = vpack.c.bf16 %v17982_v51, %v17879_v28  ;;  %v13478_v51 = vld [vmem:[#allocation3 + $0x358] sm:$0xff]  }
 0x8fb   : > { %8568 = vmatmul.mubr.bf16.vlgmr.msra.gmra.mxu0 %v8390_v40  ;;  %v18082_v46 = vadd.f32 %v18076_v43, %v18072_v33  ;;  %v18084_v30 = vpop.eup %13882  ;;  %v8921_v9 = vmul.f32 1.442695, %v8883_v52  ;;  %v8923_v2 = vmul.f32 1.442695, %v8884_v55 }
 0x8fc   : > { %8575 = vmatprep.mubr.bf16.mxu0 %v8393_v62  ;;  %12481 = vmatpush3.bf16.msra.mxu0 %v13471_v58  ;;  %v18086_v31 = vpop.eup %13884  ;;  %v8843_v50 = vpop.xlane.xlu0 %8842 }
 0x8fd   : > { %20044 = vst [vmem:[#allocation107_spill] sm:$0xff] %v18082_v46  ;;  %12482 = vmatprep.subr.bf16.mxu0 %v13472_v4  ;;  %v18090_v63 = vadd.f32 %v18086_v31, %v18084_v30  ;;  %13898 = vpow2.f32 %v8921_v9  ;;  %v8885_v40 = vsub.f32 %v17381_v47, %v8843_v50  ;;  %v8886_v4 = vsub.f32 %v17384_v11, %v8843_v50  ;;  %v18108_v47 = vpop.f32.mrf.mxu0  ;;  %v20078_v46 = vld [vmem:[#allocation32_spill] sm:$0xff] }
 0x8fe   : > { %v18094_v58 = vpop.eup %13886  ;;  %13900 = vpow2.f32 %v8923_v2  ;;  %20048 = vst [vmem:[#allocation189_spill] sm:$0xff] %v18108_v47 }
 0x8ff   : > { %20045 = vst [vmem:[#allocation186_spill] sm:$0xff] %v18090_v63  ;;  %v18100_v62 = vpop.eup %13888  ;;  %v8925_v52 = vmul.f32 1.442695, %v8885_v40  ;;  %v8927_v55 = vmul.f32 1.442695, %v8886_v4  ;;  %v12252_v2 = vpop.f32.mrf.mxu0 }
 0x900   : > { %12483 = vmatpush3.bf16.msra.mxu0 %v13473_v48  ;;  %v18106_v48 = vadd.f32 %v18100_v62, %v18094_v58  ;;  %v8846_v11 = vpop.xlane.xlu1 %8845 }
 0x901   : > { %12484 = vmatprep.subr.bf16.mxu0 %v13474_v32  ;;  %13902 = vpow2.f32 %v8925_v52  ;;  %v8887_v32 = vsub.f32 %v17397_v60, %v8846_v11  ;;  %v8888_v28 = vsub.f32 %v17400_v7, %v8846_v11  ;;  %v13479_v60 = vld [vmem:[#allocation3 + $0x318] sm:$0xff]  }
 0x902   : > { %20047 = vst [vmem:[#allocation188_spill] sm:$0xff] %v18106_v48  ;;  %v18110_v38 = vpop.eup %13890  ;;  %13904 = vpow2.f32 %v8927_v55  ;;  %v20051_v55 = vld [vmem:[#allocation164_spill] sm:$0xff] }
 0x903   : > { %8576 = vmatmul.mubr.bf16.gmra.mxu0 %v8392_v45  ;;  %v18114_v9 = vpop.eup %13892  ;;  %v8929_v50 = vmul.f32 1.442695, %v8887_v32  ;;  %v8931_v40 = vmul.f32 1.442695, %v8888_v28  ;;  %v13480_v32 = vld [vmem:[#allocation3 + $0x350] sm:$0xff]  }
 0x904   : > { %8583 = vmatprep.mubr.bf16.mxu0 %v8395_v42  ;;  %12485 = vmatpush3.bf16.msra.mxu0 %v13475_v21  ;;  %v18118_v4 = vadd.f32 %v18114_v9, %v18110_v38  ;;  %v12253_v21 = vpop.f32.mrf.mxu0  ;;  %v8849_v45 = vpop.xlane.xlu0 %8848  ;;  %v8394_v42 = vpack.c.bf16 %v17980_v29, %v17876_v12  ;;  %v8397_v12 = vpack.c.bf16 %v18004_v16, %v17936_v35  ;;  %v13482_v35 = vld [vmem:[#allocation3 + $0x348] sm:$0xff]  }
 0x905   : > { %12486 = vmatprep.subr.bf16.mxu0 %v13476_v54  ;;  %13906 = vpow2.f32 %v8929_v50  ;;  %v18124_v54 = vadd.f32 %v12253_v21, %v12252_v2  ;;  %v8889_v52 = vsub.f32 %v17413_v22, %v8849_v45  ;;  %v8890_v11 = vsub.f32 %v20051_v55, %v8849_v45 }
 0x906   : > { %20049 = vst [vmem:[#allocation190_spill] sm:$0xff] %v18118_v4  ;;  %v18122_v7 = vpop.eup %13894  ;;  %13908 = vpow2.f32 %v8931_v40  ;;  %v12255_v47 = vpop.f32.mrf.mxu0 }
 0x907   : > { %20050 = vst [vmem:[#allocation191_spill] sm:$0xff] %v18124_v54  ;;  %v18128_v28 = vpop.eup %13896  ;;  %v8933_v29 = vmul.f32 1.442695, %v8889_v52 }
 0x908   : > { %12487 = vmatpush3.bf16.msra.mxu0 %v13477_v41  ;;  %v8935_v41 = vmul.f32 1.442695, %v8890_v11  ;;  %v18134_v2 = vadd.f32 %v18128_v28, %v18122_v7  ;;  %v12256_v50 = vpop.f32.mrf.mxu0  ;;  %v18136_v22 = vpop.xlane.xlu0 %5101 }
 0x909   : > { %12488 = vmatprep.subr.bf16.mxu0 %v13478_v51  ;;  %v13481_v51 = vld [vmem:[#allocation3 + $0x310] sm:$0xff]   ;;  %13910 = vpow2.f32 %v8933_v29  ;;  %v18140_v40 = vadd.f32 %v12256_v50, %v12255_v47  ;;  %v8852_v45 = vpop.xlane.xlu1 %8851  ;;  %v13483_v47 = vld [vmem:[#allocation3 + $0x308] sm:$0xff]  }
 0x90a   : > { %20052 = vst [vmem:[#allocation164_spill] sm:$0xff] %v18134_v2  ;;  %v18138_v21 = vpop.eup %13898  ;;  %13912 = vpow2.f32 %v8935_v41  ;;  %v8892_v52 = vsub.f32 %v17424_v26, %v8852_v45  ;;  %v12258_v29 = vpop.f32.mrf.mxu0  ;;  %v20055_v50 = vld [vmem:[#allocation165_spill] sm:$0xff]  ;;  %v8396_v41 = vpack.c.bf16 %v17998_v23, %v17926_v34  ;;  %v13484_v26 = vld [vmem:[#allocation3 + $0x340] sm:$0xff]  }
 0x90b   : > { %8584 = vmatmul.mubr.bf16.gmra.mxu0 %v8394_v42  ;;  %20053 = vst [vmem:[#allocation192_spill] sm:$0xff] %v18140_v40  ;;  %v18142_v16 = vpop.eup %13900  ;;  %v8891_v42 = vsub.f32 %v17421_v53, %v8852_v45  ;;  %v13485_v23 = vld [vmem:[#allocation3 + $0x300] sm:$0xff]  }
 0x90c   : > { %8591 = vmatprep.mubr.bf16.mxu0 %v8397_v12  ;;  %12489 = vmatpush3.bf16.msra.mxu0 %v13479_v60  ;;  %v18148_v55 = vadd.f32 %v18142_v16, %v18138_v21  ;;  %v8939_v11 = vmul.f32 1.442695, %v8892_v52  ;;  %v8855_v12 = vpop.xlane.xlu0 %8854 }
 0x90d   : > { %12490 = vmatprep.subr.bf16.mxu0 %v13480_v32  ;;  %v8937_v60 = vmul.f32 1.442695, %v8891_v42  ;;  %v8893_v32 = vsub.f32 %v17433_v3, %v8855_v12  ;;  %v8894_v40 = vsub.f32 %v20055_v50, %v8855_v12  ;;  %v18154_v53 = vpop.xlane.xlu1 %5104  ;;  %v8399_v42 = vpack.c.bf16 %v18014_v1, %v17990_v13  ;;  %v12259_v12 = vpop.f32.mrf.mxu0 }
 0x90e   : > { %20054 = vst [vmem:[#allocation193_spill] sm:$0xff] %v18148_v55  ;;  %v18156_v45 = vpop.eup %13902  ;;  %v18162_v50 = vadd.f32 %v12259_v12, %v12258_v29  ;;  %v20061_v55 = vld [vmem:[#allocation168_spill] sm:$0xff] }
 0x90f   : > { %13914 = vpow2.f32 %v8937_v60  ;;  %v8941_v52 = vmul.f32 1.442695, %v8893_v32  ;;  %v8943_v3 = vmul.f32 1.442695, %v8894_v40  ;;  %v12261_v13 = vpop.f32.mrf.mxu0  ;;  %v13486_v60 = vld [vmem:[#allocation3 + $0x3f8] sm:$0xff]   ;;  %v20059_v32 = vld [vmem:[#allocation167_spill] sm:$0xff] }
 0x910   : > { %12491 = vmatpush3.bf16.msra.mxu0 %v13481_v51  ;;  %v18160_v51 = vpop.eup %13904  ;;  %13916 = vpow2.f32 %v8939_v11  ;;  %20056 = vst [vmem:[#allocation165_spill] sm:$0xff] %v18162_v50  ;;  %v18164_v34 = vpop.xlane.xlu0 %5107  ;;  %v20058_v40 = vld [vmem:[#allocation166_spill] sm:$0xff] }
 0x911   : > { %12492 = vmatprep.subr.bf16.mxu0 %v13482_v35  ;;  %v18168_v35 = vadd.f32 %v18160_v51, %v18156_v45  ;;  %13918 = vpow2.f32 %v8941_v52  ;;  %v8858_v1 = vpop.xlane.xlu1 %8857 }
 0x912   : > { %v18170_v11 = vpop.eup %13906  ;;  %13920 = vpow2.f32 %v8943_v3  ;;  %v8895_v29 = vsub.f32 %v20058_v40, %v8858_v1  ;;  %v8398_v3 = vpack.c.bf16 %v18012_v24, %v17984_v59 }
 0x913   : > { %8592 = vmatmul.mubr.bf16.gmra.mxu0 %v8396_v41  ;;  %20057 = vst [vmem:[#allocation194_spill] sm:$0xff] %v18168_v35  ;;  %v8896_v41 = vsub.f32 %v20059_v32, %v8858_v1  ;;  %v20062_v35 = vld [vmem:[#allocation169_spill] sm:$0xff] }
 0x914   : > { %8599 = vmatprep.mubr.bf16.mxu0 %v8399_v42  ;;  %12493 = vmatpush3.bf16.msra.mxu0 %v13483_v47  ;;  %v18174_v42 = vpop.eup %13908  ;;  %v12262_v47 = vpop.f32.mrf.mxu0  ;;  %v8945_v12 = vmul.f32 1.442695, %v8895_v29 }
 0x915   : > { %12494 = vmatprep.subr.bf16.mxu0 %v13484_v26  ;;  %v8947_v50 = vmul.f32 1.442695, %v8896_v41  ;;  %v18176_v54 = vadd.f32 %v12262_v47, %v12261_v13  ;;  %v8861_v49 = vpop.xlane.xlu0 %8860  ;;  %v18182_v40 = vpop.xlane.xlu1 %5110  ;;  %v18186_v1 = vadd.f32 %v18174_v42, %v18170_v11 }
 0x916   : > { %v12264_v52 = vpop.f32.mrf.mxu0  ;;  %v8897_v26 = vsub.f32 %v20061_v55, %v8861_v49  ;;  %v8898_v4 = vsub.f32 %v20062_v35, %v8861_v49  ;;  %v18188_v29 = vpop.eup %13910  ;;  %13922 = vpow2.f32 %v8945_v12 }
 0x917   : > { %20060 = vst [vmem:[#allocation166_spill] sm:$0xff] %v18176_v54  ;;  %20063 = vst [vmem:[#allocation167_spill] sm:$0xff] %v18186_v1  ;;  %v18192_v13 = vpop.eup %13912  ;;  %13924 = vpow2.f32 %v8947_v50  ;;  %v20067_v50 = vld [vmem:[#allocation171_spill] sm:$0xff]  ;;  %v20070_v1 = vld [vmem:[#allocation172_spill] sm:$0xff] }
 0x918   : > { %12495 = vmatpush3.bf16.msra.mxu0 %v13485_v23  ;;  %v8401_v23 = vpack.c.bf16 %v18038_v10, %v18022_v57  ;;  %v8949_v49 = vmul.f32 1.442695, %v8897_v26  ;;  %v8951_v55 = vmul.f32 1.442695, %v8898_v4  ;;  %v12265_v59 = vpop.f32.mrf.mxu0  ;;  %v20066_v57 = vld [vmem:[#allocation63_spill] sm:$0xff] }
 0x919   : > { %12544 = vmatprep.subr.bf16.mxu0 %v13486_v60  ;;  %v18194_v24 = vadd.f32 %v12265_v59, %v12264_v52  ;;  %v18196_v35 = vpop.xlane.xlu0 %5113  ;;  %v18200_v60 = vadd.f32 %v18192_v13, %v18188_v29  ;;  %v8864_v41 = vpop.xlane.xlu1 %8863 }
 0x91a   : > { %13926 = vpow2.f32 %v8949_v49  ;;  %v12267_v32 = vpop.f32.mrf.mxu0  ;;  %v8899_v10 = vsub.f32 %v20066_v57, %v8864_v41  ;;  %v8900_v47 = vsub.f32 %v20067_v50, %v8864_v41  ;;  %v9457_v4 = vpop.f32.mrf.mxu1  ;;  %v8400_v49 = vpack.c.bf16 %v18036_v36, %v18016_v20  ;;  %v20069_v41 = vld [vmem:[#allocation65_spill] sm:$0xff] }
 0x91b   : > { %8600 = vmatmul.mubr.bf16.gmra.mxu0 %v8398_v3  ;;  %20064 = vst [vmem:[#allocation168_spill] sm:$0xff] %v18194_v24  ;;  %20065 = vst [vmem:[#allocation169_spill] sm:$0xff] %v18200_v60  ;;  %13928 = vpow2.f32 %v8951_v55  ;;  %v18213_v55 = vadd.f32 %v9457_v4, %v15654_v44  ;;  %v8403_v36 = vpack.c.bf16 %v18062_v19, %v18052_v6 }
 0x91c   : > { %8607 = vmatprep.mubr.bf16.mxu0 %v8401_v23  ;;  %v18204_v12 = vpop.eup %13914  ;;  %v12268_v52 = vpop.f32.mrf.mxu0  ;;  %v8953_v3 = vmul.f32 1.442695, %v8899_v10  ;;  %v8955_v23 = vmul.f32 1.442695, %v8900_v47 }
 0x91d   : > { %v18206_v26 = vpop.eup %13916  ;;  %v18208_v59 = vadd.f32 %v12268_v52, %v12267_v32  ;;  %v8867_v54 = vpop.xlane.xlu0 %8866 }
 0x91e   : > { %v9459_v24 = vpop.f32.mrf.mxu1  ;;  %v12270_v57 = vpop.f32.mrf.mxu0  ;;  %v8901_v50 = vsub.f32 %v20069_v41, %v8867_v54  ;;  %v8902_v60 = vsub.f32 %v20070_v1, %v8867_v54  ;;  %13930 = vpow2.f32 %v8953_v3  ;;  %v18228_v47 = vadd.f32 %v18206_v26, %v18204_v12 }
 0x91f   : > { %20068 = vst [vmem:[#allocation63_spill] sm:$0xff] %v18208_v59  ;;  %v18218_v2 = vadd.f32 %v9459_v24, %v15656_v14  ;;  %v18220_v10 = vpop.xlane.xlu1 %5116  ;;  %v18222_v32 = vpop.eup %13918  ;;  %13932 = vpow2.f32 %v8955_v23 }
 0x920   : > { %v9461_v20 = vpop.f32.mrf.mxu1  ;;  %20071 = vst [vmem:[#allocation171_spill] sm:$0xff] %v18228_v47  ;;  %v18230_v4 = vpop.eup %13920  ;;  %v8957_v54 = vmul.f32 1.442695, %v8901_v50  ;;  %v8959_v1 = vmul.f32 1.442695, %v8902_v60 }
 0x921   : > { %v9512_v24 = vmax.f32 %v18213_v55, %v18218_v2  ;;  %v12271_v52 = vpop.f32.mrf.mxu0  ;;  %v18236_v3 = vpop.xlane.xlu0 %5119  ;;  %v18240_v19 = vadd.f32 %v18230_v4, %v18222_v32  ;;  %v18243_v23 = vadd.f32 %v9461_v20, %v15654_v44 }
 0x922   : > { %v18234_v41 = vadd.f32 %v12271_v52, %v12270_v57  ;;  %v9463_v6 = vpop.f32.mrf.mxu1  ;;  %13934 = vpow2.f32 %v8957_v54  ;;  %v20074_v57 = vld [vmem:[#allocation174_spill] sm:$0xff]  ;;  %v20075_v52 = vld [vmem:[#allocation175_spill] sm:$0xff] }
 0x923   : > { %8608 = vmatmul.mubr.bf16.gmra.mxu0 %v8400_v49  ;;  %20073 = vst [vmem:[#allocation172_spill] sm:$0xff] %v18240_v19  ;;  %v12273_v60 = vpop.f32.mrf.mxu0  ;;  %v18246_v49 = vadd.f32 %v9463_v6, %v15656_v14  ;;  %v8870_v50 = vpop.xlane.xlu1 %8869  ;;  %9513 = vmax.xlane.f32.xlu0 %v9512_v24  ;;  %13936 = vpow2.f32 %v8959_v1  ;;  %v20077_v24 = vld [vmem:[#allocation69_spill] sm:$0xff] }
 0x924   : > { %20072 = vst [vmem:[#allocation65_spill] sm:$0xff] %v18234_v41  ;;  %8615 = vmatprep.mubr.bf16.mxu0 %v8403_v36  ;;  %v8903_v36 = vsub.f32 %v20074_v57, %v8870_v50  ;;  %v8904_v59 = vsub.f32 %v20075_v52, %v8870_v50  ;;  %v18250_v41 = vpop.eup %13922  ;;  %v8402_v50 = vpack.c.bf16 %v18060_v15, %v18048_v8 }
 0x925   : > { %v9515_v47 = vmax.f32 %v18243_v23, %v18246_v49  ;;  %v12274_v54 = vpop.f32.mrf.mxu0  ;;  %v18254_v19 = vpop.eup %13924 }
 0x926   : > { %v8961_v20 = vmul.f32 1.442695, %v8903_v36  ;;  %v8963_v63 = vmul.f32 1.442695, %v8904_v59  ;;  %v18256_v48 = vadd.f32 %v12274_v54, %v12273_v60  ;;  %v8873_v6 = vpop.xlane.xlu0 %8872  ;;  %v8405_v59 = vpack.c.bf16 %v18086_v31, %v18076_v43  ;;  %v9467_v60 = vpop.f32.mrf.mxu1 }
 0x927   : > { %v12276_v25 = vpop.f32.mrf.mxu0  ;;  %v8905_v1 = vsub.f32 %v20077_v24, %v8873_v6  ;;  %v8906_v57 = vsub.f32 %v20078_v46, %v8873_v6  ;;  %v18262_v52 = vpop.xlane.xlu1 %5122  ;;  %9516 = vmax.xlane.f32.xlu1 %v9515_v47  ;;  %5757 = vadd.xlane.f32.xlu0 %v20080_v17  ;;  %v18271_v36 = vadd.f32 %v18254_v19, %v18250_v41 }
 0x928   : > { %20076 = vst [vmem:[#allocation174_spill] sm:$0xff] %v18256_v48  ;;  %20079 = vst [vmem:[#allocation175_spill] sm:$0xff] %v18262_v52  ;;  %v18265_v37 = vpop.eup %13926  ;;  %13938 = vpow2.f32 %v8961_v20  ;;  %v9469_v20 = vpop.f32.mrf.mxu1  ;;  %v18284_v31 = vadd.f32 %v9467_v60, %v15654_v44  ;;  %v20093_v52 = vld [vmem:[#allocation179_spill] sm:$0xff] }
 0x929   : > { %20081 = vst [vmem:[#allocation69_spill] sm:$0xff] %v18271_v36  ;;  %v18273_v46 = vpop.eup %13928  ;;  %13940 = vpow2.f32 %v8963_v63  ;;  %v8965_v8 = vmul.f32 1.442695, %v8905_v1  ;;  %v8967_v15 = vmul.f32 1.442695, %v8906_v57  ;;  %v12277_v47 = vpop.f32.mrf.mxu0  ;;  %v18287_v63 = vadd.f32 %v9469_v20, %v15656_v14  ;;  %v20087_v1 = vld [vmem:[#allocation57_spill] sm:$0xff] }
 0x92a   : > { %v18275_v54 = vadd.f32 %v12277_v47, %v12276_v25  ;;  %v18277_v17 = vpop.xlane.xlu0 %5125  ;;  %v18281_v43 = vadd.f32 %v18273_v46, %v18265_v37  ;;  %20085 = vst [vmem:[#allocation196_spill] sm:$0xff] %v18284_v31  ;;  %v20088_v25 = vld [vmem:[#allocation176_spill] sm:$0xff]  ;;  %v9471_v47 = vpop.f32.mrf.mxu1 }
 0x92b   : > { %8616 = vmatmul.mubr.bf16.gmra.mxu0 %v8402_v50  ;;  %20083 = vst [vmem:[#allocation123_spill] sm:$0xff] %v18277_v17  ;;  %13942 = vpow2.f32 %v8965_v8  ;;  %v12279_v6 = vpop.f32.mrf.mxu0  ;;  %20086 = vst [vmem:[#allocation197_spill] sm:$0xff] %v18287_v63  ;;  %v8876_v24 = vpop.xlane.xlu1 %8875  ;;  %5760 = vadd.xlane.f32.xlu1 %v20087_v1  ;;  %v20089_v50 = vld [vmem:[#allocation177_spill] sm:$0xff]  ;;  %v9518_v8 = vmax.f32 %v18284_v31, %v18287_v63 }
 0x92c   : > { %20082 = vst [vmem:[#allocation32_spill] sm:$0xff] %v18275_v54  ;;  %8623 = vmatprep.mubr.bf16.mxu0 %v8405_v59  ;;  %20084 = vst [vmem:[#allocation195_spill] sm:$0xff] %v18281_v43  ;;  %13944 = vpow2.f32 %v8967_v15  ;;  %v8907_v57 = vsub.f32 %v20088_v25, %v8876_v24  ;;  %v8908_v59 = vsub.f32 %v20089_v50, %v8876_v24  ;;  %v18292_v48 = vpop.eup %13930  ;;  %v9473_v1 = vpop.f32.mrf.mxu1  ;;  %v20092_v50 = vld [vmem:[#allocation178_spill] sm:$0xff] }
 0x92d   : > { %v12280_v60 = vpop.f32.mrf.mxu0  ;;  %v18296_v54 = vpop.eup %13932  ;;  %v8404_v15 = vpack.c.bf16 %v18084_v30, %v18072_v33  ;;  %v18303_v24 = vadd.f32 %v9471_v47, %v15654_v44  ;;  %v18308_v31 = vadd.f32 %v9473_v1, %v15656_v14  ;;  %9519 = vmax.xlane.f32.xlu0 %v9518_v8  ;;  %v9038_v33 = vpack.c.bf16 %v18114_v9, %v18100_v62 }
 0x92e   : > { %v8969_v36 = vmul.f32 1.442695, %v8907_v57  ;;  %v8971_v20 = vmul.f32 1.442695, %v8908_v59  ;;  %v18298_v43 = vadd.f32 %v12280_v60, %v12279_v6  ;;  %v9478_v17 = vpop.xlane.xlu0 %9477  ;;  %v18318_v44 = vadd.f32 %v18296_v54, %v18292_v48  ;;  %v20099_v60 = vld [vmem:[#allocation58_spill] sm:$0xff] }
 0x92f   : > { %20091 = vst [vmem:[#allocation176_spill] sm:$0xff] %v18303_v24  ;;  %v12282_v25 = vpop.f32.mrf.mxu0  ;;  %v9524_v56 = vsub.f32 %v20092_v50, %v9478_v17  ;;  %v9525_v63 = vsub.f32 %v20093_v52, %v9478_v17  ;;  %20094 = vst [vmem:[#allocation177_spill] sm:$0xff] %v18308_v31  ;;  %v18310_v57 = vpop.xlane.xlu1 %5128  ;;  %v9521_v14 = vmax.f32 %v18303_v24, %v18308_v31  ;;  %v20107_v31 = vld [vmem:[#allocation31_spill] sm:$0xff] }
 0x930   : > { %20090 = vst [vmem:[#allocation57_spill] sm:$0xff] %v18298_v43  ;;  %v18312_v6 = vpop.eup %13934  ;;  %13946 = vpow2.f32 %v8969_v36  ;;  %20095 = vst [vmem:[#allocation178_spill] sm:$0xff] %v18318_v44 }
 0x931   : > { %v18320_v30 = vpop.eup %13936  ;;  %13948 = vpow2.f32 %v8971_v20  ;;  %v9556_v52 = vmul.f32 1.442695, %v9524_v56  ;;  %v9558_v17 = vmul.f32 1.442695, %v9525_v63  ;;  %v12283_v59 = vpop.f32.mrf.mxu0  ;;  %5763 = vadd.xlane.f32.xlu0 %v20099_v60  ;;  %9522 = vmax.xlane.f32.xlu1 %v9521_v14  ;;  %v20100_v56 = vld [vmem:[#allocation33_spill] sm:$0xff]  ;;  %v20104_v14 = vld [vmem:[#allocation72_spill] sm:$0xff] }
 0x932   : > { %v18324_v47 = vadd.f32 %v12283_v59, %v12282_v25  ;;  %v18326_v36 = vpop.xlane.xlu0 %5131  ;;  %v18330_v62 = vadd.f32 %v18320_v30, %v18312_v6  ;;  %v20101_v20 = vld [vmem:[#allocation73_spill] sm:$0xff] }
 0x933   : > { %8624 = vmatmul.mubr.bf16.gmra.mxu0 %v8404_v15  ;;  %20097 = vst [vmem:[#allocation198_spill] sm:$0xff] %v18326_v36  ;;  %13950 = vpow2.f32 %v9556_v52  ;;  %v12285_v9 = vpop.f32.mrf.mxu0  ;;  %v9481_v8 = vpop.xlane.xlu1 %9480  ;;  %v20121_v36 = vld [vmem:[#allocation84_spill] sm:$0xff] }
 0x934   : > { %20096 = vst [vmem:[#allocation179_spill] sm:$0xff] %v18324_v47  ;;  %9214 = vmatprep.mubr.bf16.mxu0 %v9038_v33  ;;  %20098 = vst [vmem:[#allocation199_spill] sm:$0xff] %v18330_v62  ;;  %13952 = vpow2.f32 %v9558_v17  ;;  %v9526_v63 = vsub.f32 %v20100_v56, %v9481_v8  ;;  %v9527_v15 = vsub.f32 %v20101_v20, %v9481_v8  ;;  %v13487_v47 = vld [vmem:[#allocation3 + $0x3b8] sm:$0xff]   ;;  %v20106_v20 = vld [vmem:[#allocation59_spill] sm:$0xff] }
 0x935   : > { %v18335_v1 = vpop.eup %13938  ;;  %v12286_v25 = vpop.f32.mrf.mxu0  ;;  %v20103_v62 = vld [vmem:[#allocation34_spill] sm:$0xff]  ;;  %v9037_v56 = vpack.c.bf16 %v18110_v38, %v18094_v58  ;;  %5769 = vadd.xlane.f32.xlu0 %v20106_v20  ;;  %5766 = vadd.xlane.f32.xlu1 %v20107_v31 }
 0x936   : > { %v18337_v50 = vpop.eup %13940  ;;  %v9560_v33 = vmul.f32 1.442695, %v9526_v63  ;;  %v9562_v59 = vmul.f32 1.442695, %v9527_v15  ;;  %v18339_v43 = vadd.f32 %v12286_v25, %v12285_v9  ;;  %v9484_v52 = vpop.xlane.xlu0 %9483  ;;  %v9040_v9 = vpack.c.bf16 %v18142_v16, %v18128_v28  ;;  %v13488_v15 = vld [vmem:[#allocation3 + $0x3f0] sm:$0xff]  }
 0x937   : > { %v12304_v44 = vpop.f32.mrf.mxu0  ;;  %v9528_v60 = vsub.f32 %v20103_v62, %v9484_v52  ;;  %v9529_v17 = vsub.f32 %v20104_v14, %v9484_v52  ;;  %v18345_v8 = vpop.xlane.xlu1 %5134  ;;  %v18355_v62 = vadd.f32 %v18337_v50, %v18335_v1 }
 0x938   : > { %20102 = vst [vmem:[#allocation58_spill] sm:$0xff] %v18339_v43  ;;  %20105 = vst [vmem:[#allocation33_spill] sm:$0xff] %v18345_v8  ;;  %v18349_v63 = vpop.eup %13942  ;;  %13954 = vpow2.f32 %v9560_v33  ;;  %v13489_v33 = vld [vmem:[#allocation3 + $0x3b0] sm:$0xff]  }
 0x939   : > { %20108 = vst [vmem:[#allocation73_spill] sm:$0xff] %v18355_v62  ;;  %v18357_v25 = vpop.eup %13944  ;;  %13956 = vpow2.f32 %v9562_v59  ;;  %v9564_v58 = vmul.f32 1.442695, %v9528_v60  ;;  %v9566_v38 = vmul.f32 1.442695, %v9529_v17  ;;  %v12305_v52 = vpop.f32.mrf.mxu0  ;;  %v20112_v43 = vld [vmem:[#allocation61_spill] sm:$0xff] }
 0x93a   : > { %v18359_v14 = vadd.f32 %v12305_v52, %v12304_v44  ;;  %v18361_v31 = vpop.xlane.xlu0 %5137  ;;  %v18365_v28 = vadd.f32 %v18357_v25, %v18349_v63  ;;  %5775 = vadd.xlane.f32.xlu0 %v20112_v43  ;;  %v20113_v59 = vld [vmem:[#allocation60_spill] sm:$0xff]  ;;  %v20114_v60 = vld [vmem:[#allocation125_spill] sm:$0xff] }
 0x93b   : > { %9215 = vmatmul.mubr.bf16.vlgmr.msra.gmra.mxu0 %v9037_v56  ;;  %20110 = vst [vmem:[#allocation72_spill] sm:$0xff] %v18361_v31  ;;  %13958 = vpow2.f32 %v9564_v58  ;;  %v12307_v16 = vpop.f32.mrf.mxu0  ;;  %v9487_v20 = vpop.xlane.xlu1 %9486  ;;  %5772 = vadd.xlane.f32.xlu1 %v20113_v59  ;;  %v20115_v17 = vld [vmem:[#allocation181_spill] sm:$0xff]  ;;  %v13491_v43 = vld [vmem:[#allocation3 + $0x3a8] sm:$0xff]  }
 0x93c   : > { %20109 = vst [vmem:[#allocation34_spill] sm:$0xff] %v18359_v14  ;;  %9222 = vmatprep.mubr.bf16.mxu0 %v9040_v9  ;;  %12545 = vmatpush3.bf16.msra.mxu0 %v13487_v47  ;;  %20111 = vst [vmem:[#allocation59_spill] sm:$0xff] %v18365_v28  ;;  %13960 = vpow2.f32 %v9566_v38  ;;  %v9530_v44 = vsub.f32 %v20114_v60, %v9487_v20  ;;  %v9531_v56 = vsub.f32 %v20115_v17, %v9487_v20  ;;  %v13490_v9 = vld [vmem:[#allocation3 + $0x3e8] sm:$0xff]   ;;  %v20117_v38 = vld [vmem:[#allocation126_spill] sm:$0xff] }
 0x93d   : > { %12546 = vmatprep.subr.bf16.mxu0 %v13488_v15  ;;  %v18371_v47 = vpop.eup %13946  ;;  %v12308_v52 = vpop.f32.mrf.mxu0  ;;  %v20118_v60 = vld [vmem:[#allocation36_spill] sm:$0xff]  ;;  %v9039_v15 = vpack.c.bf16 %v18138_v21, %v18122_v7  ;;  %v20120_v17 = vld [vmem:[#allocation62_spill] sm:$0xff] }
 0x93e   : > { %v18373_v14 = vpop.eup %13948  ;;  %v9568_v62 = vmul.f32 1.442695, %v9530_v44  ;;  %v9570_v58 = vmul.f32 1.442695, %v9531_v56  ;;  %v18375_v28 = vadd.f32 %v12308_v52, %v12307_v16  ;;  %v9490_v24 = vpop.xlane.xlu0 %9489  ;;  %5781 = vadd.xlane.f32.xlu0 %v20120_v17  ;;  %v13492_v16 = vld [vmem:[#allocation3 + $0x3e0] sm:$0xff]   ;;  %v13494_v17 = vld [vmem:[#allocation3 + $0x3d8] sm:$0xff]  }
 0x93f   : > { %v12310_v59 = vpop.f32.mrf.mxu0  ;;  %v9532_v31 = vsub.f32 %v20117_v38, %v9490_v24  ;;  %v9533_v8 = vsub.f32 %v20118_v60, %v9490_v24  ;;  %5778 = vadd.xlane.f32.xlu1 %v20121_v36  ;;  %v18391_v24 = vadd.f32 %v18373_v14, %v18371_v47  ;;  %v20125_v60 = vld [vmem:[#allocation66_spill] sm:$0xff] }
 0x940   : > { %20116 = vst [vmem:[#allocation31_spill] sm:$0xff] %v18375_v28  ;;  %12547 = vmatpush3.bf16.msra.mxu0 %v13489_v33  ;;  %v18381_v20 = vpop.xlane.xlu1 %5140  ;;  %v18385_v44 = vpop.eup %13950  ;;  %13962 = vpow2.f32 %v9568_v62  ;;  %v9042_v33 = vpack.c.bf16 %v18174_v42, %v18160_v51  ;;  %v13493_v51 = vld [vmem:[#allocation3 + $0x3a0] sm:$0xff]  }
 0x941   : > { %20119 = vst [vmem:[#allocation61_spill] sm:$0xff] %v18381_v20  ;;  %12548 = vmatprep.subr.bf16.mxu0 %v13490_v9  ;;  %20122 = vst [vmem:[#allocation60_spill] sm:$0xff] %v18391_v24  ;;  %v18393_v56 = vpop.eup %13952  ;;  %13964 = vpow2.f32 %v9570_v58  ;;  %v9572_v7 = vmul.f32 1.442695, %v9532_v31  ;;  %v9574_v21 = vmul.f32 1.442695, %v9533_v8  ;;  %v12311_v52 = vpop.f32.mrf.mxu0 }
 0x942   : > { %v18395_v36 = vadd.f32 %v12311_v52, %v12310_v59  ;;  %v18397_v62 = vpop.xlane.xlu0 %5143  ;;  %v18401_v42 = vadd.f32 %v18393_v56, %v18385_v44  ;;  %6386 = vadd.xlane.f32.xlu0 %v20125_v60  ;;  %v20126_v31 = vld [vmem:[#allocation64_spill] sm:$0xff]  ;;  %v20127_v8 = vld [vmem:[#allocation37_spill] sm:$0xff]  ;;  %v20128_v59 = vld [vmem:[#allocation131_spill] sm:$0xff] }
 0x943   : > { %9223 = vmatmul.mubr.bf16.gmra.mxu0 %v9039_v15  ;;  %13966 = vpow2.f32 %v9572_v7  ;;  %v12313_v9 = vpop.f32.mrf.mxu0  ;;  %5784 = vadd.xlane.f32.xlu1 %v20126_v31  ;;  %v13495_v60 = vld [vmem:[#allocation3 + $0x398] sm:$0xff]   ;;  %v20132_v20 = vld [vmem:[#allocation67_spill] sm:$0xff] }
 0x944   : > { %20123 = vst [vmem:[#allocation125_spill] sm:$0xff] %v18395_v36  ;;  %9230 = vmatprep.mubr.bf16.mxu0 %v9042_v33  ;;  %12549 = vmatpush3.bf16.msra.mxu0 %v13491_v43  ;;  %20124 = vst [vmem:[#allocation181_spill] sm:$0xff] %v18401_v42  ;;  %v9493_v38 = vpop.xlane.xlu1 %9492  ;;  %13968 = vpow2.f32 %v9574_v21 }
 0x945   : > { %v9534_v58 = vsub.f32 %v20127_v8, %v9493_v38  ;;  %v9535_v15 = vsub.f32 %v20128_v59, %v9493_v38  ;;  %12550 = vmatprep.subr.bf16.mxu0 %v13492_v16  ;;  %v18407_v43 = vpop.eup %13954  ;;  %v12314_v33 = vpop.f32.mrf.mxu0  ;;  %v20130_v8 = vld [vmem:[#allocation133_spill] sm:$0xff]  ;;  %v9041_v16 = vpack.c.bf16 %v18170_v11, %v18156_v45 }
 0x946   : > { %v18409_v52 = vpop.eup %13956  ;;  %v18411_v36 = vadd.f32 %v12314_v33, %v12313_v9  ;;  %v20131_v59 = vld [vmem:[#allocation89_spill] sm:$0xff] }
 0x947   : > { %v9576_v28 = vmul.f32 1.442695, %v9534_v58  ;;  %v9578_v7 = vmul.f32 1.442695, %v9535_v15  ;;  %v12316_v31 = vpop.f32.mrf.mxu0  ;;  %6392 = vadd.xlane.f32.xlu0 %v20131_v59  ;;  %6389 = vadd.xlane.f32.xlu1 %v20132_v20  ;;  %v13496_v9 = vld [vmem:[#allocation3 + $0x3d0] sm:$0xff]  }
 0x948   : > { %20129 = vst [vmem:[#allocation126_spill] sm:$0xff] %v18411_v36  ;;  %v9496_v24 = vpop.xlane.xlu0 %9495  ;;  %12551 = vmatpush3.bf16.msra.mxu0 %v13493_v51  ;;  %v18417_v38 = vpop.xlane.xlu1 %5146  ;;  %v9044_v51 = vpack.c.bf16 %v18206_v26, %v18192_v13  ;;  %v13497_v13 = vld [vmem:[#allocation3 + $0x390] sm:$0xff]  }
 0x949   : > { %v9536_v21 = vsub.f32 %v17703_v5, %v9496_v24  ;;  %v9537_v42 = vsub.f32 %v20130_v8, %v9496_v24  ;;  %v18421_v58 = vpop.eup %13958  ;;  %13970 = vpow2.f32 %v9576_v28  ;;  %12552 = vmatprep.subr.bf16.mxu0 %v13494_v17  ;;  %v18427_v5 = vadd.f32 %v18409_v52, %v18407_v43  ;;  %v12317_v15 = vpop.f32.mrf.mxu0 }
 0x94a   : > { %v18429_v24 = vpop.eup %13960  ;;  %13972 = vpow2.f32 %v9578_v7  ;;  %v18432_v20 = vadd.f32 %v12317_v15, %v12316_v31  ;;  %v20135_v7 = vld [vmem:[#allocation144_spill] sm:$0xff]  ;;  %v20138_v31 = vld [vmem:[#allocation39_spill] sm:$0xff] }
 0x94b   : > { %20133 = vst [vmem:[#allocation36_spill] sm:$0xff] %v18427_v5  ;;  %v9580_v45 = vmul.f32 1.442695, %v9536_v21  ;;  %v9582_v11 = vmul.f32 1.442695, %v9537_v42  ;;  %9231 = vmatmul.mubr.bf16.gmra.mxu0 %v9041_v16  ;;  %13974 = vrcp.f32 %v18136_v22  ;;  %v18436_v26 = vadd.f32 %v18429_v24, %v18421_v58  ;;  %v12319_v17 = vpop.f32.mrf.mxu0  ;;  %6398 = vadd.xlane.f32.xlu0 %v20135_v7  ;;  %v20136_v42 = vld [vmem:[#allocation70_spill] sm:$0xff] }
 0x94c   : > { %20134 = vst [vmem:[#allocation62_spill] sm:$0xff] %v18432_v20  ;;  %9238 = vmatprep.mubr.bf16.mxu0 %v9044_v51  ;;  %v5740_v28 = vpop.xlane.xlu0 %5739  ;;  %12553 = vmatpush3.bf16.msra.mxu0 %v13495_v60  ;;  %v9499_v33 = vpop.xlane.xlu1 %9498  ;;  %v20137_v21 = vld [vmem:[#allocation134_spill] sm:$0xff]  ;;  %v13498_v16 = vld [vmem:[#allocation3 + $0x3c8] sm:$0xff]  }
 0x94d   : > { %13976 = vpow2.f32 %v9580_v45  ;;  %6395 = vadd.xlane.f32.xlu1 %v20136_v42  ;;  %v9538_v22 = vsub.f32 %v20137_v21, %v9499_v33  ;;  %v9539_v8 = vsub.f32 %v20138_v31, %v9499_v33  ;;  %12554 = vmatprep.subr.bf16.mxu0 %v13496_v9  ;;  %v18442_v60 = vpop.eup %13962  ;;  %v12320_v59 = vpop.f32.mrf.mxu0  ;;  %v20140_v9 = vld [vmem:[#allocation40_spill] sm:$0xff]  ;;  %v20141_v31 = vld [vmem:[#allocation83_spill] sm:$0xff]  ;;  %v20142_v5 = vld [vmem:[#allocation110_spill] sm:$0xff] }
 0x94e   : > { %13978 = vpow2.f32 %v9582_v11  ;;  %v18444_v51 = vpop.eup %13964  ;;  %v18447_v7 = vadd.f32 %v12320_v59, %v12319_v17  ;;  %v13499_v11 = vld [vmem:[#allocation3 + $0x388] sm:$0xff]  }
 0x94f   : > { %13980 = vrcp.f32 %v5740_v28  ;;  %v9584_v45 = vmul.f32 1.442695, %v9538_v22  ;;  %v9586_v15 = vmul.f32 1.442695, %v9539_v8  ;;  %v12322_v33 = vpop.f32.mrf.mxu0  ;;  %v9043_v28 = vpack.c.bf16 %v18204_v12, %v18188_v29  ;;  %6404 = vadd.xlane.f32.xlu0 %v20142_v5 }
 0x950   : > { %13982 = vrcp.f32 %v18154_v53  ;;  %20139 = vst [vmem:[#allocation84_spill] sm:$0xff] %v18447_v7  ;;  %v9502_v42 = vpop.xlane.xlu0 %9501  ;;  %12555 = vmatpush3.bf16.msra.mxu0 %v13497_v13  ;;  %v20143_v53 = vld [vmem:[#allocation74_spill] sm:$0xff]  ;;  %v18456_v17 = vpop.eup %13966  ;;  %v9046_v13 = vpack.c.bf16 %v18254_v19, %v18230_v4  ;;  %v18462_v22 = vadd.f32 %v18444_v51, %v18442_v60  ;;  %v20153_v7 = vld [vmem:[#allocation113_spill] sm:$0xff] }
 0x951   : > { %13984 = vrcp.f32 %v18164_v34  ;;  %v9540_v21 = vsub.f32 %v20140_v9, %v9502_v42  ;;  %v9541_v36 = vsub.f32 %v20141_v31, %v9502_v42  ;;  %6401 = vadd.xlane.f32.xlu1 %v20143_v53  ;;  %12556 = vmatprep.subr.bf16.mxu0 %v13498_v16  ;;  %v13500_v34 = vld [vmem:[#allocation3 + $0x3c0] sm:$0xff]   ;;  %v18464_v8 = vpop.eup %13968  ;;  %v12323_v5 = vpop.f32.mrf.mxu0 }
 0x952   : > { %v5743_v20 = vpop.xlane.xlu1 %5742  ;;  %13986 = vpow2.f32 %v9584_v45  ;;  %20144 = vst [vmem:[#allocation66_spill] sm:$0xff] %v18462_v22  ;;  %v18466_v59 = vadd.f32 %v12323_v5, %v12322_v33  ;;  %v13501_v4 = vld [vmem:[#allocation3 + $0x380] sm:$0xff]   ;;  %v18470_v19 = vadd.f32 %v18464_v8, %v18456_v17 }
 0x953   : > { %13988 = vpow2.f32 %v9586_v15  ;;  %v9588_v29 = vmul.f32 1.442695, %v9540_v21  ;;  %v9590_v12 = vmul.f32 1.442695, %v9541_v36  ;;  %9239 = vmatmul.mubr.bf16.gmra.mxu0 %v9043_v28  ;;  %v12325_v16 = vpop.f32.mrf.mxu0  ;;  %v20146_v9 = vld [vmem:[#allocation111_spill] sm:$0xff]  ;;  %v20148_v36 = vld [vmem:[#allocation142_spill] sm:$0xff] }
 0x954   : > { %13990 = vrcp.f32 %v5743_v20  ;;  %20145 = vst [vmem:[#allocation64_spill] sm:$0xff] %v18466_v59  ;;  %9246 = vmatprep.mubr.bf16.mxu0 %v9046_v13  ;;  %12557 = vmatpush3.bf16.msra.mxu0 %v13499_v11  ;;  %v20147_v15 = vld [vmem:[#allocation115_spill] sm:$0xff]  ;;  %v20164_v59 = vld [vmem:[#allocation77_spill] sm:$0xff] }
 0x955   : > { %v5746_v45 = vpop.xlane.xlu0 %5745  ;;  %13992 = vpow2.f32 %v9588_v29  ;;  %6410 = vadd.xlane.f32.xlu0 %v20146_v9  ;;  %6407 = vadd.xlane.f32.xlu1 %v20147_v15  ;;  %v20149_v33 = vld [vmem:[#allocation139_spill] sm:$0xff]  ;;  %v12326_v11 = vpop.f32.mrf.mxu0 }
 0x956   : > { %v9505_v42 = vpop.xlane.xlu1 %9504  ;;  %13994 = vpow2.f32 %v9590_v12  ;;  %12558 = vmatprep.subr.bf16.mxu0 %v13500_v34  ;;  %v18476_v31 = vpop.eup %13970  ;;  %v18481_v29 = vadd.f32 %v12326_v11, %v12325_v16  ;;  %v9045_v34 = vpack.c.bf16 %v18250_v41, %v18222_v32 }
 0x957   : > { %v9542_v20 = vsub.f32 %v20148_v36, %v9505_v42  ;;  %v9543_v21 = vsub.f32 %v20149_v33, %v9505_v42  ;;  %13996 = vrcp.f32 %v5746_v45  ;;  %v18478_v28 = vpop.eup %13972  ;;  %v12328_v9 = vpop.f32.mrf.mxu0  ;;  %v20151_v45 = vld [vmem:[#allocation86_spill] sm:$0xff]  ;;  %v20152_v36 = vld [vmem:[#allocation141_spill] sm:$0xff] }
 0x958   : > { %13998 = vrcp.f32 %v18182_v40  ;;  %20150 = vst [vmem:[#allocation37_spill] sm:$0xff] %v18481_v29  ;;  %12559 = vmatpush3.bf16.msra.mxu0 %v13501_v4  ;;  %v13975_v12 = vpop.eup %13974  ;;  %v20154_v40 = vld [vmem:[#allocation118_spill] sm:$0xff]  ;;  %v9048_v4 = vpack.c.bf16 %v18296_v54, %v18273_v46 }
 0x959   : > { %v9592_v53 = vmul.f32 1.442695, %v9542_v20  ;;  %v9594_v13 = vmul.f32 1.442695, %v9543_v21  ;;  %14000 = vrcp.f32 %v18196_v35  ;;  %6416 = vadd.xlane.f32.xlu0 %v20153_v7  ;;  %6413 = vadd.xlane.f32.xlu1 %v20154_v40  ;;  %v18496_v35 = vadd.f32 %v18478_v28, %v18476_v31  ;;  %v12329_v21 = vpop.f32.mrf.mxu0 }
 0x95a   : > { %v9508_v5 = vpop.xlane.xlu0 %9507  ;;  %v5749_v42 = vpop.xlane.xlu1 %5748  ;;  %v18500_v11 = vadd.f32 %v12329_v21, %v12328_v9  ;;  %v20163_v21 = vld [vmem:[#allocation143_spill] sm:$0xff] }
 0x95b   : > { %v9544_v15 = vsub.f32 %v20151_v45, %v9508_v5  ;;  %v9545_v33 = vsub.f32 %v20152_v36, %v9508_v5  ;;  %v18490_v16 = vpop.eup %13976  ;;  %14002 = vpow2.f32 %v9592_v53  ;;  %20155 = vst [vmem:[#allocation131_spill] sm:$0xff] %v18496_v35  ;;  %9247 = vmatmul.mubr.bf16.gmra.mxu0 %v9045_v34  ;;  %v20158_v5 = vld [vmem:[#allocation76_spill] sm:$0xff]  ;;  %v20159_v36 = vld [vmem:[#allocation43_spill] sm:$0xff]  ;;  %v20160_v34 = vld [vmem:[#allocation117_spill] sm:$0xff] }
 0x95c   : > { %v18498_v32 = vpop.eup %13978  ;;  %14004 = vpow2.f32 %v9594_v13  ;;  %20156 = vst [vmem:[#allocation133_spill] sm:$0xff] %v18500_v11  ;;  %9254 = vmatprep.mubr.bf16.mxu0 %v9048_v4  ;;  %v5405_v45 = vmul.f32 %v13975_v12, %v20158_v5  ;;  %v12331_v13 = vpop.f32.mrf.mxu0  ;;  %v20165_v35 = vld [vmem:[#allocation78_spill] sm:$0xff] }
 0x95d   : > { %v9596_v41 = vmul.f32 1.442695, %v9544_v15  ;;  %v9598_v20 = vmul.f32 1.442695, %v9545_v33  ;;  %v13981_v7 = vpop.eup %13980  ;;  %14006 = vrcp.f32 %v5749_v42  ;;  %v18504_v46 = vadd.f32 %v18498_v32, %v18490_v16  ;;  %6422 = vadd.xlane.f32.xlu0 %v20160_v34  ;;  %v20161_v15 = vld [vmem:[#allocation120_spill] sm:$0xff]  ;;  %v20162_v33 = vld [vmem:[#allocation85_spill] sm:$0xff] }
 0x95e   : > { %v5752_v53 = vpop.xlane.xlu0 %5751  ;;  %v13983_v54 = vpop.eup %13982  ;;  %v6044_v40 = vmul.f32 %v13981_v7, %v20159_v36  ;;  %6419 = vadd.xlane.f32.xlu1 %v20161_v15  ;;  %v12117_v12 = vadd.f32 %v20165_v35, %v20164_v59  ;;  %v20166_v36 = vld [vmem:[#allocation170_spill] sm:$0xff]  ;;  %v20167_v34 = vld [vmem:[#allocation44_spill] sm:$0xff]  ;;  %v9047_v59 = vpack.c.bf16 %v18292_v48, %v18265_v37  ;;  %v20169_v35 = vld [vmem:[#allocation121_spill] sm:$0xff] }
 0x95f   : > { %20157 = vst [vmem:[#allocation89_spill] sm:$0xff] %v18504_v46  ;;  %14008 = vpow2.f32 %v9596_v41  ;;  %v9511_v42 = vpop.xlane.xlu1 %9510  ;;  %v13985_v9 = vpop.eup %13984  ;;  %v12181_v15 = vadd.f32 %v20167_v34, %v20166_v36 }
 0x960   : > { %14010 = vpow2.f32 %v9598_v20  ;;  %v9546_v4 = vsub.f32 %v20162_v33, %v9511_v42  ;;  %v9547_v29 = vsub.f32 %v20163_v21, %v9511_v42  ;;  %v18512_v11 = vpop.eup %13986  ;;  %v18516_v5 = vadd.f32 %v6044_v40, %v5405_v45  ;;  %v12332_v41 = vpop.f32.mrf.mxu0 }
 0x961   : > { %14012 = vrcp.f32 %v5752_v53  ;;  %v18518_v7 = vpop.eup %13988  ;;  %v18522_v46 = vadd.f32 %v12332_v41, %v12331_v13  ;;  %6428 = vadd.xlane.f32.xlu0 %v20169_v35  ;;  %v20170_v53 = vld [vmem:[#allocation149_spill] sm:$0xff] }
 0x962   : > { %v9600_v20 = vmul.f32 1.442695, %v9546_v4  ;;  %v9602_v33 = vmul.f32 1.442695, %v9547_v29  ;;  %v13991_v22 = vpop.eup %13990  ;;  %14014 = vrcp.f32 %v18220_v10  ;;  %v12334_v42 = vpop.f32.mrf.mxu0  ;;  %6425 = vadd.xlane.f32.xlu1 %v20170_v53  ;;  %v18531_v40 = vadd.f32 %v18518_v7, %v18512_v11 }
 0x963   : > { %20168 = vst [vmem:[#allocation67_spill] sm:$0xff] %v18522_v46  ;;  %v5755_v45 = vpop.xlane.xlu1 %5754  ;;  %v18533_v13 = vpop.eup %13992  ;;  %v5406_v4 = vmul.f32 %v13983_v54, %v12117_v12  ;;  %v6045_v29 = vmul.f32 %v13991_v22, %v12181_v15  ;;  %v9050_v10 = vpack.c.bf16 %v18337_v50, %v18320_v30  ;;  %9255 = vmatmul.mubr.bf16.gmra.mxu0 %v9047_v59  ;;  %v20172_v12 = vld [vmem:[#allocation79_spill] sm:$0xff]  ;;  %v20173_v30 = vld [vmem:[#allocation45_spill] sm:$0xff] }
 0x964   : > { %14016 = vpow2.f32 %v9600_v20  ;;  %v18537_v21 = vpop.eup %13994  ;;  %v12335_v37 = vpop.f32.mrf.mxu0  ;;  %v5407_v34 = vmul.f32 %v13985_v9, %v20172_v12  ;;  %v20174_v20 = vld [vmem:[#allocation150_spill] sm:$0xff]  ;;  %v20182_v46 = vld [vmem:[#allocation153_spill] sm:$0xff] }
 0x965   : > { %14018 = vpow2.f32 %v9602_v33  ;;  %v13997_v48 = vpop.eup %13996  ;;  %v18539_v41 = vadd.f32 %v6045_v29, %v5406_v4  ;;  %v18541_v36 = vadd.f32 %v12335_v37, %v12334_v42  ;;  %9262 = vmatprep.mubr.bf16.mxu0 %v9050_v10  ;;  %v18545_v54 = vadd.f32 %v18537_v21, %v18533_v13  ;;  %7033 = vadd.xlane.f32.xlu0 %v20174_v20  ;;  %v20175_v33 = vld [vmem:[#allocation151_spill] sm:$0xff]  ;;  %v20176_v4 = vld [vmem:[#allocation94_spill] sm:$0xff]  ;;  %v20177_v29 = vld [vmem:[#allocation96_spill] sm:$0xff] }
 0x966   : > { %14020 = vrcp.f32 %v5755_v45  ;;  %v13999_v22 = vpop.eup %13998  ;;  %v6046_v50 = vmul.f32 %v13997_v48, %v20173_v30  ;;  %v12337_v15 = vpop.f32.mrf.mxu0  ;;  %6431 = vadd.xlane.f32.xlu1 %v20175_v33  ;;  %v12123_v10 = vadd.f32 %v20177_v29, %v20176_v4  ;;  %v20178_v37 = vld [vmem:[#allocation173_spill] sm:$0xff]  ;;  %v20179_v9 = vld [vmem:[#allocation46_spill] sm:$0xff]  ;;  %v9049_v20 = vpack.c.bf16 %v18335_v1, %v18312_v6  ;;  %v20181_v33 = vld [vmem:[#allocation152_spill] sm:$0xff] }
 0x967   : > { %20171 = vst [vmem:[#allocation144_spill] sm:$0xff] %v18541_v36  ;;  %v14001_v59 = vpop.eup %14000  ;;  %v12187_v12 = vadd.f32 %v20179_v9, %v20178_v37  ;;  %v20185_v9 = vld [vmem:[#allocation103_spill] sm:$0xff]  ;;  %14022 = vrcp.f32 %v18236_v3 }
 0x968   : > { %v18551_v35 = vpop.eup %14002  ;;  %v18553_v42 = vadd.f32 %v6046_v50, %v5407_v34  ;;  %v12338_v53 = vpop.f32.mrf.mxu0  ;;  %v5408_v4 = vmul.f32 %v13999_v22, %v12123_v10  ;;  %v20186_v22 = vld [vmem:[#allocation68_spill] sm:$0xff]  ;;  %v20227_v3 = vld [vmem:[#allocation175_spill] sm:$0xff] }
 0x969   : > { %v18555_v45 = vpop.eup %14004  ;;  %v18561_v48 = vadd.f32 %v12338_v53, %v12337_v15  ;;  %7039 = vadd.xlane.f32.xlu0 %v20181_v33  ;;  %v9052_v15 = vpack.c.bf16 %v18373_v14, %v18357_v25  ;;  %v5409_v33 = vmul.f32 %v14001_v59, %v20185_v9  ;;  %v20189_v25 = vld [vmem:[#allocation155_spill] sm:$0xff]  ;;  %v20192_v59 = vld [vmem:[#allocation48_spill] sm:$0xff]  ;;  %v20193_v9 = vld [vmem:[#allocation50_spill] sm:$0xff] }
 0x96a   : > { %v14007_v30 = vpop.eup %14006  ;;  %7036 = vadd.xlane.f32.xlu1 %v20182_v46  ;;  %v18569_v34 = vadd.f32 %v18555_v45, %v18551_v35  ;;  %v12340_v36 = vpop.f32.mrf.mxu0 }
 0x96b   : > { %20180 = vst [vmem:[#allocation70_spill] sm:$0xff] %v18561_v48  ;;  %v6047_v29 = vmul.f32 %v14007_v30, %v12187_v12  ;;  %9263 = vmatmul.mubr.bf16.gmra.mxu0 %v9049_v20  ;;  %v20188_v30 = vld [vmem:[#allocation154_spill] sm:$0xff]  ;;  %v20190_v48 = vld [vmem:[#allocation104_spill] sm:$0xff] }
 0x96c   : > { %20183 = vst [vmem:[#allocation134_spill] sm:$0xff] %v18569_v34  ;;  %v18571_v50 = vpop.eup %14008  ;;  %v12341_v37 = vpop.f32.mrf.mxu0  ;;  %9270 = vmatprep.mubr.bf16.mxu0 %v9052_v15  ;;  %v20191_v34 = vld [vmem:[#allocation108_spill] sm:$0xff] }
 0x96d   : > { %v18575_v53 = vpop.eup %14010  ;;  %v18577_v1 = vadd.f32 %v6047_v29, %v5408_v4  ;;  %v18585_v12 = vadd.f32 %v12341_v37, %v12340_v36  ;;  %7045 = vadd.xlane.f32.xlu0 %v20188_v30  ;;  %v9051_v30 = vpack.c.bf16 %v18371_v47, %v18349_v63  ;;  %v20196_v63 = vld [vmem:[#allocation158_spill] sm:$0xff]  ;;  %v20197_v47 = vld [vmem:[#allocation159_spill] sm:$0xff] }
 0x96e   : > { %v14013_v6 = vpop.eup %14012  ;;  %v18581_v46 = vadd.f32 %v18575_v53, %v18571_v50  ;;  %7042 = vadd.xlane.f32.xlu1 %v20189_v25  ;;  %v12343_v20 = vpop.f32.mrf.mxu0  ;;  %v20194_v25 = vld [vmem:[#allocation156_spill] sm:$0xff] }
 0x96f   : > { %v6048_v10 = vmul.f32 %v14013_v6, %v20186_v22  ;;  %20187 = vst [vmem:[#allocation40_spill] sm:$0xff] %v18585_v12  ;;  %v14015_v14 = vpop.eup %14014  ;;  %v12193_v6 = vadd.f32 %v20193_v9, %v20192_v59  ;;  %v20195_v12 = vld [vmem:[#allocation157_spill] sm:$0xff] }
 0x970   : > { %20184 = vst [vmem:[#allocation39_spill] sm:$0xff] %v18581_v46  ;;  %v12129_v46 = vadd.f32 %v20191_v34, %v20190_v48  ;;  %v12344_v36 = vpop.f32.mrf.mxu0  ;;  %v9685_v34 = vpack.c.bf16 %v18409_v52, %v18393_v56  ;;  %v20199_v56 = vld [vmem:[#allocation161_spill] sm:$0xff] }
 0x971   : > { %v18589_v4 = vpop.eup %14016  ;;  %v18591_v29 = vadd.f32 %v6048_v10, %v5409_v33  ;;  %v18599_v22 = vadd.f32 %v12344_v36, %v12343_v20  ;;  %7051 = vadd.xlane.f32.xlu0 %v20194_v25 }
 0x972   : > { %v18593_v15 = vpop.eup %14018  ;;  %7048 = vadd.xlane.f32.xlu1 %v20195_v12  ;;  %v5410_v10 = vmul.f32 %v14015_v14, %v12129_v46  ;;  %v12346_v59 = vpop.f32.mrf.mxu0  ;;  %v9684_v46 = vpack.c.bf16 %v18407_v43, %v18385_v44  ;;  %v20198_v14 = vld [vmem:[#allocation160_spill] sm:$0xff] }
 0x973   : > { %v14021_v37 = vpop.eup %14020  ;;  %v18607_v33 = vadd.f32 %v18593_v15, %v18589_v4  ;;  %9271 = vmatmul.mubr.bf16.gmra.mxu0 %v9051_v30 }
 0x974   : > { %v6049_v48 = vmul.f32 %v14021_v37, %v12193_v6  ;;  %9861 = vmatprep.mubr.bf16.mxu0 %v9685_v34  ;;  %v12347_v9 = vpop.f32.mrf.mxu0  ;;  %v9687_v6 = vpack.c.bf16 %v18444_v51, %v18429_v24  ;;  %v9689_v51 = vpack.c.bf16 %v18478_v28, %v18464_v8  ;;  %v9691_v28 = vpack.c.bf16 %v18518_v7, %v18498_v32 }
 0x975   : > { %7057 = vadd.xlane.f32.xlu0 %v20196_v63  ;;  %v18615_v12 = vadd.f32 %v12347_v9, %v12346_v59  ;;  %v9686_v59 = vpack.c.bf16 %v18442_v60, %v18421_v58  ;;  %v20202_v9 = vld [vmem:[#allocation38_spill] sm:$0xff]  ;;  %v20203_v63 = vld [vmem:[#allocation163_spill] sm:$0xff]  ;;  %v9693_v7 = vpack.c.bf16 %v18555_v45, %v18537_v21  ;;  %v9695_v45 = vpack.c.bf16 %v18593_v15, %v18575_v53 }
 0x976   : > { %v18611_v20 = vadd.f32 %v6049_v48, %v5410_v10  ;;  %7054 = vadd.xlane.f32.xlu1 %v20197_v47  ;;  %v12349_v36 = vpop.f32.mrf.mxu0  ;;  %v20200_v10 = vld [vmem:[#allocation132_spill] sm:$0xff]  ;;  %v20201_v48 = vld [vmem:[#allocation162_spill] sm:$0xff] }
 0x978   : > { %v12350_v25 = vpop.f32.mrf.mxu0 }
 0x979   : > { %7063 = vadd.xlane.f32.xlu0 %v20198_v14  ;;  %v18621_v52 = vadd.f32 %v12350_v25, %v12349_v36  ;;  %v20204_v25 = vld [vmem:[#allocation135_spill] sm:$0xff] }
 0x97a   : > { %7060 = vadd.xlane.f32.xlu1 %v20199_v56  ;;  %v12368_v37 = vpop.f32.mrf.mxu0  ;;  %v9688_v56 = vpack.c.bf16 %v18476_v31, %v18456_v17 }
 0x97b   : > { %9862 = vmatmul.mubr.bf16.vlgmr.msra.gmra.mxu0 %v9684_v46  ;;  %v20205_v46 = vld [vmem:[#allocation81_spill] sm:$0xff] }
 0x97c   : > { %9869 = vmatprep.mubr.bf16.mxu0 %v9687_v6  ;;  %v12369_v30 = vpop.f32.mrf.mxu0  ;;  %v20206_v6 = vld [vmem:[#allocation82_spill] sm:$0xff] }
 0x97d   : > { %7069 = vadd.xlane.f32.xlu0 %v20200_v10  ;;  %v18627_v34 = vadd.f32 %v12369_v30, %v12368_v37  ;;  %v20207_v37 = vld [vmem:[#allocation140_spill] sm:$0xff] }
 0x97e   : > { %7066 = vadd.xlane.f32.xlu1 %v20201_v48  ;;  %v12371_v44 = vpop.f32.mrf.mxu0  ;;  %v20208_v48 = vld [vmem:[#allocation112_spill] sm:$0xff] }
 0x980   : > { %v12372_v43 = vpop.f32.mrf.mxu0 }
 0x981   : > { %7075 = vadd.xlane.f32.xlu0 %v20202_v9  ;;  %v18633_v24 = vadd.f32 %v12372_v43, %v12371_v44  ;;  %v20209_v44 = vld [vmem:[#allocation182_spill] sm:$0xff] }
 0x982   : > { %7072 = vadd.xlane.f32.xlu1 %v20203_v63  ;;  %v12374_v47 = vpop.f32.mrf.mxu0 }
 0x983   : > { %9870 = vmatmul.mubr.bf16.gmra.mxu0 %v9686_v59  ;;  %v9690_v59 = vpack.c.bf16 %v18512_v11, %v18490_v16 }
 0x984   : > { %9877 = vmatprep.mubr.bf16.mxu0 %v9689_v51  ;;  %v12375_v36 = vpop.f32.mrf.mxu0 }
 0x985   : > { %7680 = vadd.xlane.f32.xlu0 %v20204_v25  ;;  %v18639_v14 = vadd.f32 %v12375_v36, %v12374_v47  ;;  %v20212_v36 = vld [vmem:[#allocation87_spill] sm:$0xff] }
 0x986   : > { %7078 = vadd.xlane.f32.xlu1 %v20205_v46  ;;  %v12377_v58 = vpop.f32.mrf.mxu0  ;;  %v20213_v46 = vld [vmem:[#allocation119_spill] sm:$0xff] }
 0x988   : > { %v12378_v60 = vpop.f32.mrf.mxu0 }
 0x989   : > { %7686 = vadd.xlane.f32.xlu0 %v20206_v6  ;;  %v18645_v8 = vadd.f32 %v12378_v60, %v12377_v58  ;;  %v20214_v58 = vld [vmem:[#allocation92_spill] sm:$0xff]  ;;  %v20216_v6 = vld [vmem:[#allocation145_spill] sm:$0xff] }
 0x98a   : > { %7683 = vadd.xlane.f32.xlu1 %v20207_v37  ;;  %v12380_v30 = vpop.f32.mrf.mxu0 }
 0x98b   : > { %9878 = vmatmul.mubr.bf16.gmra.mxu0 %v9688_v56  ;;  %v20215_v56 = vld [vmem:[#allocation93_spill] sm:$0xff] }
 0x98c   : > { %9885 = vmatprep.mubr.bf16.mxu0 %v9691_v28  ;;  %v12381_v10 = vpop.f32.mrf.mxu0 }
 0x98d   : > { %7692 = vadd.xlane.f32.xlu0 %v20208_v48  ;;  %v18651_v43 = vadd.f32 %v12381_v10, %v12380_v30  ;;  %v20217_v10 = vld [vmem:[#allocation146_spill] sm:$0xff] }
 0x98e   : > { %7689 = vadd.xlane.f32.xlu1 %v20209_v44  ;;  %v12383_v17 = vpop.f32.mrf.mxu0 }
 0x990   : > { %v12384_v31 = vpop.f32.mrf.mxu0 }
 0x991   : > { %7698 = vadd.xlane.f32.xlu0 %v17885_v18  ;;  %v18657_v32 = vadd.f32 %v12384_v31, %v12383_v17  ;;  %v9692_v18 = vpack.c.bf16 %v18551_v35, %v18533_v13  ;;  %v20220_v17 = vld [vmem:[#allocation147_spill] sm:$0xff] }
 0x992   : > { %7695 = vadd.xlane.f32.xlu1 %v17889_v39  ;;  %v20210_v39 = vld [vmem:[#allocation88_spill] sm:$0xff]  ;;  %v20221_v31 = vld [vmem:[#allocation95_spill] sm:$0xff] }
 0x993   : > { %v12386_v9 = vpop.f32.mrf.mxu0  ;;  %9886 = vmatmul.mubr.bf16.gmra.mxu0 %v9690_v59 }
 0x994   : > { %9893 = vmatprep.mubr.bf16.mxu0 %v9693_v7 }
 0x995   : > { %v12387_v63 = vpop.f32.mrf.mxu0  ;;  %7704 = vadd.xlane.f32.xlu0 %v17895_v0 }
 0x996   : > { %7701 = vadd.xlane.f32.xlu1 %v17905_v27  ;;  %v18663_v51 = vadd.f32 %v12387_v63, %v12386_v9  ;;  %v20211_v27 = vld [vmem:[#allocation90_spill] sm:$0xff] }
 0x997   : > { %v12389_v16 = vpop.f32.mrf.mxu0 }
 0x999   : > { %v12390_v11 = vpop.f32.mrf.mxu0  ;;  %7710 = vadd.xlane.f32.xlu0 %v17911_v61  ;;  %v9694_v61 = vpack.c.bf16 %v18589_v4, %v18571_v50  ;;  %v20218_v50 = vld [vmem:[#allocation122_spill] sm:$0xff] }
 0x99a   : > { %7707 = vadd.xlane.f32.xlu1 %v20210_v39  ;;  %v18669_v21 = vadd.f32 %v12390_v11, %v12389_v16 }
 0x99b   : > { %v12392_v47 = vpop.f32.mrf.mxu0  ;;  %9894 = vmatmul.mubr.bf16.gmra.mxu0 %v9692_v18 }
 0x99c   : > { %9901 = vmatprep.mubr.bf16.mxu0 %v9695_v45  ;;  %v20222_v45 = vld [vmem:[#allocation185_spill] sm:$0xff] }
 0x99d   : > { %v12393_v0 = vpop.f32.mrf.mxu0  ;;  %7716 = vadd.xlane.f32.xlu0 %v20211_v27 }
 0x99e   : > { %7713 = vadd.xlane.f32.xlu1 %v20212_v36  ;;  %v18675_v25 = vadd.f32 %v12393_v0, %v12392_v47  ;;  %v20223_v47 = vld [vmem:[#allocation148_spill] sm:$0xff] }
 0x99f   : > { %v12395_v13 = vpop.f32.mrf.mxu0 }
 0x9a1   : > { %v12396_v35 = vpop.f32.mrf.mxu0  ;;  %7722 = vadd.xlane.f32.xlu0 %v20213_v46 }
 0x9a2   : > { %7719 = vadd.xlane.f32.xlu1 %v20214_v58  ;;  %v18681_v53 = vadd.f32 %v12396_v35, %v12395_v13  ;;  %v20225_v58 = vld [vmem:[#allocation99_spill] sm:$0xff] }
 0x9a3   : > { %v12398_v15 = vpop.f32.mrf.mxu0  ;;  %9902 = vmatmul.mubr.bf16.gmra.mxu0 %v9694_v61 }
 0x9a5   : > { %v12399_v60 = vpop.f32.mrf.mxu0  ;;  %8327 = vadd.xlane.f32.xlu0 %v20215_v56 }
 0x9a6   : > { %7725 = vadd.xlane.f32.xlu1 %v20216_v6  ;;  %v18685_v37 = vadd.f32 %v12399_v60, %v12398_v15  ;;  %v20226_v15 = vld [vmem:[#allocation97_spill] sm:$0xff] }
 0x9a7   : > { %v12401_v28 = vpop.f32.mrf.mxu0 }
 0x9a9   : > { %v12402_v30 = vpop.f32.mrf.mxu0  ;;  %8333 = vadd.xlane.f32.xlu0 %v20217_v10 }
 0x9aa   : > { %8330 = vadd.xlane.f32.xlu1 %v20218_v50  ;;  %v18689_v4 = vadd.f32 %v12402_v30, %v12401_v28  ;;  %v20230_v28 = vld [vmem:[#allocation100_spill] sm:$0xff]  ;;  %v20232_v50 = vld [vmem:[#allocation123_spill] sm:$0xff] }
 0x9ab   : > { %v12404_v48 = vpop.f32.mrf.mxu0 }
 0x9ac   : > { %20219 = vst [vmem:[#allocation83_spill] sm:$0xff] %v18689_v4  ;;  %v9514_v7 = vpop.xlane.xlu0 %9513 }
 0x9ad   : > { %v12405_v44 = vpop.f32.mrf.mxu0  ;;  %8339 = vadd.xlane.f32.xlu0 %v20220_v17  ;;  %v9548_v63 = vsub.f32 %v18213_v55, %v9514_v7  ;;  %v9549_v16 = vsub.f32 %v18218_v2, %v9514_v7 }
 0x9ae   : > { %8336 = vadd.xlane.f32.xlu1 %v20221_v31  ;;  %v18693_v59 = vadd.f32 %v12405_v44, %v12404_v48  ;;  %v20233_v44 = vld [vmem:[#allocation196_spill] sm:$0xff]  ;;  %v20234_v31 = vld [vmem:[#allocation197_spill] sm:$0xff] }
 0x9af   : > { %v12407_v9 = vpop.f32.mrf.mxu0  ;;  %v9604_v11 = vmul.f32 1.442695, %v9548_v63  ;;  %v9606_v18 = vmul.f32 1.442695, %v9549_v16 }
 0x9b0   : > { %v5758_v27 = vpop.xlane.xlu0 %5757  ;;  %v9517_v36 = vpop.xlane.xlu1 %9516 }
 0x9b1   : > { %v12408_v39 = vpop.f32.mrf.mxu0  ;;  %8345 = vadd.xlane.f32.xlu0 %v20222_v45  ;;  %14024 = vpow2.f32 %v9604_v11  ;;  %v9550_v35 = vsub.f32 %v18243_v23, %v9517_v36  ;;  %v9551_v55 = vsub.f32 %v18246_v49, %v9517_v36  ;;  %v20229_v49 = vld [vmem:[#allocation98_spill] sm:$0xff] }
 0x9b2   : > { %8342 = vadd.xlane.f32.xlu1 %v20223_v47  ;;  %v18700_v0 = vadd.f32 %v12408_v39, %v12407_v9  ;;  %14026 = vpow2.f32 %v9606_v18  ;;  %v20235_v9 = vld [vmem:[#allocation198_spill] sm:$0xff]  ;;  %v20237_v18 = vld [vmem:[#allocation105_spill] sm:$0xff] }
 0x9b3   : > { %v12410_v13 = vpop.f32.mrf.mxu0  ;;  %14028 = vrcp.f32 %v5758_v27  ;;  %v9608_v61 = vmul.f32 1.442695, %v9550_v35  ;;  %v9610_v46 = vmul.f32 1.442695, %v9551_v55  ;;  %v20236_v11 = vld [vmem:[#allocation102_spill] sm:$0xff]  ;;  %v20238_v39 = vld [vmem:[#allocation33_spill] sm:$0xff] }
 0x9b4   : > { %20224 = vst [vmem:[#allocation110_spill] sm:$0xff] %v18700_v0  ;;  %14030 = vrcp.f32 %v20227_v3  ;;  %v5761_v56 = vpop.xlane.xlu1 %5760  ;;  %v20240_v35 = vld [vmem:[#allocation72_spill] sm:$0xff] }
 0x9b5   : > { %v12411_v2 = vpop.f32.mrf.mxu0  ;;  %8351 = vadd.xlane.f32.xlu0 %v20225_v58  ;;  %14032 = vpow2.f32 %v9608_v61  ;;  %v20242_v61 = vld [vmem:[#allocation177_spill] sm:$0xff] }
 0x9b6   : > { %8348 = vadd.xlane.f32.xlu1 %v20226_v15  ;;  %v18707_v60 = vadd.f32 %v12411_v2, %v12410_v13  ;;  %14034 = vpow2.f32 %v9610_v46  ;;  %v9520_v10 = vpop.xlane.xlu0 %9519  ;;  %v14023_v13 = vpop.eup %14022 }
 0x9b7   : > { %v12413_v6 = vpop.f32.mrf.mxu0  ;;  %14036 = vrcp.f32 %v5761_v56  ;;  %v9552_v17 = vsub.f32 %v20233_v44, %v9520_v10  ;;  %v9553_v7 = vsub.f32 %v20234_v31, %v9520_v10  ;;  %v20246_v31 = vld [vmem:[#allocation114_spill] sm:$0xff] }
 0x9b8   : > { %20228 = vst [vmem:[#allocation74_spill] sm:$0xff] %v18707_v60  ;;  %14038 = vrcp.f32 %v20232_v50  ;;  %v20275_v60 = vld [vmem:[#allocation136_spill] sm:$0xff] }
 0x9b9   : > { %v12414_v23 = vpop.f32.mrf.mxu0  ;;  %8357 = vadd.xlane.f32.xlu0 %v20229_v49  ;;  %14040 = vrcp.f32 %v18310_v57  ;;  %v9612_v63 = vmul.f32 1.442695, %v9552_v17  ;;  %v9614_v45 = vmul.f32 1.442695, %v9553_v7  ;;  %v20241_v57 = vld [vmem:[#allocation176_spill] sm:$0xff]  ;;  %v20244_v49 = vld [vmem:[#allocation109_spill] sm:$0xff]  ;;  %v5411_v7 = vmul.f32 %v14023_v13, %v20246_v31 }
 0x9ba   : > { %8354 = vadd.xlane.f32.xlu1 %v20230_v28  ;;  %v18711_v30 = vadd.f32 %v12414_v23, %v12413_v6  ;;  %14042 = vrcp.f32 %v20235_v9  ;;  %v5764_v27 = vpop.xlane.xlu0 %5763  ;;  %v9523_v36 = vpop.xlane.xlu1 %9522  ;;  %v20243_v23 = vld [vmem:[#allocation107_spill] sm:$0xff]  ;;  %v20253_v13 = vld [vmem:[#allocation186_spill] sm:$0xff] }
 0x9bb   : > { %v12432_v48 = vpop.f32.mrf.mxu0  ;;  %14044 = vrcp.f32 %v20238_v39  ;;  %v9554_v2 = vsub.f32 %v20241_v57, %v9523_v36  ;;  %v9555_v46 = vsub.f32 %v20242_v61, %v9523_v36  ;;  %v20247_v9 = vld [vmem:[#allocation71_spill] sm:$0xff]  ;;  %v20249_v39 = vld [vmem:[#allocation41_spill] sm:$0xff]  ;;  %v20252_v61 = vld [vmem:[#allocation188_spill] sm:$0xff] }
 0x9bc   : > { %20231 = vst [vmem:[#allocation111_spill] sm:$0xff] %v18711_v30  ;;  %14046 = vrcp.f32 %v20240_v35  ;;  %v20251_v35 = vld [vmem:[#allocation75_spill] sm:$0xff]  ;;  %v20272_v30 = vld [vmem:[#allocation128_spill] sm:$0xff] }
 0x9bd   : > { %v12433_v16 = vpop.f32.mrf.mxu0  ;;  %8363 = vadd.xlane.f32.xlu0 %v20236_v11  ;;  %14048 = vpow2.f32 %v9612_v63  ;;  %v9616_v56 = vmul.f32 1.442695, %v9554_v2  ;;  %v9618_v6 = vmul.f32 1.442695, %v9555_v46 }
 0x9be   : > { %8360 = vadd.xlane.f32.xlu1 %v20237_v18  ;;  %v18721_v47 = vadd.f32 %v12433_v16, %v12432_v48  ;;  %v14025_v58 = vpop.eup %14024  ;;  %14050 = vrcp.f32 %v5764_v27  ;;  %v5770_v50 = vpop.xlane.xlu0 %5769  ;;  %v20248_v18 = vld [vmem:[#allocation42_spill] sm:$0xff] }
 0x9bf   : > { %v12435_v55 = vpop.f32.mrf.mxu0  ;;  %v14027_v15 = vpop.eup %14026  ;;  %14052 = vpow2.f32 %v9614_v45  ;;  %v12135_v27 = vadd.f32 %v20249_v39, %v20248_v18  ;;  %v20250_v45 = vld [vmem:[#allocation180_spill] sm:$0xff] }
 0x9c0   : > { %20239 = vst [vmem:[#allocation115_spill] sm:$0xff] %v18721_v47  ;;  %v14029_v28 = vpop.eup %14028  ;;  %v5767_v48 = vpop.xlane.xlu1 %5766  ;;  %v18730_v44 = vadd.f32 %v14027_v15, %v14025_v58  ;;  %14054 = vpow2.f32 %v9616_v56 }
 0x9c1   : > { %v12436_v3 = vpop.f32.mrf.mxu0  ;;  %8369 = vadd.xlane.f32.xlu0 %v20243_v23  ;;  %v14031_v17 = vpop.eup %14030  ;;  %v6050_v63 = vmul.f32 %v14029_v28, %v20247_v9  ;;  %14056 = vpow2.f32 %v9618_v6 }
 0x9c2   : > { %8366 = vadd.xlane.f32.xlu1 %v20244_v49  ;;  %v18728_v10 = vadd.f32 %v12436_v3, %v12435_v55  ;;  %v14033_v11 = vpop.eup %14032  ;;  %v12199_v55 = vadd.f32 %v20251_v35, %v20250_v45  ;;  %14058 = vrcp.f32 %v5770_v50  ;;  %v5412_v31 = vmul.f32 %v14031_v17, %v12135_v27  ;;  %v20258_v17 = vld [vmem:[#allocation190_spill] sm:$0xff] }
 0x9c3   : > { %v12438_v16 = vpop.f32.mrf.mxu0  ;;  %v14035_v36 = vpop.eup %14034  ;;  %v18738_v57 = vadd.f32 %v6050_v63, %v5411_v7  ;;  %v9696_v46 = vpack.c.bf16 %v14033_v11, %v14025_v58  ;;  %14060 = vrcp.f32 %v5767_v48  ;;  %v20255_v48 = vld [vmem:[#allocation164_spill] sm:$0xff] }
 0x9c4   : > { %20245 = vst [vmem:[#allocation142_spill] sm:$0xff] %v18728_v10  ;;  %v14037_v3 = vpop.eup %14036  ;;  %v5776_v23 = vpop.xlane.xlu0 %5775  ;;  %v9697_v6 = vpack.c.bf16 %v14035_v36, %v14027_v15  ;;  %v18744_v28 = vadd.f32 %v14035_v36, %v14033_v11  ;;  %v20256_v15 = vld [vmem:[#allocation61_spill] sm:$0xff] }
 0x9c5   : > { %v12439_v2 = vpop.f32.mrf.mxu0  ;;  %8974 = vadd.xlane.f32.xlu0 %v20252_v61  ;;  %v5773_v49 = vpop.xlane.xlu1 %5772  ;;  %v6051_v9 = vmul.f32 %v14037_v3, %v12199_v55  ;;  %14062 = vrcp.f32 %v5776_v23 }
 0x9c6   : > { %8372 = vadd.xlane.f32.xlu1 %v20253_v13  ;;  %v18742_v56 = vadd.f32 %v12439_v2, %v12438_v16  ;;  %v14039_v50 = vpop.eup %14038  ;;  %14064 = vrcp.f32 %v5773_v49  ;;  %9909 = vmatprep.mubr.bf16.mxu0 %v9697_v6  ;;  %v20259_v2 = vld [vmem:[#allocation194_spill] sm:$0xff]  ;;  %v20262_v6 = vld [vmem:[#allocation47_spill] sm:$0xff] }
 0x9c7   : > { %v12441_v7 = vpop.f32.mrf.mxu0  ;;  %v14041_v63 = vpop.eup %14040  ;;  %14066 = vrcp.f32 %v18397_v62  ;;  %v18747_v58 = vadd.f32 %v6051_v9, %v5412_v31  ;;  %9910 = vmatmul.mubr.bf16.gmra.mxu0 %v9696_v46  ;;  %v20261_v46 = vld [vmem:[#allocation193_spill] sm:$0xff]  ;;  %v5413_v31 = vmul.f32 %v14039_v50, %v20262_v6  ;;  %v20263_v9 = vld [vmem:[#allocation35_spill] sm:$0xff] }
 0x9c8   : > { %20254 = vst [vmem:[#allocation139_spill] sm:$0xff] %v18742_v56  ;;  %v14043_v18 = vpop.eup %14042  ;;  %14068 = vrcp.f32 %v20256_v15  ;;  %v5782_v39 = vpop.xlane.xlu0 %5781  ;;  %v20266_v50 = vld [vmem:[#allocation127_spill] sm:$0xff]  ;;  %v20271_v56 = vld [vmem:[#allocation130_spill] sm:$0xff] }
 0x9c9   : > { %v12442_v16 = vpop.f32.mrf.mxu0  ;;  %8980 = vadd.xlane.f32.xlu0 %v20255_v48  ;;  %v5779_v27 = vpop.xlane.xlu1 %5778  ;;  %14070 = vrcp.f32 %v5782_v39  ;;  %v20264_v39 = vld [vmem:[#allocation169_spill] sm:$0xff] }
 0x9ca   : > { %v18751_v11 = vadd.f32 %v12442_v16, %v12441_v7  ;;  %8977 = vadd.xlane.f32.xlu1 %v20258_v17  ;;  %v14045_v36 = vpop.eup %14044  ;;  %14072 = vrcp.f32 %v5779_v27 }
 0x9cb   : > { %v12444_v45 = vpop.f32.mrf.mxu0  ;;  %v14047_v35 = vpop.eup %14046  ;;  %14074 = vrcp.f32 %v18417_v38 }
 0x9cc   : > { %20257 = vst [vmem:[#allocation86_spill] sm:$0xff] %v18751_v11  ;;  %v18754_v62 = vpop.eup %14048  ;;  %v6387_v3 = vpop.xlane.xlu0 %6386 }
 0x9cd   : > { %v12445_v55 = vpop.f32.mrf.mxu0  ;;  %8986 = vadd.xlane.f32.xlu0 %v20259_v2  ;;  %v14051_v61 = vpop.eup %14050  ;;  %14076 = vrcp.f32 %v6387_v3 }
 0x9ce   : > { %v18758_v13 = vadd.f32 %v12445_v55, %v12444_v45  ;;  %8983 = vadd.xlane.f32.xlu1 %v20261_v46  ;;  %v5785_v23 = vpop.xlane.xlu1 %5784  ;;  %v18761_v49 = vpop.eup %14052  ;;  %v6052_v7 = vmul.f32 %v14051_v61, %v20263_v9  ;;  %v20265_v55 = vld [vmem:[#allocation124_spill] sm:$0xff]  ;;  %v20268_v46 = vld [vmem:[#allocation167_spill] sm:$0xff] }
 0x9cf   : > { %v12447_v16 = vpop.f32.mrf.mxu0  ;;  %v18765_v48 = vpop.eup %14054  ;;  %14078 = vrcp.f32 %v5785_v23  ;;  %v12205_v2 = vadd.f32 %v20266_v50, %v20265_v55  ;;  %v20269_v9 = vld [vmem:[#allocation51_spill] sm:$0xff]  ;;  %v12211_v55 = vadd.f32 %v20272_v30, %v20271_v56 }
 0x9d0   : > { %20260 = vst [vmem:[#allocation141_spill] sm:$0xff] %v18758_v13  ;;  %v18767_v15 = vpop.eup %14056  ;;  %v18769_v38 = vadd.f32 %v6052_v7, %v5413_v31  ;;  %v9698_v27 = vpack.c.bf16 %v18765_v48, %v18754_v62  ;;  %v6393_v3 = vpop.xlane.xlu0 %6392  ;;  %v5415_v7 = vmul.f32 %v14043_v18, %v20269_v9 }
 0x9d1   : > { %v12448_v17 = vpop.f32.mrf.mxu0  ;;  %8992 = vadd.xlane.f32.xlu0 %v20264_v39  ;;  %v14059_v45 = vpop.eup %14058  ;;  %v9699_v6 = vpack.c.bf16 %v18767_v15, %v18761_v49  ;;  %v20270_v39 = vld [vmem:[#allocation129_spill] sm:$0xff]  ;;  %14080 = vrcp.f32 %v6393_v3 }
 0x9d2   : > { %v18776_v61 = vadd.f32 %v12448_v17, %v12447_v16  ;;  %8989 = vadd.xlane.f32.xlu1 %v20268_v46  ;;  %v6390_v23 = vpop.xlane.xlu1 %6389  ;;  %v14061_v31 = vpop.eup %14060  ;;  %v6054_v11 = vmul.f32 %v14059_v45, %v20270_v39  ;;  %v20273_v16 = vld [vmem:[#allocation49_spill] sm:$0xff]  ;;  %v20276_v45 = vld [vmem:[#allocation172_spill] sm:$0xff] }
 0x9d3   : > { %v12450_v13 = vpop.f32.mrf.mxu0  ;;  %v14063_v10 = vpop.eup %14062  ;;  %v5414_v17 = vmul.f32 %v14041_v63, %v20273_v16  ;;  %v6053_v50 = vmul.f32 %v14061_v31, %v12205_v2  ;;  %14082 = vrcp.f32 %v6390_v23  ;;  %9917 = vmatprep.mubr.bf16.mxu0 %v9699_v6  ;;  %v20277_v39 = vld [vmem:[#allocation52_spill] sm:$0xff]  ;;  %v20278_v2 = vld [vmem:[#allocation171_spill] sm:$0xff]  ;;  %v20280_v6 = vld [vmem:[#allocation138_spill] sm:$0xff] }
 0x9d4   : > { %20267 = vst [vmem:[#allocation113_spill] sm:$0xff] %v18776_v61  ;;  %v14065_v46 = vpop.eup %14064  ;;  %v20274_v61 = vld [vmem:[#allocation53_spill] sm:$0xff]  ;;  %v18787_v0 = vadd.f32 %v6054_v11, %v5415_v7  ;;  %v6056_v18 = vmul.f32 %v14063_v10, %v20275_v60  ;;  %9918 = vmatmul.mubr.bf16.gmra.mxu0 %v9698_v27  ;;  %v5416_v4 = vmul.f32 %v14045_v36, %v20277_v39  ;;  %v6399_v23 = vpop.xlane.xlu0 %6398  ;;  %v20282_v16 = vld [vmem:[#allocation80_spill] sm:$0xff] }
 0x9d5   : > { %v5417_v47 = vmul.f32 %v14047_v35, %v20274_v61  ;;  %v12451_v9 = vpop.f32.mrf.mxu0  ;;  %8998 = vadd.xlane.f32.xlu0 %v20276_v45  ;;  %v14067_v3 = vpop.eup %14066  ;;  %v18792_v30 = vadd.f32 %v6053_v50, %v5414_v17  ;;  %v6055_v56 = vmul.f32 %v14065_v46, %v12211_v55  ;;  %14084 = vrcp.f32 %v6399_v23  ;;  %v20279_v27 = vld [vmem:[#allocation137_spill] sm:$0xff]  ;;  %v20281_v55 = vld [vmem:[#allocation55_spill] sm:$0xff] }
 0x9d6   : > { %v18794_v63 = vadd.f32 %v12451_v9, %v12450_v13  ;;  %8995 = vadd.xlane.f32.xlu1 %v20278_v2  ;;  %v6396_v35 = vpop.xlane.xlu1 %6395  ;;  %v14069_v11 = vpop.eup %14068  ;;  %v12217_v31 = vadd.f32 %v20280_v6, %v20279_v27  ;;  %v5419_v13 = vmul.f32 %v14067_v3, %v20281_v55  ;;  %v20283_v46 = vld [vmem:[#allocation195_spill] sm:$0xff]  ;;  %v20284_v9 = vld [vmem:[#allocation54_spill] sm:$0xff]  ;;  %v20286_v27 = vld [vmem:[#allocation101_spill] sm:$0xff] }
 0x9d7   : > { %v12453_v61 = vpop.f32.mrf.mxu0  ;;  %v18797_v60 = vadd.f32 %v6056_v18, %v5417_v47  ;;  %v14071_v10 = vpop.eup %14070  ;;  %v18801_v7 = vadd.f32 %v6055_v56, %v5416_v4  ;;  %14086 = vrcp.f32 %v6396_v35  ;;  %v5418_v45 = vmul.f32 %v14069_v11, %v20284_v9  ;;  %v20285_v18 = vld [vmem:[#allocation69_spill] sm:$0xff] }
 0x9d8   : > { %v14073_v36 = vpop.eup %14072  ;;  %v6058_v17 = vmul.f32 %v14071_v10, %v20282_v16  ;;  %v6405_v2 = vpop.xlane.xlu0 %6404  ;;  %v20287_v10 = vld [vmem:[#allocation106_spill] sm:$0xff]  ;;  %v20289_v16 = vld [vmem:[#allocation199_spill] sm:$0xff] }
 0x9d9   : > { %v12454_v50 = vpop.f32.mrf.mxu0  ;;  %9004 = vadd.xlane.f32.xlu0 %v20283_v46  ;;  %v6057_v39 = vmul.f32 %v14073_v36, %v12217_v31  ;;  %v14075_v4 = vpop.eup %14074  ;;  %14088 = vrcp.f32 %v6405_v2  ;;  %v12223_v6 = vadd.f32 %v20287_v10, %v20286_v27  ;;  %v20288_v31 = vld [vmem:[#allocation183_spill] sm:$0xff] }
 0x9da   : > { %v18807_v47 = vadd.f32 %v12454_v50, %v12453_v61  ;;  %9001 = vadd.xlane.f32.xlu1 %v20285_v18  ;;  %v6402_v23 = vpop.xlane.xlu1 %6401  ;;  %v18810_v35 = vadd.f32 %v6058_v17, %v5419_v13  ;;  %v14077_v3 = vpop.eup %14076  ;;  %v20290_v50 = vld [vmem:[#allocation56_spill] sm:$0xff]  ;;  %v20291_v13 = vld [vmem:[#allocation178_spill] sm:$0xff] }
 0x9db   : > { %v12456_v56 = vpop.f32.mrf.mxu0  ;;  %14090 = vrcp.f32 %v6402_v23  ;;  %v18814_v55 = vadd.f32 %v6057_v39, %v5418_v45  ;;  %v6691_v61 = vmul.f32 %v14077_v3, %v20288_v31  ;;  %v5420_v46 = vmul.f32 %v14075_v4, %v20290_v50  ;;  %v20292_v23 = vld [vmem:[#allocation184_spill] sm:$0xff] }
 0x9dc   : > { %v14079_v11 = vpop.eup %14078  ;;  %v20293_v3 = vld [vmem:[#allocation116_spill] sm:$0xff] }
 0x9dd   : > { %v12457_v36 = vpop.f32.mrf.mxu0  ;;  %9010 = vadd.xlane.f32.xlu0 %v20289_v16  ;;  %v6059_v9 = vmul.f32 %v14079_v11, %v12223_v6  ;;  %v18823_v27 = vadd.f32 %v6691_v61, %v18516_v5  ;;  %v12245_v10 = vadd.f32 %v20293_v3, %v20292_v23  ;;  %v20294_v6 = vld [vmem:[#allocation91_spill] sm:$0xff]  ;;  %v20297_v5 = vld [vmem:[#allocation73_spill] sm:$0xff] }
 0x9de   : > { %v18819_v18 = vadd.f32 %v12457_v36, %v12456_v56  ;;  %9007 = vadd.xlane.f32.xlu1 %v20291_v13  ;;  %v6411_v17 = vpop.xlane.xlu0 %6410  ;;  %v6408_v2 = vpop.xlane.xlu1 %6407  ;;  %v20295_v36 = vld [vmem:[#allocation59_spill] sm:$0xff] }
 0x9df   : > { %v12459_v45 = vpop.f32.mrf.mxu0  ;;  %14092 = vrcp.f32 %v6411_v17  ;;  %v14081_v39 = vpop.eup %14080  ;;  %v18827_v31 = vadd.f32 %v6059_v9, %v5420_v46  ;;  %v20298_v9 = vld [vmem:[#allocation187_spill] sm:$0xff] }
 0x9e0   : > { %14094 = vrcp.f32 %v6408_v2  ;;  %v14083_v4 = vpop.eup %14082  ;;  %v6693_v56 = vmul.f32 %v14081_v39, %v20294_v6  ;;  %v20299_v2 = vld [vmem:[#allocation189_spill] sm:$0xff] }
 0x9e1   : > { %v12460_v11 = vpop.f32.mrf.mxu0  ;;  %9016 = vadd.xlane.f32.xlu0 %v20295_v36  ;;  %v6692_v16 = vmul.f32 %v14083_v4, %v12245_v10  ;;  %v12251_v3 = vadd.f32 %v20299_v2, %v20298_v9 }
 0x9e2   : > { %v18831_v50 = vadd.f32 %v12460_v11, %v12459_v45  ;;  %9013 = vadd.xlane.f32.xlu1 %v20297_v5  ;;  %v6417_v61 = vpop.xlane.xlu0 %6416  ;;  %v6414_v13 = vpop.xlane.xlu1 %6413  ;;  %v18835_v17 = vadd.f32 %v6693_v56, %v18553_v42  ;;  %v20300_v45 = vld [vmem:[#allocation191_spill] sm:$0xff]  ;;  %v20301_v11 = vld [vmem:[#allocation181_spill] sm:$0xff]  ;;  %v20302_v42 = vld [vmem:[#allocation60_spill] sm:$0xff] }
 0x9e3   : > { %v12462_v23 = vpop.f32.mrf.mxu0  ;;  %14096 = vrcp.f32 %v6417_v61  ;;  %v14085_v46 = vpop.eup %14084  ;;  %v18840_v39 = vadd.f32 %v6692_v16, %v18539_v41 }
 0x9e4   : > { %20296 = vst [vmem:[#allocation118_spill] sm:$0xff] %v18831_v50  ;;  %14098 = vrcp.f32 %v6414_v13  ;;  %v14087_v10 = vpop.eup %14086  ;;  %v6695_v4 = vmul.f32 %v14085_v46, %v20300_v45  ;;  %v20303_v46 = vld [vmem:[#allocation165_spill] sm:$0xff] }
 0x9e5   : > { %v12463_v6 = vpop.f32.mrf.mxu0  ;;  %9621 = vadd.xlane.f32.xlu0 %v20301_v11  ;;  %v6694_v36 = vmul.f32 %v14087_v10, %v12251_v3 }
 0x9e6   : > { %v18844_v5 = vadd.f32 %v12463_v6, %v12462_v23  ;;  %9019 = vadd.xlane.f32.xlu1 %v20302_v42  ;;  %v6423_v56 = vpop.xlane.xlu0 %6422  ;;  %v18848_v50 = vadd.f32 %v6695_v4, %v18591_v29  ;;  %v14089_v41 = vpop.eup %14088  ;;  %v20304_v23 = vld [vmem:[#allocation192_spill] sm:$0xff] }
 0x9e7   : > { %v6420_v61 = vpop.xlane.xlu1 %6419  ;;  %v12465_v9 = vpop.f32.mrf.mxu0  ;;  %14100 = vrcp.f32 %v6423_v56  ;;  %v18851_v16 = vadd.f32 %v6694_v36, %v18577_v1  ;;  %v6697_v2 = vmul.f32 %v14089_v41, %v20303_v46  ;;  %v20305_v6 = vld [vmem:[#allocation36_spill] sm:$0xff] }
 0x9e8   : > { %14102 = vrcp.f32 %v6420_v61  ;;  %v14091_v13 = vpop.eup %14090 }
 0x9e9   : > { %v12466_v3 = vpop.f32.mrf.mxu0  ;;  %9627 = vadd.xlane.f32.xlu0 %v18436_v26  ;;  %v6696_v10 = vmul.f32 %v14091_v13, %v20304_v23  ;;  %v18860_v11 = vadd.f32 %v6697_v2, %v18738_v57  ;;  %v20306_v26 = vld [vmem:[#allocation168_spill] sm:$0xff] }
 0x9ea   : > { %v18856_v45 = vadd.f32 %v12466_v3, %v12465_v9  ;;  %9624 = vadd.xlane.f32.xlu1 %v20305_v6  ;;  %v6429_v29 = vpop.xlane.xlu0 %6428  ;;  %v20307_v9 = vld [vmem:[#allocation166_spill] sm:$0xff] }
 0x9eb   : > { %v6426_v4 = vpop.xlane.xlu1 %6425  ;;  %v12468_v1 = vpop.f32.mrf.mxu0  ;;  %14104 = vrcp.f32 %v6429_v29  ;;  %v18863_v42 = vadd.f32 %v6696_v10, %v18611_v20  ;;  %v20308_v3 = vld [vmem:[#allocation66_spill] sm:$0xff] }
 0x9ec   : > { %v14093_v36 = vpop.eup %14092  ;;  %14106 = vrcp.f32 %v6426_v4 }
 0x9ed   : > { %v14095_v56 = vpop.eup %14094  ;;  %v6699_v61 = vmul.f32 %v14093_v36, %v20306_v26  ;;  %v12469_v41 = vpop.f32.mrf.mxu0  ;;  %9633 = vadd.xlane.f32.xlu0 %v18470_v19  ;;  %v20309_v19 = vld [vmem:[#allocation65_spill] sm:$0xff] }
 0x9ee   : > { %v6698_v13 = vmul.f32 %v14095_v56, %v20307_v9  ;;  %v18868_v46 = vadd.f32 %v12469_v41, %v12468_v1  ;;  %9630 = vadd.xlane.f32.xlu1 %v20308_v3  ;;  %v7034_v57 = vpop.xlane.xlu0 %7033  ;;  %v20310_v1 = vld [vmem:[#allocation89_spill] sm:$0xff]  ;;  %v20311_v56 = vld [vmem:[#allocation63_spill] sm:$0xff] }
 0x9ef   : > { %v6432_v2 = vpop.xlane.xlu1 %6431  ;;  %v18872_v23 = vadd.f32 %v6699_v61, %v18769_v38  ;;  %v12471_v20 = vpop.f32.mrf.mxu0  ;;  %14108 = vrcp.f32 %v7034_v57  ;;  %v20312_v9 = vld [vmem:[#allocation131_spill] sm:$0xff] }
 0x9f0   : > { %v14097_v10 = vpop.eup %14096  ;;  %v18875_v6 = vadd.f32 %v6698_v13, %v18747_v58  ;;  %14110 = vrcp.f32 %v6432_v2 }
 0x9f1   : > { %v14099_v29 = vpop.eup %14098  ;;  %v6701_v4 = vmul.f32 %v14097_v10, %v20309_v19  ;;  %v12472_v36 = vpop.f32.mrf.mxu0  ;;  %9639 = vadd.xlane.f32.xlu0 %v20310_v1  ;;  %v20313_v10 = vld [vmem:[#allocation32_spill] sm:$0xff] }
 0x9f2   : > { %v6700_v26 = vmul.f32 %v14099_v29, %v20311_v56  ;;  %v18880_v41 = vadd.f32 %v12472_v36, %v12471_v20  ;;  %9636 = vadd.xlane.f32.xlu1 %v20312_v9  ;;  %v7040_v38 = vpop.xlane.xlu0 %7039  ;;  %v20314_v20 = vld [vmem:[#allocation174_spill] sm:$0xff] }
 0x9f3   : > { %v7037_v61 = vpop.xlane.xlu1 %7036  ;;  %v18884_v3 = vadd.f32 %v6701_v4, %v18787_v0  ;;  %v12474_v58 = vpop.f32.mrf.mxu0  ;;  %14112 = vrcp.f32 %v7040_v38 }
 0x9f4   : > { %v14101_v13 = vpop.eup %14100  ;;  %v18887_v57 = vadd.f32 %v6700_v26, %v18792_v30  ;;  %14114 = vrcp.f32 %v7037_v61 }
 0x9f5   : > { %v14103_v2 = vpop.eup %14102  ;;  %v6703_v19 = vmul.f32 %v14101_v13, %v20313_v10  ;;  %v12475_v29 = vpop.f32.mrf.mxu0  ;;  %9645 = vadd.xlane.f32.xlu0 %v18545_v54  ;;  %v20315_v54 = vld [vmem:[#allocation179_spill] sm:$0xff] }
 0x9f6   : > { %v6702_v36 = vmul.f32 %v14103_v2, %v20314_v20  ;;  %v18892_v1 = vadd.f32 %v12475_v29, %v12474_v58  ;;  %9642 = vadd.xlane.f32.xlu1 %v18531_v40  ;;  %v7046_v0 = vpop.xlane.xlu0 %7045  ;;  %v20316_v58 = vld [vmem:[#allocation39_spill] sm:$0xff]  ;;  %v20317_v2 = vld [vmem:[#allocation57_spill] sm:$0xff]  ;;  %v20318_v29 = vld [vmem:[#allocation134_spill] sm:$0xff] }
 0x9f7   : > { %v7043_v4 = vpop.xlane.xlu1 %7042  ;;  %v12477_v56 = vpop.f32.mrf.mxu0  ;;  %14116 = vrcp.f32 %v7046_v0  ;;  %v18896_v30 = vadd.f32 %v6703_v19, %v18797_v60 }
 0x9f8   : > { %v14105_v26 = vpop.eup %14104  ;;  %v18899_v9 = vadd.f32 %v6702_v36, %v18801_v7  ;;  %14118 = vrcp.f32 %v7043_v4 }
 0x9f9   : > { %v14107_v38 = vpop.eup %14106  ;;  %v6705_v61 = vmul.f32 %v14105_v26, %v20315_v54  ;;  %v12478_v13 = vpop.f32.mrf.mxu0  ;;  %9651 = vadd.xlane.f32.xlu0 %v20316_v58  ;;  %v20319_v26 = vld [vmem:[#allocation34_spill] sm:$0xff] }
 0x9fa   : > { %v6704_v40 = vmul.f32 %v14107_v38, %v20317_v2  ;;  %v18904_v10 = vadd.f32 %v12478_v13, %v12477_v56  ;;  %9648 = vadd.xlane.f32.xlu1 %v20318_v29  ;;  %v7052_v20 = vpop.xlane.xlu0 %7051  ;;  %v20320_v56 = vld [vmem:[#allocation58_spill] sm:$0xff] }
 0x9fb   : > { %v7049_v60 = vpop.xlane.xlu1 %7048  ;;  %v12496_v19 = vpop.f32.mrf.mxu0  ;;  %14120 = vrcp.f32 %v7052_v20  ;;  %v18908_v7 = vadd.f32 %v6705_v61, %v18810_v35 }
 0x9fc   : > { %v14109_v36 = vpop.eup %14108  ;;  %14122 = vrcp.f32 %v7049_v60  ;;  %v18911_v0 = vadd.f32 %v6704_v40, %v18814_v55  ;;  %v9662_v55 = vadd.f32 %v18761_v49, %v18754_v62  ;;  %v20321_v60 = vld [vmem:[#allocation125_spill] sm:$0xff] }
 0x9fd   : > { %v14111_v4 = vpop.eup %14110  ;;  %v7338_v54 = vmul.f32 %v14109_v36, %v20319_v26  ;;  %v12497_v38 = vpop.f32.mrf.mxu0  ;;  %9657 = vadd.xlane.f32.xlu0 %v18730_v44 }
 0x9fe   : > { %v6706_v13 = vmul.f32 %v14111_v4, %v20320_v56  ;;  %v18916_v58 = vadd.f32 %v12497_v38, %v12496_v19  ;;  %9654 = vadd.xlane.f32.xlu1 %v18607_v33  ;;  %v7058_v2 = vpop.xlane.xlu0 %7057  ;;  %v20322_v33 = vld [vmem:[#allocation31_spill] sm:$0xff]  ;;  %v9665_v56 = vadd.f32 %v18767_v15, %v18765_v48  ;;  %v20325_v15 = vld [vmem:[#allocation64_spill] sm:$0xff] }
 0x9ff   : > { %v7055_v35 = vpop.xlane.xlu1 %7054  ;;  %v18920_v61 = vadd.f32 %v7338_v54, %v18823_v27  ;;  %v12499_v29 = vpop.f32.mrf.mxu0  ;;  %14124 = vrcp.f32 %v7058_v2  ;;  %v20323_v2 = vld [vmem:[#allocation62_spill] sm:$0xff] }
 0xa00   : > { %v14113_v40 = vpop.eup %14112  ;;  %14126 = vrcp.f32 %v7055_v35  ;;  %v18925_v44 = vadd.f32 %v6706_v13, %v18827_v31 }
 0xa01   : > { %v14115_v20 = vpop.eup %14114  ;;  %v7340_v19 = vmul.f32 %v14113_v40, %v20321_v60  ;;  %v12500_v36 = vpop.f32.mrf.mxu0  ;;  %9663 = vadd.xlane.f32.xlu0 %v9662_v55 }
 0xa02   : > { %v7339_v4 = vmul.f32 %v14115_v20, %v20322_v33  ;;  %v18929_v26 = vadd.f32 %v12500_v36, %v12499_v29  ;;  %9660 = vadd.xlane.f32.xlu1 %v18744_v28  ;;  %v7064_v27 = vpop.xlane.xlu0 %7063  ;;  %v20324_v28 = vld [vmem:[#allocation126_spill] sm:$0xff] }
 0xa03   : > { %v7061_v54 = vpop.xlane.xlu1 %7060  ;;  %v18933_v62 = vadd.f32 %v7340_v19, %v18835_v17  ;;  %v12502_v49 = vpop.f32.mrf.mxu0  ;;  %14128 = vrcp.f32 %v7064_v27  ;;  %v20326_v27 = vld [vmem:[#allocation84_spill] sm:$0xff] }
 0xa04   : > { %v14117_v31 = vpop.eup %14116  ;;  %v18936_v38 = vadd.f32 %v7339_v4, %v18840_v39  ;;  %14130 = vrcp.f32 %v7061_v54 }
 0xa05   : > { %v14119_v13 = vpop.eup %14118  ;;  %v7342_v35 = vmul.f32 %v14117_v31, %v20323_v2  ;;  %v12503_v29 = vpop.f32.mrf.mxu0 }
 0xa06   : > { %v7341_v55 = vmul.f32 %v14119_v13, %v20324_v28  ;;  %v18942_v40 = vadd.f32 %v12503_v29, %v12502_v49  ;;  %9666 = vadd.xlane.f32.xlu1 %v9665_v56  ;;  %v7070_v17 = vpop.xlane.xlu0 %7069  ;;  %v20327_v29 = vld [vmem:[#allocation133_spill] sm:$0xff] }
 0xa07   : > { %v7067_v20 = vpop.xlane.xlu1 %7066  ;;  %v18945_v60 = vadd.f32 %v7342_v35, %v18848_v50  ;;  %v12505_v39 = vpop.f32.mrf.mxu0  ;;  %14132 = vrcp.f32 %v7070_v17  ;;  %v20328_v17 = vld [vmem:[#allocation37_spill] sm:$0xff] }
 0xa08   : > { %v14121_v19 = vpop.eup %14120  ;;  %v18948_v36 = vadd.f32 %v7341_v55, %v18851_v16  ;;  %14134 = vrcp.f32 %v7067_v20 }
 0xa09   : > { %v14123_v48 = vpop.eup %14122  ;;  %v7344_v33 = vmul.f32 %v14121_v19, %v20325_v15  ;;  %v12506_v4 = vpop.f32.mrf.mxu0 }
 0xa0a   : > { %v7343_v54 = vmul.f32 %v14123_v48, %v20326_v27  ;;  %v18952_v49 = vadd.f32 %v12506_v4, %v12505_v39  ;;  %v7076_v31 = vpop.xlane.xlu0 %7075  ;;  %v20329_v27 = vld [vmem:[#allocation144_spill] sm:$0xff] }
 0xa0b   : > { %v7073_v56 = vpop.xlane.xlu1 %7072  ;;  %v18955_v50 = vadd.f32 %v7344_v33, %v18860_v11  ;;  %v12508_v13 = vpop.f32.mrf.mxu0  ;;  %14136 = vrcp.f32 %v7076_v31 }
 0xa0c   : > { %v14125_v2 = vpop.eup %14124  ;;  %v18958_v16 = vadd.f32 %v7343_v54, %v18863_v42  ;;  %14138 = vrcp.f32 %v7073_v56  ;;  %v20330_v56 = vld [vmem:[#allocation67_spill] sm:$0xff] }
 0xa0d   : > { %v14127_v35 = vpop.eup %14126  ;;  %v7346_v28 = vmul.f32 %v14125_v2, %v20327_v29  ;;  %v12509_v55 = vpop.f32.mrf.mxu0 }
 0xa0e   : > { %v7345_v20 = vmul.f32 %v14127_v35, %v20328_v17  ;;  %v18962_v39 = vadd.f32 %v12509_v55, %v12508_v13  ;;  %v7681_v19 = vpop.xlane.xlu0 %7680 }
 0xa0f   : > { %v7079_v48 = vpop.xlane.xlu1 %7078  ;;  %v18965_v11 = vadd.f32 %v7346_v28, %v18872_v23  ;;  %v12511_v15 = vpop.f32.mrf.mxu0  ;;  %14140 = vrcp.f32 %v7681_v19  ;;  %v20331_v19 = vld [vmem:[#allocation40_spill] sm:$0xff] }
 0xa10   : > { %v14129_v33 = vpop.eup %14128  ;;  %v18968_v42 = vadd.f32 %v7345_v20, %v18875_v6  ;;  %14142 = vrcp.f32 %v7079_v48 }
 0xa11   : > { %v14131_v4 = vpop.eup %14130  ;;  %v7348_v54 = vmul.f32 %v14129_v33, %v20329_v27  ;;  %v12512_v31 = vpop.f32.mrf.mxu0  ;;  %v20332_v33 = vld [vmem:[#allocation70_spill] sm:$0xff] }
 0xa12   : > { %v7347_v2 = vmul.f32 %v14131_v4, %v20330_v56  ;;  %v18972_v13 = vadd.f32 %v12512_v31, %v12511_v15  ;;  %v7687_v35 = vpop.xlane.xlu0 %7686 }
 0xa13   : > { %v7684_v29 = vpop.xlane.xlu1 %7683  ;;  %v18975_v23 = vadd.f32 %v7348_v54, %v18884_v3  ;;  %v12514_v28 = vpop.f32.mrf.mxu0  ;;  %14144 = vrcp.f32 %v7687_v35 }
 0xa14   : > { %v14133_v55 = vpop.eup %14132  ;;  %v18978_v6 = vadd.f32 %v7347_v2, %v18887_v57  ;;  %14146 = vrcp.f32 %v7684_v29 }
 0xa15   : > { %v14135_v17 = vpop.eup %14134  ;;  %v12515_v20 = vpop.f32.mrf.mxu0  ;;  %v7350_v48 = vmul.f32 %v14133_v55, %v20331_v19 }
 0xa16   : > { %v7349_v4 = vmul.f32 %v14135_v17, %v20332_v33  ;;  %v18982_v15 = vadd.f32 %v12515_v20, %v12514_v28  ;;  %v7693_v27 = vpop.xlane.xlu0 %7692 }
 0xa17   : > { %v7690_v31 = vpop.xlane.xlu1 %7689  ;;  %v12517_v56 = vpop.f32.mrf.mxu0  ;;  %14148 = vrcp.f32 %v7693_v27  ;;  %v18985_v3 = vadd.f32 %v7350_v48, %v18896_v30 }
 0xa18   : > { %v14137_v54 = vpop.eup %14136  ;;  %v18988_v57 = vadd.f32 %v7349_v4, %v18899_v9  ;;  %14150 = vrcp.f32 %v7690_v31 }
 0xa19   : > { %v14139_v2 = vpop.eup %14138  ;;  %v12518_v35 = vpop.f32.mrf.mxu0  ;;  %v7352_v29 = vmul.f32 %v14137_v54, %v18615_v12 }
 0xa1a   : > { %v18991_v55 = vadd.f32 %v12518_v35, %v12517_v56  ;;  %v7699_v28 = vpop.xlane.xlu0 %7698  ;;  %v7351_v20 = vmul.f32 %v14139_v2, %v18599_v22 }
 0xa1b   : > { %v7696_v17 = vpop.xlane.xlu1 %7695  ;;  %v12520_v19 = vpop.f32.mrf.mxu0  ;;  %14152 = vrcp.f32 %v7699_v28  ;;  %v18995_v30 = vadd.f32 %v7352_v29, %v18908_v7 }
 0xa1c   : > { %v14141_v48 = vpop.eup %14140  ;;  %14154 = vrcp.f32 %v7696_v17  ;;  %v18998_v9 = vadd.f32 %v7351_v20, %v18911_v0 }
 0xa1d   : > { %v14143_v33 = vpop.eup %14142  ;;  %v7985_v4 = vmul.f32 %v14141_v48, %v18627_v34  ;;  %v12521_v12 = vpop.f32.mrf.mxu0 }
 0xa1e   : > { %v19001_v27 = vadd.f32 %v12521_v12, %v12520_v19  ;;  %v7705_v31 = vpop.xlane.xlu0 %7704  ;;  %v7353_v22 = vmul.f32 %v14143_v33, %v18621_v52 }
 0xa1f   : > { %v7702_v56 = vpop.xlane.xlu1 %7701  ;;  %v19005_v54 = vadd.f32 %v7985_v4, %v18920_v61  ;;  %v12523_v7 = vpop.f32.mrf.mxu0  ;;  %14156 = vrcp.f32 %v7705_v31 }
 0xa20   : > { %v14145_v2 = vpop.eup %14144  ;;  %14158 = vrcp.f32 %v7702_v56  ;;  %v19008_v0 = vadd.f32 %v7353_v22, %v18925_v44 }
 0xa21   : > { %v14147_v35 = vpop.eup %14146  ;;  %v7987_v34 = vmul.f32 %v14145_v2, %v18639_v14  ;;  %v12524_v29 = vpop.f32.mrf.mxu0 }
 0xa22   : > { %v7986_v28 = vmul.f32 %v14147_v35, %v18633_v24  ;;  %v19012_v17 = vadd.f32 %v12524_v29, %v12523_v7  ;;  %v7711_v20 = vpop.xlane.xlu0 %7710 }
 0xa23   : > { %v7708_v52 = vpop.xlane.xlu1 %7707  ;;  %v19015_v61 = vadd.f32 %v7987_v34, %v18933_v62  ;;  %v12526_v19 = vpop.f32.mrf.mxu0  ;;  %14160 = vrcp.f32 %v7711_v20 }
 0xa24   : > { %v14149_v48 = vpop.eup %14148  ;;  %v19018_v33 = vadd.f32 %v7986_v28, %v18936_v38  ;;  %14162 = vrcp.f32 %v7708_v52 }
 0xa25   : > { %v14151_v44 = vpop.eup %14150  ;;  %v7989_v14 = vmul.f32 %v14149_v48, %v18651_v43  ;;  %v12527_v4 = vpop.f32.mrf.mxu0 }
 0xa26   : > { %v7988_v24 = vmul.f32 %v14151_v44, %v18645_v8  ;;  %v19022_v12 = vadd.f32 %v12527_v4, %v12526_v19  ;;  %v7717_v31 = vpop.xlane.xlu0 %7716 }
 0xa27   : > { %v7714_v56 = vpop.xlane.xlu1 %7713  ;;  %v19025_v62 = vadd.f32 %v7989_v14, %v18945_v60  ;;  %v12529_v22 = vpop.f32.mrf.mxu0  ;;  %14164 = vrcp.f32 %v7717_v31 }
 0xa28   : > { %v14153_v7 = vpop.eup %14152  ;;  %v19028_v38 = vadd.f32 %v7988_v24, %v18948_v36  ;;  %14166 = vrcp.f32 %v7714_v56 }
 0xa29   : > { %v14155_v2 = vpop.eup %14154  ;;  %v7991_v43 = vmul.f32 %v14153_v7, %v18663_v51  ;;  %v12530_v35 = vpop.f32.mrf.mxu0 }
 0xa2a   : > { %v7990_v8 = vmul.f32 %v14155_v2, %v18657_v32  ;;  %v19032_v34 = vadd.f32 %v12530_v35, %v12529_v22  ;;  %v7723_v29 = vpop.xlane.xlu0 %7722 }
 0xa2b   : > { %v7720_v28 = vpop.xlane.xlu1 %7719  ;;  %v19035_v60 = vadd.f32 %v7991_v43, %v18955_v50  ;;  %v12532_v20 = vpop.f32.mrf.mxu0  ;;  %14168 = vrcp.f32 %v7723_v29 }
 0xa2c   : > { %v14157_v52 = vpop.eup %14156  ;;  %v19038_v36 = vadd.f32 %v7990_v8, %v18958_v16  ;;  %14170 = vrcp.f32 %v7720_v28  ;;  %v20333_v28 = vld [vmem:[#allocation83_spill] sm:$0xff] }
 0xa2d   : > { %v14159_v19 = vpop.eup %14158  ;;  %v7993_v51 = vmul.f32 %v14157_v52, %v18675_v25  ;;  %v12533_v48 = vpop.f32.mrf.mxu0 }
 0xa2e   : > { %v7992_v32 = vmul.f32 %v14159_v19, %v18669_v21  ;;  %v19042_v44 = vadd.f32 %v12533_v48, %v12532_v20  ;;  %v8328_v14 = vpop.xlane.xlu0 %8327 }
 0xa2f   : > { %v7726_v4 = vpop.xlane.xlu1 %7725  ;;  %v19045_v50 = vadd.f32 %v7993_v51, %v18965_v11  ;;  %v12535_v24 = vpop.f32.mrf.mxu0  ;;  %14172 = vrcp.f32 %v8328_v14 }
 0xa30   : > { %v14161_v31 = vpop.eup %14160  ;;  %v19048_v16 = vadd.f32 %v7992_v32, %v18968_v42  ;;  %14174 = vrcp.f32 %v7726_v4  ;;  %v20334_v4 = vld [vmem:[#allocation74_spill] sm:$0xff] }
 0xa31   : > { %v14163_v56 = vpop.eup %14162  ;;  %v7995_v25 = vmul.f32 %v14161_v31, %v18685_v37  ;;  %v12536_v22 = vpop.f32.mrf.mxu0 }
 0xa32   : > { %v7994_v21 = vmul.f32 %v14163_v56, %v18681_v53  ;;  %v19052_v7 = vadd.f32 %v12536_v22, %v12535_v24  ;;  %v8334_v2 = vpop.xlane.xlu0 %8333  ;;  %v20335_v56 = vld [vmem:[#allocation110_spill] sm:$0xff] }
 0xa33   : > { %v8331_v43 = vpop.xlane.xlu1 %8330  ;;  %v19055_v11 = vadd.f32 %v7995_v25, %v18975_v23  ;;  %v19057_v35 = vpop.f32.mrf.mxu0  ;;  %14176 = vrcp.f32 %v8334_v2 }
 0xa34   : > { %v14165_v8 = vpop.eup %14164  ;;  %v19060_v42 = vadd.f32 %v7994_v21, %v18978_v6  ;;  %14178 = vrcp.f32 %v8331_v43  ;;  %v20336_v43 = vld [vmem:[#allocation115_spill] sm:$0xff] }
 0xa35   : > { %v14167_v29 = vpop.eup %14166  ;;  %v19062_v37 = vpop.f32.mrf.mxu0  ;;  %v7997_v53 = vmul.f32 %v14165_v8, %v18693_v59 }
 0xa36   : > { %v7996_v20 = vmul.f32 %v14167_v29, %v20333_v28  ;;  %v8340_v52 = vpop.xlane.xlu0 %8339 }
 0xa37   : > { %v8337_v19 = vpop.xlane.xlu1 %8336  ;;  %v19066_v51 = vpop.f32.mrf.mxu0  ;;  %14180 = vrcp.f32 %v8340_v52  ;;  %v19069_v23 = vadd.f32 %v7997_v53, %v18985_v3 }
 0xa38   : > { %v14169_v48 = vpop.eup %14168  ;;  %v19072_v6 = vadd.f32 %v7996_v20, %v18988_v57  ;;  %14182 = vrcp.f32 %v8337_v19  ;;  %v20337_v20 = vld [vmem:[#allocation111_spill] sm:$0xff] }
 0xa39   : > { %v14171_v32 = vpop.eup %14170  ;;  %v19074_v14 = vpop.f32.mrf.mxu0  ;;  %v7999_v59 = vmul.f32 %v14169_v48, %v20334_v4  ;;  %v20338_v4 = vld [vmem:[#allocation139_spill] sm:$0xff] }
 0xa3a   : > { %v8346_v24 = vpop.xlane.xlu0 %8345  ;;  %v7998_v25 = vmul.f32 %v14171_v32, %v20335_v56 }
 0xa3b   : > { %v8343_v31 = vpop.xlane.xlu1 %8342  ;;  %v19078_v22 = vpop.f32.mrf.mxu0  ;;  %14184 = vrcp.f32 %v8346_v24  ;;  %v19081_v3 = vadd.f32 %v7999_v59, %v18995_v30 }
 0xa3c   : > { %v14173_v21 = vpop.eup %14172  ;;  %14186 = vrcp.f32 %v8343_v31  ;;  %v19084_v57 = vadd.f32 %v7998_v25, %v18998_v9  ;;  %v20339_v31 = vld [vmem:[#allocation142_spill] sm:$0xff] }
 0xa3d   : > { %v14175_v2 = vpop.eup %14174  ;;  %v8632_v8 = vmul.f32 %v14173_v21, %v20336_v43  ;;  %v19087_v29 = vpop.f32.mrf.mxu0 }
 0xa3e   : > { %v8352_v53 = vpop.xlane.xlu0 %8351  ;;  %v8000_v52 = vmul.f32 %v14175_v2, %v20337_v20 }
 0xa3f   : > { %v8349_v28 = vpop.xlane.xlu1 %8348  ;;  %v19091_v19 = vadd.f32 %v8632_v8, %v19005_v54  ;;  %v19093_v48 = vpop.f32.mrf.mxu0  ;;  %14188 = vrcp.f32 %v8352_v53  ;;  %v20340_v53 = vld [vmem:[#allocation141_spill] sm:$0xff] }
 0xa40   : > { %v14177_v30 = vpop.eup %14176  ;;  %14190 = vrcp.f32 %v8349_v28  ;;  %v19096_v9 = vadd.f32 %v8000_v52, %v19008_v0  ;;  %v20341_v52 = vld [vmem:[#allocation86_spill] sm:$0xff] }
 0xa41   : > { %v14179_v32 = vpop.eup %14178  ;;  %v8634_v59 = vmul.f32 %v14177_v30, %v20338_v4  ;;  %v19099_v24 = vpop.f32.mrf.mxu0 }
 0xa42   : > { %v8633_v56 = vmul.f32 %v14179_v32, %v20339_v31  ;;  %v8358_v25 = vpop.xlane.xlu0 %8357 }
 0xa43   : > { %v8355_v21 = vpop.xlane.xlu1 %8354  ;;  %v19103_v54 = vadd.f32 %v8634_v59, %v19015_v61  ;;  %v19105_v2 = vpop.f32.mrf.mxu0  ;;  %14192 = vrcp.f32 %v8358_v25 }
 0xa44   : > { %v14181_v43 = vpop.eup %14180  ;;  %v19108_v8 = vadd.f32 %v8633_v56, %v19018_v33  ;;  %14194 = vrcp.f32 %v8355_v21 }
 0xa45   : > { %v14183_v0 = vpop.eup %14182  ;;  %v8636_v28 = vmul.f32 %v14181_v43, %v20340_v53  ;;  %v19111_v20 = vpop.f32.mrf.mxu0  ;;  %v20342_v43 = vld [vmem:[#allocation113_spill] sm:$0xff] }
 0xa46   : > { %v8635_v30 = vmul.f32 %v14183_v0, %v20341_v52  ;;  %v8364_v32 = vpop.xlane.xlu0 %8363 }
 0xa47   : > { %v8361_v4 = vpop.xlane.xlu1 %8360  ;;  %v19115_v61 = vadd.f32 %v8636_v28, %v19025_v62  ;;  %v19117_v59 = vpop.f32.mrf.mxu0  ;;  %14196 = vrcp.f32 %v8364_v32 }
 0xa48   : > { %v14185_v31 = vpop.eup %14184  ;;  %v19120_v33 = vadd.f32 %v8635_v30, %v19028_v38  ;;  %14198 = vrcp.f32 %v8361_v4 }
 0xa49   : > { %v14187_v56 = vpop.eup %14186  ;;  %v8638_v25 = vmul.f32 %v14185_v31, %v18794_v63  ;;  %v19123_v21 = vpop.f32.mrf.mxu0 }
 0xa4a   : > { %v8637_v0 = vmul.f32 %v14187_v56, %v20342_v43  ;;  %v8370_v53 = vpop.xlane.xlu0 %8369 }
 0xa4b   : > { %v8367_v52 = vpop.xlane.xlu1 %8366  ;;  %v19127_v62 = vadd.f32 %v8638_v25, %v19035_v60  ;;  %v19129_v28 = vpop.f32.mrf.mxu0  ;;  %14200 = vrcp.f32 %v8370_v53 }
 0xa4c   : > { %v14189_v32 = vpop.eup %14188  ;;  %v19132_v38 = vadd.f32 %v8637_v0, %v19038_v36  ;;  %14202 = vrcp.f32 %v8367_v52  ;;  %v20343_v52 = vld [vmem:[#allocation118_spill] sm:$0xff] }
 0xa4d   : > { %v14191_v30 = vpop.eup %14190  ;;  %v8640_v63 = vmul.f32 %v14189_v32, %v18819_v18  ;;  %v19139_v60 = vpop.f32.mrf.mxu0 }
 0xa4e   : > { %v8639_v4 = vmul.f32 %v14191_v30, %v18807_v47  ;;  %v8975_v31 = vpop.xlane.xlu0 %8974 }
 0xa4f   : > { %v8373_v56 = vpop.xlane.xlu1 %8372  ;;  %v19137_v43 = vadd.f32 %v8640_v63, %v19045_v50  ;;  %14204 = vrcp.f32 %v8975_v31  ;;  %v19149_v30 = vpop.f32.mrf.mxu0 }
 0xa50   : > { %v14193_v25 = vpop.eup %14192  ;;  %v19142_v53 = vadd.f32 %v8639_v4, %v19048_v16  ;;  %14206 = vrcp.f32 %v8373_v56 }
 0xa51   : > { %v14195_v36 = vpop.eup %14194  ;;  %v8642_v0 = vmul.f32 %v14193_v25, %v18844_v5  ;;  %v19156_v25 = vpop.f32.mrf.mxu0 }
 0xa52   : > { %v8641_v18 = vmul.f32 %v14195_v36, %v20343_v52  ;;  %v8981_v32 = vpop.xlane.xlu0 %8980 }
 0xa53   : > { %v19147_v47 = vadd.f32 %v8642_v0, %v19055_v11  ;;  %14208 = vrcp.f32 %v8981_v32  ;;  %v8978_v50 = vpop.xlane.xlu1 %8977 }
 0xa54   : > { %v14197_v63 = vpop.eup %14196  ;;  %v19152_v31 = vadd.f32 %v8641_v18, %v19060_v42  ;;  %14210 = vrcp.f32 %v8978_v50 }
 0xa55   : > { %v14199_v16 = vpop.eup %14198  ;;  %v8644_v4 = vmul.f32 %v14197_v63, %v18868_v46 }
 0xa56   : > { %v8643_v5 = vmul.f32 %v14199_v16, %v18856_v45  ;;  %v8987_v56 = vpop.xlane.xlu0 %8986  ;;  %v19166_v45 = vpop.f32.mrf.mxu0 }
 0xa57   : > { %14212 = vrcp.f32 %v8987_v56  ;;  %v8984_v11 = vpop.xlane.xlu1 %8983  ;;  %v19159_v36 = vadd.f32 %v8644_v4, %v19069_v23 }
 0xa58   : > { %v14201_v0 = vpop.eup %14200  ;;  %v19162_v52 = vadd.f32 %v8643_v5, %v19072_v6  ;;  %14214 = vrcp.f32 %v8984_v11  ;;  %v19179_v56 = vpop.f32.mrf.mxu0 }
 0xa59   : > { %v14203_v42 = vpop.eup %14202  ;;  %v8646_v18 = vmul.f32 %v14201_v0, %v18892_v1 }
 0xa5a   : > { %v8993_v32 = vpop.xlane.xlu0 %8992  ;;  %v8645_v46 = vmul.f32 %v14203_v42, %v18880_v41 }
 0xa5b   : > { %14216 = vrcp.f32 %v8993_v32  ;;  %v8990_v50 = vpop.xlane.xlu1 %8989  ;;  %v19169_v63 = vadd.f32 %v8646_v18, %v19081_v3 }
 0xa5c   : > { %v14205_v23 = vpop.eup %14204  ;;  %14218 = vrcp.f32 %v8990_v50  ;;  %v19172_v16 = vadd.f32 %v8645_v46, %v19084_v57 }
 0xa5d   : > { %v14207_v6 = vpop.eup %14206  ;;  %v9279_v4 = vmul.f32 %v14205_v23, %v18916_v58 }
 0xa5e   : > { %v8999_v5 = vpop.xlane.xlu0 %8998  ;;  %v8647_v1 = vmul.f32 %v14207_v6, %v18904_v10 }
 0xa5f   : > { %v19177_v41 = vadd.f32 %v9279_v4, %v19091_v19  ;;  %14220 = vrcp.f32 %v8999_v5  ;;  %v8996_v11 = vpop.xlane.xlu1 %8995  ;;  %v19189_v19 = vpop.f32.mrf.mxu0 }
 0xa60   : > { %v14209_v3 = vpop.eup %14208  ;;  %14222 = vrcp.f32 %v8996_v11  ;;  %v19182_v0 = vadd.f32 %v8647_v1, %v19096_v9 }
 0xa61   : > { %v14211_v57 = vpop.eup %14210  ;;  %v9281_v42 = vmul.f32 %v14209_v3, %v18942_v40 }
 0xa62   : > { %v9280_v58 = vmul.f32 %v14211_v57, %v18929_v26  ;;  %v9005_v18 = vpop.xlane.xlu0 %9004 }
 0xa63   : > { %v19187_v10 = vadd.f32 %v9281_v42, %v19103_v54  ;;  %14224 = vrcp.f32 %v9005_v18  ;;  %v9002_v32 = vpop.xlane.xlu1 %9001  ;;  %v19199_v54 = vpop.f32.mrf.mxu0 }
 0xa64   : > { %v14213_v46 = vpop.eup %14212  ;;  %v19192_v50 = vadd.f32 %v9280_v58, %v19108_v8  ;;  %14226 = vrcp.f32 %v9002_v32 }
 0xa65   : > { %v14215_v9 = vpop.eup %14214  ;;  %v9283_v23 = vmul.f32 %v14213_v46, %v18962_v39 }
 0xa66   : > { %v9282_v40 = vmul.f32 %v14215_v9, %v18952_v49  ;;  %v9011_v6 = vpop.xlane.xlu0 %9010  ;;  %v19206_v49 = vpop.f32.mrf.mxu0 }
 0xa67   : > { %v19197_v26 = vadd.f32 %v9283_v23, %v19115_v61  ;;  %14228 = vrcp.f32 %v9011_v6  ;;  %v9008_v4 = vpop.xlane.xlu1 %9007 }
 0xa68   : > { %v14217_v5 = vpop.eup %14216  ;;  %v19202_v1 = vadd.f32 %v9282_v40, %v19120_v33  ;;  %14230 = vrcp.f32 %v9008_v4 }
 0xa69   : > { %v14219_v8 = vpop.eup %14218  ;;  %v9285_v11 = vmul.f32 %v14217_v5, %v18982_v15 }
 0xa6a   : > { %v9284_v39 = vmul.f32 %v14219_v8, %v18972_v13  ;;  %v9017_v3 = vpop.xlane.xlu0 %9016  ;;  %v19216_v13 = vpop.f32.mrf.mxu0 }
 0xa6b   : > { %v19209_v61 = vadd.f32 %v9285_v11, %v19127_v62  ;;  %14232 = vrcp.f32 %v9017_v3  ;;  %v9014_v57 = vpop.xlane.xlu1 %9013 }
 0xa6c   : > { %v14221_v42 = vpop.eup %14220  ;;  %v19212_v58 = vadd.f32 %v9284_v39, %v19132_v38  ;;  %14234 = vrcp.f32 %v9014_v57 }
 0xa6d   : > { %v14223_v33 = vpop.eup %14222  ;;  %v9287_v18 = vmul.f32 %v14221_v42, %v19001_v27 }
 0xa6e   : > { %v9286_v15 = vmul.f32 %v14223_v33, %v18991_v55  ;;  %v9622_v32 = vpop.xlane.xlu0 %9621  ;;  %v19226_v55 = vpop.f32.mrf.mxu0 }
 0xa6f   : > { %v19219_v46 = vadd.f32 %v9287_v18, %v19137_v43  ;;  %14236 = vrcp.f32 %v9622_v32  ;;  %v9020_v62 = vpop.xlane.xlu1 %9019 }
 0xa70   : > { %v14225_v9 = vpop.eup %14224  ;;  %v19222_v23 = vadd.f32 %v9286_v15, %v19142_v53  ;;  %14238 = vrcp.f32 %v9020_v62  ;;  %v19238_v3 = vpop.f32.mrf.mxu0 }
 0xa71   : > { %v14227_v38 = vpop.eup %14226  ;;  %v9289_v40 = vmul.f32 %v14225_v9, %v19022_v12 }
 0xa72   : > { %v9288_v27 = vmul.f32 %v14227_v38, %v19012_v17  ;;  %v9628_v6 = vpop.xlane.xlu0 %9627  ;;  %v12540_v17 = vadd.f32 %v19062_v37, %v19057_v35  ;;  %v12562_v35 = vadd.f32 %v19087_v29, %v19078_v22  ;;  %v19249_v37 = vpop.f32.mrf.mxu0  ;;  %v19262_v22 = vld [vmem:[%s20344_s2] ss:$0 sm:$0xff] }
 0xa73   : > { %v19229_v4 = vadd.f32 %v9289_v40, %v19147_v47  ;;  %14240 = vrcp.f32 %v9628_v6  ;;  %v9625_v43 = vpop.xlane.xlu1 %9624 }
 0xa74   : > { %v14229_v5 = vpop.eup %14228  ;;  %v19232_v8 = vadd.f32 %v9288_v27, %v19152_v31  ;;  %14242 = vrcp.f32 %v9625_v43  ;;  %v19266_v40 = vpop.f32.mrf.mxu0  ;;  %v12565_v27 = vadd.f32 %v19099_v24, %v19093_v48 }
 0xa75   : > { %v14231_v53 = vpop.eup %14230  ;;  %v9291_v11 = vmul.f32 %v14229_v5, %v19042_v44 }
 0xa76   : > { %v9290_v12 = vmul.f32 %v14231_v53, %v19032_v34  ;;  %v9634_v39 = vpop.xlane.xlu0 %9633 }
 0xa77   : > { %14244 = vrcp.f32 %v9634_v39  ;;  %v9631_v47 = vpop.xlane.xlu1 %9630  ;;  %v19241_v57 = vadd.f32 %v9291_v11, %v19159_v36  ;;  %v12574_v11 = vadd.f32 %v19139_v60, %v19129_v28 }
 0xa78   : > { %v14233_v42 = vpop.eup %14232  ;;  %v19244_v31 = vadd.f32 %v9290_v12, %v19162_v52  ;;  %14246 = vrcp.f32 %v9631_v47  ;;  %v12543_v52 = vadd.f32 %v19074_v14, %v19066_v51 }
 0xa79   : > { %v14235_v33 = vpop.eup %14234  ;;  %v9293_v44 = vmul.f32 %v14233_v42, %v12540_v17 }
 0xa7a   : > { %v9640_v18 = vpop.xlane.xlu0 %9639  ;;  %v9292_v34 = vmul.f32 %v14235_v33, %v19052_v7 }
 0xa7b   : > { %14248 = vrcp.f32 %v9640_v18  ;;  %v9637_v15 = vpop.xlane.xlu1 %9636  ;;  %v19252_v36 = vadd.f32 %v9293_v44, %v19169_v63  ;;  %v12568_v63 = vadd.f32 %v19111_v20, %v19105_v2 }
 0xa7c   : > { %v14237_v32 = vpop.eup %14236  ;;  %14250 = vrcp.f32 %v9637_v15  ;;  %v19257_v62 = vadd.f32 %v9292_v34, %v19172_v16 }
 0xa7d   : > { %v14239_v9 = vpop.eup %14238  ;;  %v9926_v7 = vmul.f32 %v14237_v32, %v12562_v35 }
 0xa7e   : > { %v9646_v29 = vpop.xlane.xlu0 %9645  ;;  %v9294_v38 = vmul.f32 %v14239_v9, %v12543_v52  ;;  %v12586_v9 = vadd.f32 %v19216_v13, %v19206_v49 }
 0xa7f   : > { %v9942_v51 = vadd.f32 %v9926_v7, %v19177_v41  ;;  %14252 = vrcp.f32 %v9646_v29  ;;  %v9643_v14 = vpop.xlane.xlu1 %9642  ;;  %v19277_v41 = vpop.f32.mrf.mxu0  ;;  %v12583_v29 = vadd.f32 %v19199_v54, %v19189_v19 }
 0xa80   : > { %v14241_v16 = vpop.eup %14240  ;;  %14254 = vrcp.f32 %v9643_v14  ;;  %v19272_v6 = vadd.f32 %v9294_v38, %v19182_v0  ;;  %v12571_v0 = vadd.f32 %v19123_v21, %v19117_v59 }
 0xa81   : > { %v14243_v43 = vpop.eup %14242  ;;  %v9965_v5 = vadd.f32 %v19262_v22, %v9942_v51  ;;  %v9928_v53 = vmul.f32 %v14241_v16, %v12568_v63  ;;  %v12594_v44 = vpop.f32.mrf.mxu0 }
 0xa82   : > { %v9927_v2 = vmul.f32 %v14243_v43, %v12565_v27  ;;  %v9652_v20 = vpop.xlane.xlu0 %9651 }
 0xa83   : > { %9981 = vst [vmem:[%s14885_s16] sm:$0xff] %v9965_v5  ;;  %v9944_v12 = vadd.f32 %v9928_v53, %v19187_v10  ;;  %14256 = vrcp.f32 %v9652_v20  ;;  %v9649_v48 = vpop.xlane.xlu1 %9648  ;;  %v12580_v10 = vadd.f32 %v19179_v56, %v19166_v45 }
 0xa84   : > { %v14245_v24 = vpop.eup %14244  ;;  %v9943_v39 = vadd.f32 %v9927_v2, %v19192_v50  ;;  %14258 = vrcp.f32 %v9649_v48  ;;  %v12577_v50 = vadd.f32 %v19156_v25, %v19149_v30 }
 0xa85   : > { %v14247_v17 = vpop.eup %14246  ;;  %v9967_v47 = vadd.f32 %v19262_v22, %v9944_v12  ;;  %v9930_v28 = vmul.f32 %v14245_v24, %v12574_v11 }
 0xa86   : > { %v9966_v60 = vadd.f32 %v19262_v22, %v9943_v39  ;;  %v9929_v42 = vmul.f32 %v14247_v17, %v12571_v0  ;;  %v9658_v33 = vpop.xlane.xlu0 %9657 }
 0xa87   : > { %9983 = vst [vmem:[%s14885_s16 + $0x10] sm:$0xff] %v9967_v47  ;;  %v9946_v18 = vadd.f32 %v9930_v28, %v19197_v26  ;;  %14260 = vrcp.f32 %v9658_v33  ;;  %v9655_v59 = vpop.xlane.xlu1 %9654  ;;  %v12596_v56 = vpop.f32.mrf.mxu0 }
 0xa88   : > { %v14249_v21 = vpop.eup %14248  ;;  %9982 = vst [vmem:[%s14885_s16 + $0x8] sm:$0xff] %v9966_v60  ;;  %v9945_v34 = vadd.f32 %v9929_v42, %v19202_v1  ;;  %14262 = vrcp.f32 %v9655_v59 }
 0xa89   : > { %v14251_v35 = vpop.eup %14250  ;;  %v9969_v15 = vadd.f32 %v19262_v22, %v9946_v18  ;;  %v9932_v45 = vmul.f32 %v14249_v21, %v12580_v10  ;;  %v12597_v25 = vpop.f32.mrf.mxu0 }
 0xa8a   : > { %v9968_v32 = vadd.f32 %v19262_v22, %v9945_v34  ;;  %v9931_v26 = vmul.f32 %v14251_v35, %v12577_v50  ;;  %v9664_v52 = vpop.xlane.xlu0 %9663  ;;  %v12598_v20 = vadd.f32 %v12597_v25, %v12596_v56 }
 0xa8b   : > { %9985 = vst [vmem:[%s14885_s16 + $0x20] sm:$0xff] %v9969_v15  ;;  %v9948_v30 = vadd.f32 %v9932_v45, %v19209_v61  ;;  %14264 = vrcp.f32 %v9664_v52  ;;  %v9661_v1 = vpop.xlane.xlu1 %9660  ;;  %v12592_v61 = vadd.f32 %v19266_v40, %v19249_v37  ;;  %v12599_v19 = vpop.f32.mrf.mxu0 }
 0xa8c   : > { %v14253_v7 = vpop.eup %14252  ;;  %9984 = vst [vmem:[%s14885_s16 + $0x18] sm:$0xff] %v9968_v32  ;;  %v9947_v38 = vadd.f32 %v9931_v26, %v19212_v58  ;;  %14266 = vrcp.f32 %v9661_v1  ;;  %v12589_v58 = vadd.f32 %v19238_v3, %v19226_v55  ;;  %v12595_v55 = vadd.f32 %v12594_v44, %v19277_v41 }
 0xa8d   : > { %v14255_v63 = vpop.eup %14254  ;;  %v9971_v51 = vadd.f32 %v19262_v22, %v9948_v30  ;;  %v9934_v49 = vmul.f32 %v14253_v7, %v12586_v9  ;;  %v12600_v11 = vpop.f32.mrf.mxu0 }
 0xa8e   : > { %v9970_v13 = vadd.f32 %v19262_v22, %v9947_v38  ;;  %v9933_v14 = vmul.f32 %v14255_v63, %v12583_v29  ;;  %v12601_v28 = vadd.f32 %v12600_v11, %v12599_v19 }
 0xa8f   : > { %9987 = vst [vmem:[%s14885_s16 + $0x30] sm:$0xff] %v9971_v51  ;;  %v9950_v16 = vadd.f32 %v9934_v49, %v19219_v46  ;;  %v9667_v54 = vpop.xlane.xlu1 %9666 }
 0xa90   : > { %v14257_v27 = vpop.eup %14256  ;;  %9986 = vst [vmem:[%s14885_s16 + $0x28] sm:$0xff] %v9970_v13  ;;  %v9949_v43 = vadd.f32 %v9933_v14, %v19222_v23  ;;  %14268 = vrcp.f32 %v9667_v54 }
 0xa91   : > { %v14259_v5 = vpop.eup %14258  ;;  %v9973_v53 = vadd.f32 %v19262_v22, %v9950_v16  ;;  %v9936_v2 = vmul.f32 %v14257_v27, %v12592_v61 }
 0xa92   : > { %v9972_v37 = vadd.f32 %v19262_v22, %v9949_v43  ;;  %v9935_v40 = vmul.f32 %v14259_v5, %v12589_v58 }
 0xa93   : > { %9989 = vst [vmem:[%s14885_s16 + $0x40] sm:$0xff] %v9973_v53  ;;  %v9952_v46 = vadd.f32 %v9936_v2, %v19229_v4 }
 0xa94   : > { %v14261_v12 = vpop.eup %14260  ;;  %9988 = vst [vmem:[%s14885_s16 + $0x38] sm:$0xff] %v9972_v37  ;;  %v9951_v23 = vadd.f32 %v9935_v40, %v19232_v8  ;;  %v12602_v0 = vpop.f32.mrf.mxu0 }
 0xa95   : > { %v14263_v3 = vpop.eup %14262  ;;  %v9975_v48 = vadd.f32 %v19262_v22, %v9952_v46  ;;  %v9938_v24 = vmul.f32 %v14261_v12, %v12598_v20 }
 0xa96   : > { %v9974_v39 = vadd.f32 %v19262_v22, %v9951_v23  ;;  %v9937_v17 = vmul.f32 %v14263_v3, %v12595_v55  ;;  %v12603_v47 = vpop.f32.mrf.mxu0 }
 0xa97   : > { %9991 = vst [vmem:[%s14885_s16 + $0x50] sm:$0xff] %v9975_v48  ;;  %v9954_v4 = vadd.f32 %v9938_v24, %v19241_v57  ;;  %v12604_v60 = vadd.f32 %v12603_v47, %v12602_v0 }
 0xa98   : > { %v14265_v41 = vpop.eup %14264  ;;  %9990 = vst [vmem:[%s14885_s16 + $0x48] sm:$0xff] %v9974_v39  ;;  %v9953_v8 = vadd.f32 %v9937_v17, %v19244_v31  ;;  %v12605_v10 = vpop.f32.mrf.mxu0 }
 0xa99   : > { %v14267_v42 = vpop.eup %14266  ;;  %v9977_v33 = vadd.f32 %v19262_v22, %v9954_v4  ;;  %v9940_v57 = vmul.f32 %v14265_v41, %v12604_v60 }
 0xa9a   : > { %v9976_v44 = vadd.f32 %v19262_v22, %v9953_v8  ;;  %v9939_v18 = vmul.f32 %v14267_v42, %v12601_v28  ;;  %v12606_v59 = vpop.f32.mrf.mxu0 }
 0xa9b   : > { %9993 = vst [vmem:[%s14885_s16 + $0x60] sm:$0xff] %v9977_v33  ;;  %v9956_v21 = vadd.f32 %v9940_v57, %v19252_v36  ;;  %v12607_v50 = vadd.f32 %v12606_v59, %v12605_v10 }
 0xa9c   : > { %9992 = vst [vmem:[%s14885_s16 + $0x58] sm:$0xff] %v9976_v44  ;;  %v9955_v31 = vadd.f32 %v9939_v18, %v19257_v62 }
 0xa9d   : > { %v14269_v34 = vpop.eup %14268  ;;  %v9979_v15 = vadd.f32 %v19262_v22, %v9956_v21 }
 0xa9e   : > { %v9978_v35 = vadd.f32 %v19262_v22, %v9955_v31  ;;  %v9941_v45 = vmul.f32 %v14269_v34, %v12607_v50 }
 0xa9f   : > { %9995 = vst [vmem:[%s14885_s16 + $0x70] sm:$0xff] %v9979_v15 }
 0xaa0   : > { %9994 = vst [vmem:[%s14885_s16 + $0x68] sm:$0xff] %v9978_v35  ;;  %v9957_v56 = vadd.f32 %v9941_v45, %v19272_v6 }
 0xaa2   : > { %v9980_v36 = vadd.f32 %v19262_v22, %v9957_v56 }
 0xaa4   : > { %9996 = vst [vmem:[%s14885_s16 + $0x78] sm:$0xff] %v9980_v36 }
 0xaa5   : > { %14443 = shalt.err (!%p14440_p6)
}
 0xaa6   : > { %s14444_s27 = scalar_lea.hbm %s19347_s30, 2048  ;;  %s14448_s10 = scalar_lea.hbm %s20347_s0, 8192 }
 0xaa7   : > { %p14445_p8 = scmp.ne.s32.totalorder %s19347_s30, %s14444_s27  ;;  %p14449_p0 = scmp.lt.s32.totalorder %s19347_s30, %s20347_s0 }
 0xaa8   : > { %p14450_p3 = scmp.lt.s32.totalorder %s14448_s10, %s14444_s27 }
 0xaa9   : > { %p14446_p4 = pnand %p14445_p8, %p14720_p7 }
 0xaaa   : > { %p14451_p10 = por %p14450_p3, %p14449_p0 }
 0xaab   : > { %p14447_p5 = pneg %p14446_p4 }
 0xaad   : > { %p14452_p1 = pnand %p14451_p10, %p14447_p5 }
 0xaaf   : > { %14455 = shalt.err (!%p14452_p1)
}
 0xab0   : > { %s14592_s2 = smov 128   ;;  %s14593_s25 = smov 8  }
 0xab1   : > { %13044 = dma.vmem_to_hbm [thread:$0]  (%p14720_p7), %s19341_s11, 2048, %s19347_s30, %s19352_s18, %s14592_s2, %s14592_s2, %s14593_s25  }
 0xab2 PF: > { %s20348_s3 = sld [smem:[#allocation22_spill]]  ;;  %p13079_p12 = scmp.ge.s32.totalorder %s14566_s23, 2 }
 0xab4   : > { %p13067_p13 = pnand %p13079_p12, %p14725_p9 }
 0xab6   : > { %p13068_p2 = pneg %p13067_p13 }
 0xab8   : > { %s10028_s12 = sand.u32 1, %s20348_s3  }
 0xab9   : > { %s10029_s6 = scalar_lea.sflag [#allocation6], %s10028_s12 }
 0xaba   : > { %14521 = dma.done.wait (%p13068_p2), %s10029_s6, 2048  }
 0xabb   : > { %14523 = vsyncadd (%p13068_p2), %s10029_s6, 4294965248  ;;  %s31_s23 = sadd.s32 1, %s14566_s23   ;;  %s20350_s19 = sld [smem:[#allocation23_spill]] }
 0xabc   : > { %p28_p11 = scmp.ge.s32.totalorder %s31_s23, 6   ;;  %s20351_s18 = sld [smem:[#allocation30_spill]] }
 0xabd   : > { %s20352_s11 = sld [smem:[#allocation25_spill]]  ;;  %s20355_s13 = smov %s14530_s14 }
 0xabe   : > { %s20353_s21 = sld [smem:[#allocation28_spill]]  ;;  %s20356_s14 = smov %s14534_s15 }
 0xabf   : > { %s20354_s5 = sld [smem:[#allocation29_spill]]  ;;  %s20357_s15 = smov %s14822_s28 }
 0xac0   : > { %s20358_s16 = smov %s14542_s17  ;;  %s20361_s20 = smov %s14562_s22 }
 0xac1   : > { %s20359_s17 = smov %s20350_s19  ;;  %30 = sbr.rel (!%p28_p11) target bundleno = 23 (0x17), region = 160 }
 0xac3   : > { %s20360_s19 = smov %s20352_s11 }
 0xac5   : > { %s20362_s22 = smov %s20354_s5 }
 0xac6   :  { %10034 = vsyncpa [#allocation5], 1 }
 0xac7   :  { %10036 = vsyncpa [#allocation5 + $0x1], 1 }
 0xac8   :  { %10037 = vsyncpa [#allocation8], 1 }
 0xac9   :  { %10039 = vsyncpa [#allocation8 + $0x1], 1 }
 0xaca   :  { %10040 = vsyncpa [#allocation11], 1 }
 0xacb   :  { %10041 = vsyncpa [#allocation14], 1 }
 0xacc   :  { %10042 = vsyncpa [#allocation6], 1 }
 0xacd   :  { %10044 = vsyncpa [#allocation6 + $0x1], 1 }

</bundles_post_ra>
